<compile_context>
chip_gen: v6e
topology: v6e:2x2x1
jax: 0.10.0
libtpu: 0.0.40
codegen_flags: <defaults>
</compile_context>

<pallas_src>
import functools
import math

import jax
import jax.numpy as jnp
from jax.experimental import pallas as pl
from jax.experimental.pallas import tpu as pltpu

BN_EPS = 1e-5


# ----------------------------------------------------------------------------
# VMEM / tiling helpers
# ----------------------------------------------------------------------------
def _query_vmem_limit():
    cap = 64 * 1024 * 1024
    try:
        info = pltpu.get_tpu_info()
        cap = int(getattr(info, "vmem_capacity_bytes", cap))
    except Exception:
        pass
    # Half of physical VMEM (32 MiB on v7x, 64 MiB on v5e/v6e) leaves headroom for
    # double-buffering while comfortably exceeding the scoped default.
    return int(min(max(cap // 2, 16 * 1024 * 1024), 64 * 1024 * 1024))


_VMEM_LIMIT = _query_vmem_limit()


def _cparams(n_parallel_axes=1):
    return pltpu.CompilerParams(
        dimension_semantics=("parallel",) * n_parallel_axes,
        vmem_limit_bytes=_VMEM_LIMIT,
    )


_TILE_CANDIDATES = (2048, 1024, 512, 256, 128, 64, 32, 16, 8)


def _row_tile(m, bytes_per_row):
    """Largest row tile that divides m, is sublane-aligned, fits a VMEM budget and
    (when possible) leaves >=2 grid steps so both v7x TensorCores get work."""
    cap = max(8, min(2048, (_VMEM_LIMIT // 6) // max(int(bytes_per_row), 1)))
    for t in _TILE_CANDIDATES:
        if t <= cap and t < m and m % t == 0:
            return t
    return m


# ----------------------------------------------------------------------------
# In-kernel helpers
# ----------------------------------------------------------------------------
def _stats_rows(sum_vec, sq_vec, cout):
    """Pack (1,C) sum and (1,C) sumsq into a sublane-aligned (8,C) slab:
    row0 = sum, row1 = sumsq, rows 2..7 zero (single unmasked store)."""
    rows = jax.lax.broadcasted_iota(jnp.int32, (8, cout), 0)
    zero = jnp.zeros((8, cout), jnp.float32)
    out = jnp.where(rows == 0, jnp.broadcast_to(sum_vec, (8, cout)), zero)
    out = jnp.where(rows == 1, jnp.broadcast_to(sq_vec, (8, cout)), out)
    return out


# ----------------------------------------------------------------------------
# Pallas kernels
# ----------------------------------------------------------------------------
def _matmul_stats_kernel(a_ref, b_ref, y_ref, st_ref):
    """bf16 [tm,K] @ bf16 [K,C] -> f32 [tm,C], with fused per-channel sum / sumsq."""
    y = jnp.dot(a_ref[...], b_ref[...], preferred_element_type=jnp.float32)
    y_ref[...] = y
    s = jnp.sum(y, axis=0, keepdims=True)
    q = jnp.sum(y * y, axis=0, keepdims=True)
    st_ref[0, :, :] = _stats_rows(s, q, y.shape[1])


def pallas_matmul_stats(a, b):
    """[M,K]bf16 @ [K,C]bf16 -> ([M,C]f32, [G,8,C]f32 per-tile (sum,sumsq) stats)."""
    m, k = a.shape
    c = b.shape[1]
    tm = _row_tile(m, k * 2 + c * 6)
    g = m // tm
    return pl.pallas_call(
        _matmul_stats_kernel,
        out_shape=(
            jax.ShapeDtypeStruct((m, c), jnp.float32),
            jax.ShapeDtypeStruct((g, 8, c), jnp.float32),
        ),
        grid=(g,),
        in_specs=[
            pl.BlockSpec((tm, k), lambda i: (i, 0)),
            pl.BlockSpec((k, c), lambda i: (0, 0)),
        ],
        out_specs=(
            pl.BlockSpec((tm, c), lambda i: (i, 0)),
            pl.BlockSpec((1, 8, c), lambda i: (i, 0, 0)),
        ),
        compiler_params=_cparams(1),
    )(a, b)


def _conv_direct_kernel(x_ref, w_ref, y_ref, st_ref, *, kh, kw, stride, ho, wo, cout):
    """Direct conv for one image: accumulate kh*kw taps in VMEM (bf16 MXU, f32 acc),
    fused per-channel sum / sumsq for BatchNorm.

    x_ref : (1, Hp*stride, Wq, Cin) bf16, column-phase layout
            x_ph[0, h*stride + p, w, c] == x_pad[h, w*stride + p, c]
    w_ref : (kh, kw, Cin, Cout) bf16
    y_ref : (1, Ho, Wo, Cout) f32 (pre-BN conv output)
    st_ref: (1, 8, Cout) f32 (row0 = sum, row1 = sumsq)
    """
    # Hoist tap weights (loaded once, reused across all output rows).
    w_taps = [[w_ref[i, j, :, :] for j in range(kw)] for i in range(kh)]

    s_acc = jnp.zeros((1, cout), jnp.float32)
    q_acc = jnp.zeros((1, cout), jnp.float32)
    for r in range(ho):                       # static unroll over output rows
        acc = jnp.zeros((wo, cout), jnp.float32)
        for i in range(kh):                   # static unroll over tap rows
            for j in range(kw):               # static unroll over tap cols
                rid = (r * stride + i) * stride + (j % stride)
                off = j // stride
                patch = x_ref[0, rid, off:off + wo, :]        # [wo, Cin] bf16
                acc = acc + jnp.dot(patch, w_taps[i][j],
                                    preferred_element_type=jnp.float32)
        y_ref[0, r, :, :] = acc
        s_acc = s_acc + jnp.sum(acc, axis=0, keepdims=True)
        q_acc = q_acc + jnp.sum(acc * acc, axis=0, keepdims=True)
    st_ref[0, :, :] = _stats_rows(s_acc, q_acc, cout)


def pallas_conv_direct(x_ph, w4, stride, ho, wo):
    n, hps, wq, cin = x_ph.shape
    kh, kw, _, cout = w4.shape
    kernel = functools.partial(
        _conv_direct_kernel, kh=kh, kw=kw, stride=stride, ho=ho, wo=wo, cout=cout)
    return pl.pallas_call(
        kernel,
        out_shape=(
            jax.ShapeDtypeStruct((n, ho, wo, cout), jnp.float32),
            jax.ShapeDtypeStruct((n, 8, cout), jnp.float32),
        ),
        grid=(n,),
        in_specs=[
            pl.BlockSpec((1, hps, wq, cin), lambda b: (b, 0, 0, 0)),
            pl.BlockSpec((kh, kw, cin, cout), lambda b: (0, 0, 0, 0)),
        ],
        out_specs=(
            pl.BlockSpec((1, ho, wo, cout), lambda b: (b, 0, 0, 0)),
            pl.BlockSpec((1, 8, cout), lambda b: (b, 0, 0)),
        ),
        compiler_params=_cparams(1),
    )(x_ph, w4)
    # TODO(synk): for large spatial extents, add an Ho-tile grid axis (overlapping input
    # windows need manual DMA); the whole per-image slab fits VMEM at these sizes.


def _bn_act_kernel(x_ref, s_ref, b_ref, o_ref, *, relu):
    y = x_ref[...].astype(jnp.float32) * s_ref[...] + b_ref[...]
    if relu:
        y = jnp.maximum(y, 0.0)
    o_ref[...] = y.astype(o_ref.dtype)


def _bn_add_act_kernel(x_ref, s_ref, b_ref, r_ref, o_ref, *, relu):
    y = (x_ref[...].astype(jnp.float32) * s_ref[...] + b_ref[...]
         + r_ref[...].astype(jnp.float32))
    if relu:
        y = jnp.maximum(y, 0.0)
    o_ref[...] = y.astype(o_ref.dtype)


def pallas_bn_act(y, scale, bias, residual=None, relu=True, out_dtype=jnp.bfloat16):
    """y*scale + bias (+ residual) (+ ReLU) on an [M, C] slab, bf16 output.
    C<128 slabs are folded to 128 lanes (scale/bias tiled) for lane-dense stores."""
    m, c = y.shape
    fold = 1
    if c < 128 and 128 % c == 0 and m % (128 // c) == 0:
        fold = 128 // c
    mf, cf = m // fold, c * fold
    yf = y.reshape(mf, cf)
    sf = jnp.tile(scale.reshape(1, c).astype(jnp.float32), (1, fold))
    bf = jnp.tile(bias.reshape(1, c).astype(jnp.float32), (1, fold))

    bytes_per_row = cf * 4 + cf * 2 + (cf * 2 if residual is not None else 0)
    tm = _row_tile(mf, bytes_per_row)
    slab = pl.BlockSpec((tm, cf), lambda i: (i, 0))
    vec = pl.BlockSpec((1, cf), lambda i: (0, 0))

    if residual is None:
        kernel = functools.partial(_bn_act_kernel, relu=relu)
        in_specs = [slab, vec, vec]
        args = (yf, sf, bf)
    else:
        rf = residual.reshape(mf, cf)
        kernel = functools.partial(_bn_add_act_kernel, relu=relu)
        in_specs = [slab, vec, vec, slab]
        args = (yf, sf, bf, rf)

    out = pl.pallas_call(
        kernel,
        out_shape=jax.ShapeDtypeStruct((mf, cf), out_dtype),
        grid=(mf // tm,),
        in_specs=in_specs,
        out_specs=slab,
        compiler_params=_cparams(1),
    )(*args)
    return out.reshape(m, c)


def _maxpool_kernel(x_ref, o_ref, *, k, stride, ho, wo):
    """Fused kxk/stride maxpool over the (-inf padded) column-phase input, one image."""
    for r in range(ho):
        best = None
        for i in range(k):
            for j in range(k):
                rid = (r * stride + i) * stride + (j % stride)
                off = j // stride
                win = x_ref[0, rid, off:off + wo, :]
                best = win if best is None else jnp.maximum(best, win)
        o_ref[0, r, :, :] = best


def pallas_maxpool(x_ph, k, stride, ho, wo):
    n, hps, wq, c = x_ph.shape
    kernel = functools.partial(_maxpool_kernel, k=k, stride=stride, ho=ho, wo=wo)
    return pl.pallas_call(
        kernel,
        out_shape=jax.ShapeDtypeStruct((n, ho, wo, c), x_ph.dtype),
        grid=(n,),
        in_specs=[pl.BlockSpec((1, hps, wq, c), lambda b: (b, 0, 0, 0))],
        out_specs=pl.BlockSpec((1, ho, wo, c), lambda b: (b, 0, 0, 0)),
        compiler_params=_cparams(1),
    )(x_ph)


# ----------------------------------------------------------------------------
# Plain-JAX glue (layout plumbing only: pad / phase relayout / reshape)
# ----------------------------------------------------------------------------
def _col_phase(x_pad, stride, kw, wo, fill):
    """[N,Hp,Wp,C] -> [N,Hp*stride,Wq,C] with out[n, h*stride+p, w, c] = x_pad[n, h, w*stride+p, c].
    Makes strided column taps static contiguous slices inside the kernel (~1x data;
    identity when stride == 1)."""
    n, hp, wp, c = x_pad.shape
    if stride == 1:
        return x_pad
    wq = (kw - 1) // stride + wo
    need = wq * stride
    if need > wp:
        x_pad = jnp.pad(x_pad, ((0, 0), (0, 0), (0, need - wp), (0, 0)),
                        constant_values=fill)
    elif need < wp:
        x_pad = x_pad[:, :, :need, :]
    x_ph = x_pad.reshape(n, hp, wq, stride, c)
    x_ph = jnp.transpose(x_ph, (0, 1, 3, 2, 4))     # [N, Hp, stride, Wq, C]
    return x_ph.reshape(n, hp * stride, wq, c)


def _im2col(x, kh, kw, stride, pad):
    """NHWC -> patches [N*Ho*Wo, kh*kw*C] ((i,j,c)-major).  Used only for the 7x7/s2 stem
    (Cin is tiny there, so per-tap matmuls would starve the MXU)."""
    n, h, w, c = x.shape
    ho = (h + 2 * pad - kh) // stride + 1
    wo = (w + 2 * pad - kw) // stride + 1
    xp = jnp.pad(x, ((0, 0), (pad, pad), (pad, pad), (0, 0)))
    cols = []
    for i in range(kh):
        for j in range(kw):
            cols.append(xp[:, i:i + stride * (ho - 1) + 1:stride,
                           j:j + stride * (wo - 1) + 1:stride, :])
    patches = jnp.stack(cols, axis=3)               # [N, Ho, Wo, kh*kw, C]
    return patches.reshape(n * ho * wo, kh * kw * c), (n, ho, wo)


def conv_bn_act(x, w, gamma, beta, stride, pad, relu, residual=None):
    """Conv2d(bias=False) + BatchNorm2d (training-mode batch stats) + optional residual
    add + optional ReLU.  x: NHWC bf16 activations.  Returns NHWC bf16."""
    cout, cin, kh, kw = w.shape
    n, h, wdt, _ = x.shape
    ho = (h + 2 * pad - kh) // stride + 1
    wo = (wdt + 2 * pad - kw) // stride + 1
    m = n * ho * wo
    w_hwio = jnp.transpose(w, (2, 3, 1, 0)).astype(jnp.bfloat16)   # [kh, kw, cin, cout]

    if kh * kw == 1:
        # 1x1 (possibly strided, pad == 0 in this net): pure channel matmul on a subsample.
        xs = x[:, ::stride, ::stride, :][:, :ho, :wo, :]
        a = xs.reshape(m, cin).astype(jnp.bfloat16)
        y, st = pallas_matmul_stats(a, w_hwio.reshape(cin, cout))
        y = y.reshape(n, ho, wo, cout)
    elif kh * kw <= 9:
        # 3x3 convs: direct tap accumulation in VMEM, no im2col in HBM.
        xp = jnp.pad(x, ((0, 0), (pad, pad), (pad, pad), (0, 0)))
        x_ph = _col_phase(xp, stride, kw, wo, 0.0)
        y, st = pallas_conv_direct(x_ph, w_hwio, stride, ho, wo)
    else:
        # 7x7 stride-2 stem: bf16 im2col + matmul with fused stats.
        patches, _ = _im2col(x, kh, kw, stride, pad)
        y, st = pallas_matmul_stats(patches.astype(jnp.bfloat16),
                                    w_hwio.reshape(kh * kw * cin, cout))
        y = y.reshape(n, ho, wo, cout)

    # Batch statistics (biased variance, like PyTorch BN in training mode), from fused stats.
    ssum = jnp.sum(st[:, 0, :], axis=0)
    ssq = jnp.sum(st[:, 1, :], axis=0)
    mean = ssum / m
    var = jnp.maximum(ssq / m - mean * mean, 0.0)    # guard tiny negative from cancellation
    scale = gamma / jnp.sqrt(var + BN_EPS)
    bias = beta - mean * scale

    res = None if residual is None else residual.reshape(m, cout)
    out = pallas_bn_act(y.reshape(m, cout), scale, bias, res, relu)
    return out.reshape(n, ho, wo, cout)


def maxpool_3x3_s2_p1(x):
    """MaxPool2d(kernel_size=3, stride=2, padding=1) in NHWC (bf16), single fused kernel."""
    n, h, w, c = x.shape
    ho = (h + 2 - 3) // 2 + 1
    wo = (w + 2 - 3) // 2 + 1
    xp = jnp.pad(x, ((0, 0), (1, 1), (1, 1), (0, 0)), constant_values=-jnp.inf)
    x_ph = _col_phase(xp, 2, 3, wo, -jnp.inf)
    return pallas_maxpool(x_ph, 3, 2, ho, wo)


# ----------------------------------------------------------------------------
# Parameters (deterministic init matching the module's __init__)
# ----------------------------------------------------------------------------
def _conv_init(key, cout, cin, kh, kw):
    n = kh * kw * cout
    return jax.random.normal(key, (cout, cin, kh, kw), jnp.float32) * math.sqrt(2.0 / n)


def _bn_init(c):
    return (jnp.ones((c,), jnp.float32), jnp.zeros((c,), jnp.float32))


def init_params(key, input_channels, layers=(2, 2)):
    keys = iter(jax.random.split(key, 64))
    params = {
        "conv1": _conv_init(next(keys), 64, input_channels, 7, 7),
        "bn1": _bn_init(64),
    }
    inplanes = 64
    for li, (planes, nblocks, stride0) in enumerate(
            [(64, layers[0], 1), (128, layers[1], 2)], start=1):
        blocks = []
        for bi in range(nblocks):
            s = stride0 if bi == 0 else 1
            blk = {
                "conv1": _conv_init(next(keys), planes, inplanes, 3, 3),
                "bn1": _bn_init(planes),
                "conv2": _conv_init(next(keys), planes, planes, 3, 3),
                "bn2": _bn_init(planes),
                "stride": s,
            }
            if s != 1 or inplanes != planes:
                blk["ds_conv"] = _conv_init(next(keys), planes, inplanes, 1, 1)
                blk["ds_bn"] = _bn_init(planes)
            blocks.append(blk)
            inplanes = planes
        params[f"layer{li}"] = blocks
    return params


# ----------------------------------------------------------------------------
# Forward pass (conv1 -> bn1 -> relu -> maxpool -> layer1 -> layer2)
# ----------------------------------------------------------------------------
def basic_block(x, blk):
    s = blk["stride"]
    if "ds_conv" in blk:
        g, b = blk["ds_bn"]
        residual = conv_bn_act(x, blk["ds_conv"], g, b, s, 0, relu=False)
    else:
        residual = x
    g1, b1 = blk["bn1"]
    out = conv_bn_act(x, blk["conv1"], g1, b1, s, 1, relu=True)
    g2, b2 = blk["bn2"]
    out = conv_bn_act(out, blk["conv2"], g2, b2, 1, 1, relu=True, residual=residual)
    return out


def resnet_forward(params, x_nchw):
    x = jnp.transpose(x_nchw, (0, 2, 3, 1)).astype(jnp.bfloat16)   # NCHW -> NHWC, bf16 acts
    g, b = params["bn1"]
    x = conv_bn_act(x, params["conv1"], g, b, stride=2, pad=3, relu=True)
    x = maxpool_3x3_s2_p1(x)
    for blk in params["layer1"]:
        x = basic_block(x, blk)
    for blk in params["layer2"]:
        x = basic_block(x, blk)
    return jnp.transpose(x, (0, 3, 1, 2)).astype(jnp.float32)      # NHWC -> NCHW


# ----------------------------------------------------------------------------
if __name__ == "__main__":
    key = jax.random.PRNGKey(0)
    pkey, xkey = jax.random.split(key)

    input_channels = 4
    params = init_params(pkey, input_channels, layers=(2, 2))
    x = jax.random.normal(xkey, (2, input_channels, 16, 16), jnp.float32)

    fwd = jax.jit(lambda inp: resnet_forward(params, inp))
    out = jax.block_until_ready(fwd(x))

    assert out.shape == (2, 128, 2, 2), out.shape
    assert bool(jnp.all(jnp.isfinite(out)))
    print("KERNEL_OK")
</pallas_src>

<mosaic_0001>
module attributes {stable_mosaic.version = 11 : i64} {
  func.func @_matmul_stats_kernel(%arg0: i32, %arg1: memref<64x196xbf16, #tpu.memory_space<vmem>>, %arg2: memref<196x64xbf16, #tpu.memory_space<vmem>>, %arg3: memref<64x64xf32, #tpu.memory_space<vmem>>, %arg4: memref<1x8x64xf32, #tpu.memory_space<vmem>>) attributes {dimension_semantics = [#tpu.dimension_semantics<parallel>], iteration_bounds = array<i64: 2>, scalar_prefetch = 0 : i64, scratch_operands = 0 : i64, tpu.core_type = #tpu.core_type<tc>, window_params = [{transform_indices = @transform_0, window_bounds = array<i64: 64, 196>}, {pipeline_mode = #tpu.pipeline_mode<synchronous>, transform_indices = @transform_1, window_bounds = array<i64: 196, 64>}, {transform_indices = @transform_2, window_bounds = array<i64: 64, 64>}, {transform_indices = @transform_3, window_bounds = array<i64: 1, 8, 64>}]} {
    %c0 = arith.constant 0 : index
    %c0_0 = arith.constant 0 : index
    %0 = vector.load %arg1[%c0, %c0_0] : memref<64x196xbf16, #tpu.memory_space<vmem>>, vector<64x196xbf16>
    %c0_1 = arith.constant 0 : index
    %c0_2 = arith.constant 0 : index
    %1 = vector.load %arg2[%c0_1, %c0_2] : memref<196x64xbf16, #tpu.memory_space<vmem>>, vector<196x64xbf16>
    %cst = arith.constant dense<0.000000e+00> : vector<64x64xf32>
    %2 = tpu.matmul %0, %1, %cst {dimension_numbers = #tpu.dot_dimension_numbers<[1], [0], [0], [1], [0, 0, 1, 1], [], []>} : vector<64x196xbf16>, vector<196x64xbf16>, vector<64x64xf32> -> vector<64x64xf32>
    %c0_3 = arith.constant 0 : index
    %c0_4 = arith.constant 0 : index
    %3 = vector.load %arg3[%c0_3, %c0_4] : memref<64x64xf32, #tpu.memory_space<vmem>>, vector<64x64xf32>
    tpu.vector_store %arg3[%c0_3, %c0_4], %2 {strides = array<i32>} : memref<64x64xf32, #tpu.memory_space<vmem>>, vector<64x64xf32>,
    %cst_5 = arith.constant dense<0.000000e+00> : vector<64xf32>
    %4 = vector.multi_reduction <add>, %2, %cst_5 [0] : vector<64x64xf32> to vector<64xf32>
    %5 = vector.shape_cast %4 : vector<64xf32> to vector<1x64xf32>
    %6 = arith.mulf %2, %2 : vector<64x64xf32>
    %cst_6 = arith.constant dense<0.000000e+00> : vector<64xf32>
    %7 = vector.multi_reduction <add>, %6, %cst_6 [0] : vector<64x64xf32> to vector<64xf32>
    %8 = vector.shape_cast %7 : vector<64xf32> to vector<1x64xf32>
    %9 = tpu.iota {dimensions = array<i32: 0>} : vector<8x64xi32>
    %cst_7 = arith.constant 0.000000e+00 : f32
    %10 = vector.broadcast %cst_7 : f32 to vector<8x64xf32>
    %c0_i32 = arith.constant 0 : i32
    %11 = vector.broadcast %c0_i32 : i32 to vector<8x64xi32>
    %12 = arith.cmpi eq, %9, %11 : vector<8x64xi32>
    %13 = vector.shape_cast %5 : vector<1x64xf32> to vector<1x64xf32>
    %14 = vector.broadcast %13 : vector<1x64xf32> to vector<8x64xf32>
    %15 = arith.select %12, %14, %10 : vector<8x64xi1>, vector<8x64xf32>
    %c1_i32 = arith.constant 1 : i32
    %16 = vector.broadcast %c1_i32 : i32 to vector<8x64xi32>
    %17 = arith.cmpi eq, %9, %16 : vector<8x64xi32>
    %18 = vector.shape_cast %8 : vector<1x64xf32> to vector<1x64xf32>
    %19 = vector.broadcast %18 : vector<1x64xf32> to vector<8x64xf32>
    %20 = arith.select %17, %19, %15 : vector<8x64xi1>, vector<8x64xf32>
    %c0_8 = arith.constant 0 : index
    %c0_9 = arith.constant 0 : index
    %c0_10 = arith.constant 0 : index
    %21 = vector.load %arg4[%c0_8, %c0_9, %c0_10] : memref<1x8x64xf32, #tpu.memory_space<vmem>>, vector<1x8x64xf32>
    %22 = vector.shape_cast %21 : vector<1x8x64xf32> to vector<8x64xf32>
    %23 = vector.shape_cast %20 : vector<8x64xf32> to vector<1x8x64xf32>
    tpu.vector_store %arg4[%c0_8, %c0_9, %c0_10], %23 {strides = array<i32>} : memref<1x8x64xf32, #tpu.memory_space<vmem>>, vector<1x8x64xf32>,
    return
  }
  func.func @transform_0(%arg0: i32) -> (i32, i32) {
    %c0_i32 = arith.constant 0 : i32
    %c0_i32_0 = arith.constant 0 : i32
    return %arg0, %c0_i32 : i32, i32
  }
  func.func @transform_1(%arg0: i32) -> (i32, i32) {
    %c0_i32 = arith.constant 0 : i32
    %c0_i32_0 = arith.constant 0 : i32
    %c0_i32_1 = arith.constant 0 : i32
    return %c0_i32, %c0_i32_0 : i32, i32
  }
  func.func @transform_2(%arg0: i32) -> (i32, i32) {
    %c0_i32 = arith.constant 0 : i32
    %c0_i32_0 = arith.constant 0 : i32
    return %arg0, %c0_i32 : i32, i32
  }
  func.func @transform_3(%arg0: i32) -> (i32, i32, i32) {
    %c0_i32 = arith.constant 0 : i32
    %c0_i32_0 = arith.constant 0 : i32
    %c0_i32_1 = arith.constant 0 : i32
    return %arg0, %c0_i32, %c0_i32_0 : i32, i32, i32
  }
}

module attributes {stable_mosaic.version = 11 : i64} {
  func.func @_bn_act_kernel(%arg0: i32, %arg1: memref<32x128xf32, #tpu.memory_space<vmem>>, %arg2: memref<1x128xf32, #tpu.memory_space<vmem>>, %arg3: memref<1x128xf32, #tpu.memory_space<vmem>>, %arg4: memref<32x128xbf16, #tpu.memory_space<vmem>>) attributes {dimension_semantics = [#tpu.dimension_semantics<parallel>], iteration_bounds = array<i64: 2>, scalar_prefetch = 0 : i64, scratch_operands = 0 : i64, tpu.core_type = #tpu.core_type<tc>, window_params = [{transform_indices = @transform_0, window_bounds = array<i64: 32, 128>}, {pipeline_mode = #tpu.pipeline_mode<synchronous>, transform_indices = @transform_1, window_bounds = array<i64: 1, 128>}, {pipeline_mode = #tpu.pipeline_mode<synchronous>, transform_indices = @transform_2, window_bounds = array<i64: 1, 128>}, {transform_indices = @transform_3, window_bounds = array<i64: 32, 128>}]} {
    %c0 = arith.constant 0 : index
    %c0_0 = arith.constant 0 : index
    %0 = vector.load %arg1[%c0, %c0_0] : memref<32x128xf32, #tpu.memory_space<vmem>>, vector<32x128xf32>
    %c0_1 = arith.constant 0 : index
    %c0_2 = arith.constant 0 : index
    %1 = vector.load %arg2[%c0_1, %c0_2] : memref<1x128xf32, #tpu.memory_space<vmem>>, vector<1x128xf32>
    %2 = vector.broadcast %1 : vector<1x128xf32> to vector<32x128xf32>
    %3 = arith.mulf %0, %2 : vector<32x128xf32>
    %c0_3 = arith.constant 0 : index
    %c0_4 = arith.constant 0 : index
    %4 = vector.load %arg3[%c0_3, %c0_4] : memref<1x128xf32, #tpu.memory_space<vmem>>, vector<1x128xf32>
    %5 = vector.broadcast %4 : vector<1x128xf32> to vector<32x128xf32>
    %6 = arith.addf %3, %5 : vector<32x128xf32>
    %cst = arith.constant 0.000000e+00 : f32
    %7 = vector.broadcast %cst : f32 to vector<32x128xf32>
    %8 = arith.maximumf %6, %7 : vector<32x128xf32>
    %9 = arith.truncf %8 : vector<32x128xf32> to vector<32x128xbf16>
    %c0_5 = arith.constant 0 : index
    %c0_6 = arith.constant 0 : index
    %10 = vector.load %arg4[%c0_5, %c0_6] : memref<32x128xbf16, #tpu.memory_space<vmem>>, vector<32x128xbf16>
    tpu.vector_store %arg4[%c0_5, %c0_6], %9 {strides = array<i32>} : memref<32x128xbf16, #tpu.memory_space<vmem>>, vector<32x128xbf16>,
    return
  }
  func.func @transform_0(%arg0: i32) -> (i32, i32) {
    %c0_i32 = arith.constant 0 : i32
    %c0_i32_0 = arith.constant 0 : i32
    return %arg0, %c0_i32 : i32, i32
  }
  func.func @transform_1(%arg0: i32) -> (i32, i32) {
    %c0_i32 = arith.constant 0 : i32
    %c0_i32_0 = arith.constant 0 : i32
    %c0_i32_1 = arith.constant 0 : i32
    return %c0_i32, %c0_i32_0 : i32, i32
  }
  func.func @transform_2(%arg0: i32) -> (i32, i32) {
    %c0_i32 = arith.constant 0 : i32
    %c0_i32_0 = arith.constant 0 : i32
    %c0_i32_1 = arith.constant 0 : i32
    return %c0_i32, %c0_i32_0 : i32, i32
  }
  func.func @transform_3(%arg0: i32) -> (i32, i32) {
    %c0_i32 = arith.constant 0 : i32
    %c0_i32_0 = arith.constant 0 : i32
    return %arg0, %c0_i32 : i32, i32
  }
}

module attributes {stable_mosaic.version = 11 : i64} {
  func.func @_maxpool_kernel(%arg0: i32, %arg1: memref<1x20x5x64xbf16, #tpu.memory_space<vmem>>, %arg2: memref<1x4x4x64xbf16, #tpu.memory_space<vmem>>) attributes {dimension_semantics = [#tpu.dimension_semantics<parallel>], iteration_bounds = array<i64: 2>, scalar_prefetch = 0 : i64, scratch_operands = 0 : i64, tpu.core_type = #tpu.core_type<tc>, window_params = [{transform_indices = @transform_0, window_bounds = array<i64: 1, 20, 5, 64>}, {transform_indices = @transform_1, window_bounds = array<i64: 1, 4, 4, 64>}]} {
    %c0 = arith.constant 0 : index
    %c0_0 = arith.constant 0 : index
    %c0_1 = arith.constant 0 : index
    %c0_2 = arith.constant 0 : index
    %0 = vector.load %arg1[%c0, %c0_0, %c0_1, %c0_2] : memref<1x20x5x64xbf16, #tpu.memory_space<vmem>>, vector<1x1x4x64xbf16>
    %1 = vector.shape_cast %0 : vector<1x1x4x64xbf16> to vector<4x64xbf16>
    %c0_3 = arith.constant 0 : index
    %c1 = arith.constant 1 : index
    %c0_4 = arith.constant 0 : index
    %c0_5 = arith.constant 0 : index
    %2 = vector.load %arg1[%c0_3, %c1, %c0_4, %c0_5] : memref<1x20x5x64xbf16, #tpu.memory_space<vmem>>, vector<1x1x4x64xbf16>
    %3 = vector.shape_cast %2 : vector<1x1x4x64xbf16> to vector<4x64xbf16>
    %4 = arith.maximumf %1, %3 : vector<4x64xbf16>
    %c0_6 = arith.constant 0 : index
    %c0_7 = arith.constant 0 : index
    %c1_8 = arith.constant 1 : index
    %c0_9 = arith.constant 0 : index
    %5 = vector.load %arg1[%c0_6, %c0_7, %c1_8, %c0_9] : memref<1x20x5x64xbf16, #tpu.memory_space<vmem>>, vector<1x1x4x64xbf16>
    %6 = vector.shape_cast %5 : vector<1x1x4x64xbf16> to vector<4x64xbf16>
    %7 = arith.maximumf %4, %6 : vector<4x64xbf16>
    %c0_10 = arith.constant 0 : index
    %c2 = arith.constant 2 : index
    %c0_11 = arith.constant 0 : index
    %c0_12 = arith.constant 0 : index
    %8 = vector.load %arg1[%c0_10, %c2, %c0_11, %c0_12] : memref<1x20x5x64xbf16, #tpu.memory_space<vmem>>, vector<1x1x4x64xbf16>
    %9 = vector.shape_cast %8 : vector<1x1x4x64xbf16> to vector<4x64xbf16>
    %10 = arith.maximumf %7, %9 : vector<4x64xbf16>
    %c0_13 = arith.constant 0 : index
    %c3 = arith.constant 3 : index
    %c0_14 = arith.constant 0 : index
    %c0_15 = arith.constant 0 : index
    %11 = vector.load %arg1[%c0_13, %c3, %c0_14, %c0_15] : memref<1x20x5x64xbf16, #tpu.memory_space<vmem>>, vector<1x1x4x64xbf16>
    %12 = vector.shape_cast %11 : vector<1x1x4x64xbf16> to vector<4x64xbf16>
    %13 = arith.maximumf %10, %12 : vector<4x64xbf16>
    %c0_16 = arith.constant 0 : index
    %c2_17 = arith.constant 2 : index
    %c1_18 = arith.constant 1 : index
    %c0_19 = arith.constant 0 : index
    %14 = vector.load %arg1[%c0_16, %c2_17, %c1_18, %c0_19] : memref<1x20x5x64xbf16, #tpu.memory_space<vmem>>, vector<1x1x4x64xbf16>
    %15 = vector.shape_cast %14 : vector<1x1x4x64xbf16> to vector<4x64xbf16>
    %16 = arith.maximumf %13, %15 : vector<4x64xbf16>
    %c0_20 = arith.constant 0 : index
    %c4 = arith.constant 4 : index
    %c0_21 = arith.constant 0 : index
    %c0_22 = arith.constant 0 : index
    %17 = vector.load %arg1[%c0_20, %c4, %c0_21, %c0_22] : memref<1x20x5x64xbf16, #tpu.memory_space<vmem>>, vector<1x1x4x64xbf16>
    %18 = vector.shape_cast %17 : vector<1x1x4x64xbf16> to vector<4x64xbf16>
    %19 = arith.maximumf %16, %18 : vector<4x64xbf16>
    %c0_23 = arith.constant 0 : index
    %c5 = arith.constant 5 : index
    %c0_24 = arith.constant 0 : index
    %c0_25 = arith.constant 0 : index
    %20 = vector.load %arg1[%c0_23, %c5, %c0_24, %c0_25] : memref<1x20x5x64xbf16, #tpu.memory_space<vmem>>, vector<1x1x4x64xbf16>
    %21 = vector.shape_cast %20 : vector<1x1x4x64xbf16> to vector<4x64xbf16>
    %22 = arith.maximumf %19, %21 : vector<4x64xbf16>
    %c0_26 = arith.constant 0 : index
    %c4_27 = arith.constant 4 : index
    %c1_28 = arith.constant 1 : index
    %c0_29 = arith.constant 0 : index
    %23 = vector.load %arg1[%c0_26, %c4_27, %c1_28, %c0_29] : memref<1x20x5x64xbf16, #tpu.memory_space<vmem>>, vector<1x1x4x64xbf16>
    %24 = vector.shape_cast %23 : vector<1x1x4x64xbf16> to vector<4x64xbf16>
    %25 = arith.maximumf %22, %24 : vector<4x64xbf16>
    %c0_30 = arith.constant 0 : index
    %c0_31 = arith.constant 0 : index
    %c0_32 = arith.constant 0 : index
    %c0_33 = arith.constant 0 : index
    %26 = vector.load %arg2[%c0_30, %c0_31, %c0_32, %c0_33] : memref<1x4x4x64xbf16, #tpu.memory_space<vmem>>, vector<1x1x4x64xbf16>
    %27 = vector.shape_cast %26 : vector<1x1x4x64xbf16> to vector<4x64xbf16>
    %28 = vector.shape_cast %25 : vector<4x64xbf16> to vector<1x1x4x64xbf16>
    tpu.vector_store %arg2[%c0_30, %c0_31, %c0_32, %c0_33], %28 {strides = array<i32>} : memref<1x4x4x64xbf16, #tpu.memory_space<vmem>>, vector<1x1x4x64xbf16>,
    %c0_34 = arith.constant 0 : index
    %c4_35 = arith.constant 4 : index
    %c0_36 = arith.constant 0 : index
    %c0_37 = arith.constant 0 : index
    %29 = vector.load %arg1[%c0_34, %c4_35, %c0_36, %c0_37] : memref<1x20x5x64xbf16, #tpu.memory_space<vmem>>, vector<1x1x4x64xbf16>
    %30 = vector.shape_cast %29 : vector<1x1x4x64xbf16> to vector<4x64xbf16>
    %c0_38 = arith.constant 0 : index
    %c5_39 = arith.constant 5 : index
    %c0_40 = arith.constant 0 : index
    %c0_41 = arith.constant 0 : index
    %31 = vector.load %arg1[%c0_38, %c5_39, %c0_40, %c0_41] : memref<1x20x5x64xbf16, #tpu.memory_space<vmem>>, vector<1x1x4x64xbf16>
    %32 = vector.shape_cast %31 : vector<1x1x4x64xbf16> to vector<4x64xbf16>
    %33 = arith.maximumf %30, %32 : vector<4x64xbf16>
    %c0_42 = arith.constant 0 : index
    %c4_43 = arith.constant 4 : index
    %c1_44 = arith.constant 1 : index
    %c0_45 = arith.constant 0 : index
    %34 = vector.load %arg1[%c0_42, %c4_43, %c1_44, %c0_45] : memref<1x20x5x64xbf16, #tpu.memory_space<vmem>>, vector<1x1x4x64xbf16>
    %35 = vector.shape_cast %34 : vector<1x1x4x64xbf16> to vector<4x64xbf16>
    %36 = arith.maximumf %33, %35 : vector<4x64xbf16>
    %c0_46 = arith.constant 0 : index
    %c6 = arith.constant 6 : index
    %c0_47 = arith.constant 0 : index
    %c0_48 = arith.constant 0 : index
    %37 = vector.load %arg1[%c0_46, %c6, %c0_47, %c0_48] : memref<1x20x5x64xbf16, #tpu.memory_space<vmem>>, vector<1x1x4x64xbf16>
    %38 = vector.shape_cast %37 : vector<1x1x4x64xbf16> to vector<4x64xbf16>
    %39 = arith.maximumf %36, %38 : vector<4x64xbf16>
    %c0_49 = arith.constant 0 : index
    %c7 = arith.constant 7 : index
    %c0_50 = arith.constant 0 : index
    %c0_51 = arith.constant 0 : index
    %40 = vector.load %arg1[%c0_49, %c7, %c0_50, %c0_51] : memref<1x20x5x64xbf16, #tpu.memory_space<vmem>>, vector<1x1x4x64xbf16>
    %41 = vector.shape_cast %40 : vector<1x1x4x64xbf16> to vector<4x64xbf16>
    %42 = arith.maximumf %39, %41 : vector<4x64xbf16>
    %c0_52 = arith.constant 0 : index
    %c6_53 = arith.constant 6 : index
    %c1_54 = arith.constant 1 : index
    %c0_55 = arith.constant 0 : index
    %43 = vector.load %arg1[%c0_52, %c6_53, %c1_54, %c0_55] : memref<1x20x5x64xbf16, #tpu.memory_space<vmem>>, vector<1x1x4x64xbf16>
    %44 = vector.shape_cast %43 : vector<1x1x4x64xbf16> to vector<4x64xbf16>
    %45 = arith.maximumf %42, %44 : vector<4x64xbf16>
    %c0_56 = arith.constant 0 : index
    %c8 = arith.constant 8 : index
    %c0_57 = arith.constant 0 : index
    %c0_58 = arith.constant 0 : index
    %46 = vector.load %arg1[%c0_56, %c8, %c0_57, %c0_58] : memref<1x20x5x64xbf16, #tpu.memory_space<vmem>>, vector<1x1x4x64xbf16>
    %47 = vector.shape_cast %46 : vector<1x1x4x64xbf16> to vector<4x64xbf16>
    %48 = arith.maximumf %45, %47 : vector<4x64xbf16>
    %c0_59 = arith.constant 0 : index
    %c9 = arith.constant 9 : index
    %c0_60 = arith.constant 0 : index
    %c0_61 = arith.constant 0 : index
    %49 = vector.load %arg1[%c0_59, %c9, %c0_60, %c0_61] : memref<1x20x5x64xbf16, #tpu.memory_space<vmem>>, vector<1x1x4x64xbf16>
    %50 = vector.shape_cast %49 : vector<1x1x4x64xbf16> to vector<4x64xbf16>
    %51 = arith.maximumf %48, %50 : vector<4x64xbf16>
    %c0_62 = arith.constant 0 : index
    %c8_63 = arith.constant 8 : index
    %c1_64 = arith.constant 1 : index
    %c0_65 = arith.constant 0 : index
    %52 = vector.load %arg1[%c0_62, %c8_63, %c1_64, %c0_65] : memref<1x20x5x64xbf16, #tpu.memory_space<vmem>>, vector<1x1x4x64xbf16>
    %53 = vector.shape_cast %52 : vector<1x1x4x64xbf16> to vector<4x64xbf16>
    %54 = arith.maximumf %51, %53 : vector<4x64xbf16>
    %c0_66 = arith.constant 0 : index
    %c1_67 = arith.constant 1 : index
    %c0_68 = arith.constant 0 : index
    %c0_69 = arith.constant 0 : index
    %55 = vector.load %arg2[%c0_66, %c1_67, %c0_68, %c0_69] : memref<1x4x4x64xbf16, #tpu.memory_space<vmem>>, vector<1x1x4x64xbf16>
    %56 = vector.shape_cast %55 : vector<1x1x4x64xbf16> to vector<4x64xbf16>
    %57 = vector.shape_cast %54 : vector<4x64xbf16> to vector<1x1x4x64xbf16>
    tpu.vector_store %arg2[%c0_66, %c1_67, %c0_68, %c0_69], %57 {strides = array<i32>} : memref<1x4x4x64xbf16, #tpu.memory_space<vmem>>, vector<1x1x4x64xbf16>,
    %c0_70 = arith.constant 0 : index
    %c8_71 = arith.constant 8 : index
    %c0_72 = arith.constant 0 : index
    %c0_73 = arith.constant 0 : index
    %58 = vector.load %arg1[%c0_70, %c8_71, %c0_72, %c0_73] : memref<1x20x5x64xbf16, #tpu.memory_space<vmem>>, vector<1x1x4x64xbf16>
    %59 = vector.shape_cast %58 : vector<1x1x4x64xbf16> to vector<4x64xbf16>
    %c0_74 = arith.constant 0 : index
    %c9_75 = arith.constant 9 : index
    %c0_76 = arith.constant 0 : index
    %c0_77 = arith.constant 0 : index
    %60 = vector.load %arg1[%c0_74, %c9_75, %c0_76, %c0_77] : memref<1x20x5x64xbf16, #tpu.memory_space<vmem>>, vector<1x1x4x64xbf16>
    %61 = vector.shape_cast %60 : vector<1x1x4x64xbf16> to vector<4x64xbf16>
    %62 = arith.maximumf %59, %61 : vector<4x64xbf16>
    %c0_78 = arith.constant 0 : index
    %c8_79 = arith.constant 8 : index
    %c1_80 = arith.constant 1 : index
    %c0_81 = arith.constant 0 : index
    %63 = vector.load %arg1[%c0_78, %c8_79, %c1_80, %c0_81] : memref<1x20x5x64xbf16, #tpu.memory_space<vmem>>, vector<1x1x4x64xbf16>
    %64 = vector.shape_cast %63 : vector<1x1x4x64xbf16> to vector<4x64xbf16>
    %65 = arith.maximumf %62, %64 : vector<4x64xbf16>
    %c0_82 = arith.constant 0 : index
    %c10 = arith.constant 10 : index
    %c0_83 = arith.constant 0 : index
    %c0_84 = arith.constant 0 : index
    %66 = vector.load %arg1[%c0_82, %c10, %c0_83, %c0_84] : memref<1x20x5x64xbf16, #tpu.memory_space<vmem>>, vector<1x1x4x64xbf16>
    %67 = vector.shape_cast %66 : vector<1x1x4x64xbf16> to vector<4x64xbf16>
    %68 = arith.maximumf %65, %67 : vector<4x64xbf16>
    %c0_85 = arith.constant 0 : index
    %c11 = arith.constant 11 : index
    %c0_86 = arith.constant 0 : index
    %c0_87 = arith.constant 0 : index
    %69 = vector.load %arg1[%c0_85, %c11, %c0_86, %c0_87] : memref<1x20x5x64xbf16, #tpu.memory_space<vmem>>, vector<1x1x4x64xbf16>
    %70 = vector.shape_cast %69 : vector<1x1x4x64xbf16> to vector<4x64xbf16>
    %71 = arith.maximumf %68, %70 : vector<4x64xbf16>
    %c0_88 = arith.constant 0 : index
    %c10_89 = arith.constant 10 : index
    %c1_90 = arith.constant 1 : index
    %c0_91 = arith.constant 0 : index
    %72 = vector.load %arg1[%c0_88, %c10_89, %c1_90, %c0_91] : memref<1x20x5x64xbf16, #tpu.memory_space<vmem>>, vector<1x1x4x64xbf16>
    %73 = vector.shape_cast %72 : vector<1x1x4x64xbf16> to vector<4x64xbf16>
    %74 = arith.maximumf %71, %73 : vector<4x64xbf16>
    %c0_92 = arith.constant 0 : index
    %c12 = arith.constant 12 : index
    %c0_93 = arith.constant 0 : index
    %c0_94 = arith.constant 0 : index
    %75 = vector.load %arg1[%c0_92, %c12, %c0_93, %c0_94] : memref<1x20x5x64xbf16, #tpu.memory_space<vmem>>, vector<1x1x4x64xbf16>
    %76 = vector.shape_cast %75 : vector<1x1x4x64xbf16> to vector<4x64xbf16>
    %77 = arith.maximumf %74, %76 : vector<4x64xbf16>
    %c0_95 = arith.constant 0 : index
    %c13 = arith.constant 13 : index
    %c0_96 = arith.constant 0 : index
    %c0_97 = arith.constant 0 : index
    %78 = vector.load %arg1[%c0_95, %c13, %c0_96, %c0_97] : memref<1x20x5x64xbf16, #tpu.memory_space<vmem>>, vector<1x1x4x64xbf16>
    %79 = vector.shape_cast %78 : vector<1x1x4x64xbf16> to vector<4x64xbf16>
    %80 = arith.maximumf %77, %79 : vector<4x64xbf16>
    %c0_98 = arith.constant 0 : index
    %c12_99 = arith.constant 12 : index
    %c1_100 = arith.constant 1 : index
    %c0_101 = arith.constant 0 : index
    %81 = vector.load %arg1[%c0_98, %c12_99, %c1_100, %c0_101] : memref<1x20x5x64xbf16, #tpu.memory_space<vmem>>, vector<1x1x4x64xbf16>
    %82 = vector.shape_cast %81 : vector<1x1x4x64xbf16> to vector<4x64xbf16>
    %83 = arith.maximumf %80, %82 : vector<4x64xbf16>
    %c0_102 = arith.constant 0 : index
    %c2_103 = arith.constant 2 : index
    %c0_104 = arith.constant 0 : index
    %c0_105 = arith.constant 0 : index
    %84 = vector.load %arg2[%c0_102, %c2_103, %c0_104, %c0_105] : memref<1x4x4x64xbf16, #tpu.memory_space<vmem>>, vector<1x1x4x64xbf16>
    %85 = vector.shape_cast %84 : vector<1x1x4x64xbf16> to vector<4x64xbf16>
    %86 = vector.shape_cast %83 : vector<4x64xbf16> to vector<1x1x4x64xbf16>
    tpu.vector_store %arg2[%c0_102, %c2_103, %c0_104, %c0_105], %86 {strides = array<i32>} : memref<1x4x4x64xbf16, #tpu.memory_space<vmem>>, vector<1x1x4x64xbf16>,
    %c0_106 = arith.constant 0 : index
    %c12_107 = arith.constant 12 : index
    %c0_108 = arith.constant 0 : index
    %c0_109 = arith.constant 0 : index
    %87 = vector.load %arg1[%c0_106, %c12_107, %c0_108, %c0_109] : memref<1x20x5x64xbf16, #tpu.memory_space<vmem>>, vector<1x1x4x64xbf16>
    %88 = vector.shape_cast %87 : vector<1x1x4x64xbf16> to vector<4x64xbf16>
    %c0_110 = arith.constant 0 : index
    %c13_111 = arith.constant 13 : index
    %c0_112 = arith.constant 0 : index
    %c0_113 = arith.constant 0 : index
    %89 = vector.load %arg1[%c0_110, %c13_111, %c0_112, %c0_113] : memref<1x20x5x64xbf16, #tpu.memory_space<vmem>>, vector<1x1x4x64xbf16>
    %90 = vector.shape_cast %89 : vector<1x1x4x64xbf16> to vector<4x64xbf16>
    %91 = arith.maximumf %88, %90 : vector<4x64xbf16>
    %c0_114 = arith.constant 0 : index
    %c12_115 = arith.constant 12 : index
    %c1_116 = arith.constant 1 : index
    %c0_117 = arith.constant 0 : index
    %92 = vector.load %arg1[%c0_114, %c12_115, %c1_116, %c0_117] : memref<1x20x5x64xbf16, #tpu.memory_space<vmem>>, vector<1x1x4x64xbf16>
    %93 = vector.shape_cast %92 : vector<1x1x4x64xbf16> to vector<4x64xbf16>
    %94 = arith.maximumf %91, %93 : vector<4x64xbf16>
    %c0_118 = arith.constant 0 : index
    %c14 = arith.constant 14 : index
    %c0_119 = arith.constant 0 : index
    %c0_120 = arith.constant 0 : index
    %95 = vector.load %arg1[%c0_118, %c14, %c0_119, %c0_120] : memref<1x20x5x64xbf16, #tpu.memory_space<vmem>>, vector<1x1x4x64xbf16>
    %96 = vector.shape_cast %95 : vector<1x1x4x64xbf16> to vector<4x64xbf16>
    %97 = arith.maximumf %94, %96 : vector<4x64xbf16>
    %c0_121 = arith.constant 0 : index
    %c15 = arith.constant 15 : index
    %c0_122 = arith.constant 0 : index
    %c0_123 = arith.constant 0 : index
    %98 = vector.load %arg1[%c0_121, %c15, %c0_122, %c0_123] : memref<1x20x5x64xbf16, #tpu.memory_space<vmem>>, vector<1x1x4x64xbf16>
    %99 = vector.shape_cast %98 : vector<1x1x4x64xbf16> to vector<4x64xbf16>
    %100 = arith.maximumf %97, %99 : vector<4x64xbf16>
    %c0_124 = arith.constant 0 : index
    %c14_125 = arith.constant 14 : index
    %c1_126 = arith.constant 1 : index
    %c0_127 = arith.constant 0 : index
    %101 = vector.load %arg1[%c0_124, %c14_125, %c1_126, %c0_127] : memref<1x20x5x64xbf16, #tpu.memory_space<vmem>>, vector<1x1x4x64xbf16>
    %102 = vector.shape_cast %101 : vector<1x1x4x64xbf16> to vector<4x64xbf16>
    %103 = arith.maximumf %100, %102 : vector<4x64xbf16>
    %c0_128 = arith.constant 0 : index
    %c16 = arith.constant 16 : index
    %c0_129 = arith.constant 0 : index
    %c0_130 = arith.constant 0 : index
    %104 = vector.load %arg1[%c0_128, %c16, %c0_129, %c0_130] : memref<1x20x5x64xbf16, #tpu.memory_space<vmem>>, vector<1x1x4x64xbf16>
    %105 = vector.shape_cast %104 : vector<1x1x4x64xbf16> to vector<4x64xbf16>
    %106 = arith.maximumf %103, %105 : vector<4x64xbf16>
    %c0_131 = arith.constant 0 : index
    %c17 = arith.constant 17 : index
    %c0_132 = arith.constant 0 : index
    %c0_133 = arith.constant 0 : index
    %107 = vector.load %arg1[%c0_131, %c17, %c0_132, %c0_133] : memref<1x20x5x64xbf16, #tpu.memory_space<vmem>>, vector<1x1x4x64xbf16>
    %108 = vector.shape_cast %107 : vector<1x1x4x64xbf16> to vector<4x64xbf16>
    %109 = arith.maximumf %106, %108 : vector<4x64xbf16>
    %c0_134 = arith.constant 0 : index
    %c16_135 = arith.constant 16 : index
    %c1_136 = arith.constant 1 : index
    %c0_137 = arith.constant 0 : index
    %110 = vector.load %arg1[%c0_134, %c16_135, %c1_136, %c0_137] : memref<1x20x5x64xbf16, #tpu.memory_space<vmem>>, vector<1x1x4x64xbf16>
    %111 = vector.shape_cast %110 : vector<1x1x4x64xbf16> to vector<4x64xbf16>
    %112 = arith.maximumf %109, %111 : vector<4x64xbf16>
    %c0_138 = arith.constant 0 : index
    %c3_139 = arith.constant 3 : index
    %c0_140 = arith.constant 0 : index
    %c0_141 = arith.constant 0 : index
    %113 = vector.load %arg2[%c0_138, %c3_139, %c0_140, %c0_141] : memref<1x4x4x64xbf16, #tpu.memory_space<vmem>>, vector<1x1x4x64xbf16>
    %114 = vector.shape_cast %113 : vector<1x1x4x64xbf16> to vector<4x64xbf16>
    %115 = vector.shape_cast %112 : vector<4x64xbf16> to vector<1x1x4x64xbf16>
    tpu.vector_store %arg2[%c0_138, %c3_139, %c0_140, %c0_141], %115 {strides = array<i32>} : memref<1x4x4x64xbf16, #tpu.memory_space<vmem>>, vector<1x1x4x64xbf16>,
    return
  }
  func.func @transform_0(%arg0: i32) -> (i32, i32, i32, i32) {
    %c0_i32 = arith.constant 0 : i32
    %c0_i32_0 = arith.constant 0 : i32
    %c0_i32_1 = arith.constant 0 : i32
    %c0_i32_2 = arith.constant 0 : i32
    return %arg0, %c0_i32, %c0_i32_0, %c0_i32_1 : i32, i32, i32, i32
  }
  func.func @transform_1(%arg0: i32) -> (i32, i32, i32, i32) {
    %c0_i32 = arith.constant 0 : i32
    %c0_i32_0 = arith.constant 0 : i32
    %c0_i32_1 = arith.constant 0 : i32
    %c0_i32_2 = arith.constant 0 : i32
    return %arg0, %c0_i32, %c0_i32_0, %c0_i32_1 : i32, i32, i32, i32
  }
}

module attributes {stable_mosaic.version = 11 : i64} {
  func.func @_conv_direct_kernel(%arg0: i32, %arg1: memref<1x6x6x64xbf16, #tpu.memory_space<vmem>>, %arg2: memref<3x3x64x64xbf16, #tpu.memory_space<vmem>>, %arg3: memref<1x4x4x64xf32, #tpu.memory_space<vmem>>, %arg4: memref<1x8x64xf32, #tpu.memory_space<vmem>>) attributes {dimension_semantics = [#tpu.dimension_semantics<parallel>], iteration_bounds = array<i64: 2>, scalar_prefetch = 0 : i64, scratch_operands = 0 : i64, tpu.core_type = #tpu.core_type<tc>, window_params = [{transform_indices = @transform_0, window_bounds = array<i64: 1, 6, 6, 64>}, {pipeline_mode = #tpu.pipeline_mode<synchronous>, transform_indices = @transform_1, window_bounds = array<i64: 3, 3, 64, 64>}, {transform_indices = @transform_2, window_bounds = array<i64: 1, 4, 4, 64>}, {transform_indices = @transform_3, window_bounds = array<i64: 1, 8, 64>}]} {
    %c0 = arith.constant 0 : index
    %c0_0 = arith.constant 0 : index
    %c0_1 = arith.constant 0 : index
    %c0_2 = arith.constant 0 : index
    %0 = vector.load %arg2[%c0, %c0_0, %c0_1, %c0_2] : memref<3x3x64x64xbf16, #tpu.memory_space<vmem>>, vector<1x1x64x64xbf16>
    %1 = vector.shape_cast %0 : vector<1x1x64x64xbf16> to vector<64x64xbf16>
    %c0_3 = arith.constant 0 : index
    %c1 = arith.constant 1 : index
    %c0_4 = arith.constant 0 : index
    %c0_5 = arith.constant 0 : index
    %2 = vector.load %arg2[%c0_3, %c1, %c0_4, %c0_5] : memref<3x3x64x64xbf16, #tpu.memory_space<vmem>>, vector<1x1x64x64xbf16>
    %3 = vector.shape_cast %2 : vector<1x1x64x64xbf16> to vector<64x64xbf16>
    %c0_6 = arith.constant 0 : index
    %c2 = arith.constant 2 : index
    %c0_7 = arith.constant 0 : index
    %c0_8 = arith.constant 0 : index
    %4 = vector.load %arg2[%c0_6, %c2, %c0_7, %c0_8] : memref<3x3x64x64xbf16, #tpu.memory_space<vmem>>, vector<1x1x64x64xbf16>
    %5 = vector.shape_cast %4 : vector<1x1x64x64xbf16> to vector<64x64xbf16>
    %c1_9 = arith.constant 1 : index
    %c0_10 = arith.constant 0 : index
    %c0_11 = arith.constant 0 : index
    %c0_12 = arith.constant 0 : index
    %6 = vector.load %arg2[%c1_9, %c0_10, %c0_11, %c0_12] : memref<3x3x64x64xbf16, #tpu.memory_space<vmem>>, vector<1x1x64x64xbf16>
    %7 = vector.shape_cast %6 : vector<1x1x64x64xbf16> to vector<64x64xbf16>
    %c1_13 = arith.constant 1 : index
    %c1_14 = arith.constant 1 : index
    %c0_15 = arith.constant 0 : index
    %c0_16 = arith.constant 0 : index
    %8 = vector.load %arg2[%c1_13, %c1_14, %c0_15, %c0_16] : memref<3x3x64x64xbf16, #tpu.memory_space<vmem>>, vector<1x1x64x64xbf16>
    %9 = vector.shape_cast %8 : vector<1x1x64x64xbf16> to vector<64x64xbf16>
    %c1_17 = arith.constant 1 : index
    %c2_18 = arith.constant 2 : index
    %c0_19 = arith.constant 0 : index
    %c0_20 = arith.constant 0 : index
    %10 = vector.load %arg2[%c1_17, %c2_18, %c0_19, %c0_20] : memref<3x3x64x64xbf16, #tpu.memory_space<vmem>>, vector<1x1x64x64xbf16>
    %11 = vector.shape_cast %10 : vector<1x1x64x64xbf16> to vector<64x64xbf16>
    %c2_21 = arith.constant 2 : index
    %c0_22 = arith.constant 0 : index
    %c0_23 = arith.constant 0 : index
    %c0_24 = arith.constant 0 : index
    %12 = vector.load %arg2[%c2_21, %c0_22, %c0_23, %c0_24] : memref<3x3x64x64xbf16, #tpu.memory_space<vmem>>, vector<1x1x64x64xbf16>
    %13 = vector.shape_cast %12 : vector<1x1x64x64xbf16> to vector<64x64xbf16>
    %c2_25 = arith.constant 2 : index
    %c1_26 = arith.constant 1 : index
    %c0_27 = arith.constant 0 : index
    %c0_28 = arith.constant 0 : index
    %14 = vector.load %arg2[%c2_25, %c1_26, %c0_27, %c0_28] : memref<3x3x64x64xbf16, #tpu.memory_space<vmem>>, vector<1x1x64x64xbf16>
    %15 = vector.shape_cast %14 : vector<1x1x64x64xbf16> to vector<64x64xbf16>
    %c2_29 = arith.constant 2 : index
    %c2_30 = arith.constant 2 : index
    %c0_31 = arith.constant 0 : index
    %c0_32 = arith.constant 0 : index
    %16 = vector.load %arg2[%c2_29, %c2_30, %c0_31, %c0_32] : memref<3x3x64x64xbf16, #tpu.memory_space<vmem>>, vector<1x1x64x64xbf16>
    %17 = vector.shape_cast %16 : vector<1x1x64x64xbf16> to vector<64x64xbf16>
    %cst = arith.constant 0.000000e+00 : f32
    %18 = vector.broadcast %cst : f32 to vector<1x64xf32>
    %cst_33 = arith.constant 0.000000e+00 : f32
    %19 = vector.broadcast %cst_33 : f32 to vector<1x64xf32>
    %cst_34 = arith.constant 0.000000e+00 : f32
    %20 = vector.broadcast %cst_34 : f32 to vector<4x64xf32>
    %c0_35 = arith.constant 0 : index
    %c0_36 = arith.constant 0 : index
    %c0_37 = arith.constant 0 : index
    %c0_38 = arith.constant 0 : index
    %21 = vector.load %arg1[%c0_35, %c0_36, %c0_37, %c0_38] : memref<1x6x6x64xbf16, #tpu.memory_space<vmem>>, vector<1x1x4x64xbf16>
    %22 = vector.shape_cast %21 : vector<1x1x4x64xbf16> to vector<4x64xbf16>
    %cst_39 = arith.constant dense<0.000000e+00> : vector<4x64xf32>
    %23 = tpu.matmul %22, %1, %cst_39 {dimension_numbers = #tpu.dot_dimension_numbers<[1], [0], [0], [1], [0, 0, 1, 1], [], []>} : vector<4x64xbf16>, vector<64x64xbf16>, vector<4x64xf32> -> vector<4x64xf32>
    %24 = arith.addf %20, %23 : vector<4x64xf32>
    %c0_40 = arith.constant 0 : index
    %c0_41 = arith.constant 0 : index
    %c1_42 = arith.constant 1 : index
    %c0_43 = arith.constant 0 : index
    %25 = vector.load %arg1[%c0_40, %c0_41, %c1_42, %c0_43] : memref<1x6x6x64xbf16, #tpu.memory_space<vmem>>, vector<1x1x4x64xbf16>
    %26 = vector.shape_cast %25 : vector<1x1x4x64xbf16> to vector<4x64xbf16>
    %cst_44 = arith.constant dense<0.000000e+00> : vector<4x64xf32>
    %27 = tpu.matmul %26, %3, %cst_44 {dimension_numbers = #tpu.dot_dimension_numbers<[1], [0], [0], [1], [0, 0, 1, 1], [], []>} : vector<4x64xbf16>, vector<64x64xbf16>, vector<4x64xf32> -> vector<4x64xf32>
    %28 = arith.addf %24, %27 : vector<4x64xf32>
    %c0_45 = arith.constant 0 : index
    %c0_46 = arith.constant 0 : index
    %c2_47 = arith.constant 2 : index
    %c0_48 = arith.constant 0 : index
    %29 = vector.load %arg1[%c0_45, %c0_46, %c2_47, %c0_48] : memref<1x6x6x64xbf16, #tpu.memory_space<vmem>>, vector<1x1x4x64xbf16>
    %30 = vector.shape_cast %29 : vector<1x1x4x64xbf16> to vector<4x64xbf16>
    %cst_49 = arith.constant dense<0.000000e+00> : vector<4x64xf32>
    %31 = tpu.matmul %30, %5, %cst_49 {dimension_numbers = #tpu.dot_dimension_numbers<[1], [0], [0], [1], [0, 0, 1, 1], [], []>} : vector<4x64xbf16>, vector<64x64xbf16>, vector<4x64xf32> -> vector<4x64xf32>
    %32 = arith.addf %28, %31 : vector<4x64xf32>
    %c0_50 = arith.constant 0 : index
    %c1_51 = arith.constant 1 : index
    %c0_52 = arith.constant 0 : index
    %c0_53 = arith.constant 0 : index
    %33 = vector.load %arg1[%c0_50, %c1_51, %c0_52, %c0_53] : memref<1x6x6x64xbf16, #tpu.memory_space<vmem>>, vector<1x1x4x64xbf16>
    %34 = vector.shape_cast %33 : vector<1x1x4x64xbf16> to vector<4x64xbf16>
    %cst_54 = arith.constant dense<0.000000e+00> : vector<4x64xf32>
    %35 = tpu.matmul %34, %7, %cst_54 {dimension_numbers = #tpu.dot_dimension_numbers<[1], [0], [0], [1], [0, 0, 1, 1], [], []>} : vector<4x64xbf16>, vector<64x64xbf16>, vector<4x64xf32> -> vector<4x64xf32>
    %36 = arith.addf %32, %35 : vector<4x64xf32>
    %c0_55 = arith.constant 0 : index
    %c1_56 = arith.constant 1 : index
    %c1_57 = arith.constant 1 : index
    %c0_58 = arith.constant 0 : index
    %37 = vector.load %arg1[%c0_55, %c1_56, %c1_57, %c0_58] : memref<1x6x6x64xbf16, #tpu.memory_space<vmem>>, vector<1x1x4x64xbf16>
    %38 = vector.shape_cast %37 : vector<1x1x4x64xbf16> to vector<4x64xbf16>
    %cst_59 = arith.constant dense<0.000000e+00> : vector<4x64xf32>
    %39 = tpu.matmul %38, %9, %cst_59 {dimension_numbers = #tpu.dot_dimension_numbers<[1], [0], [0], [1], [0, 0, 1, 1], [], []>} : vector<4x64xbf16>, vector<64x64xbf16>, vector<4x64xf32> -> vector<4x64xf32>
    %40 = arith.addf %36, %39 : vector<4x64xf32>
    %c0_60 = arith.constant 0 : index
    %c1_61 = arith.constant 1 : index
    %c2_62 = arith.constant 2 : index
    %c0_63 = arith.constant 0 : index
    %41 = vector.load %arg1[%c0_60, %c1_61, %c2_62, %c0_63] : memref<1x6x6x64xbf16, #tpu.memory_space<vmem>>, vector<1x1x4x64xbf16>
    %42 = vector.shape_cast %41 : vector<1x1x4x64xbf16> to vector<4x64xbf16>
    %cst_64 = arith.constant dense<0.000000e+00> : vector<4x64xf32>
    %43 = tpu.matmul %42, %11, %cst_64 {dimension_numbers = #tpu.dot_dimension_numbers<[1], [0], [0], [1], [0, 0, 1, 1], [], []>} : vector<4x64xbf16>, vector<64x64xbf16>, vector<4x64xf32> -> vector<4x64xf32>
    %44 = arith.addf %40, %43 : vector<4x64xf32>
    %c0_65 = arith.constant 0 : index
    %c2_66 = arith.constant 2 : index
    %c0_67 = arith.constant 0 : index
    %c0_68 = arith.constant 0 : index
    %45 = vector.load %arg1[%c0_65, %c2_66, %c0_67, %c0_68] : memref<1x6x6x64xbf16, #tpu.memory_space<vmem>>, vector<1x1x4x64xbf16>
    %46 = vector.shape_cast %45 : vector<1x1x4x64xbf16> to vector<4x64xbf16>
    %cst_69 = arith.constant dense<0.000000e+00> : vector<4x64xf32>
    %47 = tpu.matmul %46, %13, %cst_69 {dimension_numbers = #tpu.dot_dimension_numbers<[1], [0], [0], [1], [0, 0, 1, 1], [], []>} : vector<4x64xbf16>, vector<64x64xbf16>, vector<4x64xf32> -> vector<4x64xf32>
    %48 = arith.addf %44, %47 : vector<4x64xf32>
    %c0_70 = arith.constant 0 : index
    %c2_71 = arith.constant 2 : index
    %c1_72 = arith.constant 1 : index
    %c0_73 = arith.constant 0 : index
    %49 = vector.load %arg1[%c0_70, %c2_71, %c1_72, %c0_73] : memref<1x6x6x64xbf16, #tpu.memory_space<vmem>>, vector<1x1x4x64xbf16>
    %50 = vector.shape_cast %49 : vector<1x1x4x64xbf16> to vector<4x64xbf16>
    %cst_74 = arith.constant dense<0.000000e+00> : vector<4x64xf32>
    %51 = tpu.matmul %50, %15, %cst_74 {dimension_numbers = #tpu.dot_dimension_numbers<[1], [0], [0], [1], [0, 0, 1, 1], [], []>} : vector<4x64xbf16>, vector<64x64xbf16>, vector<4x64xf32> -> vector<4x64xf32>
    %52 = arith.addf %48, %51 : vector<4x64xf32>
    %c0_75 = arith.constant 0 : index
    %c2_76 = arith.constant 2 : index
    %c2_77 = arith.constant 2 : index
    %c0_78 = arith.constant 0 : index
    %53 = vector.load %arg1[%c0_75, %c2_76, %c2_77, %c0_78] : memref<1x6x6x64xbf16, #tpu.memory_space<vmem>>, vector<1x1x4x64xbf16>
    %54 = vector.shape_cast %53 : vector<1x1x4x64xbf16> to vector<4x64xbf16>
    %cst_79 = arith.constant dense<0.000000e+00> : vector<4x64xf32>
    %55 = tpu.matmul %54, %17, %cst_79 {dimension_numbers = #tpu.dot_dimension_numbers<[1], [0], [0], [1], [0, 0, 1, 1], [], []>} : vector<4x64xbf16>, vector<64x64xbf16>, vector<4x64xf32> -> vector<4x64xf32>
    %56 = arith.addf %52, %55 : vector<4x64xf32>
    %c0_80 = arith.constant 0 : index
    %c0_81 = arith.constant 0 : index
    %c0_82 = arith.constant 0 : index
    %c0_83 = arith.constant 0 : index
    %57 = vector.load %arg3[%c0_80, %c0_81, %c0_82, %c0_83] : memref<1x4x4x64xf32, #tpu.memory_space<vmem>>, vector<1x1x4x64xf32>
    %58 = vector.shape_cast %57 : vector<1x1x4x64xf32> to vector<4x64xf32>
    %59 = vector.shape_cast %56 : vector<4x64xf32> to vector<1x1x4x64xf32>
    tpu.vector_store %arg3[%c0_80, %c0_81, %c0_82, %c0_83], %59 {strides = array<i32>} : memref<1x4x4x64xf32, #tpu.memory_space<vmem>>, vector<1x1x4x64xf32>,
    %cst_84 = arith.constant dense<0.000000e+00> : vector<64xf32>
    %60 = vector.multi_reduction <add>, %56, %cst_84 [0] : vector<4x64xf32> to vector<64xf32>
    %61 = vector.shape_cast %60 : vector<64xf32> to vector<1x64xf32>
    %62 = arith.addf %18, %61 : vector<1x64xf32>
    %63 = arith.mulf %56, %56 : vector<4x64xf32>
    %cst_85 = arith.constant dense<0.000000e+00> : vector<64xf32>
    %64 = vector.multi_reduction <add>, %63, %cst_85 [0] : vector<4x64xf32> to vector<64xf32>
    %65 = vector.shape_cast %64 : vector<64xf32> to vector<1x64xf32>
    %66 = arith.addf %19, %65 : vector<1x64xf32>
    %cst_86 = arith.constant 0.000000e+00 : f32
    %67 = vector.broadcast %cst_86 : f32 to vector<4x64xf32>
    %c0_87 = arith.constant 0 : index
    %c1_88 = arith.constant 1 : index
    %c0_89 = arith.constant 0 : index
    %c0_90 = arith.constant 0 : index
    %68 = vector.load %arg1[%c0_87, %c1_88, %c0_89, %c0_90] : memref<1x6x6x64xbf16, #tpu.memory_space<vmem>>, vector<1x1x4x64xbf16>
    %69 = vector.shape_cast %68 : vector<1x1x4x64xbf16> to vector<4x64xbf16>
    %cst_91 = arith.constant dense<0.000000e+00> : vector<4x64xf32>
    %70 = tpu.matmul %69, %1, %cst_91 {dimension_numbers = #tpu.dot_dimension_numbers<[1], [0], [0], [1], [0, 0, 1, 1], [], []>} : vector<4x64xbf16>, vector<64x64xbf16>, vector<4x64xf32> -> vector<4x64xf32>
    %71 = arith.addf %67, %70 : vector<4x64xf32>
    %c0_92 = arith.constant 0 : index
    %c1_93 = arith.constant 1 : index
    %c1_94 = arith.constant 1 : index
    %c0_95 = arith.constant 0 : index
    %72 = vector.load %arg1[%c0_92, %c1_93, %c1_94, %c0_95] : memref<1x6x6x64xbf16, #tpu.memory_space<vmem>>, vector<1x1x4x64xbf16>
    %73 = vector.shape_cast %72 : vector<1x1x4x64xbf16> to vector<4x64xbf16>
    %cst_96 = arith.constant dense<0.000000e+00> : vector<4x64xf32>
    %74 = tpu.matmul %73, %3, %cst_96 {dimension_numbers = #tpu.dot_dimension_numbers<[1], [0], [0], [1], [0, 0, 1, 1], [], []>} : vector<4x64xbf16>, vector<64x64xbf16>, vector<4x64xf32> -> vector<4x64xf32>
    %75 = arith.addf %71, %74 : vector<4x64xf32>
    %c0_97 = arith.constant 0 : index
    %c1_98 = arith.constant 1 : index
    %c2_99 = arith.constant 2 : index
    %c0_100 = arith.constant 0 : index
    %76 = vector.load %arg1[%c0_97, %c1_98, %c2_99, %c0_100] : memref<1x6x6x64xbf16, #tpu.memory_space<vmem>>, vector<1x1x4x64xbf16>
    %77 = vector.shape_cast %76 : vector<1x1x4x64xbf16> to vector<4x64xbf16>
    %cst_101 = arith.constant dense<0.000000e+00> : vector<4x64xf32>
    %78 = tpu.matmul %77, %5, %cst_101 {dimension_numbers = #tpu.dot_dimension_numbers<[1], [0], [0], [1], [0, 0, 1, 1], [], []>} : vector<4x64xbf16>, vector<64x64xbf16>, vector<4x64xf32> -> vector<4x64xf32>
    %79 = arith.addf %75, %78 : vector<4x64xf32>
    %c0_102 = arith.constant 0 : index
    %c2_103 = arith.constant 2 : index
    %c0_104 = arith.constant 0 : index
    %c0_105 = arith.constant 0 : index
    %80 = vector.load %arg1[%c0_102, %c2_103, %c0_104, %c0_105] : memref<1x6x6x64xbf16, #tpu.memory_space<vmem>>, vector<1x1x4x64xbf16>
    %81 = vector.shape_cast %80 : vector<1x1x4x64xbf16> to vector<4x64xbf16>
    %cst_106 = arith.constant dense<0.000000e+00> : vector<4x64xf32>
    %82 = tpu.matmul %81, %7, %cst_106 {dimension_numbers = #tpu.dot_dimension_numbers<[1], [0], [0], [1], [0, 0, 1, 1], [], []>} : vector<4x64xbf16>, vector<64x64xbf16>, vector<4x64xf32> -> vector<4x64xf32>
    %83 = arith.addf %79, %82 : vector<4x64xf32>
    %c0_107 = arith.constant 0 : index
    %c2_108 = arith.constant 2 : index
    %c1_109 = arith.constant 1 : index
    %c0_110 = arith.constant 0 : index
    %84 = vector.load %arg1[%c0_107, %c2_108, %c1_109, %c0_110] : memref<1x6x6x64xbf16, #tpu.memory_space<vmem>>, vector<1x1x4x64xbf16>
    %85 = vector.shape_cast %84 : vector<1x1x4x64xbf16> to vector<4x64xbf16>
    %cst_111 = arith.constant dense<0.000000e+00> : vector<4x64xf32>
    %86 = tpu.matmul %85, %9, %cst_111 {dimension_numbers = #tpu.dot_dimension_numbers<[1], [0], [0], [1], [0, 0, 1, 1], [], []>} : vector<4x64xbf16>, vector<64x64xbf16>, vector<4x64xf32> -> vector<4x64xf32>
    %87 = arith.addf %83, %86 : vector<4x64xf32>
    %c0_112 = arith.constant 0 : index
    %c2_113 = arith.constant 2 : index
    %c2_114 = arith.constant 2 : index
    %c0_115 = arith.constant 0 : index
    %88 = vector.load %arg1[%c0_112, %c2_113, %c2_114, %c0_115] : memref<1x6x6x64xbf16, #tpu.memory_space<vmem>>, vector<1x1x4x64xbf16>
    %89 = vector.shape_cast %88 : vector<1x1x4x64xbf16> to vector<4x64xbf16>
    %cst_116 = arith.constant dense<0.000000e+00> : vector<4x64xf32>
    %90 = tpu.matmul %89, %11, %cst_116 {dimension_numbers = #tpu.dot_dimension_numbers<[1], [0], [0], [1], [0, 0, 1, 1], [], []>} : vector<4x64xbf16>, vector<64x64xbf16>, vector<4x64xf32> -> vector<4x64xf32>
    %91 = arith.addf %87, %90 : vector<4x64xf32>
    %c0_117 = arith.constant 0 : index
    %c3 = arith.constant 3 : index
    %c0_118 = arith.constant 0 : index
    %c0_119 = arith.constant 0 : index
    %92 = vector.load %arg1[%c0_117, %c3, %c0_118, %c0_119] : memref<1x6x6x64xbf16, #tpu.memory_space<vmem>>, vector<1x1x4x64xbf16>
    %93 = vector.shape_cast %92 : vector<1x1x4x64xbf16> to vector<4x64xbf16>
    %cst_120 = arith.constant dense<0.000000e+00> : vector<4x64xf32>
    %94 = tpu.matmul %93, %13, %cst_120 {dimension_numbers = #tpu.dot_dimension_numbers<[1], [0], [0], [1], [0, 0, 1, 1], [], []>} : vector<4x64xbf16>, vector<64x64xbf16>, vector<4x64xf32> -> vector<4x64xf32>
    %95 = arith.addf %91, %94 : vector<4x64xf32>
    %c0_121 = arith.constant 0 : index
    %c3_122 = arith.constant 3 : index
    %c1_123 = arith.constant 1 : index
    %c0_124 = arith.constant 0 : index
    %96 = vector.load %arg1[%c0_121, %c3_122, %c1_123, %c0_124] : memref<1x6x6x64xbf16, #tpu.memory_space<vmem>>, vector<1x1x4x64xbf16>
    %97 = vector.shape_cast %96 : vector<1x1x4x64xbf16> to vector<4x64xbf16>
    %cst_125 = arith.constant dense<0.000000e+00> : vector<4x64xf32>
    %98 = tpu.matmul %97, %15, %cst_125 {dimension_numbers = #tpu.dot_dimension_numbers<[1], [0], [0], [1], [0, 0, 1, 1], [], []>} : vector<4x64xbf16>, vector<64x64xbf16>, vector<4x64xf32> -> vector<4x64xf32>
    %99 = arith.addf %95, %98 : vector<4x64xf32>
    %c0_126 = arith.constant 0 : index
    %c3_127 = arith.constant 3 : index
    %c2_128 = arith.constant 2 : index
    %c0_129 = arith.constant 0 : index
    %100 = vector.load %arg1[%c0_126, %c3_127, %c2_128, %c0_129] : memref<1x6x6x64xbf16, #tpu.memory_space<vmem>>, vector<1x1x4x64xbf16>
    %101 = vector.shape_cast %100 : vector<1x1x4x64xbf16> to vector<4x64xbf16>
    %cst_130 = arith.constant dense<0.000000e+00> : vector<4x64xf32>
    %102 = tpu.matmul %101, %17, %cst_130 {dimension_numbers = #tpu.dot_dimension_numbers<[1], [0], [0], [1], [0, 0, 1, 1], [], []>} : vector<4x64xbf16>, vector<64x64xbf16>, vector<4x64xf32> -> vector<4x64xf32>
    %103 = arith.addf %99, %102 : vector<4x64xf32>
    %c0_131 = arith.constant 0 : index
    %c1_132 = arith.constant 1 : index
    %c0_133 = arith.constant 0 : index
    %c0_134 = arith.constant 0 : index
    %104 = vector.load %arg3[%c0_131, %c1_132, %c0_133, %c0_134] : memref<1x4x4x64xf32, #tpu.memory_space<vmem>>, vector<1x1x4x64xf32>
    %105 = vector.shape_cast %104 : vector<1x1x4x64xf32> to vector<4x64xf32>
    %106 = vector.shape_cast %103 : vector<4x64xf32> to vector<1x1x4x64xf32>
    tpu.vector_store %arg3[%c0_131, %c1_132, %c0_133, %c0_134], %106 {strides = array<i32>} : memref<1x4x4x64xf32, #tpu.memory_space<vmem>>, vector<1x1x4x64xf32>,
    %cst_135 = arith.constant dense<0.000000e+00> : vector<64xf32>
    %107 = vector.multi_reduction <add>, %103, %cst_135 [0] : vector<4x64xf32> to vector<64xf32>
    %108 = vector.shape_cast %107 : vector<64xf32> to vector<1x64xf32>
    %109 = arith.addf %62, %108 : vector<1x64xf32>
    %110 = arith.mulf %103, %103 : vector<4x64xf32>
    %cst_136 = arith.constant dense<0.000000e+00> : vector<64xf32>
    %111 = vector.multi_reduction <add>, %110, %cst_136 [0] : vector<4x64xf32> to vector<64xf32>
    %112 = vector.shape_cast %111 : vector<64xf32> to vector<1x64xf32>
    %113 = arith.addf %66, %112 : vector<1x64xf32>
    %cst_137 = arith.constant 0.000000e+00 : f32
    %114 = vector.broadcast %cst_137 : f32 to vector<4x64xf32>
    %c0_138 = arith.constant 0 : index
    %c2_139 = arith.constant 2 : index
    %c0_140 = arith.constant 0 : index
    %c0_141 = arith.constant 0 : index
    %115 = vector.load %arg1[%c0_138, %c2_139, %c0_140, %c0_141] : memref<1x6x6x64xbf16, #tpu.memory_space<vmem>>, vector<1x1x4x64xbf16>
    %116 = vector.shape_cast %115 : vector<1x1x4x64xbf16> to vector<4x64xbf16>
    %cst_142 = arith.constant dense<0.000000e+00> : vector<4x64xf32>
    %117 = tpu.matmul %116, %1, %cst_142 {dimension_numbers = #tpu.dot_dimension_numbers<[1], [0], [0], [1], [0, 0, 1, 1], [], []>} : vector<4x64xbf16>, vector<64x64xbf16>, vector<4x64xf32> -> vector<4x64xf32>
    %118 = arith.addf %114, %117 : vector<4x64xf32>
    %c0_143 = arith.constant 0 : index
    %c2_144 = arith.constant 2 : index
    %c1_145 = arith.constant 1 : index
    %c0_146 = arith.constant 0 : index
    %119 = vector.load %arg1[%c0_143, %c2_144, %c1_145, %c0_146] : memref<1x6x6x64xbf16, #tpu.memory_space<vmem>>, vector<1x1x4x64xbf16>
    %120 = vector.shape_cast %119 : vector<1x1x4x64xbf16> to vector<4x64xbf16>
    %cst_147 = arith.constant dense<0.000000e+00> : vector<4x64xf32>
    %121 = tpu.matmul %120, %3, %cst_147 {dimension_numbers = #tpu.dot_dimension_numbers<[1], [0], [0], [1], [0, 0, 1, 1], [], []>} : vector<4x64xbf16>, vector<64x64xbf16>, vector<4x64xf32> -> vector<4x64xf32>
    %122 = arith.addf %118, %121 : vector<4x64xf32>
    %c0_148 = arith.constant 0 : index
    %c2_149 = arith.constant 2 : index
    %c2_150 = arith.constant 2 : index
    %c0_151 = arith.constant 0 : index
    %123 = vector.load %arg1[%c0_148, %c2_149, %c2_150, %c0_151] : memref<1x6x6x64xbf16, #tpu.memory_space<vmem>>, vector<1x1x4x64xbf16>
    %124 = vector.shape_cast %123 : vector<1x1x4x64xbf16> to vector<4x64xbf16>
    %cst_152 = arith.constant dense<0.000000e+00> : vector<4x64xf32>
    %125 = tpu.matmul %124, %5, %cst_152 {dimension_numbers = #tpu.dot_dimension_numbers<[1], [0], [0], [1], [0, 0, 1, 1], [], []>} : vector<4x64xbf16>, vector<64x64xbf16>, vector<4x64xf32> -> vector<4x64xf32>
    %126 = arith.addf %122, %125 : vector<4x64xf32>
    %c0_153 = arith.constant 0 : index
    %c3_154 = arith.constant 3 : index
    %c0_155 = arith.constant 0 : index
    %c0_156 = arith.constant 0 : index
    %127 = vector.load %arg1[%c0_153, %c3_154, %c0_155, %c0_156] : memref<1x6x6x64xbf16, #tpu.memory_space<vmem>>, vector<1x1x4x64xbf16>
    %128 = vector.shape_cast %127 : vector<1x1x4x64xbf16> to vector<4x64xbf16>
    %cst_157 = arith.constant dense<0.000000e+00> : vector<4x64xf32>
    %129 = tpu.matmul %128, %7, %cst_157 {dimension_numbers = #tpu.dot_dimension_numbers<[1], [0], [0], [1], [0, 0, 1, 1], [], []>} : vector<4x64xbf16>, vector<64x64xbf16>, vector<4x64xf32> -> vector<4x64xf32>
    %130 = arith.addf %126, %129 : vector<4x64xf32>
    %c0_158 = arith.constant 0 : index
    %c3_159 = arith.constant 3 : index
    %c1_160 = arith.constant 1 : index
    %c0_161 = arith.constant 0 : index
    %131 = vector.load %arg1[%c0_158, %c3_159, %c1_160, %c0_161] : memref<1x6x6x64xbf16, #tpu.memory_space<vmem>>, vector<1x1x4x64xbf16>
    %132 = vector.shape_cast %131 : vector<1x1x4x64xbf16> to vector<4x64xbf16>
    %cst_162 = arith.constant dense<0.000000e+00> : vector<4x64xf32>
    %133 = tpu.matmul %132, %9, %cst_162 {dimension_numbers = #tpu.dot_dimension_numbers<[1], [0], [0], [1], [0, 0, 1, 1], [], []>} : vector<4x64xbf16>, vector<64x64xbf16>, vector<4x64xf32> -> vector<4x64xf32>
    %134 = arith.addf %130, %133 : vector<4x64xf32>
    %c0_163 = arith.constant 0 : index
    %c3_164 = arith.constant 3 : index
    %c2_165 = arith.constant 2 : index
    %c0_166 = arith.constant 0 : index
    %135 = vector.load %arg1[%c0_163, %c3_164, %c2_165, %c0_166] : memref<1x6x6x64xbf16, #tpu.memory_space<vmem>>, vector<1x1x4x64xbf16>
    %136 = vector.shape_cast %135 : vector<1x1x4x64xbf16> to vector<4x64xbf16>
    %cst_167 = arith.constant dense<0.000000e+00> : vector<4x64xf32>
    %137 = tpu.matmul %136, %11, %cst_167 {dimension_numbers = #tpu.dot_dimension_numbers<[1], [0], [0], [1], [0, 0, 1, 1], [], []>} : vector<4x64xbf16>, vector<64x64xbf16>, vector<4x64xf32> -> vector<4x64xf32>
    %138 = arith.addf %134, %137 : vector<4x64xf32>
    %c0_168 = arith.constant 0 : index
    %c4 = arith.constant 4 : index
    %c0_169 = arith.constant 0 : index
    %c0_170 = arith.constant 0 : index
    %139 = vector.load %arg1[%c0_168, %c4, %c0_169, %c0_170] : memref<1x6x6x64xbf16, #tpu.memory_space<vmem>>, vector<1x1x4x64xbf16>
    %140 = vector.shape_cast %139 : vector<1x1x4x64xbf16> to vector<4x64xbf16>
    %cst_171 = arith.constant dense<0.000000e+00> : vector<4x64xf32>
    %141 = tpu.matmul %140, %13, %cst_171 {dimension_numbers = #tpu.dot_dimension_numbers<[1], [0], [0], [1], [0, 0, 1, 1], [], []>} : vector<4x64xbf16>, vector<64x64xbf16>, vector<4x64xf32> -> vector<4x64xf32>
    %142 = arith.addf %138, %141 : vector<4x64xf32>
    %c0_172 = arith.constant 0 : index
    %c4_173 = arith.constant 4 : index
    %c1_174 = arith.constant 1 : index
    %c0_175 = arith.constant 0 : index
    %143 = vector.load %arg1[%c0_172, %c4_173, %c1_174, %c0_175] : memref<1x6x6x64xbf16, #tpu.memory_space<vmem>>, vector<1x1x4x64xbf16>
    %144 = vector.shape_cast %143 : vector<1x1x4x64xbf16> to vector<4x64xbf16>
    %cst_176 = arith.constant dense<0.000000e+00> : vector<4x64xf32>
    %145 = tpu.matmul %144, %15, %cst_176 {dimension_numbers = #tpu.dot_dimension_numbers<[1], [0], [0], [1], [0, 0, 1, 1], [], []>} : vector<4x64xbf16>, vector<64x64xbf16>, vector<4x64xf32> -> vector<4x64xf32>
    %146 = arith.addf %142, %145 : vector<4x64xf32>
    %c0_177 = arith.constant 0 : index
    %c4_178 = arith.constant 4 : index
    %c2_179 = arith.constant 2 : index
    %c0_180 = arith.constant 0 : index
    %147 = vector.load %arg1[%c0_177, %c4_178, %c2_179, %c0_180] : memref<1x6x6x64xbf16, #tpu.memory_space<vmem>>, vector<1x1x4x64xbf16>
    %148 = vector.shape_cast %147 : vector<1x1x4x64xbf16> to vector<4x64xbf16>
    %cst_181 = arith.constant dense<0.000000e+00> : vector<4x64xf32>
    %149 = tpu.matmul %148, %17, %cst_181 {dimension_numbers = #tpu.dot_dimension_numbers<[1], [0], [0], [1], [0, 0, 1, 1], [], []>} : vector<4x64xbf16>, vector<64x64xbf16>, vector<4x64xf32> -> vector<4x64xf32>
    %150 = arith.addf %146, %149 : vector<4x64xf32>
    %c0_182 = arith.constant 0 : index
    %c2_183 = arith.constant 2 : index
    %c0_184 = arith.constant 0 : index
    %c0_185 = arith.constant 0 : index
    %151 = vector.load %arg3[%c0_182, %c2_183, %c0_184, %c0_185] : memref<1x4x4x64xf32, #tpu.memory_space<vmem>>, vector<1x1x4x64xf32>
    %152 = vector.shape_cast %151 : vector<1x1x4x64xf32> to vector<4x64xf32>
    %153 = vector.shape_cast %150 : vector<4x64xf32> to vector<1x1x4x64xf32>
    tpu.vector_store %arg3[%c0_182, %c2_183, %c0_184, %c0_185], %153 {strides = array<i32>} : memref<1x4x4x64xf32, #tpu.memory_space<vmem>>, vector<1x1x4x64xf32>,
    %cst_186 = arith.constant dense<0.000000e+00> : vector<64xf32>
    %154 = vector.multi_reduction <add>, %150, %cst_186 [0] : vector<4x64xf32> to vector<64xf32>
    %155 = vector.shape_cast %154 : vector<64xf32> to vector<1x64xf32>
    %156 = arith.addf %109, %155 : vector<1x64xf32>
    %157 = arith.mulf %150, %150 : vector<4x64xf32>
    %cst_187 = arith.constant dense<0.000000e+00> : vector<64xf32>
    %158 = vector.multi_reduction <add>, %157, %cst_187 [0] : vector<4x64xf32> to vector<64xf32>
    %159 = vector.shape_cast %158 : vector<64xf32> to vector<1x64xf32>
    %160 = arith.addf %113, %159 : vector<1x64xf32>
    %cst_188 = arith.constant 0.000000e+00 : f32
    %161 = vector.broadcast %cst_188 : f32 to vector<4x64xf32>
    %c0_189 = arith.constant 0 : index
    %c3_190 = arith.constant 3 : index
    %c0_191 = arith.constant 0 : index
    %c0_192 = arith.constant 0 : index
    %162 = vector.load %arg1[%c0_189, %c3_190, %c0_191, %c0_192] : memref<1x6x6x64xbf16, #tpu.memory_space<vmem>>, vector<1x1x4x64xbf16>
    %163 = vector.shape_cast %162 : vector<1x1x4x64xbf16> to vector<4x64xbf16>
    %cst_193 = arith.constant dense<0.000000e+00> : vector<4x64xf32>
    %164 = tpu.matmul %163, %1, %cst_193 {dimension_numbers = #tpu.dot_dimension_numbers<[1], [0], [0], [1], [0, 0, 1, 1], [], []>} : vector<4x64xbf16>, vector<64x64xbf16>, vector<4x64xf32> -> vector<4x64xf32>
    %165 = arith.addf %161, %164 : vector<4x64xf32>
    %c0_194 = arith.constant 0 : index
    %c3_195 = arith.constant 3 : index
    %c1_196 = arith.constant 1 : index
    %c0_197 = arith.constant 0 : index
    %166 = vector.load %arg1[%c0_194, %c3_195, %c1_196, %c0_197] : memref<1x6x6x64xbf16, #tpu.memory_space<vmem>>, vector<1x1x4x64xbf16>
    %167 = vector.shape_cast %166 : vector<1x1x4x64xbf16> to vector<4x64xbf16>
    %cst_198 = arith.constant dense<0.000000e+00> : vector<4x64xf32>
    %168 = tpu.matmul %167, %3, %cst_198 {dimension_numbers = #tpu.dot_dimension_numbers<[1], [0], [0], [1], [0, 0, 1, 1], [], []>} : vector<4x64xbf16>, vector<64x64xbf16>, vector<4x64xf32> -> vector<4x64xf32>
    %169 = arith.addf %165, %168 : vector<4x64xf32>
    %c0_199 = arith.constant 0 : index
    %c3_200 = arith.constant 3 : index
    %c2_201 = arith.constant 2 : index
    %c0_202 = arith.constant 0 : index
    %170 = vector.load %arg1[%c0_199, %c3_200, %c2_201, %c0_202] : memref<1x6x6x64xbf16, #tpu.memory_space<vmem>>, vector<1x1x4x64xbf16>
    %171 = vector.shape_cast %170 : vector<1x1x4x64xbf16> to vector<4x64xbf16>
    %cst_203 = arith.constant dense<0.000000e+00> : vector<4x64xf32>
    %172 = tpu.matmul %171, %5, %cst_203 {dimension_numbers = #tpu.dot_dimension_numbers<[1], [0], [0], [1], [0, 0, 1, 1], [], []>} : vector<4x64xbf16>, vector<64x64xbf16>, vector<4x64xf32> -> vector<4x64xf32>
    %173 = arith.addf %169, %172 : vector<4x64xf32>
    %c0_204 = arith.constant 0 : index
    %c4_205 = arith.constant 4 : index
    %c0_206 = arith.constant 0 : index
    %c0_207 = arith.constant 0 : index
    %174 = vector.load %arg1[%c0_204, %c4_205, %c0_206, %c0_207] : memref<1x6x6x64xbf16, #tpu.memory_space<vmem>>, vector<1x1x4x64xbf16>
    %175 = vector.shape_cast %174 : vector<1x1x4x64xbf16> to vector<4x64xbf16>
    %cst_208 = arith.constant dense<0.000000e+00> : vector<4x64xf32>
    %176 = tpu.matmul %175, %7, %cst_208 {dimension_numbers = #tpu.dot_dimension_numbers<[1], [0], [0], [1], [0, 0, 1, 1], [], []>} : vector<4x64xbf16>, vector<64x64xbf16>, vector<4x64xf32> -> vector<4x64xf32>
    %177 = arith.addf %173, %176 : vector<4x64xf32>
    %c0_209 = arith.constant 0 : index
    %c4_210 = arith.constant 4 : index
    %c1_211 = arith.constant 1 : index
    %c0_212 = arith.constant 0 : index
    %178 = vector.load %arg1[%c0_209, %c4_210, %c1_211, %c0_212] : memref<1x6x6x64xbf16, #tpu.memory_space<vmem>>, vector<1x1x4x64xbf16>
    %179 = vector.shape_cast %178 : vector<1x1x4x64xbf16> to vector<4x64xbf16>
    %cst_213 = arith.constant dense<0.000000e+00> : vector<4x64xf32>
    %180 = tpu.matmul %179, %9, %cst_213 {dimension_numbers = #tpu.dot_dimension_numbers<[1], [0], [0], [1], [0, 0, 1, 1], [], []>} : vector<4x64xbf16>, vector<64x64xbf16>, vector<4x64xf32> -> vector<4x64xf32>
    %181 = arith.addf %177, %180 : vector<4x64xf32>
    %c0_214 = arith.constant 0 : index
    %c4_215 = arith.constant 4 : index
    %c2_216 = arith.constant 2 : index
    %c0_217 = arith.constant 0 : index
    %182 = vector.load %arg1[%c0_214, %c4_215, %c2_216, %c0_217] : memref<1x6x6x64xbf16, #tpu.memory_space<vmem>>, vector<1x1x4x64xbf16>
    %183 = vector.shape_cast %182 : vector<1x1x4x64xbf16> to vector<4x64xbf16>
    %cst_218 = arith.constant dense<0.000000e+00> : vector<4x64xf32>
    %184 = tpu.matmul %183, %11, %cst_218 {dimension_numbers = #tpu.dot_dimension_numbers<[1], [0], [0], [1], [0, 0, 1, 1], [], []>} : vector<4x64xbf16>, vector<64x64xbf16>, vector<4x64xf32> -> vector<4x64xf32>
    %185 = arith.addf %181, %184 : vector<4x64xf32>
    %c0_219 = arith.constant 0 : index
    %c5 = arith.constant 5 : index
    %c0_220 = arith.constant 0 : index
    %c0_221 = arith.constant 0 : index
    %186 = vector.load %arg1[%c0_219, %c5, %c0_220, %c0_221] : memref<1x6x6x64xbf16, #tpu.memory_space<vmem>>, vector<1x1x4x64xbf16>
    %187 = vector.shape_cast %186 : vector<1x1x4x64xbf16> to vector<4x64xbf16>
    %cst_222 = arith.constant dense<0.000000e+00> : vector<4x64xf32>
    %188 = tpu.matmul %187, %13, %cst_222 {dimension_numbers = #tpu.dot_dimension_numbers<[1], [0], [0], [1], [0, 0, 1, 1], [], []>} : vector<4x64xbf16>, vector<64x64xbf16>, vector<4x64xf32> -> vector<4x64xf32>
    %189 = arith.addf %185, %188 : vector<4x64xf32>
    %c0_223 = arith.constant 0 : index
    %c5_224 = arith.constant 5 : index
    %c1_225 = arith.constant 1 : index
    %c0_226 = arith.constant 0 : index
    %190 = vector.load %arg1[%c0_223, %c5_224, %c1_225, %c0_226] : memref<1x6x6x64xbf16, #tpu.memory_space<vmem>>, vector<1x1x4x64xbf16>
    %191 = vector.shape_cast %190 : vector<1x1x4x64xbf16> to vector<4x64xbf16>
    %cst_227 = arith.constant dense<0.000000e+00> : vector<4x64xf32>
    %192 = tpu.matmul %191, %15, %cst_227 {dimension_numbers = #tpu.dot_dimension_numbers<[1], [0], [0], [1], [0, 0, 1, 1], [], []>} : vector<4x64xbf16>, vector<64x64xbf16>, vector<4x64xf32> -> vector<4x64xf32>
    %193 = arith.addf %189, %192 : vector<4x64xf32>
    %c0_228 = arith.constant 0 : index
    %c5_229 = arith.constant 5 : index
    %c2_230 = arith.constant 2 : index
    %c0_231 = arith.constant 0 : index
    %194 = vector.load %arg1[%c0_228, %c5_229, %c2_230, %c0_231] : memref<1x6x6x64xbf16, #tpu.memory_space<vmem>>, vector<1x1x4x64xbf16>
    %195 = vector.shape_cast %194 : vector<1x1x4x64xbf16> to vector<4x64xbf16>
    %cst_232 = arith.constant dense<0.000000e+00> : vector<4x64xf32>
    %196 = tpu.matmul %195, %17, %cst_232 {dimension_numbers = #tpu.dot_dimension_numbers<[1], [0], [0], [1], [0, 0, 1, 1], [], []>} : vector<4x64xbf16>, vector<64x64xbf16>, vector<4x64xf32> -> vector<4x64xf32>
    %197 = arith.addf %193, %196 : vector<4x64xf32>
    %c0_233 = arith.constant 0 : index
    %c3_234 = arith.constant 3 : index
    %c0_235 = arith.constant 0 : index
    %c0_236 = arith.constant 0 : index
    %198 = vector.load %arg3[%c0_233, %c3_234, %c0_235, %c0_236] : memref<1x4x4x64xf32, #tpu.memory_space<vmem>>, vector<1x1x4x64xf32>
    %199 = vector.shape_cast %198 : vector<1x1x4x64xf32> to vector<4x64xf32>
    %200 = vector.shape_cast %197 : vector<4x64xf32> to vector<1x1x4x64xf32>
    tpu.vector_store %arg3[%c0_233, %c3_234, %c0_235, %c0_236], %200 {strides = array<i32>} : memref<1x4x4x64xf32, #tpu.memory_space<vmem>>, vector<1x1x4x64xf32>,
    %cst_237 = arith.constant dense<0.000000e+00> : vector<64xf32>
    %201 = vector.multi_reduction <add>, %197, %cst_237 [0] : vector<4x64xf32> to vector<64xf32>
    %202 = vector.shape_cast %201 : vector<64xf32> to vector<1x64xf32>
    %203 = arith.addf %156, %202 : vector<1x64xf32>
    %204 = arith.mulf %197, %197 : vector<4x64xf32>
    %cst_238 = arith.constant dense<0.000000e+00> : vector<64xf32>
    %205 = vector.multi_reduction <add>, %204, %cst_238 [0] : vector<4x64xf32> to vector<64xf32>
    %206 = vector.shape_cast %205 : vector<64xf32> to vector<1x64xf32>
    %207 = arith.addf %160, %206 : vector<1x64xf32>
    %208 = tpu.iota {dimensions = array<i32: 0>} : vector<8x64xi32>
    %cst_239 = arith.constant 0.000000e+00 : f32
    %209 = vector.broadcast %cst_239 : f32 to vector<8x64xf32>
    %c0_i32 = arith.constant 0 : i32
    %210 = vector.broadcast %c0_i32 : i32 to vector<8x64xi32>
    %211 = arith.cmpi eq, %208, %210 : vector<8x64xi32>
    %212 = vector.shape_cast %203 : vector<1x64xf32> to vector<1x64xf32>
    %213 = vector.broadcast %212 : vector<1x64xf32> to vector<8x64xf32>
    %214 = arith.select %211, %213, %209 : vector<8x64xi1>, vector<8x64xf32>
    %c1_i32 = arith.constant 1 : i32
    %215 = vector.broadcast %c1_i32 : i32 to vector<8x64xi32>
    %216 = arith.cmpi eq, %208, %215 : vector<8x64xi32>
    %217 = vector.shape_cast %207 : vector<1x64xf32> to vector<1x64xf32>
    %218 = vector.broadcast %217 : vector<1x64xf32> to vector<8x64xf32>
    %219 = arith.select %216, %218, %214 : vector<8x64xi1>, vector<8x64xf32>
    %c0_240 = arith.constant 0 : index
    %c0_241 = arith.constant 0 : index
    %c0_242 = arith.constant 0 : index
    %220 = vector.load %arg4[%c0_240, %c0_241, %c0_242] : memref<1x8x64xf32, #tpu.memory_space<vmem>>, vector<1x8x64xf32>
    %221 = vector.shape_cast %220 : vector<1x8x64xf32> to vector<8x64xf32>
    %222 = vector.shape_cast %219 : vector<8x64xf32> to vector<1x8x64xf32>
    tpu.vector_store %arg4[%c0_240, %c0_241, %c0_242], %222 {strides = array<i32>} : memref<1x8x64xf32, #tpu.memory_space<vmem>>, vector<1x8x64xf32>,
    return
  }
  func.func @transform_0(%arg0: i32) -> (i32, i32, i32, i32) {
    %c0_i32 = arith.constant 0 : i32
    %c0_i32_0 = arith.constant 0 : i32
    %c0_i32_1 = arith.constant 0 : i32
    %c0_i32_2 = arith.constant 0 : i32
    return %arg0, %c0_i32, %c0_i32_0, %c0_i32_1 : i32, i32, i32, i32
  }
  func.func @transform_1(%arg0: i32) -> (i32, i32, i32, i32) {
    %c0_i32 = arith.constant 0 : i32
    %c0_i32_0 = arith.constant 0 : i32
    %c0_i32_1 = arith.constant 0 : i32
    %c0_i32_2 = arith.constant 0 : i32
    %c0_i32_3 = arith.constant 0 : i32
    return %c0_i32, %c0_i32_0, %c0_i32_1, %c0_i32_2 : i32, i32, i32, i32
  }
  func.func @transform_2(%arg0: i32) -> (i32, i32, i32, i32) {
    %c0_i32 = arith.constant 0 : i32
    %c0_i32_0 = arith.constant 0 : i32
    %c0_i32_1 = arith.constant 0 : i32
    %c0_i32_2 = arith.constant 0 : i32
    return %arg0, %c0_i32, %c0_i32_0, %c0_i32_1 : i32, i32, i32, i32
  }
  func.func @transform_3(%arg0: i32) -> (i32, i32, i32) {
    %c0_i32 = arith.constant 0 : i32
    %c0_i32_0 = arith.constant 0 : i32
    %c0_i32_1 = arith.constant 0 : i32
    return %arg0, %c0_i32, %c0_i32_0 : i32, i32, i32
  }
}

module attributes {stable_mosaic.version = 11 : i64} {
  func.func @_bn_act_kernel(%arg0: i32, %arg1: memref<8x128xf32, #tpu.memory_space<vmem>>, %arg2: memref<1x128xf32, #tpu.memory_space<vmem>>, %arg3: memref<1x128xf32, #tpu.memory_space<vmem>>, %arg4: memref<8x128xbf16, #tpu.memory_space<vmem>>) attributes {dimension_semantics = [#tpu.dimension_semantics<parallel>], iteration_bounds = array<i64: 2>, scalar_prefetch = 0 : i64, scratch_operands = 0 : i64, tpu.core_type = #tpu.core_type<tc>, window_params = [{transform_indices = @transform_0, window_bounds = array<i64: 8, 128>}, {pipeline_mode = #tpu.pipeline_mode<synchronous>, transform_indices = @transform_1, window_bounds = array<i64: 1, 128>}, {pipeline_mode = #tpu.pipeline_mode<synchronous>, transform_indices = @transform_2, window_bounds = array<i64: 1, 128>}, {transform_indices = @transform_3, window_bounds = array<i64: 8, 128>}]} {
    %c0 = arith.constant 0 : index
    %c0_0 = arith.constant 0 : index
    %0 = vector.load %arg1[%c0, %c0_0] : memref<8x128xf32, #tpu.memory_space<vmem>>, vector<8x128xf32>
    %c0_1 = arith.constant 0 : index
    %c0_2 = arith.constant 0 : index
    %1 = vector.load %arg2[%c0_1, %c0_2] : memref<1x128xf32, #tpu.memory_space<vmem>>, vector<1x128xf32>
    %2 = vector.broadcast %1 : vector<1x128xf32> to vector<8x128xf32>
    %3 = arith.mulf %0, %2 : vector<8x128xf32>
    %c0_3 = arith.constant 0 : index
    %c0_4 = arith.constant 0 : index
    %4 = vector.load %arg3[%c0_3, %c0_4] : memref<1x128xf32, #tpu.memory_space<vmem>>, vector<1x128xf32>
    %5 = vector.broadcast %4 : vector<1x128xf32> to vector<8x128xf32>
    %6 = arith.addf %3, %5 : vector<8x128xf32>
    %cst = arith.constant 0.000000e+00 : f32
    %7 = vector.broadcast %cst : f32 to vector<8x128xf32>
    %8 = arith.maximumf %6, %7 : vector<8x128xf32>
    %9 = arith.truncf %8 : vector<8x128xf32> to vector<8x128xbf16>
    %c0_5 = arith.constant 0 : index
    %c0_6 = arith.constant 0 : index
    %10 = vector.load %arg4[%c0_5, %c0_6] : memref<8x128xbf16, #tpu.memory_space<vmem>>, vector<8x128xbf16>
    tpu.vector_store %arg4[%c0_5, %c0_6], %9 {strides = array<i32>} : memref<8x128xbf16, #tpu.memory_space<vmem>>, vector<8x128xbf16>,
    return
  }
  func.func @transform_0(%arg0: i32) -> (i32, i32) {
    %c0_i32 = arith.constant 0 : i32
    %c0_i32_0 = arith.constant 0 : i32
    return %arg0, %c0_i32 : i32, i32
  }
  func.func @transform_1(%arg0: i32) -> (i32, i32) {
    %c0_i32 = arith.constant 0 : i32
    %c0_i32_0 = arith.constant 0 : i32
    %c0_i32_1 = arith.constant 0 : i32
    return %c0_i32, %c0_i32_0 : i32, i32
  }
  func.func @transform_2(%arg0: i32) -> (i32, i32) {
    %c0_i32 = arith.constant 0 : i32
    %c0_i32_0 = arith.constant 0 : i32
    %c0_i32_1 = arith.constant 0 : i32
    return %c0_i32, %c0_i32_0 : i32, i32
  }
  func.func @transform_3(%arg0: i32) -> (i32, i32) {
    %c0_i32 = arith.constant 0 : i32
    %c0_i32_0 = arith.constant 0 : i32
    return %arg0, %c0_i32 : i32, i32
  }
}

module attributes {stable_mosaic.version = 11 : i64} {
  func.func @_bn_add_act_kernel(%arg0: i32, %arg1: memref<8x128xf32, #tpu.memory_space<vmem>>, %arg2: memref<1x128xf32, #tpu.memory_space<vmem>>, %arg3: memref<1x128xf32, #tpu.memory_space<vmem>>, %arg4: memref<8x128xbf16, #tpu.memory_space<vmem>>, %arg5: memref<8x128xbf16, #tpu.memory_space<vmem>>) attributes {dimension_semantics = [#tpu.dimension_semantics<parallel>], iteration_bounds = array<i64: 2>, scalar_prefetch = 0 : i64, scratch_operands = 0 : i64, tpu.core_type = #tpu.core_type<tc>, window_params = [{transform_indices = @transform_0, window_bounds = array<i64: 8, 128>}, {pipeline_mode = #tpu.pipeline_mode<synchronous>, transform_indices = @transform_1, window_bounds = array<i64: 1, 128>}, {pipeline_mode = #tpu.pipeline_mode<synchronous>, transform_indices = @transform_2, window_bounds = array<i64: 1, 128>}, {transform_indices = @transform_3, window_bounds = array<i64: 8, 128>}, {transform_indices = @transform_4, window_bounds = array<i64: 8, 128>}]} {
    %c0 = arith.constant 0 : index
    %c0_0 = arith.constant 0 : index
    %0 = vector.load %arg1[%c0, %c0_0] : memref<8x128xf32, #tpu.memory_space<vmem>>, vector<8x128xf32>
    %c0_1 = arith.constant 0 : index
    %c0_2 = arith.constant 0 : index
    %1 = vector.load %arg2[%c0_1, %c0_2] : memref<1x128xf32, #tpu.memory_space<vmem>>, vector<1x128xf32>
    %2 = vector.broadcast %1 : vector<1x128xf32> to vector<8x128xf32>
    %3 = arith.mulf %0, %2 : vector<8x128xf32>
    %c0_3 = arith.constant 0 : index
    %c0_4 = arith.constant 0 : index
    %4 = vector.load %arg3[%c0_3, %c0_4] : memref<1x128xf32, #tpu.memory_space<vmem>>, vector<1x128xf32>
    %5 = vector.broadcast %4 : vector<1x128xf32> to vector<8x128xf32>
    %6 = arith.addf %3, %5 : vector<8x128xf32>
    %c0_5 = arith.constant 0 : index
    %c0_6 = arith.constant 0 : index
    %7 = vector.load %arg4[%c0_5, %c0_6] : memref<8x128xbf16, #tpu.memory_space<vmem>>, vector<8x128xbf16>
    %8 = arith.extf %7 : vector<8x128xbf16> to vector<8x128xf32>
    %9 = arith.addf %6, %8 : vector<8x128xf32>
    %cst = arith.constant 0.000000e+00 : f32
    %10 = vector.broadcast %cst : f32 to vector<8x128xf32>
    %11 = arith.maximumf %9, %10 : vector<8x128xf32>
    %12 = arith.truncf %11 : vector<8x128xf32> to vector<8x128xbf16>
    %c0_7 = arith.constant 0 : index
    %c0_8 = arith.constant 0 : index
    %13 = vector.load %arg5[%c0_7, %c0_8] : memref<8x128xbf16, #tpu.memory_space<vmem>>, vector<8x128xbf16>
    tpu.vector_store %arg5[%c0_7, %c0_8], %12 {strides = array<i32>} : memref<8x128xbf16, #tpu.memory_space<vmem>>, vector<8x128xbf16>,
    return
  }
  func.func @transform_0(%arg0: i32) -> (i32, i32) {
    %c0_i32 = arith.constant 0 : i32
    %c0_i32_0 = arith.constant 0 : i32
    return %arg0, %c0_i32 : i32, i32
  }
  func.func @transform_1(%arg0: i32) -> (i32, i32) {
    %c0_i32 = arith.constant 0 : i32
    %c0_i32_0 = arith.constant 0 : i32
    %c0_i32_1 = arith.constant 0 : i32
    return %c0_i32, %c0_i32_0 : i32, i32
  }
  func.func @transform_2(%arg0: i32) -> (i32, i32) {
    %c0_i32 = arith.constant 0 : i32
    %c0_i32_0 = arith.constant 0 : i32
    %c0_i32_1 = arith.constant 0 : i32
    return %c0_i32, %c0_i32_0 : i32, i32
  }
  func.func @transform_3(%arg0: i32) -> (i32, i32) {
    %c0_i32 = arith.constant 0 : i32
    %c0_i32_0 = arith.constant 0 : i32
    return %arg0, %c0_i32 : i32, i32
  }
  func.func @transform_4(%arg0: i32) -> (i32, i32) {
    %c0_i32 = arith.constant 0 : i32
    %c0_i32_0 = arith.constant 0 : i32
    return %arg0, %c0_i32 : i32, i32
  }
}

module attributes {stable_mosaic.version = 11 : i64} {
  func.func @_bn_act_kernel(%arg0: i32, %arg1: memref<8x128xf32, #tpu.memory_space<vmem>>, %arg2: memref<1x128xf32, #tpu.memory_space<vmem>>, %arg3: memref<1x128xf32, #tpu.memory_space<vmem>>, %arg4: memref<8x128xbf16, #tpu.memory_space<vmem>>) attributes {dimension_semantics = [#tpu.dimension_semantics<parallel>], iteration_bounds = array<i64: 1>, scalar_prefetch = 0 : i64, scratch_operands = 0 : i64, tpu.core_type = #tpu.core_type<tc>, window_params = [{transform_indices = @transform_0, window_bounds = array<i64: 8, 128>}, {pipeline_mode = #tpu.pipeline_mode<synchronous>, transform_indices = @transform_1, window_bounds = array<i64: 1, 128>}, {pipeline_mode = #tpu.pipeline_mode<synchronous>, transform_indices = @transform_2, window_bounds = array<i64: 1, 128>}, {transform_indices = @transform_3, window_bounds = array<i64: 8, 128>}]} {
    %c0 = arith.constant 0 : index
    %c0_0 = arith.constant 0 : index
    %0 = vector.load %arg1[%c0, %c0_0] : memref<8x128xf32, #tpu.memory_space<vmem>>, vector<8x128xf32>
    %c0_1 = arith.constant 0 : index
    %c0_2 = arith.constant 0 : index
    %1 = vector.load %arg2[%c0_1, %c0_2] : memref<1x128xf32, #tpu.memory_space<vmem>>, vector<1x128xf32>
    %2 = vector.broadcast %1 : vector<1x128xf32> to vector<8x128xf32>
    %3 = arith.mulf %0, %2 : vector<8x128xf32>
    %c0_3 = arith.constant 0 : index
    %c0_4 = arith.constant 0 : index
    %4 = vector.load %arg3[%c0_3, %c0_4] : memref<1x128xf32, #tpu.memory_space<vmem>>, vector<1x128xf32>
    %5 = vector.broadcast %4 : vector<1x128xf32> to vector<8x128xf32>
    %6 = arith.addf %3, %5 : vector<8x128xf32>
    %7 = arith.truncf %6 : vector<8x128xf32> to vector<8x128xbf16>
    %c0_5 = arith.constant 0 : index
    %c0_6 = arith.constant 0 : index
    %8 = vector.load %arg4[%c0_5, %c0_6] : memref<8x128xbf16, #tpu.memory_space<vmem>>, vector<8x128xbf16>
    tpu.vector_store %arg4[%c0_5, %c0_6], %7 {strides = array<i32>} : memref<8x128xbf16, #tpu.memory_space<vmem>>, vector<8x128xbf16>,
    return
  }
  func.func @transform_0(%arg0: i32) -> (i32, i32) {
    %c0_i32 = arith.constant 0 : i32
    %c0_i32_0 = arith.constant 0 : i32
    return %arg0, %c0_i32 : i32, i32
  }
  func.func @transform_1(%arg0: i32) -> (i32, i32) {
    %c0_i32 = arith.constant 0 : i32
    %c0_i32_0 = arith.constant 0 : i32
    %c0_i32_1 = arith.constant 0 : i32
    return %c0_i32, %c0_i32_0 : i32, i32
  }
  func.func @transform_2(%arg0: i32) -> (i32, i32) {
    %c0_i32 = arith.constant 0 : i32
    %c0_i32_0 = arith.constant 0 : i32
    %c0_i32_1 = arith.constant 0 : i32
    return %c0_i32, %c0_i32_0 : i32, i32
  }
  func.func @transform_3(%arg0: i32) -> (i32, i32) {
    %c0_i32 = arith.constant 0 : i32
    %c0_i32_0 = arith.constant 0 : i32
    return %arg0, %c0_i32 : i32, i32
  }
}

module attributes {stable_mosaic.version = 11 : i64} {
  func.func @_matmul_stats_kernel(%arg0: i32, %arg1: memref<8x64xbf16, #tpu.memory_space<vmem>>, %arg2: memref<64x128xbf16, #tpu.memory_space<vmem>>, %arg3: memref<8x128xf32, #tpu.memory_space<vmem>>, %arg4: memref<1x8x128xf32, #tpu.memory_space<vmem>>) attributes {dimension_semantics = [#tpu.dimension_semantics<parallel>], iteration_bounds = array<i64: 1>, scalar_prefetch = 0 : i64, scratch_operands = 0 : i64, tpu.core_type = #tpu.core_type<tc>, window_params = [{transform_indices = @transform_0, window_bounds = array<i64: 8, 64>}, {pipeline_mode = #tpu.pipeline_mode<synchronous>, transform_indices = @transform_1, window_bounds = array<i64: 64, 128>}, {transform_indices = @transform_2, window_bounds = array<i64: 8, 128>}, {transform_indices = @transform_3, window_bounds = array<i64: 1, 8, 128>}]} {
    %c0 = arith.constant 0 : index
    %c0_0 = arith.constant 0 : index
    %0 = vector.load %arg1[%c0, %c0_0] : memref<8x64xbf16, #tpu.memory_space<vmem>>, vector<8x64xbf16>
    %c0_1 = arith.constant 0 : index
    %c0_2 = arith.constant 0 : index
    %1 = vector.load %arg2[%c0_1, %c0_2] : memref<64x128xbf16, #tpu.memory_space<vmem>>, vector<64x128xbf16>
    %cst = arith.constant dense<0.000000e+00> : vector<8x128xf32>
    %2 = tpu.matmul %0, %1, %cst {dimension_numbers = #tpu.dot_dimension_numbers<[1], [0], [0], [1], [0, 0, 1, 1], [], []>} : vector<8x64xbf16>, vector<64x128xbf16>, vector<8x128xf32> -> vector<8x128xf32>
    %c0_3 = arith.constant 0 : index
    %c0_4 = arith.constant 0 : index
    %3 = vector.load %arg3[%c0_3, %c0_4] : memref<8x128xf32, #tpu.memory_space<vmem>>, vector<8x128xf32>
    tpu.vector_store %arg3[%c0_3, %c0_4], %2 {strides = array<i32>} : memref<8x128xf32, #tpu.memory_space<vmem>>, vector<8x128xf32>,
    %cst_5 = arith.constant dense<0.000000e+00> : vector<128xf32>
    %4 = vector.multi_reduction <add>, %2, %cst_5 [0] : vector<8x128xf32> to vector<128xf32>
    %5 = vector.shape_cast %4 : vector<128xf32> to vector<1x128xf32>
    %6 = arith.mulf %2, %2 : vector<8x128xf32>
    %cst_6 = arith.constant dense<0.000000e+00> : vector<128xf32>
    %7 = vector.multi_reduction <add>, %6, %cst_6 [0] : vector<8x128xf32> to vector<128xf32>
    %8 = vector.shape_cast %7 : vector<128xf32> to vector<1x128xf32>
    %9 = tpu.iota {dimensions = array<i32: 0>} : vector<8x128xi32>
    %cst_7 = arith.constant 0.000000e+00 : f32
    %10 = vector.broadcast %cst_7 : f32 to vector<8x128xf32>
    %c0_i32 = arith.constant 0 : i32
    %11 = vector.broadcast %c0_i32 : i32 to vector<8x128xi32>
    %12 = arith.cmpi eq, %9, %11 : vector<8x128xi32>
    %13 = vector.shape_cast %5 : vector<1x128xf32> to vector<1x128xf32>
    %14 = vector.broadcast %13 : vector<1x128xf32> to vector<8x128xf32>
    %15 = arith.select %12, %14, %10 : vector<8x128xi1>, vector<8x128xf32>
    %c1_i32 = arith.constant 1 : i32
    %16 = vector.broadcast %c1_i32 : i32 to vector<8x128xi32>
    %17 = arith.cmpi eq, %9, %16 : vector<8x128xi32>
    %18 = vector.shape_cast %8 : vector<1x128xf32> to vector<1x128xf32>
    %19 = vector.broadcast %18 : vector<1x128xf32> to vector<8x128xf32>
    %20 = arith.select %17, %19, %15 : vector<8x128xi1>, vector<8x128xf32>
    %c0_8 = arith.constant 0 : index
    %c0_9 = arith.constant 0 : index
    %c0_10 = arith.constant 0 : index
    %21 = vector.load %arg4[%c0_8, %c0_9, %c0_10] : memref<1x8x128xf32, #tpu.memory_space<vmem>>, vector<1x8x128xf32>
    %22 = vector.shape_cast %21 : vector<1x8x128xf32> to vector<8x128xf32>
    %23 = vector.shape_cast %20 : vector<8x128xf32> to vector<1x8x128xf32>
    tpu.vector_store %arg4[%c0_8, %c0_9, %c0_10], %23 {strides = array<i32>} : memref<1x8x128xf32, #tpu.memory_space<vmem>>, vector<1x8x128xf32>,
    return
  }
  func.func @transform_0(%arg0: i32) -> (i32, i32) {
    %c0_i32 = arith.constant 0 : i32
    %c0_i32_0 = arith.constant 0 : i32
    return %arg0, %c0_i32 : i32, i32
  }
  func.func @transform_1(%arg0: i32) -> (i32, i32) {
    %c0_i32 = arith.constant 0 : i32
    %c0_i32_0 = arith.constant 0 : i32
    %c0_i32_1 = arith.constant 0 : i32
    return %c0_i32, %c0_i32_0 : i32, i32
  }
  func.func @transform_2(%arg0: i32) -> (i32, i32) {
    %c0_i32 = arith.constant 0 : i32
    %c0_i32_0 = arith.constant 0 : i32
    return %arg0, %c0_i32 : i32, i32
  }
  func.func @transform_3(%arg0: i32) -> (i32, i32, i32) {
    %c0_i32 = arith.constant 0 : i32
    %c0_i32_0 = arith.constant 0 : i32
    %c0_i32_1 = arith.constant 0 : i32
    return %arg0, %c0_i32, %c0_i32_0 : i32, i32, i32
  }
}

module attributes {stable_mosaic.version = 11 : i64} {
  func.func @_conv_direct_kernel(%arg0: i32, %arg1: memref<1x12x3x64xbf16, #tpu.memory_space<vmem>>, %arg2: memref<3x3x64x128xbf16, #tpu.memory_space<vmem>>, %arg3: memref<1x2x2x128xf32, #tpu.memory_space<vmem>>, %arg4: memref<1x8x128xf32, #tpu.memory_space<vmem>>) attributes {dimension_semantics = [#tpu.dimension_semantics<parallel>], iteration_bounds = array<i64: 2>, scalar_prefetch = 0 : i64, scratch_operands = 0 : i64, tpu.core_type = #tpu.core_type<tc>, window_params = [{transform_indices = @transform_0, window_bounds = array<i64: 1, 12, 3, 64>}, {pipeline_mode = #tpu.pipeline_mode<synchronous>, transform_indices = @transform_1, window_bounds = array<i64: 3, 3, 64, 128>}, {transform_indices = @transform_2, window_bounds = array<i64: 1, 2, 2, 128>}, {transform_indices = @transform_3, window_bounds = array<i64: 1, 8, 128>}]} {
    %c0 = arith.constant 0 : index
    %c0_0 = arith.constant 0 : index
    %c0_1 = arith.constant 0 : index
    %c0_2 = arith.constant 0 : index
    %0 = vector.load %arg2[%c0, %c0_0, %c0_1, %c0_2] : memref<3x3x64x128xbf16, #tpu.memory_space<vmem>>, vector<1x1x64x128xbf16>
    %1 = vector.shape_cast %0 : vector<1x1x64x128xbf16> to vector<64x128xbf16>
    %c0_3 = arith.constant 0 : index
    %c1 = arith.constant 1 : index
    %c0_4 = arith.constant 0 : index
    %c0_5 = arith.constant 0 : index
    %2 = vector.load %arg2[%c0_3, %c1, %c0_4, %c0_5] : memref<3x3x64x128xbf16, #tpu.memory_space<vmem>>, vector<1x1x64x128xbf16>
    %3 = vector.shape_cast %2 : vector<1x1x64x128xbf16> to vector<64x128xbf16>
    %c0_6 = arith.constant 0 : index
    %c2 = arith.constant 2 : index
    %c0_7 = arith.constant 0 : index
    %c0_8 = arith.constant 0 : index
    %4 = vector.load %arg2[%c0_6, %c2, %c0_7, %c0_8] : memref<3x3x64x128xbf16, #tpu.memory_space<vmem>>, vector<1x1x64x128xbf16>
    %5 = vector.shape_cast %4 : vector<1x1x64x128xbf16> to vector<64x128xbf16>
    %c1_9 = arith.constant 1 : index
    %c0_10 = arith.constant 0 : index
    %c0_11 = arith.constant 0 : index
    %c0_12 = arith.constant 0 : index
    %6 = vector.load %arg2[%c1_9, %c0_10, %c0_11, %c0_12] : memref<3x3x64x128xbf16, #tpu.memory_space<vmem>>, vector<1x1x64x128xbf16>
    %7 = vector.shape_cast %6 : vector<1x1x64x128xbf16> to vector<64x128xbf16>
    %c1_13 = arith.constant 1 : index
    %c1_14 = arith.constant 1 : index
    %c0_15 = arith.constant 0 : index
    %c0_16 = arith.constant 0 : index
    %8 = vector.load %arg2[%c1_13, %c1_14, %c0_15, %c0_16] : memref<3x3x64x128xbf16, #tpu.memory_space<vmem>>, vector<1x1x64x128xbf16>
    %9 = vector.shape_cast %8 : vector<1x1x64x128xbf16> to vector<64x128xbf16>
    %c1_17 = arith.constant 1 : index
    %c2_18 = arith.constant 2 : index
    %c0_19 = arith.constant 0 : index
    %c0_20 = arith.constant 0 : index
    %10 = vector.load %arg2[%c1_17, %c2_18, %c0_19, %c0_20] : memref<3x3x64x128xbf16, #tpu.memory_space<vmem>>, vector<1x1x64x128xbf16>
    %11 = vector.shape_cast %10 : vector<1x1x64x128xbf16> to vector<64x128xbf16>
    %c2_21 = arith.constant 2 : index
    %c0_22 = arith.constant 0 : index
    %c0_23 = arith.constant 0 : index
    %c0_24 = arith.constant 0 : index
    %12 = vector.load %arg2[%c2_21, %c0_22, %c0_23, %c0_24] : memref<3x3x64x128xbf16, #tpu.memory_space<vmem>>, vector<1x1x64x128xbf16>
    %13 = vector.shape_cast %12 : vector<1x1x64x128xbf16> to vector<64x128xbf16>
    %c2_25 = arith.constant 2 : index
    %c1_26 = arith.constant 1 : index
    %c0_27 = arith.constant 0 : index
    %c0_28 = arith.constant 0 : index
    %14 = vector.load %arg2[%c2_25, %c1_26, %c0_27, %c0_28] : memref<3x3x64x128xbf16, #tpu.memory_space<vmem>>, vector<1x1x64x128xbf16>
    %15 = vector.shape_cast %14 : vector<1x1x64x128xbf16> to vector<64x128xbf16>
    %c2_29 = arith.constant 2 : index
    %c2_30 = arith.constant 2 : index
    %c0_31 = arith.constant 0 : index
    %c0_32 = arith.constant 0 : index
    %16 = vector.load %arg2[%c2_29, %c2_30, %c0_31, %c0_32] : memref<3x3x64x128xbf16, #tpu.memory_space<vmem>>, vector<1x1x64x128xbf16>
    %17 = vector.shape_cast %16 : vector<1x1x64x128xbf16> to vector<64x128xbf16>
    %cst = arith.constant 0.000000e+00 : f32
    %18 = vector.broadcast %cst : f32 to vector<1x128xf32>
    %cst_33 = arith.constant 0.000000e+00 : f32
    %19 = vector.broadcast %cst_33 : f32 to vector<1x128xf32>
    %cst_34 = arith.constant 0.000000e+00 : f32
    %20 = vector.broadcast %cst_34 : f32 to vector<2x128xf32>
    %c0_35 = arith.constant 0 : index
    %c0_36 = arith.constant 0 : index
    %c0_37 = arith.constant 0 : index
    %c0_38 = arith.constant 0 : index
    %21 = vector.load %arg1[%c0_35, %c0_36, %c0_37, %c0_38] : memref<1x12x3x64xbf16, #tpu.memory_space<vmem>>, vector<1x1x2x64xbf16>
    %22 = vector.shape_cast %21 : vector<1x1x2x64xbf16> to vector<2x64xbf16>
    %cst_39 = arith.constant dense<0.000000e+00> : vector<2x128xf32>
    %23 = tpu.matmul %22, %1, %cst_39 {dimension_numbers = #tpu.dot_dimension_numbers<[1], [0], [0], [1], [0, 0, 1, 1], [], []>} : vector<2x64xbf16>, vector<64x128xbf16>, vector<2x128xf32> -> vector<2x128xf32>
    %24 = arith.addf %20, %23 : vector<2x128xf32>
    %c0_40 = arith.constant 0 : index
    %c1_41 = arith.constant 1 : index
    %c0_42 = arith.constant 0 : index
    %c0_43 = arith.constant 0 : index
    %25 = vector.load %arg1[%c0_40, %c1_41, %c0_42, %c0_43] : memref<1x12x3x64xbf16, #tpu.memory_space<vmem>>, vector<1x1x2x64xbf16>
    %26 = vector.shape_cast %25 : vector<1x1x2x64xbf16> to vector<2x64xbf16>
    %cst_44 = arith.constant dense<0.000000e+00> : vector<2x128xf32>
    %27 = tpu.matmul %26, %3, %cst_44 {dimension_numbers = #tpu.dot_dimension_numbers<[1], [0], [0], [1], [0, 0, 1, 1], [], []>} : vector<2x64xbf16>, vector<64x128xbf16>, vector<2x128xf32> -> vector<2x128xf32>
    %28 = arith.addf %24, %27 : vector<2x128xf32>
    %c0_45 = arith.constant 0 : index
    %c0_46 = arith.constant 0 : index
    %c1_47 = arith.constant 1 : index
    %c0_48 = arith.constant 0 : index
    %29 = vector.load %arg1[%c0_45, %c0_46, %c1_47, %c0_48] : memref<1x12x3x64xbf16, #tpu.memory_space<vmem>>, vector<1x1x2x64xbf16>
    %30 = vector.shape_cast %29 : vector<1x1x2x64xbf16> to vector<2x64xbf16>
    %cst_49 = arith.constant dense<0.000000e+00> : vector<2x128xf32>
    %31 = tpu.matmul %30, %5, %cst_49 {dimension_numbers = #tpu.dot_dimension_numbers<[1], [0], [0], [1], [0, 0, 1, 1], [], []>} : vector<2x64xbf16>, vector<64x128xbf16>, vector<2x128xf32> -> vector<2x128xf32>
    %32 = arith.addf %28, %31 : vector<2x128xf32>
    %c0_50 = arith.constant 0 : index
    %c2_51 = arith.constant 2 : index
    %c0_52 = arith.constant 0 : index
    %c0_53 = arith.constant 0 : index
    %33 = vector.load %arg1[%c0_50, %c2_51, %c0_52, %c0_53] : memref<1x12x3x64xbf16, #tpu.memory_space<vmem>>, vector<1x1x2x64xbf16>
    %34 = vector.shape_cast %33 : vector<1x1x2x64xbf16> to vector<2x64xbf16>
    %cst_54 = arith.constant dense<0.000000e+00> : vector<2x128xf32>
    %35 = tpu.matmul %34, %7, %cst_54 {dimension_numbers = #tpu.dot_dimension_numbers<[1], [0], [0], [1], [0, 0, 1, 1], [], []>} : vector<2x64xbf16>, vector<64x128xbf16>, vector<2x128xf32> -> vector<2x128xf32>
    %36 = arith.addf %32, %35 : vector<2x128xf32>
    %c0_55 = arith.constant 0 : index
    %c3 = arith.constant 3 : index
    %c0_56 = arith.constant 0 : index
    %c0_57 = arith.constant 0 : index
    %37 = vector.load %arg1[%c0_55, %c3, %c0_56, %c0_57] : memref<1x12x3x64xbf16, #tpu.memory_space<vmem>>, vector<1x1x2x64xbf16>
    %38 = vector.shape_cast %37 : vector<1x1x2x64xbf16> to vector<2x64xbf16>
    %cst_58 = arith.constant dense<0.000000e+00> : vector<2x128xf32>
    %39 = tpu.matmul %38, %9, %cst_58 {dimension_numbers = #tpu.dot_dimension_numbers<[1], [0], [0], [1], [0, 0, 1, 1], [], []>} : vector<2x64xbf16>, vector<64x128xbf16>, vector<2x128xf32> -> vector<2x128xf32>
    %40 = arith.addf %36, %39 : vector<2x128xf32>
    %c0_59 = arith.constant 0 : index
    %c2_60 = arith.constant 2 : index
    %c1_61 = arith.constant 1 : index
    %c0_62 = arith.constant 0 : index
    %41 = vector.load %arg1[%c0_59, %c2_60, %c1_61, %c0_62] : memref<1x12x3x64xbf16, #tpu.memory_space<vmem>>, vector<1x1x2x64xbf16>
    %42 = vector.shape_cast %41 : vector<1x1x2x64xbf16> to vector<2x64xbf16>
    %cst_63 = arith.constant dense<0.000000e+00> : vector<2x128xf32>
    %43 = tpu.matmul %42, %11, %cst_63 {dimension_numbers = #tpu.dot_dimension_numbers<[1], [0], [0], [1], [0, 0, 1, 1], [], []>} : vector<2x64xbf16>, vector<64x128xbf16>, vector<2x128xf32> -> vector<2x128xf32>
    %44 = arith.addf %40, %43 : vector<2x128xf32>
    %c0_64 = arith.constant 0 : index
    %c4 = arith.constant 4 : index
    %c0_65 = arith.constant 0 : index
    %c0_66 = arith.constant 0 : index
    %45 = vector.load %arg1[%c0_64, %c4, %c0_65, %c0_66] : memref<1x12x3x64xbf16, #tpu.memory_space<vmem>>, vector<1x1x2x64xbf16>
    %46 = vector.shape_cast %45 : vector<1x1x2x64xbf16> to vector<2x64xbf16>
    %cst_67 = arith.constant dense<0.000000e+00> : vector<2x128xf32>
    %47 = tpu.matmul %46, %13, %cst_67 {dimension_numbers = #tpu.dot_dimension_numbers<[1], [0], [0], [1], [0, 0, 1, 1], [], []>} : vector<2x64xbf16>, vector<64x128xbf16>, vector<2x128xf32> -> vector<2x128xf32>
    %48 = arith.addf %44, %47 : vector<2x128xf32>
    %c0_68 = arith.constant 0 : index
    %c5 = arith.constant 5 : index
    %c0_69 = arith.constant 0 : index
    %c0_70 = arith.constant 0 : index
    %49 = vector.load %arg1[%c0_68, %c5, %c0_69, %c0_70] : memref<1x12x3x64xbf16, #tpu.memory_space<vmem>>, vector<1x1x2x64xbf16>
    %50 = vector.shape_cast %49 : vector<1x1x2x64xbf16> to vector<2x64xbf16>
    %cst_71 = arith.constant dense<0.000000e+00> : vector<2x128xf32>
    %51 = tpu.matmul %50, %15, %cst_71 {dimension_numbers = #tpu.dot_dimension_numbers<[1], [0], [0], [1], [0, 0, 1, 1], [], []>} : vector<2x64xbf16>, vector<64x128xbf16>, vector<2x128xf32> -> vector<2x128xf32>
    %52 = arith.addf %48, %51 : vector<2x128xf32>
    %c0_72 = arith.constant 0 : index
    %c4_73 = arith.constant 4 : index
    %c1_74 = arith.constant 1 : index
    %c0_75 = arith.constant 0 : index
    %53 = vector.load %arg1[%c0_72, %c4_73, %c1_74, %c0_75] : memref<1x12x3x64xbf16, #tpu.memory_space<vmem>>, vector<1x1x2x64xbf16>
    %54 = vector.shape_cast %53 : vector<1x1x2x64xbf16> to vector<2x64xbf16>
    %cst_76 = arith.constant dense<0.000000e+00> : vector<2x128xf32>
    %55 = tpu.matmul %54, %17, %cst_76 {dimension_numbers = #tpu.dot_dimension_numbers<[1], [0], [0], [1], [0, 0, 1, 1], [], []>} : vector<2x64xbf16>, vector<64x128xbf16>, vector<2x128xf32> -> vector<2x128xf32>
    %56 = arith.addf %52, %55 : vector<2x128xf32>
    %c0_77 = arith.constant 0 : index
    %c0_78 = arith.constant 0 : index
    %c0_79 = arith.constant 0 : index
    %c0_80 = arith.constant 0 : index
    %57 = vector.load %arg3[%c0_77, %c0_78, %c0_79, %c0_80] : memref<1x2x2x128xf32, #tpu.memory_space<vmem>>, vector<1x1x2x128xf32>
    %58 = vector.shape_cast %57 : vector<1x1x2x128xf32> to vector<2x128xf32>
    %59 = vector.shape_cast %56 : vector<2x128xf32> to vector<1x1x2x128xf32>
    tpu.vector_store %arg3[%c0_77, %c0_78, %c0_79, %c0_80], %59 {strides = array<i32>} : memref<1x2x2x128xf32, #tpu.memory_space<vmem>>, vector<1x1x2x128xf32>,
    %cst_81 = arith.constant dense<0.000000e+00> : vector<128xf32>
    %60 = vector.multi_reduction <add>, %56, %cst_81 [0] : vector<2x128xf32> to vector<128xf32>
    %61 = vector.shape_cast %60 : vector<128xf32> to vector<1x128xf32>
    %62 = arith.addf %18, %61 : vector<1x128xf32>
    %63 = arith.mulf %56, %56 : vector<2x128xf32>
    %cst_82 = arith.constant dense<0.000000e+00> : vector<128xf32>
    %64 = vector.multi_reduction <add>, %63, %cst_82 [0] : vector<2x128xf32> to vector<128xf32>
    %65 = vector.shape_cast %64 : vector<128xf32> to vector<1x128xf32>
    %66 = arith.addf %19, %65 : vector<1x128xf32>
    %cst_83 = arith.constant 0.000000e+00 : f32
    %67 = vector.broadcast %cst_83 : f32 to vector<2x128xf32>
    %c0_84 = arith.constant 0 : index
    %c4_85 = arith.constant 4 : index
    %c0_86 = arith.constant 0 : index
    %c0_87 = arith.constant 0 : index
    %68 = vector.load %arg1[%c0_84, %c4_85, %c0_86, %c0_87] : memref<1x12x3x64xbf16, #tpu.memory_space<vmem>>, vector<1x1x2x64xbf16>
    %69 = vector.shape_cast %68 : vector<1x1x2x64xbf16> to vector<2x64xbf16>
    %cst_88 = arith.constant dense<0.000000e+00> : vector<2x128xf32>
    %70 = tpu.matmul %69, %1, %cst_88 {dimension_numbers = #tpu.dot_dimension_numbers<[1], [0], [0], [1], [0, 0, 1, 1], [], []>} : vector<2x64xbf16>, vector<64x128xbf16>, vector<2x128xf32> -> vector<2x128xf32>
    %71 = arith.addf %67, %70 : vector<2x128xf32>
    %c0_89 = arith.constant 0 : index
    %c5_90 = arith.constant 5 : index
    %c0_91 = arith.constant 0 : index
    %c0_92 = arith.constant 0 : index
    %72 = vector.load %arg1[%c0_89, %c5_90, %c0_91, %c0_92] : memref<1x12x3x64xbf16, #tpu.memory_space<vmem>>, vector<1x1x2x64xbf16>
    %73 = vector.shape_cast %72 : vector<1x1x2x64xbf16> to vector<2x64xbf16>
    %cst_93 = arith.constant dense<0.000000e+00> : vector<2x128xf32>
    %74 = tpu.matmul %73, %3, %cst_93 {dimension_numbers = #tpu.dot_dimension_numbers<[1], [0], [0], [1], [0, 0, 1, 1], [], []>} : vector<2x64xbf16>, vector<64x128xbf16>, vector<2x128xf32> -> vector<2x128xf32>
    %75 = arith.addf %71, %74 : vector<2x128xf32>
    %c0_94 = arith.constant 0 : index
    %c4_95 = arith.constant 4 : index
    %c1_96 = arith.constant 1 : index
    %c0_97 = arith.constant 0 : index
    %76 = vector.load %arg1[%c0_94, %c4_95, %c1_96, %c0_97] : memref<1x12x3x64xbf16, #tpu.memory_space<vmem>>, vector<1x1x2x64xbf16>
    %77 = vector.shape_cast %76 : vector<1x1x2x64xbf16> to vector<2x64xbf16>
    %cst_98 = arith.constant dense<0.000000e+00> : vector<2x128xf32>
    %78 = tpu.matmul %77, %5, %cst_98 {dimension_numbers = #tpu.dot_dimension_numbers<[1], [0], [0], [1], [0, 0, 1, 1], [], []>} : vector<2x64xbf16>, vector<64x128xbf16>, vector<2x128xf32> -> vector<2x128xf32>
    %79 = arith.addf %75, %78 : vector<2x128xf32>
    %c0_99 = arith.constant 0 : index
    %c6 = arith.constant 6 : index
    %c0_100 = arith.constant 0 : index
    %c0_101 = arith.constant 0 : index
    %80 = vector.load %arg1[%c0_99, %c6, %c0_100, %c0_101] : memref<1x12x3x64xbf16, #tpu.memory_space<vmem>>, vector<1x1x2x64xbf16>
    %81 = vector.shape_cast %80 : vector<1x1x2x64xbf16> to vector<2x64xbf16>
    %cst_102 = arith.constant dense<0.000000e+00> : vector<2x128xf32>
    %82 = tpu.matmul %81, %7, %cst_102 {dimension_numbers = #tpu.dot_dimension_numbers<[1], [0], [0], [1], [0, 0, 1, 1], [], []>} : vector<2x64xbf16>, vector<64x128xbf16>, vector<2x128xf32> -> vector<2x128xf32>
    %83 = arith.addf %79, %82 : vector<2x128xf32>
    %c0_103 = arith.constant 0 : index
    %c7 = arith.constant 7 : index
    %c0_104 = arith.constant 0 : index
    %c0_105 = arith.constant 0 : index
    %84 = vector.load %arg1[%c0_103, %c7, %c0_104, %c0_105] : memref<1x12x3x64xbf16, #tpu.memory_space<vmem>>, vector<1x1x2x64xbf16>
    %85 = vector.shape_cast %84 : vector<1x1x2x64xbf16> to vector<2x64xbf16>
    %cst_106 = arith.constant dense<0.000000e+00> : vector<2x128xf32>
    %86 = tpu.matmul %85, %9, %cst_106 {dimension_numbers = #tpu.dot_dimension_numbers<[1], [0], [0], [1], [0, 0, 1, 1], [], []>} : vector<2x64xbf16>, vector<64x128xbf16>, vector<2x128xf32> -> vector<2x128xf32>
    %87 = arith.addf %83, %86 : vector<2x128xf32>
    %c0_107 = arith.constant 0 : index
    %c6_108 = arith.constant 6 : index
    %c1_109 = arith.constant 1 : index
    %c0_110 = arith.constant 0 : index
    %88 = vector.load %arg1[%c0_107, %c6_108, %c1_109, %c0_110] : memref<1x12x3x64xbf16, #tpu.memory_space<vmem>>, vector<1x1x2x64xbf16>
    %89 = vector.shape_cast %88 : vector<1x1x2x64xbf16> to vector<2x64xbf16>
    %cst_111 = arith.constant dense<0.000000e+00> : vector<2x128xf32>
    %90 = tpu.matmul %89, %11, %cst_111 {dimension_numbers = #tpu.dot_dimension_numbers<[1], [0], [0], [1], [0, 0, 1, 1], [], []>} : vector<2x64xbf16>, vector<64x128xbf16>, vector<2x128xf32> -> vector<2x128xf32>
    %91 = arith.addf %87, %90 : vector<2x128xf32>
    %c0_112 = arith.constant 0 : index
    %c8 = arith.constant 8 : index
    %c0_113 = arith.constant 0 : index
    %c0_114 = arith.constant 0 : index
    %92 = vector.load %arg1[%c0_112, %c8, %c0_113, %c0_114] : memref<1x12x3x64xbf16, #tpu.memory_space<vmem>>, vector<1x1x2x64xbf16>
    %93 = vector.shape_cast %92 : vector<1x1x2x64xbf16> to vector<2x64xbf16>
    %cst_115 = arith.constant dense<0.000000e+00> : vector<2x128xf32>
    %94 = tpu.matmul %93, %13, %cst_115 {dimension_numbers = #tpu.dot_dimension_numbers<[1], [0], [0], [1], [0, 0, 1, 1], [], []>} : vector<2x64xbf16>, vector<64x128xbf16>, vector<2x128xf32> -> vector<2x128xf32>
    %95 = arith.addf %91, %94 : vector<2x128xf32>
    %c0_116 = arith.constant 0 : index
    %c9 = arith.constant 9 : index
    %c0_117 = arith.constant 0 : index
    %c0_118 = arith.constant 0 : index
    %96 = vector.load %arg1[%c0_116, %c9, %c0_117, %c0_118] : memref<1x12x3x64xbf16, #tpu.memory_space<vmem>>, vector<1x1x2x64xbf16>
    %97 = vector.shape_cast %96 : vector<1x1x2x64xbf16> to vector<2x64xbf16>
    %cst_119 = arith.constant dense<0.000000e+00> : vector<2x128xf32>
    %98 = tpu.matmul %97, %15, %cst_119 {dimension_numbers = #tpu.dot_dimension_numbers<[1], [0], [0], [1], [0, 0, 1, 1], [], []>} : vector<2x64xbf16>, vector<64x128xbf16>, vector<2x128xf32> -> vector<2x128xf32>
    %99 = arith.addf %95, %98 : vector<2x128xf32>
    %c0_120 = arith.constant 0 : index
    %c8_121 = arith.constant 8 : index
    %c1_122 = arith.constant 1 : index
    %c0_123 = arith.constant 0 : index
    %100 = vector.load %arg1[%c0_120, %c8_121, %c1_122, %c0_123] : memref<1x12x3x64xbf16, #tpu.memory_space<vmem>>, vector<1x1x2x64xbf16>
    %101 = vector.shape_cast %100 : vector<1x1x2x64xbf16> to vector<2x64xbf16>
    %cst_124 = arith.constant dense<0.000000e+00> : vector<2x128xf32>
    %102 = tpu.matmul %101, %17, %cst_124 {dimension_numbers = #tpu.dot_dimension_numbers<[1], [0], [0], [1], [0, 0, 1, 1], [], []>} : vector<2x64xbf16>, vector<64x128xbf16>, vector<2x128xf32> -> vector<2x128xf32>
    %103 = arith.addf %99, %102 : vector<2x128xf32>
    %c0_125 = arith.constant 0 : index
    %c1_126 = arith.constant 1 : index
    %c0_127 = arith.constant 0 : index
    %c0_128 = arith.constant 0 : index
    %104 = vector.load %arg3[%c0_125, %c1_126, %c0_127, %c0_128] : memref<1x2x2x128xf32, #tpu.memory_space<vmem>>, vector<1x1x2x128xf32>
    %105 = vector.shape_cast %104 : vector<1x1x2x128xf32> to vector<2x128xf32>
    %106 = vector.shape_cast %103 : vector<2x128xf32> to vector<1x1x2x128xf32>
    tpu.vector_store %arg3[%c0_125, %c1_126, %c0_127, %c0_128], %106 {strides = array<i32>} : memref<1x2x2x128xf32, #tpu.memory_space<vmem>>, vector<1x1x2x128xf32>,
    %cst_129 = arith.constant dense<0.000000e+00> : vector<128xf32>
    %107 = vector.multi_reduction <add>, %103, %cst_129 [0] : vector<2x128xf32> to vector<128xf32>
    %108 = vector.shape_cast %107 : vector<128xf32> to vector<1x128xf32>
    %109 = arith.addf %62, %108 : vector<1x128xf32>
    %110 = arith.mulf %103, %103 : vector<2x128xf32>
    %cst_130 = arith.constant dense<0.000000e+00> : vector<128xf32>
    %111 = vector.multi_reduction <add>, %110, %cst_130 [0] : vector<2x128xf32> to vector<128xf32>
    %112 = vector.shape_cast %111 : vector<128xf32> to vector<1x128xf32>
    %113 = arith.addf %66, %112 : vector<1x128xf32>
    %114 = tpu.iota {dimensions = array<i32: 0>} : vector<8x128xi32>
    %cst_131 = arith.constant 0.000000e+00 : f32
    %115 = vector.broadcast %cst_131 : f32 to vector<8x128xf32>
    %c0_i32 = arith.constant 0 : i32
    %116 = vector.broadcast %c0_i32 : i32 to vector<8x128xi32>
    %117 = arith.cmpi eq, %114, %116 : vector<8x128xi32>
    %118 = vector.shape_cast %109 : vector<1x128xf32> to vector<1x128xf32>
    %119 = vector.broadcast %118 : vector<1x128xf32> to vector<8x128xf32>
    %120 = arith.select %117, %119, %115 : vector<8x128xi1>, vector<8x128xf32>
    %c1_i32 = arith.constant 1 : i32
    %121 = vector.broadcast %c1_i32 : i32 to vector<8x128xi32>
    %122 = arith.cmpi eq, %114, %121 : vector<8x128xi32>
    %123 = vector.shape_cast %113 : vector<1x128xf32> to vector<1x128xf32>
    %124 = vector.broadcast %123 : vector<1x128xf32> to vector<8x128xf32>
    %125 = arith.select %122, %124, %120 : vector<8x128xi1>, vector<8x128xf32>
    %c0_132 = arith.constant 0 : index
    %c0_133 = arith.constant 0 : index
    %c0_134 = arith.constant 0 : index
    %126 = vector.load %arg4[%c0_132, %c0_133, %c0_134] : memref<1x8x128xf32, #tpu.memory_space<vmem>>, vector<1x8x128xf32>
    %127 = vector.shape_cast %126 : vector<1x8x128xf32> to vector<8x128xf32>
    %128 = vector.shape_cast %125 : vector<8x128xf32> to vector<1x8x128xf32>
    tpu.vector_store %arg4[%c0_132, %c0_133, %c0_134], %128 {strides = array<i32>} : memref<1x8x128xf32, #tpu.memory_space<vmem>>, vector<1x8x128xf32>,
    return
  }
  func.func @transform_0(%arg0: i32) -> (i32, i32, i32, i32) {
    %c0_i32 = arith.constant 0 : i32
    %c0_i32_0 = arith.constant 0 : i32
    %c0_i32_1 = arith.constant 0 : i32
    %c0_i32_2 = arith.constant 0 : i32
    return %arg0, %c0_i32, %c0_i32_0, %c0_i32_1 : i32, i32, i32, i32
  }
  func.func @transform_1(%arg0: i32) -> (i32, i32, i32, i32) {
    %c0_i32 = arith.constant 0 : i32
    %c0_i32_0 = arith.constant 0 : i32
    %c0_i32_1 = arith.constant 0 : i32
    %c0_i32_2 = arith.constant 0 : i32
    %c0_i32_3 = arith.constant 0 : i32
    return %c0_i32, %c0_i32_0, %c0_i32_1, %c0_i32_2 : i32, i32, i32, i32
  }
  func.func @transform_2(%arg0: i32) -> (i32, i32, i32, i32) {
    %c0_i32 = arith.constant 0 : i32
    %c0_i32_0 = arith.constant 0 : i32
    %c0_i32_1 = arith.constant 0 : i32
    %c0_i32_2 = arith.constant 0 : i32
    return %arg0, %c0_i32, %c0_i32_0, %c0_i32_1 : i32, i32, i32, i32
  }
  func.func @transform_3(%arg0: i32) -> (i32, i32, i32) {
    %c0_i32 = arith.constant 0 : i32
    %c0_i32_0 = arith.constant 0 : i32
    %c0_i32_1 = arith.constant 0 : i32
    return %arg0, %c0_i32, %c0_i32_0 : i32, i32, i32
  }
}

module attributes {stable_mosaic.version = 11 : i64} {
  func.func @_bn_act_kernel(%arg0: i32, %arg1: memref<8x128xf32, #tpu.memory_space<vmem>>, %arg2: memref<1x128xf32, #tpu.memory_space<vmem>>, %arg3: memref<1x128xf32, #tpu.memory_space<vmem>>, %arg4: memref<8x128xbf16, #tpu.memory_space<vmem>>) attributes {dimension_semantics = [#tpu.dimension_semantics<parallel>], iteration_bounds = array<i64: 1>, scalar_prefetch = 0 : i64, scratch_operands = 0 : i64, tpu.core_type = #tpu.core_type<tc>, window_params = [{transform_indices = @transform_0, window_bounds = array<i64: 8, 128>}, {pipeline_mode = #tpu.pipeline_mode<synchronous>, transform_indices = @transform_1, window_bounds = array<i64: 1, 128>}, {pipeline_mode = #tpu.pipeline_mode<synchronous>, transform_indices = @transform_2, window_bounds = array<i64: 1, 128>}, {transform_indices = @transform_3, window_bounds = array<i64: 8, 128>}]} {
    %c0 = arith.constant 0 : index
    %c0_0 = arith.constant 0 : index
    %0 = vector.load %arg1[%c0, %c0_0] : memref<8x128xf32, #tpu.memory_space<vmem>>, vector<8x128xf32>
    %c0_1 = arith.constant 0 : index
    %c0_2 = arith.constant 0 : index
    %1 = vector.load %arg2[%c0_1, %c0_2] : memref<1x128xf32, #tpu.memory_space<vmem>>, vector<1x128xf32>
    %2 = vector.broadcast %1 : vector<1x128xf32> to vector<8x128xf32>
    %3 = arith.mulf %0, %2 : vector<8x128xf32>
    %c0_3 = arith.constant 0 : index
    %c0_4 = arith.constant 0 : index
    %4 = vector.load %arg3[%c0_3, %c0_4] : memref<1x128xf32, #tpu.memory_space<vmem>>, vector<1x128xf32>
    %5 = vector.broadcast %4 : vector<1x128xf32> to vector<8x128xf32>
    %6 = arith.addf %3, %5 : vector<8x128xf32>
    %cst = arith.constant 0.000000e+00 : f32
    %7 = vector.broadcast %cst : f32 to vector<8x128xf32>
    %8 = arith.maximumf %6, %7 : vector<8x128xf32>
    %9 = arith.truncf %8 : vector<8x128xf32> to vector<8x128xbf16>
    %c0_5 = arith.constant 0 : index
    %c0_6 = arith.constant 0 : index
    %10 = vector.load %arg4[%c0_5, %c0_6] : memref<8x128xbf16, #tpu.memory_space<vmem>>, vector<8x128xbf16>
    tpu.vector_store %arg4[%c0_5, %c0_6], %9 {strides = array<i32>} : memref<8x128xbf16, #tpu.memory_space<vmem>>, vector<8x128xbf16>,
    return
  }
  func.func @transform_0(%arg0: i32) -> (i32, i32) {
    %c0_i32 = arith.constant 0 : i32
    %c0_i32_0 = arith.constant 0 : i32
    return %arg0, %c0_i32 : i32, i32
  }
  func.func @transform_1(%arg0: i32) -> (i32, i32) {
    %c0_i32 = arith.constant 0 : i32
    %c0_i32_0 = arith.constant 0 : i32
    %c0_i32_1 = arith.constant 0 : i32
    return %c0_i32, %c0_i32_0 : i32, i32
  }
  func.func @transform_2(%arg0: i32) -> (i32, i32) {
    %c0_i32 = arith.constant 0 : i32
    %c0_i32_0 = arith.constant 0 : i32
    %c0_i32_1 = arith.constant 0 : i32
    return %c0_i32, %c0_i32_0 : i32, i32
  }
  func.func @transform_3(%arg0: i32) -> (i32, i32) {
    %c0_i32 = arith.constant 0 : i32
    %c0_i32_0 = arith.constant 0 : i32
    return %arg0, %c0_i32 : i32, i32
  }
}

module attributes {stable_mosaic.version = 11 : i64} {
  func.func @_conv_direct_kernel(%arg0: i32, %arg1: memref<1x4x4x128xbf16, #tpu.memory_space<vmem>>, %arg2: memref<3x3x128x128xbf16, #tpu.memory_space<vmem>>, %arg3: memref<1x2x2x128xf32, #tpu.memory_space<vmem>>, %arg4: memref<1x8x128xf32, #tpu.memory_space<vmem>>) attributes {dimension_semantics = [#tpu.dimension_semantics<parallel>], iteration_bounds = array<i64: 2>, scalar_prefetch = 0 : i64, scratch_operands = 0 : i64, tpu.core_type = #tpu.core_type<tc>, window_params = [{transform_indices = @transform_0, window_bounds = array<i64: 1, 4, 4, 128>}, {pipeline_mode = #tpu.pipeline_mode<synchronous>, transform_indices = @transform_1, window_bounds = array<i64: 3, 3, 128, 128>}, {transform_indices = @transform_2, window_bounds = array<i64: 1, 2, 2, 128>}, {transform_indices = @transform_3, window_bounds = array<i64: 1, 8, 128>}]} {
    %c0 = arith.constant 0 : index
    %c0_0 = arith.constant 0 : index
    %c0_1 = arith.constant 0 : index
    %c0_2 = arith.constant 0 : index
    %0 = vector.load %arg2[%c0, %c0_0, %c0_1, %c0_2] : memref<3x3x128x128xbf16, #tpu.memory_space<vmem>>, vector<1x1x128x128xbf16>
    %1 = vector.shape_cast %0 : vector<1x1x128x128xbf16> to vector<128x128xbf16>
    %c0_3 = arith.constant 0 : index
    %c1 = arith.constant 1 : index
    %c0_4 = arith.constant 0 : index
    %c0_5 = arith.constant 0 : index
    %2 = vector.load %arg2[%c0_3, %c1, %c0_4, %c0_5] : memref<3x3x128x128xbf16, #tpu.memory_space<vmem>>, vector<1x1x128x128xbf16>
    %3 = vector.shape_cast %2 : vector<1x1x128x128xbf16> to vector<128x128xbf16>
    %c0_6 = arith.constant 0 : index
    %c2 = arith.constant 2 : index
    %c0_7 = arith.constant 0 : index
    %c0_8 = arith.constant 0 : index
    %4 = vector.load %arg2[%c0_6, %c2, %c0_7, %c0_8] : memref<3x3x128x128xbf16, #tpu.memory_space<vmem>>, vector<1x1x128x128xbf16>
    %5 = vector.shape_cast %4 : vector<1x1x128x128xbf16> to vector<128x128xbf16>
    %c1_9 = arith.constant 1 : index
    %c0_10 = arith.constant 0 : index
    %c0_11 = arith.constant 0 : index
    %c0_12 = arith.constant 0 : index
    %6 = vector.load %arg2[%c1_9, %c0_10, %c0_11, %c0_12] : memref<3x3x128x128xbf16, #tpu.memory_space<vmem>>, vector<1x1x128x128xbf16>
    %7 = vector.shape_cast %6 : vector<1x1x128x128xbf16> to vector<128x128xbf16>
    %c1_13 = arith.constant 1 : index
    %c1_14 = arith.constant 1 : index
    %c0_15 = arith.constant 0 : index
    %c0_16 = arith.constant 0 : index
    %8 = vector.load %arg2[%c1_13, %c1_14, %c0_15, %c0_16] : memref<3x3x128x128xbf16, #tpu.memory_space<vmem>>, vector<1x1x128x128xbf16>
    %9 = vector.shape_cast %8 : vector<1x1x128x128xbf16> to vector<128x128xbf16>
    %c1_17 = arith.constant 1 : index
    %c2_18 = arith.constant 2 : index
    %c0_19 = arith.constant 0 : index
    %c0_20 = arith.constant 0 : index
    %10 = vector.load %arg2[%c1_17, %c2_18, %c0_19, %c0_20] : memref<3x3x128x128xbf16, #tpu.memory_space<vmem>>, vector<1x1x128x128xbf16>
    %11 = vector.shape_cast %10 : vector<1x1x128x128xbf16> to vector<128x128xbf16>
    %c2_21 = arith.constant 2 : index
    %c0_22 = arith.constant 0 : index
    %c0_23 = arith.constant 0 : index
    %c0_24 = arith.constant 0 : index
    %12 = vector.load %arg2[%c2_21, %c0_22, %c0_23, %c0_24] : memref<3x3x128x128xbf16, #tpu.memory_space<vmem>>, vector<1x1x128x128xbf16>
    %13 = vector.shape_cast %12 : vector<1x1x128x128xbf16> to vector<128x128xbf16>
    %c2_25 = arith.constant 2 : index
    %c1_26 = arith.constant 1 : index
    %c0_27 = arith.constant 0 : index
    %c0_28 = arith.constant 0 : index
    %14 = vector.load %arg2[%c2_25, %c1_26, %c0_27, %c0_28] : memref<3x3x128x128xbf16, #tpu.memory_space<vmem>>, vector<1x1x128x128xbf16>
    %15 = vector.shape_cast %14 : vector<1x1x128x128xbf16> to vector<128x128xbf16>
    %c2_29 = arith.constant 2 : index
    %c2_30 = arith.constant 2 : index
    %c0_31 = arith.constant 0 : index
    %c0_32 = arith.constant 0 : index
    %16 = vector.load %arg2[%c2_29, %c2_30, %c0_31, %c0_32] : memref<3x3x128x128xbf16, #tpu.memory_space<vmem>>, vector<1x1x128x128xbf16>
    %17 = vector.shape_cast %16 : vector<1x1x128x128xbf16> to vector<128x128xbf16>
    %cst = arith.constant 0.000000e+00 : f32
    %18 = vector.broadcast %cst : f32 to vector<1x128xf32>
    %cst_33 = arith.constant 0.000000e+00 : f32
    %19 = vector.broadcast %cst_33 : f32 to vector<1x128xf32>
    %cst_34 = arith.constant 0.000000e+00 : f32
    %20 = vector.broadcast %cst_34 : f32 to vector<2x128xf32>
    %c0_35 = arith.constant 0 : index
    %c0_36 = arith.constant 0 : index
    %c0_37 = arith.constant 0 : index
    %c0_38 = arith.constant 0 : index
    %21 = vector.load %arg1[%c0_35, %c0_36, %c0_37, %c0_38] : memref<1x4x4x128xbf16, #tpu.memory_space<vmem>>, vector<1x1x2x128xbf16>
    %22 = vector.shape_cast %21 : vector<1x1x2x128xbf16> to vector<2x128xbf16>
    %cst_39 = arith.constant dense<0.000000e+00> : vector<2x128xf32>
    %23 = tpu.matmul %22, %1, %cst_39 {dimension_numbers = #tpu.dot_dimension_numbers<[1], [0], [0], [1], [0, 0, 1, 1], [], []>} : vector<2x128xbf16>, vector<128x128xbf16>, vector<2x128xf32> -> vector<2x128xf32>
    %24 = arith.addf %20, %23 : vector<2x128xf32>
    %c0_40 = arith.constant 0 : index
    %c0_41 = arith.constant 0 : index
    %c1_42 = arith.constant 1 : index
    %c0_43 = arith.constant 0 : index
    %25 = vector.load %arg1[%c0_40, %c0_41, %c1_42, %c0_43] : memref<1x4x4x128xbf16, #tpu.memory_space<vmem>>, vector<1x1x2x128xbf16>
    %26 = vector.shape_cast %25 : vector<1x1x2x128xbf16> to vector<2x128xbf16>
    %cst_44 = arith.constant dense<0.000000e+00> : vector<2x128xf32>
    %27 = tpu.matmul %26, %3, %cst_44 {dimension_numbers = #tpu.dot_dimension_numbers<[1], [0], [0], [1], [0, 0, 1, 1], [], []>} : vector<2x128xbf16>, vector<128x128xbf16>, vector<2x128xf32> -> vector<2x128xf32>
    %28 = arith.addf %24, %27 : vector<2x128xf32>
    %c0_45 = arith.constant 0 : index
    %c0_46 = arith.constant 0 : index
    %c2_47 = arith.constant 2 : index
    %c0_48 = arith.constant 0 : index
    %29 = vector.load %arg1[%c0_45, %c0_46, %c2_47, %c0_48] : memref<1x4x4x128xbf16, #tpu.memory_space<vmem>>, vector<1x1x2x128xbf16>
    %30 = vector.shape_cast %29 : vector<1x1x2x128xbf16> to vector<2x128xbf16>
    %cst_49 = arith.constant dense<0.000000e+00> : vector<2x128xf32>
    %31 = tpu.matmul %30, %5, %cst_49 {dimension_numbers = #tpu.dot_dimension_numbers<[1], [0], [0], [1], [0, 0, 1, 1], [], []>} : vector<2x128xbf16>, vector<128x128xbf16>, vector<2x128xf32> -> vector<2x128xf32>
    %32 = arith.addf %28, %31 : vector<2x128xf32>
    %c0_50 = arith.constant 0 : index
    %c1_51 = arith.constant 1 : index
    %c0_52 = arith.constant 0 : index
    %c0_53 = arith.constant 0 : index
    %33 = vector.load %arg1[%c0_50, %c1_51, %c0_52, %c0_53] : memref<1x4x4x128xbf16, #tpu.memory_space<vmem>>, vector<1x1x2x128xbf16>
    %34 = vector.shape_cast %33 : vector<1x1x2x128xbf16> to vector<2x128xbf16>
    %cst_54 = arith.constant dense<0.000000e+00> : vector<2x128xf32>
    %35 = tpu.matmul %34, %7, %cst_54 {dimension_numbers = #tpu.dot_dimension_numbers<[1], [0], [0], [1], [0, 0, 1, 1], [], []>} : vector<2x128xbf16>, vector<128x128xbf16>, vector<2x128xf32> -> vector<2x128xf32>
    %36 = arith.addf %32, %35 : vector<2x128xf32>
    %c0_55 = arith.constant 0 : index
    %c1_56 = arith.constant 1 : index
    %c1_57 = arith.constant 1 : index
    %c0_58 = arith.constant 0 : index
    %37 = vector.load %arg1[%c0_55, %c1_56, %c1_57, %c0_58] : memref<1x4x4x128xbf16, #tpu.memory_space<vmem>>, vector<1x1x2x128xbf16>
    %38 = vector.shape_cast %37 : vector<1x1x2x128xbf16> to vector<2x128xbf16>
    %cst_59 = arith.constant dense<0.000000e+00> : vector<2x128xf32>
    %39 = tpu.matmul %38, %9, %cst_59 {dimension_numbers = #tpu.dot_dimension_numbers<[1], [0], [0], [1], [0, 0, 1, 1], [], []>} : vector<2x128xbf16>, vector<128x128xbf16>, vector<2x128xf32> -> vector<2x128xf32>
    %40 = arith.addf %36, %39 : vector<2x128xf32>
    %c0_60 = arith.constant 0 : index
    %c1_61 = arith.constant 1 : index
    %c2_62 = arith.constant 2 : index
    %c0_63 = arith.constant 0 : index
    %41 = vector.load %arg1[%c0_60, %c1_61, %c2_62, %c0_63] : memref<1x4x4x128xbf16, #tpu.memory_space<vmem>>, vector<1x1x2x128xbf16>
    %42 = vector.shape_cast %41 : vector<1x1x2x128xbf16> to vector<2x128xbf16>
    %cst_64 = arith.constant dense<0.000000e+00> : vector<2x128xf32>
    %43 = tpu.matmul %42, %11, %cst_64 {dimension_numbers = #tpu.dot_dimension_numbers<[1], [0], [0], [1], [0, 0, 1, 1], [], []>} : vector<2x128xbf16>, vector<128x128xbf16>, vector<2x128xf32> -> vector<2x128xf32>
    %44 = arith.addf %40, %43 : vector<2x128xf32>
    %c0_65 = arith.constant 0 : index
    %c2_66 = arith.constant 2 : index
    %c0_67 = arith.constant 0 : index
    %c0_68 = arith.constant 0 : index
    %45 = vector.load %arg1[%c0_65, %c2_66, %c0_67, %c0_68] : memref<1x4x4x128xbf16, #tpu.memory_space<vmem>>, vector<1x1x2x128xbf16>
    %46 = vector.shape_cast %45 : vector<1x1x2x128xbf16> to vector<2x128xbf16>
    %cst_69 = arith.constant dense<0.000000e+00> : vector<2x128xf32>
    %47 = tpu.matmul %46, %13, %cst_69 {dimension_numbers = #tpu.dot_dimension_numbers<[1], [0], [0], [1], [0, 0, 1, 1], [], []>} : vector<2x128xbf16>, vector<128x128xbf16>, vector<2x128xf32> -> vector<2x128xf32>
    %48 = arith.addf %44, %47 : vector<2x128xf32>
    %c0_70 = arith.constant 0 : index
    %c2_71 = arith.constant 2 : index
    %c1_72 = arith.constant 1 : index
    %c0_73 = arith.constant 0 : index
    %49 = vector.load %arg1[%c0_70, %c2_71, %c1_72, %c0_73] : memref<1x4x4x128xbf16, #tpu.memory_space<vmem>>, vector<1x1x2x128xbf16>
    %50 = vector.shape_cast %49 : vector<1x1x2x128xbf16> to vector<2x128xbf16>
    %cst_74 = arith.constant dense<0.000000e+00> : vector<2x128xf32>
    %51 = tpu.matmul %50, %15, %cst_74 {dimension_numbers = #tpu.dot_dimension_numbers<[1], [0], [0], [1], [0, 0, 1, 1], [], []>} : vector<2x128xbf16>, vector<128x128xbf16>, vector<2x128xf32> -> vector<2x128xf32>
    %52 = arith.addf %48, %51 : vector<2x128xf32>
    %c0_75 = arith.constant 0 : index
    %c2_76 = arith.constant 2 : index
    %c2_77 = arith.constant 2 : index
    %c0_78 = arith.constant 0 : index
    %53 = vector.load %arg1[%c0_75, %c2_76, %c2_77, %c0_78] : memref<1x4x4x128xbf16, #tpu.memory_space<vmem>>, vector<1x1x2x128xbf16>
    %54 = vector.shape_cast %53 : vector<1x1x2x128xbf16> to vector<2x128xbf16>
    %cst_79 = arith.constant dense<0.000000e+00> : vector<2x128xf32>
    %55 = tpu.matmul %54, %17, %cst_79 {dimension_numbers = #tpu.dot_dimension_numbers<[1], [0], [0], [1], [0, 0, 1, 1], [], []>} : vector<2x128xbf16>, vector<128x128xbf16>, vector<2x128xf32> -> vector<2x128xf32>
    %56 = arith.addf %52, %55 : vector<2x128xf32>
    %c0_80 = arith.constant 0 : index
    %c0_81 = arith.constant 0 : index
    %c0_82 = arith.constant 0 : index
    %c0_83 = arith.constant 0 : index
    %57 = vector.load %arg3[%c0_80, %c0_81, %c0_82, %c0_83] : memref<1x2x2x128xf32, #tpu.memory_space<vmem>>, vector<1x1x2x128xf32>
    %58 = vector.shape_cast %57 : vector<1x1x2x128xf32> to vector<2x128xf32>
    %59 = vector.shape_cast %56 : vector<2x128xf32> to vector<1x1x2x128xf32>
    tpu.vector_store %arg3[%c0_80, %c0_81, %c0_82, %c0_83], %59 {strides = array<i32>} : memref<1x2x2x128xf32, #tpu.memory_space<vmem>>, vector<1x1x2x128xf32>,
    %cst_84 = arith.constant dense<0.000000e+00> : vector<128xf32>
    %60 = vector.multi_reduction <add>, %56, %cst_84 [0] : vector<2x128xf32> to vector<128xf32>
    %61 = vector.shape_cast %60 : vector<128xf32> to vector<1x128xf32>
    %62 = arith.addf %18, %61 : vector<1x128xf32>
    %63 = arith.mulf %56, %56 : vector<2x128xf32>
    %cst_85 = arith.constant dense<0.000000e+00> : vector<128xf32>
    %64 = vector.multi_reduction <add>, %63, %cst_85 [0] : vector<2x128xf32> to vector<128xf32>
    %65 = vector.shape_cast %64 : vector<128xf32> to vector<1x128xf32>
    %66 = arith.addf %19, %65 : vector<1x128xf32>
    %cst_86 = arith.constant 0.000000e+00 : f32
    %67 = vector.broadcast %cst_86 : f32 to vector<2x128xf32>
    %c0_87 = arith.constant 0 : index
    %c1_88 = arith.constant 1 : index
    %c0_89 = arith.constant 0 : index
    %c0_90 = arith.constant 0 : index
    %68 = vector.load %arg1[%c0_87, %c1_88, %c0_89, %c0_90] : memref<1x4x4x128xbf16, #tpu.memory_space<vmem>>, vector<1x1x2x128xbf16>
    %69 = vector.shape_cast %68 : vector<1x1x2x128xbf16> to vector<2x128xbf16>
    %cst_91 = arith.constant dense<0.000000e+00> : vector<2x128xf32>
    %70 = tpu.matmul %69, %1, %cst_91 {dimension_numbers = #tpu.dot_dimension_numbers<[1], [0], [0], [1], [0, 0, 1, 1], [], []>} : vector<2x128xbf16>, vector<128x128xbf16>, vector<2x128xf32> -> vector<2x128xf32>
    %71 = arith.addf %67, %70 : vector<2x128xf32>
    %c0_92 = arith.constant 0 : index
    %c1_93 = arith.constant 1 : index
    %c1_94 = arith.constant 1 : index
    %c0_95 = arith.constant 0 : index
    %72 = vector.load %arg1[%c0_92, %c1_93, %c1_94, %c0_95] : memref<1x4x4x128xbf16, #tpu.memory_space<vmem>>, vector<1x1x2x128xbf16>
    %73 = vector.shape_cast %72 : vector<1x1x2x128xbf16> to vector<2x128xbf16>
    %cst_96 = arith.constant dense<0.000000e+00> : vector<2x128xf32>
    %74 = tpu.matmul %73, %3, %cst_96 {dimension_numbers = #tpu.dot_dimension_numbers<[1], [0], [0], [1], [0, 0, 1, 1], [], []>} : vector<2x128xbf16>, vector<128x128xbf16>, vector<2x128xf32> -> vector<2x128xf32>
    %75 = arith.addf %71, %74 : vector<2x128xf32>
    %c0_97 = arith.constant 0 : index
    %c1_98 = arith.constant 1 : index
    %c2_99 = arith.constant 2 : index
    %c0_100 = arith.constant 0 : index
    %76 = vector.load %arg1[%c0_97, %c1_98, %c2_99, %c0_100] : memref<1x4x4x128xbf16, #tpu.memory_space<vmem>>, vector<1x1x2x128xbf16>
    %77 = vector.shape_cast %76 : vector<1x1x2x128xbf16> to vector<2x128xbf16>
    %cst_101 = arith.constant dense<0.000000e+00> : vector<2x128xf32>
    %78 = tpu.matmul %77, %5, %cst_101 {dimension_numbers = #tpu.dot_dimension_numbers<[1], [0], [0], [1], [0, 0, 1, 1], [], []>} : vector<2x128xbf16>, vector<128x128xbf16>, vector<2x128xf32> -> vector<2x128xf32>
    %79 = arith.addf %75, %78 : vector<2x128xf32>
    %c0_102 = arith.constant 0 : index
    %c2_103 = arith.constant 2 : index
    %c0_104 = arith.constant 0 : index
    %c0_105 = arith.constant 0 : index
    %80 = vector.load %arg1[%c0_102, %c2_103, %c0_104, %c0_105] : memref<1x4x4x128xbf16, #tpu.memory_space<vmem>>, vector<1x1x2x128xbf16>
    %81 = vector.shape_cast %80 : vector<1x1x2x128xbf16> to vector<2x128xbf16>
    %cst_106 = arith.constant dense<0.000000e+00> : vector<2x128xf32>
    %82 = tpu.matmul %81, %7, %cst_106 {dimension_numbers = #tpu.dot_dimension_numbers<[1], [0], [0], [1], [0, 0, 1, 1], [], []>} : vector<2x128xbf16>, vector<128x128xbf16>, vector<2x128xf32> -> vector<2x128xf32>
    %83 = arith.addf %79, %82 : vector<2x128xf32>
    %c0_107 = arith.constant 0 : index
    %c2_108 = arith.constant 2 : index
    %c1_109 = arith.constant 1 : index
    %c0_110 = arith.constant 0 : index
    %84 = vector.load %arg1[%c0_107, %c2_108, %c1_109, %c0_110] : memref<1x4x4x128xbf16, #tpu.memory_space<vmem>>, vector<1x1x2x128xbf16>
    %85 = vector.shape_cast %84 : vector<1x1x2x128xbf16> to vector<2x128xbf16>
    %cst_111 = arith.constant dense<0.000000e+00> : vector<2x128xf32>
    %86 = tpu.matmul %85, %9, %cst_111 {dimension_numbers = #tpu.dot_dimension_numbers<[1], [0], [0], [1], [0, 0, 1, 1], [], []>} : vector<2x128xbf16>, vector<128x128xbf16>, vector<2x128xf32> -> vector<2x128xf32>
    %87 = arith.addf %83, %86 : vector<2x128xf32>
    %c0_112 = arith.constant 0 : index
    %c2_113 = arith.constant 2 : index
    %c2_114 = arith.constant 2 : index
    %c0_115 = arith.constant 0 : index
    %88 = vector.load %arg1[%c0_112, %c2_113, %c2_114, %c0_115] : memref<1x4x4x128xbf16, #tpu.memory_space<vmem>>, vector<1x1x2x128xbf16>
    %89 = vector.shape_cast %88 : vector<1x1x2x128xbf16> to vector<2x128xbf16>
    %cst_116 = arith.constant dense<0.000000e+00> : vector<2x128xf32>
    %90 = tpu.matmul %89, %11, %cst_116 {dimension_numbers = #tpu.dot_dimension_numbers<[1], [0], [0], [1], [0, 0, 1, 1], [], []>} : vector<2x128xbf16>, vector<128x128xbf16>, vector<2x128xf32> -> vector<2x128xf32>
    %91 = arith.addf %87, %90 : vector<2x128xf32>
    %c0_117 = arith.constant 0 : index
    %c3 = arith.constant 3 : index
    %c0_118 = arith.constant 0 : index
    %c0_119 = arith.constant 0 : index
    %92 = vector.load %arg1[%c0_117, %c3, %c0_118, %c0_119] : memref<1x4x4x128xbf16, #tpu.memory_space<vmem>>, vector<1x1x2x128xbf16>
    %93 = vector.shape_cast %92 : vector<1x1x2x128xbf16> to vector<2x128xbf16>
    %cst_120 = arith.constant dense<0.000000e+00> : vector<2x128xf32>
    %94 = tpu.matmul %93, %13, %cst_120 {dimension_numbers = #tpu.dot_dimension_numbers<[1], [0], [0], [1], [0, 0, 1, 1], [], []>} : vector<2x128xbf16>, vector<128x128xbf16>, vector<2x128xf32> -> vector<2x128xf32>
    %95 = arith.addf %91, %94 : vector<2x128xf32>
    %c0_121 = arith.constant 0 : index
    %c3_122 = arith.constant 3 : index
    %c1_123 = arith.constant 1 : index
    %c0_124 = arith.constant 0 : index
    %96 = vector.load %arg1[%c0_121, %c3_122, %c1_123, %c0_124] : memref<1x4x4x128xbf16, #tpu.memory_space<vmem>>, vector<1x1x2x128xbf16>
    %97 = vector.shape_cast %96 : vector<1x1x2x128xbf16> to vector<2x128xbf16>
    %cst_125 = arith.constant dense<0.000000e+00> : vector<2x128xf32>
    %98 = tpu.matmul %97, %15, %cst_125 {dimension_numbers = #tpu.dot_dimension_numbers<[1], [0], [0], [1], [0, 0, 1, 1], [], []>} : vector<2x128xbf16>, vector<128x128xbf16>, vector<2x128xf32> -> vector<2x128xf32>
    %99 = arith.addf %95, %98 : vector<2x128xf32>
    %c0_126 = arith.constant 0 : index
    %c3_127 = arith.constant 3 : index
    %c2_128 = arith.constant 2 : index
    %c0_129 = arith.constant 0 : index
    %100 = vector.load %arg1[%c0_126, %c3_127, %c2_128, %c0_129] : memref<1x4x4x128xbf16, #tpu.memory_space<vmem>>, vector<1x1x2x128xbf16>
    %101 = vector.shape_cast %100 : vector<1x1x2x128xbf16> to vector<2x128xbf16>
    %cst_130 = arith.constant dense<0.000000e+00> : vector<2x128xf32>
    %102 = tpu.matmul %101, %17, %cst_130 {dimension_numbers = #tpu.dot_dimension_numbers<[1], [0], [0], [1], [0, 0, 1, 1], [], []>} : vector<2x128xbf16>, vector<128x128xbf16>, vector<2x128xf32> -> vector<2x128xf32>
    %103 = arith.addf %99, %102 : vector<2x128xf32>
    %c0_131 = arith.constant 0 : index
    %c1_132 = arith.constant 1 : index
    %c0_133 = arith.constant 0 : index
    %c0_134 = arith.constant 0 : index
    %104 = vector.load %arg3[%c0_131, %c1_132, %c0_133, %c0_134] : memref<1x2x2x128xf32, #tpu.memory_space<vmem>>, vector<1x1x2x128xf32>
    %105 = vector.shape_cast %104 : vector<1x1x2x128xf32> to vector<2x128xf32>
    %106 = vector.shape_cast %103 : vector<2x128xf32> to vector<1x1x2x128xf32>
    tpu.vector_store %arg3[%c0_131, %c1_132, %c0_133, %c0_134], %106 {strides = array<i32>} : memref<1x2x2x128xf32, #tpu.memory_space<vmem>>, vector<1x1x2x128xf32>,
    %cst_135 = arith.constant dense<0.000000e+00> : vector<128xf32>
    %107 = vector.multi_reduction <add>, %103, %cst_135 [0] : vector<2x128xf32> to vector<128xf32>
    %108 = vector.shape_cast %107 : vector<128xf32> to vector<1x128xf32>
    %109 = arith.addf %62, %108 : vector<1x128xf32>
    %110 = arith.mulf %103, %103 : vector<2x128xf32>
    %cst_136 = arith.constant dense<0.000000e+00> : vector<128xf32>
    %111 = vector.multi_reduction <add>, %110, %cst_136 [0] : vector<2x128xf32> to vector<128xf32>
    %112 = vector.shape_cast %111 : vector<128xf32> to vector<1x128xf32>
    %113 = arith.addf %66, %112 : vector<1x128xf32>
    %114 = tpu.iota {dimensions = array<i32: 0>} : vector<8x128xi32>
    %cst_137 = arith.constant 0.000000e+00 : f32
    %115 = vector.broadcast %cst_137 : f32 to vector<8x128xf32>
    %c0_i32 = arith.constant 0 : i32
    %116 = vector.broadcast %c0_i32 : i32 to vector<8x128xi32>
    %117 = arith.cmpi eq, %114, %116 : vector<8x128xi32>
    %118 = vector.shape_cast %109 : vector<1x128xf32> to vector<1x128xf32>
    %119 = vector.broadcast %118 : vector<1x128xf32> to vector<8x128xf32>
    %120 = arith.select %117, %119, %115 : vector<8x128xi1>, vector<8x128xf32>
    %c1_i32 = arith.constant 1 : i32
    %121 = vector.broadcast %c1_i32 : i32 to vector<8x128xi32>
    %122 = arith.cmpi eq, %114, %121 : vector<8x128xi32>
    %123 = vector.shape_cast %113 : vector<1x128xf32> to vector<1x128xf32>
    %124 = vector.broadcast %123 : vector<1x128xf32> to vector<8x128xf32>
    %125 = arith.select %122, %124, %120 : vector<8x128xi1>, vector<8x128xf32>
    %c0_138 = arith.constant 0 : index
    %c0_139 = arith.constant 0 : index
    %c0_140 = arith.constant 0 : index
    %126 = vector.load %arg4[%c0_138, %c0_139, %c0_140] : memref<1x8x128xf32, #tpu.memory_space<vmem>>, vector<1x8x128xf32>
    %127 = vector.shape_cast %126 : vector<1x8x128xf32> to vector<8x128xf32>
    %128 = vector.shape_cast %125 : vector<8x128xf32> to vector<1x8x128xf32>
    tpu.vector_store %arg4[%c0_138, %c0_139, %c0_140], %128 {strides = array<i32>} : memref<1x8x128xf32, #tpu.memory_space<vmem>>, vector<1x8x128xf32>,
    return
  }
  func.func @transform_0(%arg0: i32) -> (i32, i32, i32, i32) {
    %c0_i32 = arith.constant 0 : i32
    %c0_i32_0 = arith.constant 0 : i32
    %c0_i32_1 = arith.constant 0 : i32
    %c0_i32_2 = arith.constant 0 : i32
    return %arg0, %c0_i32, %c0_i32_0, %c0_i32_1 : i32, i32, i32, i32
  }
  func.func @transform_1(%arg0: i32) -> (i32, i32, i32, i32) {
    %c0_i32 = arith.constant 0 : i32
    %c0_i32_0 = arith.constant 0 : i32
    %c0_i32_1 = arith.constant 0 : i32
    %c0_i32_2 = arith.constant 0 : i32
    %c0_i32_3 = arith.constant 0 : i32
    return %c0_i32, %c0_i32_0, %c0_i32_1, %c0_i32_2 : i32, i32, i32, i32
  }
  func.func @transform_2(%arg0: i32) -> (i32, i32, i32, i32) {
    %c0_i32 = arith.constant 0 : i32
    %c0_i32_0 = arith.constant 0 : i32
    %c0_i32_1 = arith.constant 0 : i32
    %c0_i32_2 = arith.constant 0 : i32
    return %arg0, %c0_i32, %c0_i32_0, %c0_i32_1 : i32, i32, i32, i32
  }
  func.func @transform_3(%arg0: i32) -> (i32, i32, i32) {
    %c0_i32 = arith.constant 0 : i32
    %c0_i32_0 = arith.constant 0 : i32
    %c0_i32_1 = arith.constant 0 : i32
    return %arg0, %c0_i32, %c0_i32_0 : i32, i32, i32
  }
}

module attributes {stable_mosaic.version = 11 : i64} {
  func.func @_bn_add_act_kernel(%arg0: i32, %arg1: memref<8x128xf32, #tpu.memory_space<vmem>>, %arg2: memref<1x128xf32, #tpu.memory_space<vmem>>, %arg3: memref<1x128xf32, #tpu.memory_space<vmem>>, %arg4: memref<8x128xbf16, #tpu.memory_space<vmem>>, %arg5: memref<8x128xbf16, #tpu.memory_space<vmem>>) attributes {dimension_semantics = [#tpu.dimension_semantics<parallel>], iteration_bounds = array<i64: 1>, scalar_prefetch = 0 : i64, scratch_operands = 0 : i64, tpu.core_type = #tpu.core_type<tc>, window_params = [{transform_indices = @transform_0, window_bounds = array<i64: 8, 128>}, {pipeline_mode = #tpu.pipeline_mode<synchronous>, transform_indices = @transform_1, window_bounds = array<i64: 1, 128>}, {pipeline_mode = #tpu.pipeline_mode<synchronous>, transform_indices = @transform_2, window_bounds = array<i64: 1, 128>}, {transform_indices = @transform_3, window_bounds = array<i64: 8, 128>}, {transform_indices = @transform_4, window_bounds = array<i64: 8, 128>}]} {
    %c0 = arith.constant 0 : index
    %c0_0 = arith.constant 0 : index
    %0 = vector.load %arg1[%c0, %c0_0] : memref<8x128xf32, #tpu.memory_space<vmem>>, vector<8x128xf32>
    %c0_1 = arith.constant 0 : index
    %c0_2 = arith.constant 0 : index
    %1 = vector.load %arg2[%c0_1, %c0_2] : memref<1x128xf32, #tpu.memory_space<vmem>>, vector<1x128xf32>
    %2 = vector.broadcast %1 : vector<1x128xf32> to vector<8x128xf32>
    %3 = arith.mulf %0, %2 : vector<8x128xf32>
    %c0_3 = arith.constant 0 : index
    %c0_4 = arith.constant 0 : index
    %4 = vector.load %arg3[%c0_3, %c0_4] : memref<1x128xf32, #tpu.memory_space<vmem>>, vector<1x128xf32>
    %5 = vector.broadcast %4 : vector<1x128xf32> to vector<8x128xf32>
    %6 = arith.addf %3, %5 : vector<8x128xf32>
    %c0_5 = arith.constant 0 : index
    %c0_6 = arith.constant 0 : index
    %7 = vector.load %arg4[%c0_5, %c0_6] : memref<8x128xbf16, #tpu.memory_space<vmem>>, vector<8x128xbf16>
    %8 = arith.extf %7 : vector<8x128xbf16> to vector<8x128xf32>
    %9 = arith.addf %6, %8 : vector<8x128xf32>
    %cst = arith.constant 0.000000e+00 : f32
    %10 = vector.broadcast %cst : f32 to vector<8x128xf32>
    %11 = arith.maximumf %9, %10 : vector<8x128xf32>
    %12 = arith.truncf %11 : vector<8x128xf32> to vector<8x128xbf16>
    %c0_7 = arith.constant 0 : index
    %c0_8 = arith.constant 0 : index
    %13 = vector.load %arg5[%c0_7, %c0_8] : memref<8x128xbf16, #tpu.memory_space<vmem>>, vector<8x128xbf16>
    tpu.vector_store %arg5[%c0_7, %c0_8], %12 {strides = array<i32>} : memref<8x128xbf16, #tpu.memory_space<vmem>>, vector<8x128xbf16>,
    return
  }
  func.func @transform_0(%arg0: i32) -> (i32, i32) {
    %c0_i32 = arith.constant 0 : i32
    %c0_i32_0 = arith.constant 0 : i32
    return %arg0, %c0_i32 : i32, i32
  }
  func.func @transform_1(%arg0: i32) -> (i32, i32) {
    %c0_i32 = arith.constant 0 : i32
    %c0_i32_0 = arith.constant 0 : i32
    %c0_i32_1 = arith.constant 0 : i32
    return %c0_i32, %c0_i32_0 : i32, i32
  }
  func.func @transform_2(%arg0: i32) -> (i32, i32) {
    %c0_i32 = arith.constant 0 : i32
    %c0_i32_0 = arith.constant 0 : i32
    %c0_i32_1 = arith.constant 0 : i32
    return %c0_i32, %c0_i32_0 : i32, i32
  }
  func.func @transform_3(%arg0: i32) -> (i32, i32) {
    %c0_i32 = arith.constant 0 : i32
    %c0_i32_0 = arith.constant 0 : i32
    return %arg0, %c0_i32 : i32, i32
  }
  func.func @transform_4(%arg0: i32) -> (i32, i32) {
    %c0_i32 = arith.constant 0 : i32
    %c0_i32_0 = arith.constant 0 : i32
    return %arg0, %c0_i32 : i32, i32
  }
}

</mosaic_0001>

<bundles_post_ra>
// kernel: _lambda_.21
= control target key start
LH: loop header
LB: loop body
LE: loop exit
PB: predicated region body
PF: predicated region fallthrough
CT: control target
= control target key end

     0   :  { %s696_s12 = smov 0   ;;  %s842_s0 = inlined_call_operand.vmem [shape: bf16[128,196], index: 0, kind: input, shape index: {}]   ;;  %s843_s1 = inlined_call_operand.vmem [shape: bf16[196,64], index: 1, kind: input, shape index: {}]   ;;  %s844_s2 = inlined_call_operand.vmem [shape: f32[128,64], index: 2, kind: output, shape index: {0}]   ;;  %s845_s3 = inlined_call_operand.vmem [shape: f32[2,8,64], index: 3, kind: output, shape index: {1}]  }
   0x1 LB: > { %s702_s13 = sadd.s32 4294967295, %s673_s12   ;;  %p572_p0 = scmp.ge.s32.totalorder %s673_s12, 1  ;;  %s673_s12 = sphi %s696_s12, %s14_s12  }
   0x2   : > { %p142_p1 = scmp.lt.s32.totalorder %s673_s12, 3 }
   0x4   : > { %p143_p2 = pnand %p572_p0, %p142_p1 }
   0x5   : > { %s573_s18 = sshll.u32 (!%p143_p2), %s702_s13, 3  ;;  %p184_p4 = scmp.lt.s32.totalorder (!%p143_p2), %s702_s13, 1 }
   0x6   : > { %146 = sbr.rel (%p143_p2) target bundleno = 296 (0x128), region = 28  ;;  %p172_p3 = scmp.lt.s32.totalorder (!%p143_p2), %s573_s18, 15 }
   0xb   : > { %v642_v0 = vld [vmem:[%s843_s1 + $0x38] sm:$0xff]   ;;  %v675_v1 = vmov 0   ;;  %v643_v2 = vld [vmem:[%s843_s1 + $0x30] sm:$0xff]   ;;  %s847_s18 = smov (!%p172_p3, %s573_s18), 15  ;;  %v644_v3 = vld [vmem:[%s843_s1 + $0x28] sm:$0xff]   ;;  %vm333_vm0 = vcmask 556032  }
   0xc   : > { %350 = vmatprep.subr.bf16.mxu0 %v675_v1  ;;  %607 = vmatprep.subr.bf16.mxu1 %v675_v1  ;;  %s606_s21 = sshll.u32 %s847_s18, 3  ;;  %v645_v4 = vld [vmem:[%s843_s1 + $0x20] sm:$0xff]   ;;  %v646_v6 = vld [vmem:[%s843_s1 + $0x18] sm:$0xff]   ;;  %v647_v8 = vld [vmem:[%s843_s1 + $0x10] sm:$0xff]   ;;  %vm346_vm1 = vcmask 1041408   ;;  %vm415_vm2 = vcmask 523264  }
   0xd   : > { %351 = vmatpush1.bf16.msra.mxu0 %v642_v0  ;;  %620 = vmatpush1.bf16.msra.mxu1 %v642_v0  ;;  %s733_s26 = scalar_lea.vmem %s842_s0, %s606_s21  ;;  %v648_v9 = vld [vmem:[%s843_s1 + $0x8] sm:$0xff]   ;;  %v649_v10 = vld [vmem:[%s843_s1] sm:$0xff]   ;;  %v651_v13 = vld [vmem:[%s843_s1 + $0x58] sm:$0xff]   ;;  %s799_s24 = scalar_lea.vmem %s844_s2, %s606_s21 }
   0xe   : > { %352 = vmatprep.subr.bf16.mxu0 %v675_v1  ;;  %608 = vmatprep.subr.bf16.mxu1 %v675_v1  ;;  %v657_v5 = vld [vmem:[%s733_s26 + $0x4] ss:$8 sps:$4 sm:$0xff]   ;;  %v650_v11 = vld [vmem:[%s843_s1 + $0x60] ss:$0 sps:$4 sm:$0x33]   ;;  %v652_v14 = vld [vmem:[%s843_s1 + $0x50] sm:$0xff]  }
   0xf   : > { %v660_v7 = vld [vmem:[%s733_s26 + $0x24] ss:$8 sps:$4 sm:$0xff]   ;;  %600 = vmatprep.mubr.msk.bf16.mxu0 %vm333_vm0, %v657_v5  ;;  %v348_v12 = vsel %vm346_vm1, %v650_v11, 0  ;;  %v655_v17 = vld [vmem:[%s733_s26] ss:$8 sps:$4 sm:$0xff]   ;;  %s849_s13 = smov (!%p184_p4, %s702_s13), 1 }
  0x10   : > { %602 = vmatprep.mubr.msk.bf16.mxu1 %vm333_vm0, %v660_v7  ;;  %v653_v15 = vld [vmem:[%s843_s1 + $0x48] sm:$0xff]   ;;  %v654_v16 = vld [vmem:[%s843_s1 + $0x40] sm:$0xff]   ;;  %v661_v19 = vld [vmem:[%s733_s26 + $0x14] ss:$8 sps:$4 sm:$0xff]   ;;  %s578_s18 = sshll.u32 %s849_s13, 3 }
  0x11   : > { %353 = vmatpush1.bf16.msra.mxu0 %v643_v2  ;;  %621 = vmatpush1.bf16.msra.mxu1 %v643_v2  ;;  %v658_v18 = vld [vmem:[%s733_s26 + $0x20] ss:$8 sps:$4 sm:$0xff]   ;;  %v664_v20 = vld [vmem:[%s733_s26 + $0x34] ss:$8 sps:$4 sm:$0xff]   ;;  %v663_v21 = vld [vmem:[%s733_s26 + $0x10] ss:$8 sps:$4 sm:$0xff]  }
  0x12   : > { %354 = vmatprep.subr.bf16.mxu0 %v675_v1  ;;  %609 = vmatprep.subr.bf16.mxu1 %v675_v1  ;;  %v666_v22 = vld [vmem:[%s733_s26 + $0x30] ss:$8 sps:$4 sm:$0xff]   ;;  %s187_s26 = scalar_lea.vmem %s845_s3, %s578_s18 }
  0x15   : > { %355 = vmatpush1.bf16.msra.mxu0 %v644_v3  ;;  %622 = vmatpush1.bf16.msra.mxu1 %v644_v3 }
  0x16   : > { %356 = vmatprep.subr.bf16.mxu0 %v675_v1  ;;  %610 = vmatprep.subr.bf16.mxu1 %v675_v1 }
  0x19   : > { %357 = vmatpush1.bf16.msra.mxu0 %v645_v4  ;;  %623 = vmatpush1.bf16.msra.mxu1 %v645_v4 }
  0x1a   : > { %358 = vmatprep.subr.bf16.mxu0 %v675_v1  ;;  %611 = vmatprep.subr.bf16.mxu1 %v675_v1 }
  0x1d   : > { %359 = vmatpush1.bf16.msra.mxu0 %v646_v6  ;;  %624 = vmatpush1.bf16.msra.mxu1 %v646_v6 }
  0x1e   : > { %360 = vmatprep.subr.bf16.mxu0 %v675_v1  ;;  %612 = vmatprep.subr.bf16.mxu1 %v675_v1 }
  0x21   : > { %361 = vmatpush1.bf16.msra.mxu0 %v647_v8  ;;  %625 = vmatpush1.bf16.msra.mxu1 %v647_v8 }
  0x22   : > { %362 = vmatprep.subr.bf16.mxu0 %v675_v1  ;;  %613 = vmatprep.subr.bf16.mxu1 %v675_v1 }
  0x25   : > { %363 = vmatpush1.bf16.msra.mxu0 %v648_v9  ;;  %626 = vmatpush1.bf16.msra.mxu1 %v648_v9 }
  0x26   : > { %364 = vmatprep.subr.bf16.mxu0 %v675_v1  ;;  %614 = vmatprep.subr.bf16.mxu1 %v675_v1 }
  0x29   : > { %365 = vmatpush1.bf16.msra.mxu0 %v649_v10  ;;  %627 = vmatpush1.bf16.msra.mxu1 %v649_v10 }
  0x2a   : > { %372 = vmatprep.subr.bf16.mxu0 %v675_v1  ;;  %615 = vmatprep.subr.bf16.mxu1 %v675_v1 }
  0x2d   : > { %373 = vmatpush2.bf16.msra.mxu0 %v348_v12  ;;  %628 = vmatpush2.bf16.msra.mxu1 %v348_v12 }
  0x2e   : > { %374 = vmatprep.subr.bf16.mxu0 %v675_v1  ;;  %616 = vmatprep.subr.bf16.mxu1 %v675_v1 }
  0x31   : > { %375 = vmatpush2.bf16.msra.mxu0 %v651_v13  ;;  %629 = vmatpush2.bf16.msra.mxu1 %v651_v13 }
  0x32   : > { %376 = vmatprep.subr.bf16.mxu0 %v675_v1  ;;  %617 = vmatprep.subr.bf16.mxu1 %v675_v1 }
  0x35   : > { %377 = vmatpush2.bf16.msra.mxu0 %v652_v14  ;;  %630 = vmatpush2.bf16.msra.mxu1 %v652_v14  ;;  %v474_v14 = vlaneseq }
  0x36   : > { %378 = vmatprep.subr.bf16.mxu0 %v675_v1  ;;  %618 = vmatprep.subr.bf16.mxu1 %v675_v1 }
  0x39   : > { %379 = vmatpush2.bf16.msra.mxu0 %v653_v15  ;;  %631 = vmatpush2.bf16.msra.mxu1 %v653_v15 }
  0x3a   : > { %380 = vmatprep.subr.bf16.mxu0 %v675_v1  ;;  %619 = vmatprep.subr.bf16.mxu1 %v675_v1 }
  0x3d   : > { %381 = vmatpush2.bf16.msra.mxu0 %v654_v16  ;;  %632 = vmatpush2.bf16.msra.mxu1 %v654_v16 }
  0x40   : > { %383 = vmatmul.mubr.bf16.vlgmr.msra.gmra.mxu0 %v655_v17  ;;  %399 = vmatmul.mubr.bf16.vlgmr.msra.gmra.mxu1 %v658_v18 }
  0x41   : > { %601 = vmatprep.mubr.msk.bf16.mxu0 %vm333_vm0, %v661_v19  ;;  %603 = vmatprep.mubr.msk.bf16.mxu1 %vm333_vm0, %v664_v20  ;;  %v475_v19 = vshrl.u32 %v474_v14, 7 }
  0x43   : > { %vm476_vm3 = vcmp.eq.s32.totalorder %v475_v19, 0  ;;  %vm478_vm4 = vcmp.eq.s32.totalorder %v475_v19, 1 }
  0x48   : > { %391 = vmatmul.mubr.bf16.gmra.mxu0 %v663_v21  ;;  %407 = vmatmul.mubr.bf16.gmra.mxu1 %v666_v22 }
 0x100   : > { %v384_v23 = vpop.f32.mrf.mxu0  ;;  %v400_v24 = vpop.f32.mrf.mxu1 }
 0x101   : > { %416 = vst.msk [vmem:[%s799_s24] sm:$0xff] %vm415_vm2, %v384_v23  ;;  %420 = vst.msk [vmem:[%s799_s24 + $0x20] sm:$0xff] %vm415_vm2, %v400_v24  ;;  %v445_v32 = vmul.f32 %v384_v23, %v384_v23  ;;  %v424_v36 = vsel %vm415_vm2, %v384_v23, 0.0  ;;  %v449_v49 = vmul.f32 %v400_v24, %v400_v24  ;;  %v431_v56 = vsel %vm415_vm2, %v400_v24, 0.0 }
 0x102   : > { %v386_v25 = vpop.f32.mrf.mxu0  ;;  %v402_v26 = vpop.f32.mrf.mxu1 }
 0x103   : > { %v453_v43 = vsel %vm415_vm2, %v445_v32, 0.0  ;;  %v460_v61 = vsel %vm415_vm2, %v449_v49, 0.0 }
 0x104   : > { %v387_v27 = vpop.f32.mrf.mxu0  ;;  %v403_v28 = vpop.f32.mrf.mxu1 }
 0x105   : > { %417 = vst.msk [vmem:[%s799_s24 + $0x8] sm:$0xff] %vm415_vm2, %v387_v27  ;;  %v446_v29 = vmul.f32 %v387_v27, %v387_v27  ;;  %421 = vst.msk [vmem:[%s799_s24 + $0x28] sm:$0xff] %vm415_vm2, %v403_v28  ;;  %v425_v33 = vsel %vm415_vm2, %v387_v27, 0.0  ;;  %v450_v57 = vmul.f32 %v403_v28, %v403_v28  ;;  %v433_v62 = vsel %vm415_vm2, %v403_v28, 0.0 }
 0x106   : > { %v389_v30 = vpop.f32.mrf.mxu0  ;;  %v405_v31 = vpop.f32.mrf.mxu1  ;;  %v426_v40 = vadd.f32 %v425_v33, %v424_v36 }
 0x107   : > { %v454_v37 = vsel %vm415_vm2, %v446_v29, 0.0  ;;  %v462_v2 = vsel %vm415_vm2, %v450_v57, 0.0 }
 0x108   : > { %v392_v34 = vpop.f32.mrf.mxu0  ;;  %v408_v35 = vpop.f32.mrf.mxu1  ;;  %v455_v45 = vadd.f32 %v454_v37, %v453_v43 }
 0x109   : > { %418 = vst.msk [vmem:[%s799_s24 + $0x10] sm:$0xff] %vm415_vm2, %v392_v34  ;;  %v427_v38 = vsel %vm415_vm2, %v392_v34, 0.0  ;;  %v447_v39 = vmul.f32 %v392_v34, %v392_v34  ;;  %422 = vst.msk [vmem:[%s799_s24 + $0x30] sm:$0xff] %vm415_vm2, %v408_v35  ;;  %v451_v63 = vmul.f32 %v408_v35, %v408_v35  ;;  %v435_v3 = vsel %vm415_vm2, %v408_v35, 0.0 }
 0x10a   : > { %v394_v41 = vpop.f32.mrf.mxu0  ;;  %v410_v42 = vpop.f32.mrf.mxu1  ;;  %v428_v46 = vadd.f32 %v427_v38, %v426_v40 }
 0x10b   : > { %v456_v44 = vsel %vm415_vm2, %v447_v39, 0.0  ;;  %v464_v7 = vsel %vm415_vm2, %v451_v63, 0.0 }
 0x10c   : > { %v395_v47 = vpop.f32.mrf.mxu0  ;;  %v411_v48 = vpop.f32.mrf.mxu1  ;;  %v457_v52 = vadd.f32 %v456_v44, %v455_v45 }
 0x10d   : > { %419 = vst.msk [vmem:[%s799_s24 + $0x18] sm:$0xff] %vm415_vm2, %v395_v47  ;;  %v429_v50 = vsel %vm415_vm2, %v395_v47, 0.0  ;;  %v448_v51 = vmul.f32 %v395_v47, %v395_v47  ;;  %423 = vst.msk [vmem:[%s799_s24 + $0x38] sm:$0xff] %vm415_vm2, %v411_v48  ;;  %v452_v4 = vmul.f32 %v411_v48, %v411_v48  ;;  %v437_v8 = vsel %vm415_vm2, %v411_v48, 0.0 }
 0x10e   : > { %v430_v53 = vadd.f32 %v429_v50, %v428_v46  ;;  %v397_v54 = vpop.f32.mrf.mxu0  ;;  %v413_v55 = vpop.f32.mrf.mxu1 }
 0x10f   : > { %v458_v58 = vsel %vm415_vm2, %v448_v51, 0.0  ;;  %v466_v11 = vsel %vm415_vm2, %v452_v4, 0.0 }
 0x110   : > { %v432_v59 = vadd.f32 %v431_v56, %v430_v53  ;;  %v459_v60 = vadd.f32 %v458_v58, %v457_v52 }
 0x112   : > { %v461_v0 = vadd.f32 %v460_v61, %v459_v60  ;;  %v434_v1 = vadd.f32 %v433_v62, %v432_v59 }
 0x114   : > { %v436_v5 = vadd.f32 %v435_v3, %v434_v1  ;;  %v463_v6 = vadd.f32 %v462_v2, %v461_v0 }
 0x116   : > { %v438_v9 = vadd.f32 %v437_v8, %v436_v5  ;;  %v465_v10 = vadd.f32 %v464_v7, %v463_v6 }
 0x118   : > { %v439_v12 = vrot.slane %v438_v9, 4  ;;  %v467_v13 = vadd.f32 %v466_v11, %v465_v10 }
 0x11a   : > { %v440_v15 = vadd.f32 %v439_v12, %v438_v9  ;;  %v468_v16 = vrot.slane %v467_v13, 4 }
 0x11c   : > { %v441_v17 = vrot.slane %v440_v15, 2  ;;  %v469_v18 = vadd.f32 %v468_v16, %v467_v13 }
 0x11e   : > { %v442_v20 = vadd.f32 %v441_v17, %v440_v15  ;;  %v470_v21 = vrot.slane %v469_v18, 2 }
 0x120   : > { %v443_v22 = vrot.slane %v442_v20, 1  ;;  %v471_v23 = vadd.f32 %v470_v21, %v469_v18 }
 0x122   : > { %v444_v24 = vadd.f32 %v443_v22, %v442_v20  ;;  %v472_v25 = vrot.slane %v471_v23, 1 }
 0x124   : > { %v473_v26 = vadd.f32 %v472_v25, %v471_v23  ;;  %v477_v27 = vsel %vm476_vm3, %v444_v24, 0.0 }
 0x126   : > { %v479_v28 = vsel %vm478_vm4, %v473_v26, %v477_v27 }
 0x127   : > { %480 = vst.msk [vmem:[%s187_s26] sm:$0xff] %vm415_vm2, %v479_v28 }
 0x128 PF: > { %s14_s12 = sadd.s32 1, %s673_s12  }
 0x129   : > { %p11_p5 = scmp.ge.s32.totalorder %s14_s12, 4  }
 0x12b   :  { %13 = sbr.rel (!%p11_p5) target bundleno = 1 (0x1), region = 70 }

// kernel: _lambda_.22
= control target key start
LH: loop header
LB: loop body
LE: loop exit
PB: predicated region body
PF: predicated region fallthrough
CT: control target
= control target key end

     0   :  { %s348_s12 = smov 0   ;;  %s371_s0 = inlined_call_operand.vmem [shape: f32[64,128], index: 0, kind: input, shape index: {}]   ;;  %s372_s1 = inlined_call_operand.vmem [shape: f32[1,128], index: 1, kind: input, shape index: {}]   ;;  %s373_s2 = inlined_call_operand.vmem [shape: f32[1,128], index: 2, kind: input, shape index: {}]   ;;  %s374_s3 = inlined_call_operand.vmem [shape: bf16[64,128], index: 3, kind: output, shape index: {}]  }
   0x1 LB: > { %s280_s13 = sadd.s32 4294967295, %s326_s12   ;;  %p284_p0 = scmp.ge.s32.totalorder %s326_s12, 1  ;;  %s326_s12 = sphi %s348_s12, %s13_s12  }
   0x2   : > { %p138_p1 = scmp.lt.s32.totalorder %s326_s12, 3 }
   0x4   : > { %p139_p2 = pnand %p284_p0, %p138_p1 }
   0x5   : > { %s285_s14 = sshll.u32 (!%p139_p2), %s280_s13, 2 }
   0x6   : > { %142 = sbr.rel (%p139_p2) target bundleno = 25 (0x19), region = 32  ;;  %p163_p3 = scmp.lt.s32.totalorder (!%p139_p2), %s285_s14, 7 }
   0xb   : > { %s376_s14 = smov (!%p163_p3, %s285_s14), 7  ;;  %v289_v0 = vld [vmem:[%s372_s1] ss:$0 sm:$0xff] }
   0xc   : > { %s286_s15 = sshll.u32 %s376_s14, 3  ;;  %v290_v1 = vld [vmem:[%s373_s2] ss:$0 sm:$0xff]  ;;  %s288_s23 = sshll.u32 %s376_s14, 2 }
   0xd   : > { %s166_s20 = scalar_lea.vmem %s371_s0, %s286_s15  ;;  %s172_s26 = scalar_lea.vmem %s374_s3, %s288_s23 }
   0xe   : > { %v174_v2 = vld [vmem:[%s166_s20] sm:$0xff]  ;;  %v175_v3 = vld [vmem:[%s166_s20 + $0x8] sm:$0xff]  ;;  %v176_v4 = vld [vmem:[%s166_s20 + $0x10] sm:$0xff] }
   0xf   : > { %v177_v5 = vld [vmem:[%s166_s20 + $0x18] sm:$0xff]  ;;  %v185_v6 = vmul.f32 %v289_v0, %v174_v2  ;;  %v186_v7 = vmul.f32 %v289_v0, %v175_v3  ;;  %v187_v8 = vmul.f32 %v289_v0, %v176_v4 }
  0x10   : > { %v188_v9 = vmul.f32 %v289_v0, %v177_v5 }
  0x11   : > { %v196_v10 = vadd.f32 %v290_v1, %v185_v6  ;;  %v197_v11 = vadd.f32 %v290_v1, %v186_v7  ;;  %v198_v12 = vadd.f32 %v290_v1, %v187_v8 }
  0x12   : > { %v199_v13 = vadd.f32 %v290_v1, %v188_v9 }
  0x13   : > { %v200_v14 = vmax.f32 %v196_v10, 0.0  ;;  %v201_v15 = vmax.f32 %v197_v11, 0.0  ;;  %v202_v16 = vmax.f32 %v198_v12, 0.0 }
  0x14   : > { %v203_v17 = vmax.f32 %v199_v13, 0.0 }
  0x15   : > { %v304_v18 = vpack.c.bf16 %v201_v15, %v200_v14 }
  0x16   : > { %v309_v19 = vpack.c.bf16 %v203_v17, %v202_v16 }
  0x17   : > { %305 = vst [vmem:[%s172_s26] sm:$0xff] %v304_v18  }
  0x18   : > { %311 = vst [vmem:[%s172_s26 + $0x8] sm:$0xff] %v309_v19  }
  0x19 PF: > { %s13_s12 = sadd.s32 1, %s326_s12  }
  0x1a   : > { %p10_p4 = scmp.ge.s32.totalorder %s13_s12, 4  }
  0x1c   :  { %12 = sbr.rel (!%p10_p4) target bundleno = 1 (0x1), region = 62 }

// kernel: _lambda_.23
= control target key start
LH: loop header
LB: loop body
LE: loop exit
PB: predicated region body
PF: predicated region fallthrough
CT: control target
= control target key end

     0   :  { %s460_s6 = smov 0   ;;  %s529_s0 = inlined_call_operand.vmem [shape: bf16[2,20,5,64], index: 0, kind: input, shape index: {}]   ;;  %s530_s1 = inlined_call_operand.vmem [shape: bf16[2,4,4,64], index: 1, kind: output, shape index: {}]  }
   0x1 LB: > { %s385_s7 = sadd.s32 4294967295, %s448_s6   ;;  %p389_p0 = scmp.ge.s32.totalorder %s448_s6, 1  ;;  %s448_s6 = sphi %s460_s6, %s11_s6  }
   0x2   : > { %p87_p1 = scmp.lt.s32.totalorder %s448_s6, 3 }
   0x4   : > { %p88_p2 = pnand %p389_p0, %p87_p1 }
   0x5   : > { %p107_p3 = scmp.lt.s32.totalorder (!%p88_p2), %s385_s7, 1 }
   0x6   : > { %91 = sbr.rel (%p88_p2) target bundleno = 55 (0x37), region = 24 }
   0xb   : > { %s532_s7 = smov (!%p107_p3, %s385_s7), 1  ;;  %vm169_vm0 = vcmask 517120  }
   0xc   : > { %s433_s8 = smul.u32 80, %s532_s7  ;;  %s432_s12 = sshll.u32 %s532_s7, 3 }
   0xd   : > { %s507_s15 = scalar_lea.vmem %s530_s1, %s432_s12 }
   0xe   : > { %s474_s11 = scalar_lea.vmem %s529_s0, %s433_s8 }
   0xf   : > { %v121_v0 = vld [vmem:[%s474_s11] sm:$0x7]  ;;  %v393_v4 = vld [vmem:[%s474_s11 + $0x4] sm:$0x3]  ;;  %v396_v5 = vld [vmem:[%s474_s11 + $0x8] sm:$0x7] }
  0x10   : > { %v123_v1 = vshrl.u32 %v121_v0, 16  ;;  %v126_v2 = vshll.u32 %v121_v0, 16  ;;  %v117_v3 = vld [vmem:[%s474_s11] sm:$0x3]  ;;  %v141_v8 = vshrl.u32 %v396_v5, 16  ;;  %v144_v9 = vshll.u32 %v396_v5, 16 }
  0x11   : > { %v399_v10 = vld [vmem:[%s474_s11 + $0x10] sm:$0x7]  ;;  %v120_v13 = vmax.bf16 %v393_v4, %v117_v3  ;;  %v401_v21 = vld [vmem:[%s474_s11 + $0x14] sm:$0x3]  ;;  %v405_v26 = vld [vmem:[%s474_s11 + $0x18] sm:$0x7] }
  0x12   : > { %v125_v6 = vrot.slane %v123_v1, 4  ;;  %v128_v7 = vrot.slane %v126_v2, 5  ;;  %v159_v11 = vshrl.u32 %v399_v10, 16  ;;  %v162_v12 = vshll.u32 %v399_v10, 16  ;;  %v400_v17 = vld [vmem:[%s474_s11 + $0x10] sm:$0x3] }
  0x13   : > { %v143_v15 = vrot.slane %v141_v8, 4  ;;  %v146_v16 = vrot.slane %v144_v9, 5  ;;  %v402_v18 = vld [vmem:[%s474_s11 + $0x10] sm:$0x7]  ;;  %v394_v27 = vld [vmem:[%s474_s11 + $0x8] sm:$0x3]  ;;  %v173_v33 = vmax.bf16 %v401_v21, %v400_v17 }
  0x14   : > { %v129_v14 = vor.u32 %v128_v7, %v125_v6  ;;  %v161_v19 = vrot.slane %v159_v11, 4  ;;  %v164_v20 = vrot.slane %v162_v12, 5  ;;  %v176_v22 = vshrl.u32 %v402_v18, 16  ;;  %v408_v35 = vld [vmem:[%s474_s11 + $0x20] sm:$0x7] }
  0x15   : > { %v179_v23 = vshll.u32 %v402_v18, 16  ;;  %v147_v25 = vor.u32 %v146_v16, %v143_v15  ;;  %v194_v31 = vshrl.u32 %v405_v26, 16  ;;  %v197_v34 = vshll.u32 %v405_v26, 16  ;;  %v395_v36 = vld [vmem:[%s474_s11 + $0xc] sm:$0x3] }
  0x16   : > { %v130_v24 = vrot.slane %v129_v14, 4  ;;  %v165_v28 = vor.u32 %v164_v20, %v161_v19  ;;  %v178_v29 = vrot.slane %v176_v22, 4  ;;  %v212_v40 = vshrl.u32 %v408_v35, 16  ;;  %v410_v44 = vld [vmem:[%s474_s11 + $0x20] sm:$0x3] }
  0x17   : > { %v181_v30 = vrot.slane %v179_v23, 5  ;;  %v148_v37 = vrot.slane %v147_v25, 4  ;;  %v196_v39 = vrot.slane %v194_v31, 4  ;;  %v199_v42 = vrot.slane %v197_v34, 5  ;;  %v412_v45 = vld [vmem:[%s474_s11 + $0x20] sm:$0x7] }
  0x18   : > { %v132_v32 = vmax.bf16 %v130_v24, %v120_v13  ;;  %v215_v43 = vshll.u32 %v408_v35, 16  ;;  %v166_v46 = vrot.slane %v165_v28, 4  ;;  %v411_v48 = vld [vmem:[%s474_s11 + $0x24] sm:$0x3]  ;;  %v229_v49 = vshrl.u32 %v412_v45, 16 }
  0x19   : > { %v182_v38 = vor.u32 %v181_v30, %v178_v29  ;;  %v232_v50 = vshll.u32 %v412_v45, 16  ;;  %v403_v52 = vld [vmem:[%s474_s11 + $0x18] sm:$0x3]  ;;  %v200_v53 = vor.u32 %v199_v42, %v196_v39  ;;  %v214_v54 = vrot.slane %v212_v40, 4  ;;  %v415_v56 = vld [vmem:[%s474_s11 + $0x28] sm:$0x7] }
  0x1a   : > { %v135_v41 = vmax.bf16 %v394_v27, %v132_v32  ;;  %v217_v55 = vrot.slane %v215_v43, 5  ;;  %v397_v57 = vld [vmem:[%s474_s11 + $0x10] sm:$0x3]  ;;  %v231_v59 = vrot.slane %v229_v49, 4  ;;  %v247_v61 = vshrl.u32 %v415_v56, 16 }
  0x1b   : > { %v183_v47 = vrot.slane %v182_v38, 4  ;;  %v234_v60 = vrot.slane %v232_v50, 5  ;;  %v404_v63 = vld [vmem:[%s474_s11 + $0x1c] sm:$0x3]  ;;  %v201_v0 = vrot.slane %v200_v53, 4  ;;  %v226_v1 = vmax.bf16 %v411_v48, %v410_v44 }
  0x1c   : > { %v138_v51 = vmax.bf16 %v395_v36, %v135_v41  ;;  %v250_v2 = vshll.u32 %v415_v56, 16  ;;  %v418_v3 = vld [vmem:[%s474_s11 + $0x30] sm:$0x7]  ;;  %v398_v4 = vld [vmem:[%s474_s11 + $0x14] sm:$0x3]  ;;  %v249_v7 = vrot.slane %v247_v61, 4  ;;  %v218_v11 = vor.u32 %v217_v55, %v214_v54 }
  0x1d   : > { %v185_v58 = vmax.bf16 %v183_v47, %v173_v33  ;;  %v235_v6 = vor.u32 %v234_v60, %v231_v59  ;;  %v265_v8 = vshrl.u32 %v418_v3, 16  ;;  %v422_v9 = vld [vmem:[%s474_s11 + $0x30] sm:$0x7]  ;;  %v268_v13 = vshll.u32 %v418_v3, 16  ;;  %v421_v18 = vld [vmem:[%s474_s11 + $0x34] sm:$0x3] }
  0x1e   : > { %v150_v62 = vmax.bf16 %v148_v37, %v138_v51  ;;  %v252_v12 = vrot.slane %v250_v2, 5  ;;  %v420_v14 = vld [vmem:[%s474_s11 + $0x30] sm:$0x3]  ;;  %v425_v19 = vld [vmem:[%s474_s11 + $0x38] sm:$0x7]  ;;  %v282_v25 = vshrl.u32 %v422_v9, 16 }
  0x1f   : > { %v188_v5 = vmax.bf16 %v403_v52, %v185_v58  ;;  %v236_v16 = vrot.slane %v235_v6, 4  ;;  %v267_v17 = vrot.slane %v265_v8, 4  ;;  %v406_v21 = vld [vmem:[%s474_s11 + $0x20] sm:$0x3]  ;;  %v413_v22 = vld [vmem:[%s474_s11 + $0x28] sm:$0x3]  ;;  %v279_v35 = vmax.bf16 %v421_v18, %v420_v14 }
  0x20   : > { %v153_v10 = vmax.bf16 %v397_v57, %v150_v62  ;;  %v253_v23 = vor.u32 %v252_v12, %v249_v7  ;;  %v270_v24 = vrot.slane %v268_v13, 5  ;;  %v285_v28 = vshll.u32 %v422_v9, 16  ;;  %v428_v30 = vld [vmem:[%s474_s11 + $0x40] sm:$0x7]  ;;  %v407_v32 = vld [vmem:[%s474_s11 + $0x24] sm:$0x3] }
  0x21   : > { %v191_v15 = vmax.bf16 %v404_v63, %v188_v5  ;;  %v238_v27 = vmax.bf16 %v236_v16, %v226_v1  ;;  %v300_v29 = vshrl.u32 %v425_v19, 16  ;;  %v219_v33 = vrot.slane %v218_v11, 4  ;;  %v414_v34 = vld [vmem:[%s474_s11 + $0x2c] sm:$0x3]  ;;  %v416_v49 = vld [vmem:[%s474_s11 + $0x30] sm:$0x3] }
  0x22   : > { %v156_v20 = vmax.bf16 %v398_v4, %v153_v10  ;;  %v284_v36 = vrot.slane %v282_v25, 4  ;;  %v254_v39 = vrot.slane %v253_v23, 4  ;;  %v287_v40 = vrot.slane %v285_v28, 5  ;;  %v417_v54 = vld [vmem:[%s474_s11 + $0x34] sm:$0x3] }
  0x23   : > { %v203_v26 = vmax.bf16 %v201_v0, %v191_v15  ;;  %v241_v38 = vmax.bf16 %v413_v22, %v238_v27  ;;  %v271_v41 = vor.u32 %v270_v24, %v267_v17  ;;  %v302_v42 = vrot.slane %v300_v29, 4  ;;  %v423_v56 = vld [vmem:[%s474_s11 + $0x38] sm:$0x3]  ;;  %v424_v62 = vld [vmem:[%s474_s11 + $0x3c] sm:$0x3] }
  0x24   : > { %v168_v31 = vmax.bf16 %v166_v46, %v156_v20  ;;  %v303_v43 = vshll.u32 %v425_v19, 16  ;;  %v318_v44 = vshrl.u32 %v428_v30, 16  ;;  %v288_v47 = vor.u32 %v287_v40, %v284_v36  ;;  %v426_v5 = vld [vmem:[%s474_s11 + $0x40] sm:$0x3]  ;;  %v427_v7 = vld [vmem:[%s474_s11 + $0x44] sm:$0x3] }
  0x25   : > { %v206_v37 = vmax.bf16 %v406_v21, %v203_v26  ;;  %v244_v46 = vmax.bf16 %v414_v34, %v241_v38  ;;  %v321_v48 = vshll.u32 %v428_v30, 16  ;;  %v272_v55 = vrot.slane %v271_v41, 4 }
  0x26   : > { %170 = vst.msk [vmem:[%s507_s15] sm:$0x3] %vm169_vm0, %v168_v31  ;;  %v305_v50 = vrot.slane %v303_v43, 5  ;;  %v289_v53 = vrot.slane %v288_v47, 4  ;;  %v320_v60 = vrot.slane %v318_v44, 4 }
  0x27   : > { %v209_v45 = vmax.bf16 %v407_v32, %v206_v37  ;;  %v256_v52 = vmax.bf16 %v254_v39, %v244_v46  ;;  %v323_v61 = vrot.slane %v321_v48, 5 }
  0x28   : > { %v306_v57 = vor.u32 %v305_v50, %v302_v42  ;;  %v291_v59 = vmax.bf16 %v289_v53, %v279_v35 }
  0x29   : > { %v221_v51 = vmax.bf16 %v219_v33, %v209_v45  ;;  %v259_v58 = vmax.bf16 %v416_v49, %v256_v52  ;;  %v324_v4 = vor.u32 %v323_v61, %v320_v60 }
  0x2a   : > { %v294_v0 = vmax.bf16 %v423_v56, %v291_v59  ;;  %v307_v1 = vrot.slane %v306_v57, 4 }
  0x2b   : > { %409 = vst.msk [vmem:[%s507_s15 + $0x2] sm:$0x3] %vm169_vm0, %v221_v51  ;;  %v262_v63 = vmax.bf16 %v417_v54, %v259_v58  ;;  %v325_v9 = vrot.slane %v324_v4, 4 }
  0x2c   : > { %v297_v3 = vmax.bf16 %v424_v62, %v294_v0 }
  0x2d   : > { %v274_v2 = vmax.bf16 %v272_v55, %v262_v63 }
  0x2e   : > { %v309_v6 = vmax.bf16 %v307_v1, %v297_v3 }
  0x2f   : > { %419 = vst.msk [vmem:[%s507_s15 + $0x4] sm:$0x3] %vm169_vm0, %v274_v2 }
  0x30   : > { %v312_v8 = vmax.bf16 %v426_v5, %v309_v6 }
  0x32   : > { %v315_v10 = vmax.bf16 %v427_v7, %v312_v8 }
  0x34   : > { %v327_v11 = vmax.bf16 %v325_v9, %v315_v10 }
  0x36   : > { %429 = vst.msk [vmem:[%s507_s15 + $0x6] sm:$0x3] %vm169_vm0, %v327_v11 }
  0x37 PF: > { %s11_s6 = sadd.s32 1, %s448_s6  }
  0x38   : > { %p8_p4 = scmp.ge.s32.totalorder %s11_s6, 4  }
  0x3a   :  { %10 = sbr.rel (!%p8_p4) target bundleno = 1 (0x1), region = 74 }

// kernel: _lambda_.25
= control target key start
LH: loop header
LB: loop body
LE: loop exit
PB: predicated region body
PF: predicated region fallthrough
CT: control target
= control target key end

     0   :  { %s262_s12 = smov 0   ;;  %s298_s0 = inlined_call_operand.vmem [shape: f32[16,128], index: 0, kind: input, shape index: {}]   ;;  %s299_s1 = inlined_call_operand.vmem [shape: f32[1,128], index: 1, kind: input, shape index: {}]   ;;  %s300_s2 = inlined_call_operand.vmem [shape: f32[1,128], index: 2, kind: input, shape index: {}]   ;;  %s301_s3 = inlined_call_operand.vmem [shape: bf16[16,128], index: 3, kind: output, shape index: {}]  }
   0x1 LB: > { %s239_s13 = sadd.s32 4294967295, %s264_s12   ;;  %p243_p0 = scmp.ge.s32.totalorder %s264_s12, 1  ;;  %s264_s12 = sphi %s262_s12, %s13_s12  }
   0x2   : > { %p136_p1 = scmp.lt.s32.totalorder %s264_s12, 3 }
   0x4   : > { %p137_p2 = pnand %p243_p0, %p136_p1 }
   0x5   : > { %p158_p3 = scmp.lt.s32.totalorder (!%p137_p2), %s239_s13, 1 }
   0x6   : > { %140 = sbr.rel (%p137_p2) target bundleno = 24 (0x18), region = 32 }
   0xb   : > { %s303_s13 = smov (!%p158_p3, %s239_s13), 1  ;;  %v246_v0 = vld [vmem:[%s299_s1] ss:$0 sm:$0xff] }
   0xc   : > { %s244_s14 = sshll.u32 %s303_s13, 3  ;;  %v247_v2 = vld [vmem:[%s300_s2] ss:$0 sm:$0xff]  ;;  %s245_s22 = sshll.u32 %s303_s13, 2 }
   0xd   : > { %s161_s19 = scalar_lea.vmem %s298_s0, %s244_s14  ;;  %s165_s25 = scalar_lea.vmem %s301_s3, %s245_s22 }
   0xe   : > { %v166_v1 = vld [vmem:[%s161_s19] sm:$0xff] }
   0xf   : > { %v174_v3 = vmul.f32 %v246_v0, %v166_v1 }
  0x11   : > { %v182_v4 = vadd.f32 %v247_v2, %v174_v3 }
  0x13   : > { %v183_v5 = vmax.f32 %v182_v4, 0.0 }
  0x15   : > { %v184_v6 = vpack.c.bf16 %v183_v5, %v183_v5 }
  0x17   : > { %185 = vst [vmem:[%s165_s25] sm:$0xf] %v184_v6 }
  0x18 PF: > { %s13_s12 = sadd.s32 1, %s264_s12  }
  0x19   : > { %p10_p4 = scmp.ge.s32.totalorder %s13_s12, 4  }
  0x1b   :  { %12 = sbr.rel (!%p10_p4) target bundleno = 1 (0x1), region = 62 }

// kernel: _lambda_.27
= control target key start
LH: loop header
LB: loop body
LE: loop exit
PB: predicated region body
PF: predicated region fallthrough
CT: control target
= control target key end

     0   :  { %s351_s15 = smov 0   ;;  %s371_s0 = inlined_call_operand.vmem [shape: f32[16,128], index: 0, kind: input, shape index: {}]   ;;  %s372_s1 = inlined_call_operand.vmem [shape: f32[1,128], index: 1, kind: input, shape index: {}]   ;;  %s373_s2 = inlined_call_operand.vmem [shape: f32[1,128], index: 2, kind: input, shape index: {}]   ;;  %s374_s3 = inlined_call_operand.vmem [shape: bf16[16,128], index: 3, kind: input, shape index: {}]   ;;  %s375_s4 = inlined_call_operand.vmem [shape: bf16[16,128], index: 4, kind: output, shape index: {}]  }
   0x1 LB: > { %s298_s16 = sadd.s32 4294967295, %s324_s15   ;;  %p302_p0 = scmp.ge.s32.totalorder %s324_s15, 1  ;;  %s324_s15 = sphi %s351_s15, %s14_s15  }
   0x2   : > { %p170_p1 = scmp.lt.s32.totalorder %s324_s15, 3 }
   0x4   : > { %p171_p2 = pnand %p302_p0, %p170_p1 }
   0x5   : > { %p198_p3 = scmp.lt.s32.totalorder (!%p171_p2), %s298_s16, 1 }
   0x6   : > { %174 = sbr.rel (%p171_p2) target bundleno = 26 (0x1a), region = 36 }
   0xb   : > { %s377_s16 = smov (!%p198_p3, %s298_s16), 1  ;;  %v306_v0 = vld [vmem:[%s372_s1] ss:$0 sm:$0xff] }
   0xc   : > { %s303_s17 = sshll.u32 %s377_s16, 3  ;;  %s304_s18 = sshll.u32 %s377_s16, 2  ;;  %v307_v2 = vld [vmem:[%s373_s2] ss:$0 sm:$0xff] }
   0xd   : > { %s201_s23 = scalar_lea.vmem %s371_s0, %s303_s17  ;;  %s205_s26 = scalar_lea.vmem %s374_s3, %s304_s18 }
   0xe   : > { %v210_v1 = vld [vmem:[%s201_s23] sm:$0xff]  ;;  %s209_s5 = scalar_lea.vmem %s375_s4, %s304_s18 }
   0xf   : > { %v227_v3 = vld [vmem:[%s205_s26] sm:$0xf]  ;;  %v218_v4 = vmul.f32 %v306_v0, %v210_v1 }
  0x10   : > { %v228_v5 = vunpack.c.l.bf16 %v227_v3 }
  0x11   : > { %v226_v6 = vadd.f32 %v307_v2, %v218_v4 }
  0x13   : > { %v229_v7 = vadd.f32 %v228_v5, %v226_v6 }
  0x15   : > { %v230_v8 = vmax.f32 %v229_v7, 0.0 }
  0x17   : > { %v231_v9 = vpack.c.bf16 %v230_v8, %v230_v8 }
  0x19   : > { %232 = vst [vmem:[%s209_s5] sm:$0xf] %v231_v9 }
  0x1a PF: > { %s14_s15 = sadd.s32 1, %s324_s15  }
  0x1b   : > { %p11_p4 = scmp.ge.s32.totalorder %s14_s15, 4  }
  0x1d   :  { %13 = sbr.rel (!%p11_p4) target bundleno = 1 (0x1), region = 69 }

// kernel: _lambda_.33
= control target key start
LH: loop header
LB: loop body
LE: loop exit
PB: predicated region body
PF: predicated region fallthrough
CT: control target
= control target key end

     0   :  { %s71_s0 = inlined_call_operand.vmem [shape: f32[8,128], index: 0, kind: input, shape index: {}]   ;;  %s72_s1 = inlined_call_operand.vmem [shape: f32[1,128], index: 1, kind: input, shape index: {}]   ;;  %s73_s2 = inlined_call_operand.vmem [shape: f32[1,128], index: 2, kind: input, shape index: {}]   ;;  %s74_s3 = inlined_call_operand.vmem [shape: bf16[8,128], index: 3, kind: output, shape index: {}]  }
   0x1   :  { %v14_v0 = vld [vmem:[%s71_s0] sm:$0xff] }
   0x2   :  { %v37_v1 = vld [vmem:[%s72_s1] ss:$0 sm:$0xff] }
   0x3   :  { %v38_v2 = vld [vmem:[%s73_s2] ss:$0 sm:$0xff]  ;;  %v22_v3 = vmul.f32 %v37_v1, %v14_v0 }
   0x5   :  { %v30_v4 = vadd.f32 %v38_v2, %v22_v3 }
   0x7   :  { %v31_v5 = vpack.c.bf16 %v30_v4, %v30_v4 }
   0x9   :  { %32 = vst [vmem:[%s74_s3] sm:$0xf] %v31_v5 }

// kernel: _lambda_.24
= control target key start
LH: loop header
LB: loop body
LE: loop exit
PB: predicated region body
PF: predicated region fallthrough
CT: control target
= control target key end

     0   :  { %s3355_s12 = smov 0   ;;  %s4031_s0 = inlined_call_operand.vmem [shape: bf16[2,6,6,64], index: 0, kind: input, shape index: {}]   ;;  %s4032_s1 = inlined_call_operand.vmem [shape: bf16[3,3,64,64], index: 1, kind: input, shape index: {}]   ;;  %s4033_s2 = inlined_call_operand.vmem [shape: f32[2,4,4,64], index: 2, kind: output, shape index: {0}]   ;;  %s4034_s3 = inlined_call_operand.vmem [shape: f32[2,8,64], index: 3, kind: output, shape index: {1}]  }
   0x1 LB: > { %s2434_s13 = sadd.s32 4294967295, %s3331_s12   ;;  %p2438_p0 = scmp.ge.s32.totalorder %s3331_s12, 1  ;;  %s3331_s12 = sphi %s3355_s12, %s14_s12  }
   0x2   : > { %p140_p1 = scmp.lt.s32.totalorder %s3331_s12, 3 }
   0x4   : > { %p141_p2 = pnand %p2438_p0, %p140_p1 }
   0x5   : > { %p168_p3 = scmp.lt.s32.totalorder (!%p141_p2), %s2434_s13, 1 }
   0x6   : > { %144 = sbr.rel (%p141_p2) target bundleno = 516 (0x204), region = 28 }
   0xb   : > { %v3366_v0 = vld [vmem:[%s4032_s1 + $0x38] sm:$0xff]   ;;  %v3333_v1 = vmov 0.0   ;;  %v3379_v3 = vld [vmem:[%s4032_s1 + $0x30] sm:$0xff]   ;;  %vm3334_vm0 = vmmov 0   ;;  %s4036_s13 = smov (!%p168_p3, %s2434_s13), 1  ;;  %v3399_v5 = vld [vmem:[%s4032_s1 + $0x28] sm:$0xff]  }
   0xc   : > { %2822 = vmatprep.subr.bf16.mxu0 %v3333_v1  ;;  %2834 = vmatprep.subr.bf16.mxu1 %v3333_v1  ;;  %v3373_v2 = vld [vmem:[%s4032_s1 + $0x18] sm:$0xff]   ;;  %v3388_v4 = vld [vmem:[%s4032_s1 + $0x10] sm:$0xff]   ;;  %s3254_s24 = smul.u32 24, %s4036_s13  ;;  %v3407_v6 = vld [vmem:[%s4032_s1 + $0x8] sm:$0xff]   ;;  %vm299_vm1 = vcmask 523264   ;;  %s2641_s17 = sshll.u32 %s4036_s13, 4 }
   0xd   : > { %2823 = vmatpush3.bf16.msra.mxu0 %v3366_v0  ;;  %2830 = vmatprep.mubr.msk.bf16.mxu0 %vm3334_vm0, %v3333_v1  ;;  %v3418_v7 = vld [vmem:[%s4032_s1 + $0x20] sm:$0xff]   ;;  %v3433_v13 = vld [vmem:[%s4032_s1 + $0x58] sm:$0xff]   ;;  %v3451_v17 = vld [vmem:[%s4032_s1 + $0x50] sm:$0xff]   ;;  %s3975_s20 = scalar_lea.vmem %s4033_s2, %s2641_s17  ;;  %vm927_vm2 = vcmask 519168  }
   0xe   : > { %2835 = vmatpush3.bf16.msra.mxu1 %v3373_v2  ;;  %2824 = vmatprep.subr.bf16.mxu0 %v3333_v1  ;;  %s3413_s29 = scalar_lea.vmem %s4031_s0, %s3254_s24  ;;  %v3425_v9 = vld [vmem:[%s4032_s1] sm:$0xff]   ;;  %v3439_v14 = vld [vmem:[%s4032_s1 + $0x78] sm:$0xff]   ;;  %v3458_v18 = vld [vmem:[%s4032_s1 + $0x70] sm:$0xff]  }
   0xf   : > { %2836 = vmatprep.subr.bf16.mxu1 %v3333_v1  ;;  %2842 = vmatprep.mubr.msk.bf16.mxu1 %vm3334_vm0, %v3333_v1  ;;  %v3273_v8 = vld [vmem:[%s3413_s29] ss:$0 sps:$4 sm:$0x77]   ;;  %v3469_v19 = vld [vmem:[%s4032_s1 + $0x48] sm:$0xff]   ;;  %v2524_v25 = vld [vmem:[%s3413_s29 + $0x4] sm:$0x3] }
  0x10   : > { %v269_v10 = vshrl.u32 %v3273_v8, 16  ;;  %v271_v11 = vshll.u32 %v3273_v8, 16  ;;  %v263_v16 = vld [vmem:[%s3413_s29] sm:$0x3]  ;;  %v3476_v20 = vld [vmem:[%s4032_s1 + $0x68] sm:$0xff]   ;;  %v3499_v26 = vld [vmem:[%s4032_s1 + $0x98] sm:$0xff]  }
  0x11   : > { %2825 = vmatpush3.bf16.msra.mxu0 %v3379_v3  ;;  %v3282_v21 = vld [vmem:[%s3413_s29] ss:$0 sps:$4 sm:$0x66]   ;;  %v3506_v27 = vld [vmem:[%s4032_s1 + $0xb8] sm:$0xff]   ;;  %v3516_v29 = vld [vmem:[%s4032_s1 + $0x90] sm:$0xff]  }
  0x12   : > { %2837 = vmatpush3.bf16.msra.mxu1 %v3388_v4  ;;  %2826 = vmatprep.subr.bf16.mxu0 %v3333_v1  ;;  %v273_v12 = vrot.slane %v271_v11, 1  ;;  %v3484_v22 = vld [vmem:[%s4032_s1 + $0x40] sm:$0xff]   ;;  %v414_v24 = vrot.slane %v3282_v21, 1  ;;  %v3523_v30 = vld [vmem:[%s4032_s1 + $0xb0] sm:$0xff]   ;;  %v3534_v32 = vld [vmem:[%s4032_s1 + $0x88] sm:$0xff]  }
  0x13   : > { %2838 = vmatprep.subr.bf16.mxu1 %v3333_v1  ;;  %v3491_v23 = vld [vmem:[%s4032_s1 + $0x60] sm:$0xff]   ;;  %v3541_v33 = vld [vmem:[%s4032_s1 + $0xa8] sm:$0xff]   ;;  %v3563_v41 = vld [vmem:[%s4032_s1 + $0xd8] sm:$0xff]  }
  0x14   : > { %v274_v15 = vor.u32 %v273_v12, %v269_v10  ;;  %v3291_v28 = vld [vmem:[%s3413_s29 + $0x4] ss:$0 sps:$4 sm:$0x77]   ;;  %v3570_v42 = vld [vmem:[%s4032_s1 + $0xf8] sm:$0xff]   ;;  %v3580_v44 = vld [vmem:[%s4032_s1 + $0xd0] sm:$0xff]  }
  0x15   : > { %2827 = vmatpush3.bf16.msra.mxu0 %v3399_v5  ;;  %v560_v31 = vshll.u32 %v3291_v28, 16  ;;  %v558_v34 = vshrl.u32 %v3291_v28, 16  ;;  %v3548_v36 = vld [vmem:[%s4032_s1 + $0x80] sm:$0xff]   ;;  %v3301_v43 = vld [vmem:[%s3413_s29 + $0x8] ss:$0 sps:$4 sm:$0x77]  }
  0x16   : > { %2839 = vmatpush3.bf16.msra.mxu1 %v3407_v6  ;;  %2828 = vmatprep.subr.bf16.mxu0 %v3333_v1  ;;  %v3292_v37 = vld [vmem:[%s3413_s29 + $0x4] ss:$0 sps:$4 sm:$0x66]   ;;  %v3587_v45 = vld [vmem:[%s4032_s1 + $0xf0] sm:$0xff]   ;;  %v3595_v46 = vld [vmem:[%s4032_s1 + $0xc8] sm:$0xff]   ;;  %v782_v47 = vshll.u32 %v3301_v43, 16 }
  0x17   : > { %2840 = vmatprep.subr.bf16.mxu1 %v3333_v1  ;;  %v562_v35 = vrot.slane %v560_v31, 1  ;;  %v3556_v38 = vld [vmem:[%s4032_s1 + $0xa0] sm:$0xff]   ;;  %v636_v40 = vrot.slane %v3292_v37, 1  ;;  %v3605_v48 = vld [vmem:[%s4032_s1 + $0xe8] sm:$0xff]   ;;  %v780_v50 = vshrl.u32 %v3301_v43, 16  ;;  %v3627_v55 = vld [vmem:[%s4032_s1 + $0x118] sm:$0xff]  }
  0x18   : > { %v3612_v49 = vld [vmem:[%s4032_s1 + $0xc0] sm:$0xff]   ;;  %v784_v51 = vrot.slane %v782_v47, 1  ;;  %v2544_v53 = vld [vmem:[%s3413_s29 + $0x8] sm:$0x3]  ;;  %v3638_v56 = vld [vmem:[%s4032_s1 + $0x110] sm:$0xff]  }
  0x19   : > { %2829 = vmatpush3.bf16.msra.mxu0 %v3418_v7  ;;  %v563_v39 = vor.u32 %v562_v35, %v558_v34  ;;  %v3619_v52 = vld [vmem:[%s4032_s1 + $0xe0] sm:$0xff]   ;;  %v3652_v58 = vld [vmem:[%s4032_s1 + $0x108] sm:$0xff]  }
  0x1a   : > { %2841 = vmatpush3.bf16.msra.mxu1 %v3425_v9  ;;  %2846 = vmatprep.subr.bf16.mxu0 %v3333_v1  ;;  %v785_v54 = vor.u32 %v784_v51, %v780_v50  ;;  %v3307_v57 = vld [vmem:[%s3413_s29 + $0x4] ss:$0 sps:$4 sm:$0x77]   ;;  %v3306_v60 = vld [vmem:[%s3413_s29 + $0x8] ss:$0 sps:$4 sm:$0x66]  }
  0x1b   : > { %2858 = vmatprep.subr.bf16.mxu1 %v3333_v1  ;;  %v954_v59 = vshll.u32 %v3307_v57, 16  ;;  %v3662_v61 = vld [vmem:[%s4032_s1 + $0x100] sm:$0xff]   ;;  %v952_v62 = vshrl.u32 %v3307_v57, 16  ;;  %v858_v8 = vrot.slane %v3306_v60, 1  ;;  %v2572_v28 = vld [vmem:[%s3413_s29 + $0x8] sm:$0x3] }
  0x1c   : > { %2831 = vmatmul.mubr.msk.bf16.vlgmr.msra.gmra.mxu0 %vm299_vm1, %v274_v15  ;;  %v3308_v11 = vld [vmem:[%s3413_s29 + $0x4] ss:$0 sps:$4 sm:$0x66]   ;;  %v3310_v34 = vld [vmem:[%s3413_s29 + $0x8] ss:$0 sps:$4 sm:$0x66]  }
  0x1d   : > { %2843 = vmatmul.mubr.msk.bf16.vlgmr.msra.gmra.mxu1 %vm299_vm1, %v263_v16  ;;  %2847 = vmatpush3.bf16.msra.mxu0 %v3433_v13  ;;  %v956_v63 = vrot.slane %v954_v59, 1  ;;  %v2564_v12 = vld [vmem:[%s3413_s29 + $0x4] sm:$0x3]  ;;  %v1048_v15 = vrot.slane %v3308_v11, 1  ;;  %v1197_v35 = vrot.slane %v3310_v34, 1 }
  0x1e   : > { %2859 = vmatpush3.bf16.msra.mxu1 %v3439_v14  ;;  %2848 = vmatprep.subr.bf16.mxu0 %v3333_v1  ;;  %v3309_v16 = vld [vmem:[%s3413_s29 + $0x8] ss:$0 sps:$4 sm:$0x77]   ;;  %v2580_v37 = vld [vmem:[%s3413_s29 + $0xc] sm:$0x3] }
  0x1f   : > { %2860 = vmatprep.subr.bf16.mxu1 %v3333_v1  ;;  %2854 = vmatprep.mubr.msk.bf16.mxu0 %vm3334_vm0, %v3333_v1  ;;  %v957_v10 = vor.u32 %v956_v63, %v952_v62  ;;  %v1145_v21 = vshll.u32 %v3309_v16, 16  ;;  %v3312_v50 = vld [vmem:[%s3413_s29 + $0xc] ss:$0 sps:$4 sm:$0x66]   ;;  %v2589_v63 = vld [vmem:[%s3413_s29 + $0x8] sm:$0x3] }
  0x20   : > { %2866 = vmatprep.mubr.msk.bf16.mxu1 %vm3334_vm0, %v3333_v1  ;;  %v2597_v11 = vld [vmem:[%s3413_s29 + $0xc] sm:$0x3] }
  0x21   : > { %2849 = vmatpush3.bf16.msra.mxu0 %v3451_v17 }
  0x22   : > { %2861 = vmatpush3.bf16.msra.mxu1 %v3458_v18  ;;  %2850 = vmatprep.subr.bf16.mxu0 %v3333_v1 }
  0x23   : > { %2862 = vmatprep.subr.bf16.mxu1 %v3333_v1 }
  0x25   : > { %2851 = vmatpush3.bf16.msra.mxu0 %v3469_v19 }
  0x26   : > { %2863 = vmatpush3.bf16.msra.mxu1 %v3476_v20  ;;  %2852 = vmatprep.subr.bf16.mxu0 %v3333_v1 }
  0x27   : > { %2864 = vmatprep.subr.bf16.mxu1 %v3333_v1 }
  0x29   : > { %2853 = vmatpush3.bf16.msra.mxu0 %v3484_v22 }
  0x2a   : > { %2865 = vmatpush3.bf16.msra.mxu1 %v3491_v23  ;;  %2870 = vmatprep.subr.bf16.mxu0 %v3333_v1 }
  0x2b   : > { %2882 = vmatprep.subr.bf16.mxu1 %v3333_v1 }
  0x2c   : > { %2855 = vmatmul.mubr.msk.bf16.vlgmr.msra.gmra.mxu0 %vm299_vm1, %v414_v24  ;;  %v1143_v24 = vshrl.u32 %v3309_v16, 16 }
  0x2d   : > { %2867 = vmatmul.mubr.msk.bf16.vlgmr.msra.gmra.mxu1 %vm299_vm1, %v2524_v25  ;;  %2871 = vmatpush3.bf16.msra.mxu0 %v3499_v26  ;;  %v1147_v25 = vrot.slane %v1145_v21, 1 }
  0x2e   : > { %2883 = vmatpush3.bf16.msra.mxu1 %v3506_v27  ;;  %2872 = vmatprep.subr.bf16.mxu0 %v3333_v1 }
  0x2f   : > { %2884 = vmatprep.subr.bf16.mxu1 %v3333_v1  ;;  %2878 = vmatprep.mubr.msk.bf16.mxu0 %vm3334_vm0, %v3333_v1  ;;  %v1148_v31 = vor.u32 %v1147_v25, %v1143_v24  ;;  %v3316_v24 = vld [vmem:[%s3413_s29 + $0xc] ss:$0 sps:$4 sm:$0x66]  }
  0x30   : > { %2890 = vmatprep.mubr.msk.bf16.mxu1 %vm3334_vm0, %v3333_v1 }
  0x31   : > { %2873 = vmatpush3.bf16.msra.mxu0 %v3516_v29 }
  0x32   : > { %2885 = vmatpush3.bf16.msra.mxu1 %v3523_v30  ;;  %2874 = vmatprep.subr.bf16.mxu0 %v3333_v1 }
  0x33   : > { %2886 = vmatprep.subr.bf16.mxu1 %v3333_v1 }
  0x35   : > { %2875 = vmatpush3.bf16.msra.mxu0 %v3534_v32 }
  0x36   : > { %2887 = vmatpush3.bf16.msra.mxu1 %v3541_v33  ;;  %2876 = vmatprep.subr.bf16.mxu0 %v3333_v1 }
  0x37   : > { %2888 = vmatprep.subr.bf16.mxu1 %v3333_v1 }
  0x39   : > { %2877 = vmatpush3.bf16.msra.mxu0 %v3548_v36 }
  0x3a   : > { %2889 = vmatpush3.bf16.msra.mxu1 %v3556_v38  ;;  %2894 = vmatprep.subr.bf16.mxu0 %v3333_v1 }
  0x3b   : > { %2906 = vmatprep.subr.bf16.mxu1 %v3333_v1 }
  0x3c   : > { %2879 = vmatmul.mubr.msk.bf16.vlgmr.msra.gmra.mxu0 %vm299_vm1, %v563_v39  ;;  %v3311_v39 = vld [vmem:[%s3413_s29 + $0xc] ss:$0 sps:$4 sm:$0x77]  }
  0x3d   : > { %2891 = vmatmul.mubr.msk.bf16.vlgmr.msra.gmra.mxu1 %vm299_vm1, %v636_v40  ;;  %2895 = vmatpush3.bf16.msra.mxu0 %v3563_v41  ;;  %v1295_v40 = vshll.u32 %v3311_v39, 16  ;;  %v1293_v43 = vshrl.u32 %v3311_v39, 16  ;;  %v2605_v39 = vld [vmem:[%s3413_s29 + $0x10] sm:$0x3] }
  0x3e   : > { %2907 = vmatpush3.bf16.msra.mxu1 %v3570_v42  ;;  %2896 = vmatprep.subr.bf16.mxu0 %v3333_v1 }
  0x3f   : > { %2908 = vmatprep.subr.bf16.mxu1 %v3333_v1  ;;  %2902 = vmatprep.mubr.msk.bf16.mxu0 %vm3334_vm0, %v3333_v1  ;;  %v1297_v47 = vrot.slane %v1295_v40, 1 }
  0x40   : > { %2914 = vmatprep.mubr.msk.bf16.mxu1 %vm3334_vm0, %v3333_v1 }
  0x41   : > { %2897 = vmatpush3.bf16.msra.mxu0 %v3580_v44  ;;  %v1298_v51 = vor.u32 %v1297_v47, %v1293_v43 }
  0x42   : > { %2909 = vmatpush3.bf16.msra.mxu1 %v3587_v45  ;;  %2898 = vmatprep.subr.bf16.mxu0 %v3333_v1 }
  0x43   : > { %2910 = vmatprep.subr.bf16.mxu1 %v3333_v1 }
  0x45   : > { %2899 = vmatpush3.bf16.msra.mxu0 %v3595_v46 }
  0x46   : > { %2911 = vmatpush3.bf16.msra.mxu1 %v3605_v48  ;;  %2900 = vmatprep.subr.bf16.mxu0 %v3333_v1 }
  0x47   : > { %2912 = vmatprep.subr.bf16.mxu1 %v3333_v1 }
  0x49   : > { %2901 = vmatpush3.bf16.msra.mxu0 %v3612_v49 }
  0x4a   : > { %2913 = vmatpush3.bf16.msra.mxu1 %v3619_v52  ;;  %2918 = vmatprep.subr.bf16.mxu0 %v3333_v1 }
  0x4b   : > { %2930 = vmatprep.subr.bf16.mxu1 %v3333_v1 }
  0x4c   : > { %2903 = vmatmul.mubr.msk.bf16.vlgmr.msra.gmra.mxu0 %vm299_vm1, %v2544_v53  ;;  %v1347_v53 = vrot.slane %v3312_v50, 1  ;;  %v3319_v50 = vld [vmem:[%s3413_s29 + $0xc] ss:$0 sps:$4 sm:$0x77]  }
  0x4d   : > { %2915 = vmatmul.mubr.msk.bf16.vlgmr.msra.gmra.mxu1 %vm299_vm1, %v785_v54  ;;  %2919 = vmatpush3.bf16.msra.mxu0 %v3627_v55  ;;  %v3313_v54 = vld [vmem:[%s3413_s29 + $0x8] ss:$0 sps:$4 sm:$0x77]  }
  0x4e   : > { %2931 = vmatpush3.bf16.msra.mxu1 %v3366_v0  ;;  %2920 = vmatprep.subr.bf16.mxu0 %v3333_v1  ;;  %v1419_v57 = vshll.u32 %v3313_v54, 16  ;;  %v1417_v59 = vshrl.u32 %v3313_v54, 16 }
  0x4f   : > { %2932 = vmatprep.subr.bf16.mxu1 %v3333_v1  ;;  %2926 = vmatprep.mubr.msk.bf16.mxu0 %vm3334_vm0, %v3333_v1 }
  0x50   : > { %2938 = vmatprep.mubr.msk.bf16.mxu1 %vm3334_vm0, %v3333_v1  ;;  %v1421_v60 = vrot.slane %v1419_v57, 1 }
  0x51   : > { %2921 = vmatpush3.bf16.msra.mxu0 %v3638_v56 }
  0x52   : > { %2933 = vmatpush3.bf16.msra.mxu1 %v3379_v3  ;;  %2922 = vmatprep.subr.bf16.mxu0 %v3333_v1  ;;  %v1422_v62 = vor.u32 %v1421_v60, %v1417_v59  ;;  %v1884_v59 = vshll.u32 %v3319_v50, 16 }
  0x53   : > { %2934 = vmatprep.subr.bf16.mxu1 %v3333_v1 }
  0x55   : > { %2923 = vmatpush3.bf16.msra.mxu0 %v3652_v58 }
  0x56   : > { %2935 = vmatpush3.bf16.msra.mxu1 %v3399_v5  ;;  %2924 = vmatprep.subr.bf16.mxu0 %v3333_v1 }
  0x57   : > { %2936 = vmatprep.subr.bf16.mxu1 %v3333_v1 }
  0x59   : > { %2925 = vmatpush3.bf16.msra.mxu0 %v3662_v61 }
  0x5a   : > { %2937 = vmatpush3.bf16.msra.mxu1 %v3418_v7  ;;  %2942 = vmatprep.subr.bf16.mxu0 %v3333_v1 }
  0x5b   : > { %2954 = vmatprep.subr.bf16.mxu1 %v3333_v1 }
  0x5c   : > { %2927 = vmatmul.mubr.msk.bf16.vlgmr.msra.gmra.mxu0 %vm299_vm1, %v858_v8  ;;  %v3314_v8 = vld [vmem:[%s3413_s29 + $0x8] ss:$0 sps:$4 sm:$0x66]  }
  0x5d   : > { %2939 = vmatmul.mubr.msk.bf16.vlgmr.msra.gmra.mxu1 %vm299_vm1, %v957_v10  ;;  %2943 = vmatpush3.bf16.msra.mxu0 %v3373_v2  ;;  %v1513_v10 = vrot.slane %v3314_v8, 1  ;;  %v1886_v8 = vrot.slane %v1884_v59, 1 }
  0x5e   : > { %2955 = vmatpush3.bf16.msra.mxu1 %v3433_v13  ;;  %2944 = vmatprep.subr.bf16.mxu0 %v3333_v1 }
  0x5f   : > { %2956 = vmatprep.subr.bf16.mxu1 %v3333_v1  ;;  %2950 = vmatprep.mubr.msk.bf16.mxu0 %vm3334_vm0, %v3333_v1 }
  0x60   : > { %2962 = vmatprep.mubr.msk.bf16.mxu1 %vm3334_vm0, %v3333_v1 }
  0x61   : > { %2945 = vmatpush3.bf16.msra.mxu0 %v3388_v4 }
  0x62   : > { %2957 = vmatpush3.bf16.msra.mxu1 %v3451_v17  ;;  %2946 = vmatprep.subr.bf16.mxu0 %v3333_v1 }
  0x63   : > { %2958 = vmatprep.subr.bf16.mxu1 %v3333_v1 }
  0x65   : > { %2947 = vmatpush3.bf16.msra.mxu0 %v3407_v6 }
  0x66   : > { %2959 = vmatpush3.bf16.msra.mxu1 %v3469_v19  ;;  %2948 = vmatprep.subr.bf16.mxu0 %v3333_v1 }
  0x67   : > { %2960 = vmatprep.subr.bf16.mxu1 %v3333_v1 }
  0x69   : > { %2949 = vmatpush3.bf16.msra.mxu0 %v3425_v9 }
  0x6a   : > { %2961 = vmatpush3.bf16.msra.mxu1 %v3484_v22  ;;  %2966 = vmatprep.subr.bf16.mxu0 %v3333_v1 }
  0x6b   : > { %2978 = vmatprep.subr.bf16.mxu1 %v3333_v1 }
  0x6c   : > { %2951 = vmatmul.mubr.msk.bf16.vlgmr.msra.gmra.mxu0 %vm299_vm1, %v2564_v12  ;;  %v3315_v12 = vld [vmem:[%s3413_s29 + $0xc] ss:$0 sps:$4 sm:$0x77]  }
  0x6d   : > { %2963 = vmatmul.mubr.msk.bf16.vlgmr.msra.gmra.mxu1 %vm299_vm1, %v1048_v15  ;;  %2967 = vmatpush3.bf16.msra.mxu0 %v3439_v14  ;;  %v1610_v15 = vshll.u32 %v3315_v12, 16  ;;  %v1608_v16 = vshrl.u32 %v3315_v12, 16 }
  0x6e   : > { %2979 = vmatpush3.bf16.msra.mxu1 %v3499_v26  ;;  %2968 = vmatprep.subr.bf16.mxu0 %v3333_v1 }
  0x6f   : > { %2980 = vmatprep.subr.bf16.mxu1 %v3333_v1  ;;  %2974 = vmatprep.mubr.msk.bf16.mxu0 %vm3334_vm0, %v3333_v1  ;;  %v1612_v21 = vrot.slane %v1610_v15, 1 }
  0x70   : > { %2986 = vmatprep.mubr.msk.bf16.mxu1 %vm3334_vm0, %v3333_v1 }
  0x71   : > { %2969 = vmatpush3.bf16.msra.mxu0 %v3458_v18  ;;  %v1613_v25 = vor.u32 %v1612_v21, %v1608_v16  ;;  %v3320_v21 = vld [vmem:[%s3413_s29 + $0xc] ss:$0 sps:$4 sm:$0x66]  }
  0x72   : > { %2981 = vmatpush3.bf16.msra.mxu1 %v3516_v29  ;;  %2970 = vmatprep.subr.bf16.mxu0 %v3333_v1 }
  0x73   : > { %2982 = vmatprep.subr.bf16.mxu1 %v3333_v1 }
  0x75   : > { %2971 = vmatpush3.bf16.msra.mxu0 %v3476_v20 }
  0x76   : > { %2983 = vmatpush3.bf16.msra.mxu1 %v3534_v32  ;;  %2972 = vmatprep.subr.bf16.mxu0 %v3333_v1 }
  0x77   : > { %2984 = vmatprep.subr.bf16.mxu1 %v3333_v1 }
  0x79   : > { %2973 = vmatpush3.bf16.msra.mxu0 %v3491_v23 }
  0x7a   : > { %2985 = vmatpush3.bf16.msra.mxu1 %v3548_v36  ;;  %2990 = vmatprep.subr.bf16.mxu0 %v3333_v1 }
  0x7b   : > { %3002 = vmatprep.subr.bf16.mxu1 %v3333_v1 }
  0x7c   : > { %2975 = vmatmul.mubr.msk.bf16.vlgmr.msra.gmra.mxu0 %vm299_vm1, %v2572_v28  ;;  %v1662_v28 = vrot.slane %v3316_v24, 1 }
  0x7d   : > { %2987 = vmatmul.mubr.msk.bf16.vlgmr.msra.gmra.mxu1 %vm299_vm1, %v1148_v31  ;;  %2991 = vmatpush3.bf16.msra.mxu0 %v3506_v27  ;;  %v3317_v31 = vld [vmem:[%s3413_s29 + $0x10] ss:$0 sps:$4 sm:$0x77]  }
  0x7e   : > { %3003 = vmatpush3.bf16.msra.mxu1 %v3563_v41  ;;  %2992 = vmatprep.subr.bf16.mxu0 %v3333_v1  ;;  %v1760_v34 = vshll.u32 %v3317_v31, 16 }
  0x7f   : > { %3004 = vmatprep.subr.bf16.mxu1 %v3333_v1  ;;  %2998 = vmatprep.mubr.msk.bf16.mxu0 %vm3334_vm0, %v3333_v1 }
  0x80   : > { %3010 = vmatprep.mubr.msk.bf16.mxu1 %vm3334_vm0, %v3333_v1 }
  0x81   : > { %2993 = vmatpush3.bf16.msra.mxu0 %v3523_v30 }
  0x82   : > { %3005 = vmatpush3.bf16.msra.mxu1 %v3580_v44  ;;  %2994 = vmatprep.subr.bf16.mxu0 %v3333_v1 }
  0x83   : > { %3006 = vmatprep.subr.bf16.mxu1 %v3333_v1 }
  0x85   : > { %2995 = vmatpush3.bf16.msra.mxu0 %v3541_v33 }
  0x86   : > { %3007 = vmatpush3.bf16.msra.mxu1 %v3595_v46  ;;  %2996 = vmatprep.subr.bf16.mxu0 %v3333_v1 }
  0x87   : > { %3008 = vmatprep.subr.bf16.mxu1 %v3333_v1 }
  0x89   : > { %2997 = vmatpush3.bf16.msra.mxu0 %v3556_v38 }
  0x8a   : > { %3009 = vmatpush3.bf16.msra.mxu1 %v3612_v49  ;;  %3014 = vmatprep.subr.bf16.mxu0 %v3333_v1 }
  0x8b   : > { %3026 = vmatprep.subr.bf16.mxu1 %v3333_v1 }
  0x8c   : > { %2999 = vmatmul.mubr.msk.bf16.vlgmr.msra.gmra.mxu0 %vm299_vm1, %v1197_v35  ;;  %v1758_v35 = vshrl.u32 %v3317_v31, 16 }
  0x8d   : > { %3011 = vmatmul.mubr.msk.bf16.vlgmr.msra.gmra.mxu1 %vm299_vm1, %v2580_v37  ;;  %3015 = vmatpush3.bf16.msra.mxu0 %v3570_v42  ;;  %v1762_v37 = vrot.slane %v1760_v34, 1 }
  0x8e   : > { %3027 = vmatpush3.bf16.msra.mxu1 %v3627_v55  ;;  %3016 = vmatprep.subr.bf16.mxu0 %v3333_v1 }
  0x8f   : > { %3028 = vmatprep.subr.bf16.mxu1 %v3333_v1  ;;  %3022 = vmatprep.mubr.msk.bf16.mxu0 %vm3334_vm0, %v3333_v1  ;;  %v1763_v40 = vor.u32 %v1762_v37, %v1758_v35 }
  0x90   : > { %3034 = vmatprep.mubr.msk.bf16.mxu1 %vm3334_vm0, %v3333_v1 }
  0x91   : > { %3017 = vmatpush3.bf16.msra.mxu0 %v3587_v45 }
  0x92   : > { %3029 = vmatpush3.bf16.msra.mxu1 %v3638_v56  ;;  %3018 = vmatprep.subr.bf16.mxu0 %v3333_v1 }
  0x93   : > { %3030 = vmatprep.subr.bf16.mxu1 %v3333_v1 }
  0x95   : > { %3019 = vmatpush3.bf16.msra.mxu0 %v3605_v48 }
  0x96   : > { %3031 = vmatpush3.bf16.msra.mxu1 %v3652_v58  ;;  %3020 = vmatprep.subr.bf16.mxu0 %v3333_v1 }
  0x97   : > { %3032 = vmatprep.subr.bf16.mxu1 %v3333_v1 }
  0x99   : > { %3021 = vmatpush3.bf16.msra.mxu0 %v3619_v52 }
  0x9a   : > { %3033 = vmatpush3.bf16.msra.mxu1 %v3662_v61  ;;  %3038 = vmatprep.subr.bf16.mxu0 %v3333_v1 }
  0x9b   : > { %3050 = vmatprep.subr.bf16.mxu1 %v3333_v1 }
  0x9c   : > { %3023 = vmatmul.mubr.msk.bf16.vlgmr.msra.gmra.mxu0 %vm299_vm1, %v1298_v51 }
  0x9d   : > { %3035 = vmatmul.mubr.msk.bf16.vlgmr.msra.gmra.mxu1 %vm299_vm1, %v1347_v53  ;;  %3039 = vmatpush3.bf16.msra.mxu0 %v3366_v0 }
  0x9e   : > { %3051 = vmatpush3.bf16.msra.mxu1 %v3373_v2  ;;  %3040 = vmatprep.subr.bf16.mxu0 %v3333_v1 }
  0x9f   : > { %3052 = vmatprep.subr.bf16.mxu1 %v3333_v1  ;;  %3046 = vmatprep.mubr.msk.bf16.mxu0 %vm3334_vm0, %v3333_v1 }
  0xa0   : > { %3058 = vmatprep.mubr.msk.bf16.mxu1 %vm3334_vm0, %v3333_v1 }
  0xa1   : > { %3041 = vmatpush3.bf16.msra.mxu0 %v3379_v3 }
  0xa2   : > { %3053 = vmatpush3.bf16.msra.mxu1 %v3388_v4  ;;  %3042 = vmatprep.subr.bf16.mxu0 %v3333_v1 }
  0xa3   : > { %3054 = vmatprep.subr.bf16.mxu1 %v3333_v1 }
  0xa5   : > { %3043 = vmatpush3.bf16.msra.mxu0 %v3399_v5 }
  0xa6   : > { %3055 = vmatpush3.bf16.msra.mxu1 %v3407_v6  ;;  %3044 = vmatprep.subr.bf16.mxu0 %v3333_v1 }
  0xa7   : > { %3056 = vmatprep.subr.bf16.mxu1 %v3333_v1 }
  0xa9   : > { %3045 = vmatpush3.bf16.msra.mxu0 %v3418_v7 }
  0xaa   : > { %3057 = vmatpush3.bf16.msra.mxu1 %v3425_v9  ;;  %3062 = vmatprep.subr.bf16.mxu0 %v3333_v1 }
  0xab   : > { %3074 = vmatprep.subr.bf16.mxu1 %v3333_v1 }
  0xac   : > { %3047 = vmatmul.mubr.msk.bf16.vlgmr.msra.gmra.mxu0 %vm299_vm1, %v1422_v62  ;;  %v3318_v62 = vld [vmem:[%s3413_s29 + $0x10] ss:$0 sps:$4 sm:$0x66]  }
  0xad   : > { %3059 = vmatmul.mubr.msk.bf16.vlgmr.msra.gmra.mxu1 %vm299_vm1, %v2589_v63  ;;  %3063 = vmatpush3.bf16.msra.mxu0 %v3433_v13  ;;  %v1882_v63 = vshrl.u32 %v3319_v50, 16 }
  0xae   : > { %3075 = vmatpush3.bf16.msra.mxu1 %v3439_v14  ;;  %3064 = vmatprep.subr.bf16.mxu0 %v3333_v1 }
  0xaf   : > { %3076 = vmatprep.subr.bf16.mxu1 %v3333_v1  ;;  %3070 = vmatprep.mubr.msk.bf16.mxu0 %vm3334_vm0, %v3333_v1 }
  0xb0   : > { %3082 = vmatprep.mubr.msk.bf16.mxu1 %vm3334_vm0, %v3333_v1 }
  0xb1   : > { %3065 = vmatpush3.bf16.msra.mxu0 %v3451_v17 }
  0xb2   : > { %3077 = vmatpush3.bf16.msra.mxu1 %v3458_v18  ;;  %3066 = vmatprep.subr.bf16.mxu0 %v3333_v1 }
  0xb3   : > { %3078 = vmatprep.subr.bf16.mxu1 %v3333_v1 }
  0xb5   : > { %3067 = vmatpush3.bf16.msra.mxu0 %v3469_v19 }
  0xb6   : > { %3079 = vmatpush3.bf16.msra.mxu1 %v3476_v20  ;;  %3068 = vmatprep.subr.bf16.mxu0 %v3333_v1 }
  0xb7   : > { %3080 = vmatprep.subr.bf16.mxu1 %v3333_v1 }
  0xb9   : > { %3069 = vmatpush3.bf16.msra.mxu0 %v3484_v22 }
  0xba   : > { %3081 = vmatpush3.bf16.msra.mxu1 %v3491_v23  ;;  %3086 = vmatprep.subr.bf16.mxu0 %v3333_v1 }
  0xbb   : > { %3098 = vmatprep.subr.bf16.mxu1 %v3333_v1 }
  0xbc   : > { %3071 = vmatmul.mubr.msk.bf16.vlgmr.msra.gmra.mxu0 %vm299_vm1, %v1513_v10  ;;  %v1812_v10 = vrot.slane %v3318_v62, 1 }
  0xbd   : > { %3083 = vmatmul.mubr.msk.bf16.vlgmr.msra.gmra.mxu1 %vm299_vm1, %v2597_v11  ;;  %3087 = vmatpush3.bf16.msra.mxu0 %v3499_v26 }
  0xbe   : > { %3099 = vmatpush3.bf16.msra.mxu1 %v3506_v27  ;;  %3088 = vmatprep.subr.bf16.mxu0 %v3333_v1 }
  0xbf   : > { %3100 = vmatprep.subr.bf16.mxu1 %v3333_v1  ;;  %3094 = vmatprep.mubr.msk.bf16.mxu0 %vm3334_vm0, %v3333_v1 }
  0xc0   : > { %3106 = vmatprep.mubr.msk.bf16.mxu1 %vm3334_vm0, %v3333_v1 }
  0xc1   : > { %3089 = vmatpush3.bf16.msra.mxu0 %v3516_v29 }
  0xc2   : > { %3101 = vmatpush3.bf16.msra.mxu1 %v3523_v30  ;;  %3090 = vmatprep.subr.bf16.mxu0 %v3333_v1 }
  0xc3   : > { %3102 = vmatprep.subr.bf16.mxu1 %v3333_v1 }
  0xc5   : > { %3091 = vmatpush3.bf16.msra.mxu0 %v3534_v32 }
  0xc6   : > { %3103 = vmatpush3.bf16.msra.mxu1 %v3541_v33  ;;  %3092 = vmatprep.subr.bf16.mxu0 %v3333_v1 }
  0xc7   : > { %3104 = vmatprep.subr.bf16.mxu1 %v3333_v1 }
  0xc9   : > { %3093 = vmatpush3.bf16.msra.mxu0 %v3548_v36 }
  0xca   : > { %3105 = vmatpush3.bf16.msra.mxu1 %v3556_v38  ;;  %3110 = vmatprep.subr.bf16.mxu0 %v3333_v1 }
  0xcb   : > { %3122 = vmatprep.subr.bf16.mxu1 %v3333_v1 }
  0xcc   : > { %3095 = vmatmul.mubr.msk.bf16.vlgmr.msra.gmra.mxu0 %vm299_vm1, %v1613_v25 }
  0xcd   : > { %3107 = vmatmul.mubr.msk.bf16.vlgmr.msra.gmra.mxu1 %vm299_vm1, %v1662_v28  ;;  %3111 = vmatpush3.bf16.msra.mxu0 %v3563_v41 }
  0xce   : > { %3123 = vmatpush3.bf16.msra.mxu1 %v3570_v42  ;;  %3112 = vmatprep.subr.bf16.mxu0 %v3333_v1 }
  0xcf   : > { %3124 = vmatprep.subr.bf16.mxu1 %v3333_v1  ;;  %3118 = vmatprep.mubr.msk.bf16.mxu0 %vm3334_vm0, %v3333_v1 }
  0xd0   : > { %3130 = vmatprep.mubr.msk.bf16.mxu1 %vm3334_vm0, %v3333_v1 }
  0xd1   : > { %3113 = vmatpush3.bf16.msra.mxu0 %v3580_v44 }
  0xd2   : > { %3125 = vmatpush3.bf16.msra.mxu1 %v3587_v45  ;;  %3114 = vmatprep.subr.bf16.mxu0 %v3333_v1 }
  0xd3   : > { %3126 = vmatprep.subr.bf16.mxu1 %v3333_v1 }
  0xd5   : > { %3115 = vmatpush3.bf16.msra.mxu0 %v3595_v46 }
  0xd6   : > { %3127 = vmatpush3.bf16.msra.mxu1 %v3605_v48  ;;  %3116 = vmatprep.subr.bf16.mxu0 %v3333_v1 }
  0xd7   : > { %3128 = vmatprep.subr.bf16.mxu1 %v3333_v1 }
  0xd9   : > { %3117 = vmatpush3.bf16.msra.mxu0 %v3612_v49 }
  0xda   : > { %3129 = vmatpush3.bf16.msra.mxu1 %v3619_v52  ;;  %3134 = vmatprep.subr.bf16.mxu0 %v3333_v1 }
  0xdb   : > { %3146 = vmatprep.subr.bf16.mxu1 %v3333_v1 }
  0xdc   : > { %v3863_v43 = vpop.f32.mrf.mxu0  ;;  %3119 = vmatmul.mubr.msk.bf16.vlgmr.msra.gmra.mxu0 %vm299_vm1, %v2605_v39 }
  0xdd   : > { %v3866_v47 = vpop.f32.mrf.mxu1  ;;  %3131 = vmatmul.mubr.msk.bf16.vlgmr.msra.gmra.mxu1 %vm299_vm1, %v1763_v40  ;;  %3135 = vmatpush3.bf16.msra.mxu0 %v3627_v55 }
  0xde   : > { %3147 = vmatpush3.bf16.msra.mxu1 %v3366_v0  ;;  %v2832_v51 = vpop.f32.mrf.mxu0  ;;  %3136 = vmatprep.subr.bf16.mxu0 %v3333_v1 }
  0xdf   : > { %v2844_v53 = vpop.f32.mrf.mxu1  ;;  %3148 = vmatprep.subr.bf16.mxu1 %v3333_v1  ;;  %3142 = vmatprep.mubr.msk.bf16.mxu0 %vm3334_vm0, %v3333_v1  ;;  %v3322_v51 = vld [vmem:[%s3413_s29 + $0x10] ss:$0 sps:$4 sm:$0x66]  }
  0xe0   : > { %v340_v54 = vpop.f32.mrf.mxu0  ;;  %3154 = vmatprep.mubr.msk.bf16.mxu1 %vm3334_vm0, %v3333_v1 }
  0xe1   : > { %v407_v57 = vpop.f32.mrf.mxu1  ;;  %3137 = vmatpush3.bf16.msra.mxu0 %v3638_v56 }
  0xe2   : > { %3149 = vmatpush3.bf16.msra.mxu1 %v3379_v3  ;;  %v2833_v0 = vpop.f32.mrf.mxu0  ;;  %3138 = vmatprep.subr.bf16.mxu0 %v3333_v1  ;;  %v1887_v3 = vor.u32 %v1886_v8, %v1882_v63 }
  0xe3   : > { %v2845_v60 = vpop.f32.mrf.mxu1  ;;  %3150 = vmatprep.subr.bf16.mxu1 %v3333_v1 }
  0xe5   : > { %3139 = vmatpush3.bf16.msra.mxu0 %v3652_v58 }
  0xe6   : > { %3151 = vmatpush3.bf16.msra.mxu1 %v3399_v5  ;;  %3140 = vmatprep.subr.bf16.mxu0 %v3333_v1 }
  0xe7   : > { %3152 = vmatprep.subr.bf16.mxu1 %v3333_v1 }
  0xe9   : > { %3141 = vmatpush3.bf16.msra.mxu0 %v3662_v61 }
  0xea   : > { %3153 = vmatpush3.bf16.msra.mxu1 %v3418_v7  ;;  %3158 = vmatprep.subr.bf16.mxu0 %v3333_v1 }
  0xeb   : > { %3170 = vmatprep.subr.bf16.mxu1 %v3333_v1 }
  0xec   : > { %v3891_v11 = vpop.f32.mrf.mxu0  ;;  %3143 = vmatmul.mubr.msk.bf16.vlgmr.msra.gmra.mxu0 %vm299_vm1, %v1812_v10 }
  0xed   : > { %v3894_v12 = vpop.f32.mrf.mxu1  ;;  %3155 = vmatmul.mubr.msk.bf16.vlgmr.msra.gmra.mxu1 %vm299_vm1, %v1887_v3  ;;  %3159 = vmatpush3.bf16.msra.mxu0 %v3373_v2  ;;  %v3324_v3 = vld [vmem:[%s3413_s29 + $0x14] ss:$0 sps:$4 sm:$0x66]  }
  0xee   : > { %3171 = vmatpush3.bf16.msra.mxu1 %v3433_v13  ;;  %v2856_v5 = vpop.f32.mrf.mxu0  ;;  %3160 = vmatprep.subr.bf16.mxu0 %v3333_v1 }
  0xef   : > { %v2868_v7 = vpop.f32.mrf.mxu1  ;;  %3172 = vmatprep.subr.bf16.mxu1 %v3333_v1  ;;  %3166 = vmatprep.mubr.msk.bf16.mxu0 %vm3334_vm0, %v3333_v1 }
  0xf0   : > { %v479_v15 = vpop.f32.mrf.mxu0  ;;  %3178 = vmatprep.mubr.msk.bf16.mxu1 %vm3334_vm0, %v3333_v1 }
  0xf1   : > { %v549_v16 = vpop.f32.mrf.mxu1  ;;  %3161 = vmatpush3.bf16.msra.mxu0 %v3388_v4  ;;  %v2614_v4 = vld [vmem:[%s3413_s29 + $0xc] sm:$0x3] }
  0xf2   : > { %3173 = vmatpush3.bf16.msra.mxu1 %v3451_v17  ;;  %v2857_v2 = vpop.f32.mrf.mxu0  ;;  %3162 = vmatprep.subr.bf16.mxu0 %v3333_v1  ;;  %v1978_v17 = vrot.slane %v3320_v21, 1 }
  0xf3   : > { %v2869_v13 = vpop.f32.mrf.mxu1  ;;  %3174 = vmatprep.subr.bf16.mxu1 %v3333_v1 }
  0xf5   : > { %3163 = vmatpush3.bf16.msra.mxu0 %v3407_v6 }
  0xf6   : > { %3175 = vmatpush3.bf16.msra.mxu1 %v3469_v19  ;;  %3164 = vmatprep.subr.bf16.mxu0 %v3333_v1  ;;  %v3321_v19 = vld [vmem:[%s3413_s29 + $0x10] ss:$0 sps:$4 sm:$0x77]  }
  0xf7   : > { %3176 = vmatprep.subr.bf16.mxu1 %v3333_v1  ;;  %v2073_v34 = vshrl.u32 %v3321_v19, 16 }
  0xf9   : > { %3165 = vmatpush3.bf16.msra.mxu0 %v3425_v9 }
  0xfa   : > { %3177 = vmatpush3.bf16.msra.mxu1 %v3484_v22  ;;  %3182 = vmatprep.subr.bf16.mxu0 %v3333_v1 }
  0xfb   : > { %3194 = vmatprep.subr.bf16.mxu1 %v3333_v1 }
  0xfc   : > { %v625_v24 = vpop.f32.mrf.mxu0  ;;  %3167 = vmatmul.mubr.msk.bf16.vlgmr.msra.gmra.mxu0 %vm299_vm1, %v2614_v4 }
  0xfd   : > { %v698_v6 = vpop.f32.mrf.mxu1  ;;  %3179 = vmatmul.mubr.msk.bf16.vlgmr.msra.gmra.mxu1 %vm299_vm1, %v1978_v17  ;;  %3183 = vmatpush3.bf16.msra.mxu0 %v3439_v14  ;;  %v2075_v14 = vshll.u32 %v3321_v19, 16 }
  0xfe   : > { %3195 = vmatpush3.bf16.msra.mxu1 %v3499_v26  ;;  %v2880_v9 = vpop.f32.mrf.mxu0  ;;  %3184 = vmatprep.subr.bf16.mxu0 %v3333_v1 }
  0xff   : > { %v2892_v25 = vpop.f32.mrf.mxu1  ;;  %3196 = vmatprep.subr.bf16.mxu1 %v3333_v1  ;;  %3190 = vmatprep.mubr.msk.bf16.mxu0 %vm3334_vm0, %v3333_v1  ;;  %v2077_v35 = vrot.slane %v2075_v14, 1 }
 0x100   : > { %v628_v22 = vpop.f32.mrf.mxu0  ;;  %3202 = vmatprep.mubr.msk.bf16.mxu1 %vm3334_vm0, %v3333_v1 }
 0x101   : > { %v701_v28 = vpop.f32.mrf.mxu1  ;;  %3185 = vmatpush3.bf16.msra.mxu0 %v3458_v18  ;;  %v405_v18 = vadd.f32 %v3866_v47, %v3863_v43  ;;  %v2078_v37 = vor.u32 %v2077_v35, %v2073_v34 }
 0x102   : > { %3197 = vmatpush3.bf16.msra.mxu1 %v3516_v29  ;;  %v2881_v26 = vpop.f32.mrf.mxu0  ;;  %3186 = vmatprep.subr.bf16.mxu0 %v3333_v1  ;;  %v2622_v29 = vld [vmem:[%s3413_s29 + $0x10] sm:$0x3] }
 0x103   : > { %v2893_v31 = vpop.f32.mrf.mxu1  ;;  %3198 = vmatprep.subr.bf16.mxu1 %v3333_v1 }
 0x105   : > { %3187 = vmatpush3.bf16.msra.mxu0 %v3476_v20  ;;  %v482_v20 = vadd.f32 %v3891_v11, %v405_v18 }
 0x106   : > { %3199 = vmatpush3.bf16.msra.mxu1 %v3534_v32  ;;  %3188 = vmatprep.subr.bf16.mxu0 %v3333_v1 }
 0x107   : > { %3200 = vmatprep.subr.bf16.mxu1 %v3333_v1 }
 0x109   : > { %3189 = vmatpush3.bf16.msra.mxu0 %v3491_v23 }
 0x10a   : > { %3201 = vmatpush3.bf16.msra.mxu1 %v3548_v36  ;;  %3206 = vmatprep.subr.bf16.mxu0 %v3333_v1  ;;  %v552_v36 = vadd.f32 %v3894_v12, %v482_v20 }
 0x10b   : > { %3218 = vmatprep.subr.bf16.mxu1 %v3333_v1 }
 0x10c   : > { %v768_v32 = vpop.f32.mrf.mxu0  ;;  %3191 = vmatmul.mubr.msk.bf16.vlgmr.msra.gmra.mxu0 %vm299_vm1, %v2622_v29  ;;  %v631_v47 = vadd.f32 %v625_v24, %v552_v36 }
 0x10d   : > { %v847_v39 = vpop.f32.mrf.mxu1  ;;  %3203 = vmatmul.mubr.msk.bf16.vlgmr.msra.gmra.mxu1 %vm299_vm1, %v2078_v37  ;;  %3207 = vmatpush3.bf16.msra.mxu0 %v3506_v27 }
 0x10e   : > { %3219 = vmatpush3.bf16.msra.mxu1 %v3563_v41  ;;  %v2904_v23 = vpop.f32.mrf.mxu0  ;;  %3208 = vmatprep.subr.bf16.mxu0 %v3333_v1  ;;  %v704_v53 = vadd.f32 %v698_v6, %v631_v47 }
 0x10f   : > { %v2916_v40 = vpop.f32.mrf.mxu1  ;;  %3220 = vmatprep.subr.bf16.mxu1 %v3333_v1  ;;  %3214 = vmatprep.mubr.msk.bf16.mxu0 %vm3334_vm0, %v3333_v1 }
 0x110   : > { %v771_v43 = vpop.f32.mrf.mxu0  ;;  %3226 = vmatprep.mubr.msk.bf16.mxu1 %vm3334_vm0, %v3333_v1  ;;  %v774_v54 = vadd.f32 %v768_v32, %v704_v53 }
 0x111   : > { %v850_v27 = vpop.f32.mrf.mxu1  ;;  %3209 = vmatpush3.bf16.msra.mxu0 %v3523_v30  ;;  %v2127_v30 = vrot.slane %v3322_v51, 1 }
 0x112   : > { %3221 = vmatpush3.bf16.msra.mxu1 %v3580_v44  ;;  %v2905_v41 = vpop.f32.mrf.mxu0  ;;  %3210 = vmatprep.subr.bf16.mxu0 %v3333_v1  ;;  %v2630_v44 = vld [vmem:[%s3413_s29 + $0x14] sm:$0x3]  ;;  %v853_v57 = vadd.f32 %v847_v39, %v774_v54 }
 0x113   : > { %v2917_v50 = vpop.f32.mrf.mxu1  ;;  %3222 = vmatprep.subr.bf16.mxu1 %v3333_v1 }
 0x115   : > { %3211 = vmatpush3.bf16.msra.mxu0 %v3541_v33 }
 0x116   : > { %3223 = vmatpush3.bf16.msra.mxu1 %v3595_v46  ;;  %3212 = vmatprep.subr.bf16.mxu0 %v3333_v1 }
 0x117   : > { %3224 = vmatprep.subr.bf16.mxu1 %v3333_v1 }
 0x119   : > { %3213 = vmatpush3.bf16.msra.mxu0 %v3556_v38  ;;  %v3323_v38 = vld [vmem:[%s3413_s29 + $0x14] ss:$0 sps:$4 sm:$0x77]   ;;  %s2442_s29 = sshll.u32 %s4036_s13, 3 }
 0x11a   : > { %3225 = vmatpush3.bf16.msra.mxu1 %v3612_v49  ;;  %3230 = vmatprep.subr.bf16.mxu0 %v3333_v1  ;;  %v2225_v62 = vshll.u32 %v3323_v38, 16  ;;  %v2223_v8 = vshrl.u32 %v3323_v38, 16  ;;  %s181_s23 = scalar_lea.vmem %s4034_s3, %s2442_s29 }
 0x11b   : > { %3242 = vmatprep.subr.bf16.mxu1 %v3333_v1 }
 0x11c   : > { %v920_v33 = vpop.f32.mrf.mxu0  ;;  %3215 = vmatmul.mubr.msk.bf16.vlgmr.msra.gmra.mxu0 %vm299_vm1, %v2127_v30  ;;  %v2227_v10 = vrot.slane %v2225_v62, 1 }
 0x11d   : > { %v926_v46 = vadd.f32 %v920_v33, %v853_v57  ;;  %v995_v59 = vpop.f32.mrf.mxu1  ;;  %3227 = vmatmul.mubr.msk.bf16.vlgmr.msra.gmra.mxu1 %vm299_vm1, %v2630_v44  ;;  %3231 = vmatpush3.bf16.msra.mxu0 %v3570_v42 }
 0x11e   : > { %3243 = vmatpush3.bf16.msra.mxu1 %v3627_v55  ;;  %v2928_v49 = vpop.f32.mrf.mxu0  ;;  %3232 = vmatprep.subr.bf16.mxu0 %v3333_v1 }
 0x11f   : > { %928 = vst.msk [vmem:[%s3975_s20] sm:$0xf] %vm927_vm2, %v926_v46  ;;  %v2940_v0 = vpop.f32.mrf.mxu1  ;;  %3244 = vmatprep.subr.bf16.mxu1 %v3333_v1  ;;  %3238 = vmatprep.mubr.msk.bf16.mxu0 %vm3334_vm0, %v3333_v1  ;;  %v937_v34 = vmul.f32 %v926_v46, %v926_v46  ;;  %v929_v18 = vsel %vm927_vm2, %v926_v46, 0.0 }
 0x120   : > { %v923_v60 = vpop.f32.mrf.mxu0  ;;  %3250 = vmatprep.mubr.msk.bf16.mxu1 %vm3334_vm0, %v3333_v1  ;;  %v930_v32 = vrot.slane %v929_v18, 4 }
 0x121   : > { %v998_v42 = vpop.f32.mrf.mxu1  ;;  %3233 = vmatpush3.bf16.msra.mxu0 %v3587_v45  ;;  %v2228_v45 = vor.u32 %v2227_v10, %v2223_v8  ;;  %v938_v37 = vsel %vm927_vm2, %v937_v34, 0.0 }
 0x122   : > { %3245 = vmatpush3.bf16.msra.mxu1 %v3638_v56  ;;  %v2929_v55 = vpop.f32.mrf.mxu0  ;;  %3234 = vmatprep.subr.bf16.mxu0 %v3333_v1  ;;  %v2277_v56 = vrot.slane %v3324_v3, 1  ;;  %v939_v39 = vrot.slane %v938_v37, 4  ;;  %v931_v36 = vadd.f32 %v930_v32, %v929_v18 }
 0x123   : > { %v2941_v63 = vpop.f32.mrf.mxu1  ;;  %3246 = vmatprep.subr.bf16.mxu1 %v3333_v1 }
 0x124   : > { %v940_v27 = vadd.f32 %v939_v39, %v938_v37  ;;  %v932_v53 = vrot.slane %v931_v36, 2 }
 0x125   : > { %3235 = vmatpush3.bf16.msra.mxu0 %v3605_v48 }
 0x126   : > { %3247 = vmatpush3.bf16.msra.mxu1 %v3652_v58  ;;  %3236 = vmatprep.subr.bf16.mxu0 %v3333_v1  ;;  %v941_v33 = vrot.slane %v940_v27, 2  ;;  %v933_v0 = vadd.f32 %v932_v53, %v931_v36 }
 0x127   : > { %3248 = vmatprep.subr.bf16.mxu1 %v3333_v1 }
 0x128   : > { %v942_v42 = vadd.f32 %v941_v33, %v940_v27  ;;  %v934_v8 = vrot.slane %v933_v0, 1 }
 0x129   : > { %3237 = vmatpush3.bf16.msra.mxu0 %v3619_v52 }
 0x12a   : > { %3249 = vmatpush3.bf16.msra.mxu1 %v3662_v61 }
 0x12c   : > { %v1038_v11 = vpop.f32.mrf.mxu0  ;;  %3239 = vmatmul.mubr.msk.bf16.vlgmr.msra.gmra.mxu0 %vm299_vm1, %v2228_v45  ;;  %v943_v45 = vrot.slane %v942_v42, 1 }
 0x12d   : > { %v1086_v12 = vpop.f32.mrf.mxu1  ;;  %3251 = vmatmul.mubr.msk.bf16.vlgmr.msra.gmra.mxu1 %vm299_vm1, %v2277_v56  ;;  %v1039_v24 = vadd.f32 %v1038_v11, %v995_v59 }
 0x12e   : > { %v2952_v48 = vpop.f32.mrf.mxu0 }
 0x12f   : > { %v2964_v5 = vpop.f32.mrf.mxu1  ;;  %v1092_v25 = vadd.f32 %v1086_v12, %v1039_v24  ;;  %v935_v12 = vadd.f32 %v934_v8, %v933_v0 }
 0x130   : > { %v1041_v7 = vpop.f32.mrf.mxu0 }
 0x131   : > { %v1089_v58 = vpop.f32.mrf.mxu1 }
 0x132   : > { %v2953_v15 = vpop.f32.mrf.mxu0 }
 0x133   : > { %v2965_v16 = vpop.f32.mrf.mxu1  ;;  %v944_v15 = vadd.f32 %v943_v45, %v942_v42 }
 0x13c   : > { %v1131_v2 = vpop.f32.mrf.mxu0 }
 0x13d   : > { %v1186_v1 = vpop.f32.mrf.mxu1  ;;  %v1137_v14 = vadd.f32 %v1131_v2, %v1092_v25 }
 0x13e   : > { %v2976_v13 = vpop.f32.mrf.mxu0 }
 0x13f   : > { %v2988_v21 = vpop.f32.mrf.mxu1  ;;  %v1192_v29 = vadd.f32 %v1186_v1, %v1137_v14 }
 0x140   : > { %v1134_v52 = vpop.f32.mrf.mxu0 }
 0x141   : > { %v1189_v4 = vpop.f32.mrf.mxu1 }
 0x142   : > { %v2977_v17 = vpop.f32.mrf.mxu0 }
 0x143   : > { %v2989_v61 = vpop.f32.mrf.mxu1 }
 0x14c   : > { %v1235_v6 = vpop.f32.mrf.mxu0 }
 0x14d   : > { %v1281_v19 = vpop.f32.mrf.mxu1  ;;  %v1241_v20 = vadd.f32 %v1235_v6, %v1192_v29 }
 0x14e   : > { %v3000_v9 = vpop.f32.mrf.mxu0 }
 0x14f   : > { %v3012_v22 = vpop.f32.mrf.mxu1  ;;  %v1287_v23 = vadd.f32 %v1281_v19, %v1241_v20 }
 0x150   : > { %v1238_v28 = vpop.f32.mrf.mxu0 }
 0x151   : > { %v1284_v26 = vpop.f32.mrf.mxu1 }
 0x152   : > { %v3001_v31 = vpop.f32.mrf.mxu0 }
 0x153   : > { %v3013_v35 = vpop.f32.mrf.mxu1 }
 0x15c   : > { %v1336_v40 = vpop.f32.mrf.mxu0 }
 0x15d   : > { %v1342_v43 = vadd.f32 %v1336_v40, %v1287_v23  ;;  %v1385_v47 = vpop.f32.mrf.mxu1 }
 0x15e   : > { %v3024_v41 = vpop.f32.mrf.mxu0 }
 0x15f   : > { %v1391_v50 = vadd.f32 %v1385_v47, %v1342_v43  ;;  %v3036_v51 = vpop.f32.mrf.mxu1 }
 0x160   : > { %v1339_v54 = vpop.f32.mrf.mxu0 }
 0x161   : > { %2588 = vst.msk [vmem:[%s3975_s20 + $0x4] sm:$0xf] %vm927_vm2, %v1391_v50  ;;  %v1394_v30 = vsel %vm927_vm2, %v1391_v50, 0.0  ;;  %v1402_v44 = vmul.f32 %v1391_v50, %v1391_v50  ;;  %v1388_v57 = vpop.f32.mrf.mxu1 }
 0x162   : > { %v1395_v38 = vrot.slane %v1394_v30, 4  ;;  %v3025_v46 = vpop.f32.mrf.mxu0 }
 0x163   : > { %v1403_v59 = vsel %vm927_vm2, %v1402_v44, 0.0  ;;  %v3037_v49 = vpop.f32.mrf.mxu1 }
 0x164   : > { %v1396_v60 = vadd.f32 %v1395_v38, %v1394_v30  ;;  %v1404_v62 = vrot.slane %v1403_v59, 4 }
 0x166   : > { %v1397_v55 = vrot.slane %v1396_v60, 2  ;;  %v1405_v63 = vadd.f32 %v1404_v62, %v1403_v59 }
 0x168   : > { %v1398_v10 = vadd.f32 %v1397_v55, %v1396_v60  ;;  %v1406_v3 = vrot.slane %v1405_v63, 2 }
 0x16a   : > { %v1399_v56 = vrot.slane %v1398_v10, 1  ;;  %v1407_v11 = vadd.f32 %v1406_v3, %v1405_v63 }
 0x16c   : > { %v1400_v48 = vadd.f32 %v1399_v56, %v1398_v10  ;;  %v1408_v5 = vrot.slane %v1407_v11, 1  ;;  %v1460_v7 = vpop.f32.mrf.mxu0 }
 0x16d   : > { %v1503_v58 = vpop.f32.mrf.mxu1 }
 0x16e   : > { %v4009_v16 = vadd.f32 %v1400_v48, %v935_v12  ;;  %v1409_v2 = vadd.f32 %v1408_v5, %v1407_v11  ;;  %v3048_v1 = vpop.f32.mrf.mxu0  ;;  %v1504_v32 = vadd.f32 %v1503_v58, %v1460_v7 }
 0x16f   : > { %v3060_v13 = vpop.f32.mrf.mxu1 }
 0x170   : > { %v4011_v21 = vadd.f32 %v1409_v2, %v944_v15  ;;  %v1463_v52 = vpop.f32.mrf.mxu0 }
 0x171   : > { %v1506_v4 = vpop.f32.mrf.mxu1 }
 0x172   : > { %v3049_v17 = vpop.f32.mrf.mxu0 }
 0x173   : > { %v3061_v61 = vpop.f32.mrf.mxu1 }
 0x17c   : > { %v1551_v24 = vpop.f32.mrf.mxu0 }
 0x17d   : > { %v1596_v6 = vpop.f32.mrf.mxu1  ;;  %v1557_v39 = vadd.f32 %v1551_v24, %v1504_v32 }
 0x17e   : > { %v3072_v19 = vpop.f32.mrf.mxu0 }
 0x17f   : > { %v3084_v9 = vpop.f32.mrf.mxu1  ;;  %v1602_v43 = vadd.f32 %v1596_v6, %v1557_v39 }
 0x180   : > { %v1554_v25 = vpop.f32.mrf.mxu0 }
 0x181   : > { %v1599_v22 = vpop.f32.mrf.mxu1 }
 0x182   : > { %v3073_v28 = vpop.f32.mrf.mxu0 }
 0x183   : > { %v3085_v14 = vpop.f32.mrf.mxu1 }
 0x18c   : > { %v1651_v26 = vpop.f32.mrf.mxu0 }
 0x18d   : > { %v1700_v31 = vpop.f32.mrf.mxu1  ;;  %v1657_v41 = vadd.f32 %v1651_v26, %v1602_v43 }
 0x18e   : > { %v3096_v34 = vpop.f32.mrf.mxu0 }
 0x18f   : > { %v3108_v35 = vpop.f32.mrf.mxu1  ;;  %v1706_v54 = vadd.f32 %v1700_v31, %v1657_v41 }
 0x190   : > { %v1654_v18 = vpop.f32.mrf.mxu0 }
 0x191   : > { %v1703_v29 = vpop.f32.mrf.mxu1 }
 0x192   : > { %v3097_v37 = vpop.f32.mrf.mxu0 }
 0x193   : > { %v3109_v20 = vpop.f32.mrf.mxu1 }
 0x19c   : > { %v1746_v23 = vpop.f32.mrf.mxu0 }
 0x19d   : > { %v1801_v36 = vpop.f32.mrf.mxu1  ;;  %v1752_v30 = vadd.f32 %v1746_v23, %v1706_v54 }
 0x19e   : > { %v3120_v40 = vpop.f32.mrf.mxu0 }
 0x19f   : > { %v3132_v47 = vpop.f32.mrf.mxu1  ;;  %v1807_v44 = vadd.f32 %v1801_v36, %v1752_v30 }
 0x1a0   : > { %v1749_v27 = vpop.f32.mrf.mxu0 }
 0x1a1   : > { %v1804_v50 = vpop.f32.mrf.mxu1 }
 0x1a2   : > { %v3121_v51 = vpop.f32.mrf.mxu0 }
 0x1a3   : > { %v3133_v53 = vpop.f32.mrf.mxu1 }
 0x1ac   : > { %v1850_v57 = vpop.f32.mrf.mxu0 }
 0x1ad   : > { %v1856_v33 = vadd.f32 %v1850_v57, %v1807_v44  ;;  %v1925_v38 = vpop.f32.mrf.mxu1 }
 0x1ae   : > { %v3144_v46 = vpop.f32.mrf.mxu0 }
 0x1af   : > { %2613 = vst.msk [vmem:[%s3975_s20 + $0x8] sm:$0xf] %vm927_vm2, %v1856_v33  ;;  %v1859_v59 = vsel %vm927_vm2, %v1856_v33, 0.0  ;;  %v1867_v49 = vmul.f32 %v1856_v33, %v1856_v33  ;;  %v3156_v0 = vpop.f32.mrf.mxu1 }
 0x1b0   : > { %v1860_v60 = vrot.slane %v1859_v59, 4  ;;  %v1853_v62 = vpop.f32.mrf.mxu0 }
 0x1b1   : > { %v1868_v42 = vsel %vm927_vm2, %v1867_v49, 0.0  ;;  %v1928_v55 = vpop.f32.mrf.mxu1  ;;  %v2341_v62 = vlaneseq }
 0x1b2   : > { %v1861_v63 = vadd.f32 %v1860_v60, %v1859_v59  ;;  %v1869_v8 = vrot.slane %v1868_v42, 4  ;;  %v3145_v10 = vpop.f32.mrf.mxu0 }
 0x1b3   : > { %v3157_v3 = vpop.f32.mrf.mxu1  ;;  %v2342_v10 = vshrl.u32 %v2341_v62, 7 }
 0x1b4   : > { %v1862_v45 = vrot.slane %v1861_v63, 2  ;;  %v1870_v56 = vadd.f32 %v1869_v8, %v1868_v42 }
 0x1b5   : > { %vm2343_vm3 = vcmp.eq.s32.totalorder %v2342_v10, 0  ;;  %vm2345_vm4 = vcmp.eq.s32.totalorder %v2342_v10, 1 }
 0x1b6   : > { %v1863_v11 = vadd.f32 %v1862_v45, %v1861_v63  ;;  %v1871_v12 = vrot.slane %v1870_v56, 2 }
 0x1b8   : > { %v1864_v48 = vrot.slane %v1863_v11, 1  ;;  %v1872_v5 = vadd.f32 %v1871_v12, %v1870_v56 }
 0x1ba   : > { %v1865_v7 = vadd.f32 %v1864_v48, %v1863_v11  ;;  %v1873_v58 = vrot.slane %v1872_v5, 1 }
 0x1bc   : > { %v1866_v15 = vadd.f32 %v1865_v7, %v4009_v16  ;;  %v1874_v2 = vadd.f32 %v1873_v58, %v1872_v5  ;;  %v1968_v1 = vpop.f32.mrf.mxu0 }
 0x1bd   : > { %v2016_v13 = vpop.f32.mrf.mxu1  ;;  %v1969_v16 = vadd.f32 %v1968_v1, %v1925_v38 }
 0x1be   : > { %v1875_v52 = vadd.f32 %v1874_v2, %v4011_v21  ;;  %v3168_v4 = vpop.f32.mrf.mxu0 }
 0x1bf   : > { %v3180_v17 = vpop.f32.mrf.mxu1  ;;  %v2022_v37 = vadd.f32 %v2016_v13, %v1969_v16 }
 0x1c0   : > { %v1971_v61 = vpop.f32.mrf.mxu0 }
 0x1c1   : > { %v2019_v24 = vpop.f32.mrf.mxu1 }
 0x1c2   : > { %v3169_v6 = vpop.f32.mrf.mxu0 }
 0x1c3   : > { %v3181_v19 = vpop.f32.mrf.mxu1 }
 0x1cc   : > { %v2061_v9 = vpop.f32.mrf.mxu0 }
 0x1cd   : > { %v2116_v25 = vpop.f32.mrf.mxu1  ;;  %v2067_v32 = vadd.f32 %v2061_v9, %v2022_v37 }
 0x1ce   : > { %v3192_v22 = vpop.f32.mrf.mxu0 }
 0x1cf   : > { %v3204_v28 = vpop.f32.mrf.mxu1  ;;  %v2122_v40 = vadd.f32 %v2116_v25, %v2067_v32 }
 0x1d0   : > { %v2064_v14 = vpop.f32.mrf.mxu0 }
 0x1d1   : > { %v2119_v26 = vpop.f32.mrf.mxu1 }
 0x1d2   : > { %v3193_v31 = vpop.f32.mrf.mxu0 }
 0x1d3   : > { %v3205_v34 = vpop.f32.mrf.mxu1 }
 0x1dc   : > { %v2165_v35 = vpop.f32.mrf.mxu0 }
 0x1dd   : > { %v2211_v18 = vpop.f32.mrf.mxu1  ;;  %v2171_v43 = vadd.f32 %v2165_v35, %v2122_v40 }
 0x1de   : > { %v3216_v29 = vpop.f32.mrf.mxu0 }
 0x1df   : > { %v3228_v21 = vpop.f32.mrf.mxu1  ;;  %v2217_v47 = vadd.f32 %v2211_v18, %v2171_v43 }
 0x1e0   : > { %v2168_v20 = vpop.f32.mrf.mxu0 }
 0x1e1   : > { %v2214_v39 = vpop.f32.mrf.mxu1 }
 0x1e2   : > { %v3217_v23 = vpop.f32.mrf.mxu0 }
 0x1e3   : > { %v3229_v36 = vpop.f32.mrf.mxu1 }
 0x1ec   : > { %v2266_v27 = vpop.f32.mrf.mxu0 }
 0x1ed   : > { %v2272_v41 = vadd.f32 %v2266_v27, %v2217_v47  ;;  %v2315_v50 = vpop.f32.mrf.mxu1 }
 0x1ee   : > { %v3240_v51 = vpop.f32.mrf.mxu0 }
 0x1ef   : > { %v2321_v53 = vadd.f32 %v2315_v50, %v2272_v41  ;;  %v3252_v54 = vpop.f32.mrf.mxu1 }
 0x1f0   : > { %v2269_v30 = vpop.f32.mrf.mxu0 }
 0x1f1   : > { %2638 = vst.msk [vmem:[%s3975_s20 + $0xc] sm:$0xf] %vm927_vm2, %v2321_v53  ;;  %v2324_v44 = vsel %vm927_vm2, %v2321_v53, 0.0  ;;  %v2332_v57 = vmul.f32 %v2321_v53, %v2321_v53  ;;  %v2318_v33 = vpop.f32.mrf.mxu1 }
 0x1f2   : > { %v2325_v38 = vrot.slane %v2324_v44, 4  ;;  %v3241_v46 = vpop.f32.mrf.mxu0 }
 0x1f3   : > { %v2333_v59 = vsel %vm927_vm2, %v2332_v57, 0.0  ;;  %v3253_v49 = vpop.f32.mrf.mxu1 }
 0x1f4   : > { %v2326_v0 = vadd.f32 %v2325_v38, %v2324_v44  ;;  %v2334_v60 = vrot.slane %v2333_v59, 4 }
 0x1f6   : > { %v2327_v42 = vrot.slane %v2326_v0, 2  ;;  %v2335_v55 = vadd.f32 %v2334_v60, %v2333_v59 }
 0x1f8   : > { %v2328_v63 = vadd.f32 %v2327_v42, %v2326_v0  ;;  %v2336_v8 = vrot.slane %v2335_v55, 2 }
 0x1fa   : > { %v2329_v3 = vrot.slane %v2328_v63, 1  ;;  %v2337_v45 = vadd.f32 %v2336_v8, %v2335_v55 }
 0x1fc   : > { %v2330_v56 = vadd.f32 %v2329_v3, %v2328_v63  ;;  %v2338_v11 = vrot.slane %v2337_v45, 1 }
 0x1fe   : > { %v2331_v12 = vadd.f32 %v2330_v56, %v1866_v15  ;;  %v2339_v48 = vadd.f32 %v2338_v11, %v2337_v45 }
 0x200   : > { %v2340_v5 = vadd.f32 %v2339_v48, %v1875_v52  ;;  %v2344_v7 = vsel %vm2343_vm3, %v2331_v12, 0.0 }
 0x202   : > { %v2346_v58 = vsel %vm2345_vm4, %v2340_v5, %v2344_v7 }
 0x203   : > { %2347 = vst.msk [vmem:[%s181_s23] sm:$0xff] %vm299_vm1, %v2346_v58 }
 0x204 PF: > { %s14_s12 = sadd.s32 1, %s3331_s12  }
 0x205   : > { %p11_p4 = scmp.ge.s32.totalorder %s14_s12, 4  }
 0x207   :  { %13 = sbr.rel (!%p11_p4) target bundleno = 1 (0x1), region = 86 }

// kernel: _lambda_.32
= control target key start
LH: loop header
LB: loop body
LE: loop exit
PB: predicated region body
PF: predicated region fallthrough
CT: control target
= control target key end

     0   :  { %v148_v0 = vmov 0.0   ;;  %vm149_vm0 = vmmov 0   ;;  %vm47_vm1 = vcmask 523264   ;;  %v105_v9 = vlaneseq  ;;  %s191_s1 = inlined_call_operand.vmem [shape: bf16[64,128], index: 1, kind: input, shape index: {}]   ;;  %s192_s0 = inlined_call_operand.vmem [shape: bf16[8,64], index: 0, kind: input, shape index: {}]   ;;  %s193_s2 = inlined_call_operand.vmem [shape: f32[8,128], index: 2, kind: output, shape index: {0}]   ;;  %s194_s3 = inlined_call_operand.vmem [shape: f32[1,8,128], index: 3, kind: output, shape index: {1}]  }
   0x1   :  { %130 = vmatprep.subr.bf16.mxu0 %v148_v0  ;;  %v144_v1 = vld [vmem:[%s191_s1 + $0x18] sm:$0xff]   ;;  %138 = vmatprep.mubr.msk.bf16.mxu0 %vm149_vm0, %v148_v0  ;;  %v145_v2 = vld [vmem:[%s191_s1 + $0x10] sm:$0xff]   ;;  %v146_v3 = vld [vmem:[%s191_s1 + $0x8] sm:$0xff]  }
   0x2   :  { %131 = vmatpush3.bf16.msra.mxu0 %v144_v1  ;;  %v147_v4 = vld [vmem:[%s191_s1] sm:$0xff]   ;;  %v106_v16 = vshrl.u32 %v105_v9, 7 }
   0x3   :  { %132 = vmatprep.subr.bf16.mxu0 %v148_v0  ;;  %v14_v5 = vld [vmem:[%s192_s0] sm:$0xf] }
   0x4   :  { %vm107_vm2 = vcmp.eq.s32.totalorder %v106_v16, 0  ;;  %vm109_vm3 = vcmp.eq.s32.totalorder %v106_v16, 1 }
   0x6   :  { %133 = vmatpush3.bf16.msra.mxu0 %v145_v2 }
   0x7   :  { %134 = vmatprep.subr.bf16.mxu0 %v148_v0 }
   0xa   :  { %135 = vmatpush3.bf16.msra.mxu0 %v146_v3 }
   0xb   :  { %136 = vmatprep.subr.bf16.mxu0 %v148_v0 }
   0xe   :  { %137 = vmatpush3.bf16.msra.mxu0 %v147_v4 }
  0x11   :  { %139 = vmatmul.mubr.msk.bf16.vlgmr.msra.gmra.mxu0 %vm47_vm1, %v14_v5 }
  0xd1   :  { %v85_v6 = vpop.f32.mrf.mxu0 }
  0xd2   :  { %91 = vst [vmem:[%s193_s2] sm:$0xff] %v85_v6  ;;  %v92_v7 = vrot.slane %v85_v6, 4  ;;  %v98_v8 = vmul.f32 %v85_v6, %v85_v6 }
  0xd3   :  { %v140_v10 = vpop.f32.mrf.mxu0 }
  0xd4   :  { %v93_v11 = vadd.f32 %v92_v7, %v85_v6  ;;  %v99_v12 = vrot.slane %v98_v8, 4 }
  0xd5   :  { %v88_v13 = vpop.f32.mrf.mxu0 }
  0xd6   :  { %v94_v14 = vrot.slane %v93_v11, 2  ;;  %v100_v15 = vadd.f32 %v99_v12, %v98_v8 }
  0xd7   :  { %v141_v17 = vpop.f32.mrf.mxu0 }
  0xd8   :  { %v95_v18 = vadd.f32 %v94_v14, %v93_v11  ;;  %v101_v19 = vrot.slane %v100_v15, 2 }
  0xda   :  { %v96_v20 = vrot.slane %v95_v18, 1  ;;  %v102_v21 = vadd.f32 %v101_v19, %v100_v15 }
  0xdc   :  { %v97_v22 = vadd.f32 %v96_v20, %v95_v18  ;;  %v103_v23 = vrot.slane %v102_v21, 1 }
  0xde   :  { %v104_v24 = vadd.f32 %v103_v23, %v102_v21  ;;  %v108_v25 = vsel %vm107_vm2, %v97_v22, 0.0 }
  0xe0   :  { %v110_v26 = vsel %vm109_vm3, %v104_v24, %v108_v25 }
  0xe1   :  { %111 = vst [vmem:[%s194_s3] sm:$0xff] %v110_v26 }

// kernel: _lambda_.35
= control target key start
LH: loop header
LB: loop body
LE: loop exit
PB: predicated region body
PF: predicated region fallthrough
CT: control target
= control target key end

     0   :  { %s72_s0 = inlined_call_operand.vmem [shape: f32[8,128], index: 0, kind: input, shape index: {}]   ;;  %s73_s1 = inlined_call_operand.vmem [shape: f32[1,128], index: 1, kind: input, shape index: {}]   ;;  %s74_s2 = inlined_call_operand.vmem [shape: f32[1,128], index: 2, kind: input, shape index: {}]   ;;  %s75_s3 = inlined_call_operand.vmem [shape: bf16[8,128], index: 3, kind: output, shape index: {}]  }
   0x1   :  { %v14_v0 = vld [vmem:[%s72_s0] sm:$0xff] }
   0x2   :  { %v38_v1 = vld [vmem:[%s73_s1] ss:$0 sm:$0xff] }
   0x3   :  { %v39_v2 = vld [vmem:[%s74_s2] ss:$0 sm:$0xff]  ;;  %v22_v3 = vmul.f32 %v38_v1, %v14_v0 }
   0x5   :  { %v30_v4 = vadd.f32 %v39_v2, %v22_v3 }
   0x7   :  { %v31_v5 = vmax.f32 %v30_v4, 0.0 }
   0x9   :  { %v32_v6 = vpack.c.bf16 %v31_v5, %v31_v5 }
   0xb   :  { %33 = vst [vmem:[%s75_s3] sm:$0xf] %v32_v6 }

// kernel: _lambda_.37
= control target key start
LH: loop header
LB: loop body
LE: loop exit
PB: predicated region body
PF: predicated region fallthrough
CT: control target
= control target key end

     0   :  { %s86_s0 = inlined_call_operand.vmem [shape: f32[8,128], index: 0, kind: input, shape index: {}]   ;;  %s87_s1 = inlined_call_operand.vmem [shape: f32[1,128], index: 1, kind: input, shape index: {}]   ;;  %s88_s2 = inlined_call_operand.vmem [shape: f32[1,128], index: 2, kind: input, shape index: {}]   ;;  %s89_s3 = inlined_call_operand.vmem [shape: bf16[8,128], index: 3, kind: input, shape index: {}]   ;;  %s90_s4 = inlined_call_operand.vmem [shape: bf16[8,128], index: 4, kind: output, shape index: {}]  }
   0x1   :  { %v17_v0 = vld [vmem:[%s86_s0] sm:$0xff] }
   0x2   :  { %v44_v1 = vld [vmem:[%s87_s1] ss:$0 sm:$0xff] }
   0x3   :  { %v45_v2 = vld [vmem:[%s88_s2] ss:$0 sm:$0xff]  ;;  %v25_v3 = vmul.f32 %v44_v1, %v17_v0 }
   0x4   :  { %v34_v4 = vld [vmem:[%s89_s3] sm:$0xf] }
   0x5   :  { %v35_v5 = vunpack.c.l.bf16 %v34_v4  ;;  %v33_v6 = vadd.f32 %v45_v2, %v25_v3 }
   0x7   :  { %v36_v7 = vadd.f32 %v35_v5, %v33_v6 }
   0x9   :  { %v37_v8 = vmax.f32 %v36_v7, 0.0 }
   0xb   :  { %v38_v9 = vpack.c.bf16 %v37_v8, %v37_v8 }
   0xd   :  { %39 = vst [vmem:[%s90_s4] sm:$0xf] %v38_v9 }

// kernel: _lambda_.34
= control target key start
LH: loop header
LB: loop body
LE: loop exit
PB: predicated region body
PF: predicated region fallthrough
CT: control target
= control target key end

     0   :  { %s2052_s12 = smov 0   ;;  %s2482_s0 = inlined_call_operand.vmem [shape: bf16[2,12,3,64], index: 0, kind: input, shape index: {}]   ;;  %s2483_s1 = inlined_call_operand.vmem [shape: bf16[3,3,64,128], index: 1, kind: input, shape index: {}]   ;;  %s2484_s2 = inlined_call_operand.vmem [shape: f32[2,2,2,128], index: 2, kind: output, shape index: {0}]   ;;  %s2485_s3 = inlined_call_operand.vmem [shape: f32[2,8,128], index: 3, kind: output, shape index: {1}]  }
   0x1 LB: > { %s1516_s13 = sadd.s32 4294967295, %s2028_s12   ;;  %p1520_p0 = scmp.ge.s32.totalorder %s2028_s12, 1  ;;  %s2028_s12 = sphi %s2052_s12, %s14_s12  }
   0x2   : > { %p140_p1 = scmp.lt.s32.totalorder %s2028_s12, 3 }
   0x4   : > { %p141_p2 = pnand %p1520_p0, %p140_p1 }
   0x5   : > { %p168_p3 = scmp.lt.s32.totalorder (!%p141_p2), %s1516_s13, 1 }
   0x6   : > { %144 = sbr.rel (%p141_p2) target bundleno = 372 (0x174), region = 28 }
   0xb   : > { %v2063_v0 = vld [vmem:[%s2483_s1 + $0x38] sm:$0xff]   ;;  %v2030_v1 = vmov 0.0   ;;  %v2076_v3 = vld [vmem:[%s2483_s1 + $0x30] sm:$0xff]   ;;  %vm2031_vm0 = vmmov 0   ;;  %s2487_s13 = smov (!%p168_p3, %s1516_s13), 1  ;;  %v2096_v5 = vld [vmem:[%s2483_s1 + $0x28] sm:$0xff]  }
   0xc   : > { %1759 = vmatprep.subr.bf16.mxu0 %v2030_v1  ;;  %1771 = vmatprep.subr.bf16.mxu1 %v2030_v1  ;;  %v2070_v2 = vld [vmem:[%s2483_s1 + $0x18] sm:$0xff]   ;;  %v2085_v4 = vld [vmem:[%s2483_s1 + $0x10] sm:$0xff]   ;;  %s1975_s24 = smul.u32 24, %s2487_s13  ;;  %v2104_v6 = vld [vmem:[%s2483_s1 + $0x8] sm:$0xff]   ;;  %vm290_vm1 = vcmask 523264   ;;  %vm934_vm2 = vcmask 1041408  }
   0xd   : > { %1760 = vmatpush3.bf16.msra.mxu0 %v2063_v0  ;;  %1767 = vmatprep.mubr.msk.bf16.mxu0 %vm2031_vm0, %v2030_v1  ;;  %v2111_v7 = vld [vmem:[%s2483_s1 + $0x20] sm:$0xff]   ;;  %v2129_v9 = vld [vmem:[%s2483_s1 + $0x58] sm:$0xff]   ;;  %v2146_v13 = vld [vmem:[%s2483_s1 + $0x50] sm:$0xff]   ;;  %s1524_s20 = sshll.u32 %s2487_s13, 3 }
   0xe   : > { %1772 = vmatpush3.bf16.msra.mxu1 %v2070_v2  ;;  %1761 = vmatprep.subr.bf16.mxu0 %v2030_v1  ;;  %s2116_s4 = scalar_lea.vmem %s2482_s0, %s1975_s24  ;;  %v2123_v8 = vld [vmem:[%s2483_s1] sm:$0xff]   ;;  %v2139_v12 = vld [vmem:[%s2483_s1 + $0x78] sm:$0xff]   ;;  %v2151_v14 = vld [vmem:[%s2483_s1 + $0x70] sm:$0xff]   ;;  %s181_s23 = scalar_lea.vmem %s2485_s3, %s1524_s20 }
   0xf   : > { %1773 = vmatprep.subr.bf16.mxu1 %v2030_v1  ;;  %1779 = vmatprep.mubr.msk.bf16.mxu1 %vm2031_vm0, %v2030_v1  ;;  %v1589_v10 = vld [vmem:[%s2116_s4 + $0x2] sm:$0x1]  ;;  %v263_v11 = vld [vmem:[%s2116_s4] sm:$0x1]  ;;  %v2167_v17 = vld [vmem:[%s2483_s1 + $0x48] sm:$0xff]  }
  0x10   : > { %v1600_v15 = vld.sshfl [vmem:[%s2116_s4] sm:$0x3 pattern:$0x76325410]  ;;  %v2174_v18 = vld [vmem:[%s2483_s1 + $0x68] sm:$0xff]   ;;  %v2196_v25 = vld [vmem:[%s2483_s1 + $0x98] sm:$0xff]  }
  0x11   : > { %1762 = vmatpush3.bf16.msra.mxu0 %v2076_v3  ;;  %v413_v16 = vshll.u32 %v1600_v15, 16  ;;  %v411_v19 = vshrl.u32 %v1600_v15, 16  ;;  %v2181_v21 = vld [vmem:[%s2483_s1 + $0x40] sm:$0xff]   ;;  %v2203_v26 = vld [vmem:[%s2483_s1 + $0xb8] sm:$0xff]   ;;  %v2210_v27 = vld [vmem:[%s2483_s1 + $0x90] sm:$0xff]  }
  0x12   : > { %1774 = vmatpush3.bf16.msra.mxu1 %v2085_v4  ;;  %1763 = vmatprep.subr.bf16.mxu0 %v2030_v1  ;;  %v2188_v22 = vld [vmem:[%s2483_s1 + $0x60] sm:$0xff]   ;;  %v2220_v29 = vld [vmem:[%s2483_s1 + $0xb0] sm:$0xff]   ;;  %v2231_v30 = vld [vmem:[%s2483_s1 + $0x88] sm:$0xff]  }
  0x13   : > { %1775 = vmatprep.subr.bf16.mxu1 %v2030_v1  ;;  %v415_v20 = vrot.slane %v413_v16, 1  ;;  %v1606_v24 = vld [vmem:[%s2116_s4 + $0x4] sm:$0x1]  ;;  %v2238_v32 = vld [vmem:[%s2483_s1 + $0xa8] sm:$0xff]   ;;  %v1612_v37 = vld [vmem:[%s2116_s4 + $0x6] sm:$0x1] }
  0x14   : > { %v1619_v28 = vld.sshfl [vmem:[%s2116_s4 + $0x4] sm:$0x3 pattern:$0x76325410]  ;;  %v2260_v39 = vld [vmem:[%s2483_s1 + $0xd8] sm:$0xff]   ;;  %v2276_v41 = vld [vmem:[%s2483_s1 + $0xd0] sm:$0xff]  }
  0x15   : > { %1764 = vmatpush3.bf16.msra.mxu0 %v2096_v5  ;;  %v416_v23 = vor.u32 %v415_v20, %v411_v19  ;;  %v637_v31 = vshll.u32 %v1619_v28, 16  ;;  %v2245_v33 = vld [vmem:[%s2483_s1 + $0x80] sm:$0xff]   ;;  %v635_v34 = vshrl.u32 %v1619_v28, 16  ;;  %v2267_v40 = vld [vmem:[%s2483_s1 + $0xf8] sm:$0xff]   ;;  %v2283_v42 = vld [vmem:[%s2483_s1 + $0xf0] sm:$0xff]  }
  0x16   : > { %1776 = vmatpush3.bf16.msra.mxu1 %v2104_v6  ;;  %1765 = vmatprep.subr.bf16.mxu0 %v2030_v1  ;;  %v2252_v36 = vld [vmem:[%s2483_s1 + $0xa0] sm:$0xff]   ;;  %v2294_v43 = vld [vmem:[%s2483_s1 + $0xc8] sm:$0xff]   ;;  %v2323_v48 = vld [vmem:[%s2483_s1 + $0x118] sm:$0xff]  }
  0x17   : > { %1777 = vmatprep.subr.bf16.mxu1 %v2030_v1  ;;  %v639_v35 = vrot.slane %v637_v31, 1  ;;  %v2301_v44 = vld [vmem:[%s2483_s1 + $0xe8] sm:$0xff]   ;;  %v2308_v45 = vld [vmem:[%s2483_s1 + $0xc0] sm:$0xff]   ;;  %v2335_v50 = vld [vmem:[%s2483_s1 + $0x110] sm:$0xff]  }
  0x18   : > { %v2315_v46 = vld [vmem:[%s2483_s1 + $0xe0] sm:$0xff]   ;;  %v1625_v47 = vld [vmem:[%s2116_s4 + $0x8] sm:$0x1]  ;;  %v1631_v49 = vld [vmem:[%s2116_s4 + $0xa] sm:$0x1] }
  0x19   : > { %1766 = vmatpush3.bf16.msra.mxu0 %v2111_v7  ;;  %v640_v38 = vor.u32 %v639_v35, %v635_v34  ;;  %v1638_v51 = vld.sshfl [vmem:[%s2116_s4 + $0x8] sm:$0x3 pattern:$0x76325410]  ;;  %v2358_v56 = vld [vmem:[%s2483_s1 + $0x100] sm:$0xff]  }
  0x1a   : > { %1778 = vmatpush3.bf16.msra.mxu1 %v2123_v8  ;;  %1783 = vmatprep.subr.bf16.mxu0 %v2030_v1  ;;  %v861_v52 = vshll.u32 %v1638_v51, 16  ;;  %v2349_v53 = vld [vmem:[%s2483_s1 + $0x108] sm:$0xff]   ;;  %v859_v54 = vshrl.u32 %v1638_v51, 16 }
  0x1b   : > { %1795 = vmatprep.subr.bf16.mxu1 %v2030_v1  ;;  %v1645_v58 = vld [vmem:[%s2116_s4 + $0xa] sm:$0x1]  ;;  %v1644_v59 = vld [vmem:[%s2116_s4 + $0x8] sm:$0x1]  ;;  %v1651_v60 = vld [vmem:[%s2116_s4 + $0xc] sm:$0x1] }
  0x1c   : > { %1768 = vmatmul.mubr.msk.bf16.vlgmr.msra.gmra.mxu0 %vm290_vm1, %v1589_v10  ;;  %v863_v55 = vrot.slane %v861_v52, 1  ;;  %v1653_v61 = vld [vmem:[%s2116_s4 + $0xe] sm:$0x1] }
  0x1d   : > { %1780 = vmatmul.mubr.msk.bf16.vlgmr.msra.gmra.mxu1 %vm290_vm1, %v263_v11  ;;  %1784 = vmatpush3.bf16.msra.mxu0 %v2129_v9  ;;  %v1656_v62 = vld.sshfl [vmem:[%s2116_s4 + $0xc] sm:$0x3 pattern:$0x76325410] }
  0x1e   : > { %1796 = vmatpush3.bf16.msra.mxu1 %v2139_v12  ;;  %1785 = vmatprep.subr.bf16.mxu0 %v2030_v1  ;;  %v864_v57 = vor.u32 %v863_v55, %v859_v54  ;;  %v1204_v63 = vshll.u32 %v1656_v62, 16 }
  0x1f   : > { %1797 = vmatprep.subr.bf16.mxu1 %v2030_v1  ;;  %1791 = vmatprep.mubr.msk.bf16.mxu0 %vm2031_vm0, %v2030_v1 }
  0x20   : > { %1803 = vmatprep.mubr.msk.bf16.mxu1 %vm2031_vm0, %v2030_v1 }
  0x21   : > { %1786 = vmatpush3.bf16.msra.mxu0 %v2146_v13 }
  0x22   : > { %1798 = vmatpush3.bf16.msra.mxu1 %v2151_v14  ;;  %1787 = vmatprep.subr.bf16.mxu0 %v2030_v1 }
  0x23   : > { %1799 = vmatprep.subr.bf16.mxu1 %v2030_v1 }
  0x25   : > { %1788 = vmatpush3.bf16.msra.mxu0 %v2167_v17 }
  0x26   : > { %1800 = vmatpush3.bf16.msra.mxu1 %v2174_v18  ;;  %1789 = vmatprep.subr.bf16.mxu0 %v2030_v1 }
  0x27   : > { %1801 = vmatprep.subr.bf16.mxu1 %v2030_v1 }
  0x29   : > { %1790 = vmatpush3.bf16.msra.mxu0 %v2181_v21 }
  0x2a   : > { %1802 = vmatpush3.bf16.msra.mxu1 %v2188_v22  ;;  %1807 = vmatprep.subr.bf16.mxu0 %v2030_v1 }
  0x2b   : > { %1819 = vmatprep.subr.bf16.mxu1 %v2030_v1 }
  0x2c   : > { %1792 = vmatmul.mubr.msk.bf16.vlgmr.msra.gmra.mxu0 %vm290_vm1, %v416_v23 }
  0x2d   : > { %1804 = vmatmul.mubr.msk.bf16.vlgmr.msra.gmra.mxu1 %vm290_vm1, %v1606_v24  ;;  %1808 = vmatpush3.bf16.msra.mxu0 %v2196_v25 }
  0x2e   : > { %1820 = vmatpush3.bf16.msra.mxu1 %v2203_v26  ;;  %1809 = vmatprep.subr.bf16.mxu0 %v2030_v1 }
  0x2f   : > { %1821 = vmatprep.subr.bf16.mxu1 %v2030_v1  ;;  %1815 = vmatprep.mubr.msk.bf16.mxu0 %vm2031_vm0, %v2030_v1 }
  0x30   : > { %1827 = vmatprep.mubr.msk.bf16.mxu1 %vm2031_vm0, %v2030_v1 }
  0x31   : > { %1810 = vmatpush3.bf16.msra.mxu0 %v2210_v27 }
  0x32   : > { %1822 = vmatpush3.bf16.msra.mxu1 %v2220_v29  ;;  %1811 = vmatprep.subr.bf16.mxu0 %v2030_v1 }
  0x33   : > { %1823 = vmatprep.subr.bf16.mxu1 %v2030_v1 }
  0x35   : > { %1812 = vmatpush3.bf16.msra.mxu0 %v2231_v30 }
  0x36   : > { %1824 = vmatpush3.bf16.msra.mxu1 %v2238_v32  ;;  %1813 = vmatprep.subr.bf16.mxu0 %v2030_v1 }
  0x37   : > { %1825 = vmatprep.subr.bf16.mxu1 %v2030_v1 }
  0x39   : > { %1814 = vmatpush3.bf16.msra.mxu0 %v2245_v33 }
  0x3a   : > { %1826 = vmatpush3.bf16.msra.mxu1 %v2252_v36  ;;  %1831 = vmatprep.subr.bf16.mxu0 %v2030_v1 }
  0x3b   : > { %1843 = vmatprep.subr.bf16.mxu1 %v2030_v1 }
  0x3c   : > { %1816 = vmatmul.mubr.msk.bf16.vlgmr.msra.gmra.mxu0 %vm290_vm1, %v1612_v37 }
  0x3d   : > { %1828 = vmatmul.mubr.msk.bf16.vlgmr.msra.gmra.mxu1 %vm290_vm1, %v640_v38  ;;  %1832 = vmatpush3.bf16.msra.mxu0 %v2260_v39 }
  0x3e   : > { %1844 = vmatpush3.bf16.msra.mxu1 %v2267_v40  ;;  %1833 = vmatprep.subr.bf16.mxu0 %v2030_v1 }
  0x3f   : > { %1845 = vmatprep.subr.bf16.mxu1 %v2030_v1  ;;  %1839 = vmatprep.mubr.msk.bf16.mxu0 %vm2031_vm0, %v2030_v1 }
  0x40   : > { %1851 = vmatprep.mubr.msk.bf16.mxu1 %vm2031_vm0, %v2030_v1 }
  0x41   : > { %1834 = vmatpush3.bf16.msra.mxu0 %v2276_v41 }
  0x42   : > { %1846 = vmatpush3.bf16.msra.mxu1 %v2283_v42  ;;  %1835 = vmatprep.subr.bf16.mxu0 %v2030_v1 }
  0x43   : > { %1847 = vmatprep.subr.bf16.mxu1 %v2030_v1 }
  0x45   : > { %1836 = vmatpush3.bf16.msra.mxu0 %v2294_v43 }
  0x46   : > { %1848 = vmatpush3.bf16.msra.mxu1 %v2301_v44  ;;  %1837 = vmatprep.subr.bf16.mxu0 %v2030_v1 }
  0x47   : > { %1849 = vmatprep.subr.bf16.mxu1 %v2030_v1 }
  0x49   : > { %1838 = vmatpush3.bf16.msra.mxu0 %v2308_v45 }
  0x4a   : > { %1850 = vmatpush3.bf16.msra.mxu1 %v2315_v46  ;;  %1855 = vmatprep.subr.bf16.mxu0 %v2030_v1 }
  0x4b   : > { %1867 = vmatprep.subr.bf16.mxu1 %v2030_v1 }
  0x4c   : > { %1840 = vmatmul.mubr.msk.bf16.vlgmr.msra.gmra.mxu0 %vm290_vm1, %v1625_v47 }
  0x4d   : > { %1852 = vmatmul.mubr.msk.bf16.vlgmr.msra.gmra.mxu1 %vm290_vm1, %v1631_v49  ;;  %1856 = vmatpush3.bf16.msra.mxu0 %v2323_v48 }
  0x4e   : > { %1868 = vmatpush3.bf16.msra.mxu1 %v2063_v0  ;;  %1857 = vmatprep.subr.bf16.mxu0 %v2030_v1  ;;  %v1202_v0 = vshrl.u32 %v1656_v62, 16 }
  0x4f   : > { %1869 = vmatprep.subr.bf16.mxu1 %v2030_v1  ;;  %1863 = vmatprep.mubr.msk.bf16.mxu0 %vm2031_vm0, %v2030_v1 }
  0x50   : > { %1875 = vmatprep.mubr.msk.bf16.mxu1 %vm2031_vm0, %v2030_v1 }
  0x51   : > { %1858 = vmatpush3.bf16.msra.mxu0 %v2335_v50 }
  0x52   : > { %1870 = vmatpush3.bf16.msra.mxu1 %v2076_v3  ;;  %1859 = vmatprep.subr.bf16.mxu0 %v2030_v1 }
  0x53   : > { %1871 = vmatprep.subr.bf16.mxu1 %v2030_v1 }
  0x55   : > { %1860 = vmatpush3.bf16.msra.mxu0 %v2349_v53 }
  0x56   : > { %1872 = vmatpush3.bf16.msra.mxu1 %v2096_v5  ;;  %1861 = vmatprep.subr.bf16.mxu0 %v2030_v1  ;;  %v1663_v5 = vld.sshfl [vmem:[%s2116_s4 + $0x10] sm:$0x3 pattern:$0x76325410] }
  0x57   : > { %1873 = vmatprep.subr.bf16.mxu1 %v2030_v1 }
  0x59   : > { %1862 = vmatpush3.bf16.msra.mxu0 %v2358_v56 }
  0x5a   : > { %1874 = vmatpush3.bf16.msra.mxu1 %v2111_v7  ;;  %1879 = vmatprep.subr.bf16.mxu0 %v2030_v1  ;;  %v1354_v7 = vshrl.u32 %v1663_v5, 16 }
  0x5b   : > { %1891 = vmatprep.subr.bf16.mxu1 %v2030_v1 }
  0x5c   : > { %1864 = vmatmul.mubr.msk.bf16.vlgmr.msra.gmra.mxu0 %vm290_vm1, %v864_v57 }
  0x5d   : > { %1876 = vmatmul.mubr.msk.bf16.vlgmr.msra.gmra.mxu1 %vm290_vm1, %v1645_v58  ;;  %1880 = vmatpush3.bf16.msra.mxu0 %v2070_v2  ;;  %v1206_v2 = vrot.slane %v1204_v63, 1 }
  0x5e   : > { %1892 = vmatpush3.bf16.msra.mxu1 %v2129_v9  ;;  %1881 = vmatprep.subr.bf16.mxu0 %v2030_v1  ;;  %v1660_v9 = vld [vmem:[%s2116_s4 + $0x12] sm:$0x1] }
  0x5f   : > { %1893 = vmatprep.subr.bf16.mxu1 %v2030_v1  ;;  %1887 = vmatprep.mubr.msk.bf16.mxu0 %vm2031_vm0, %v2030_v1  ;;  %v1207_v3 = vor.u32 %v1206_v2, %v1202_v0 }
  0x60   : > { %1899 = vmatprep.mubr.msk.bf16.mxu1 %vm2031_vm0, %v2030_v1 }
  0x61   : > { %1882 = vmatpush3.bf16.msra.mxu0 %v2085_v4  ;;  %v1658_v4 = vld [vmem:[%s2116_s4 + $0x10] sm:$0x1]  ;;  %s1668_s4 = sshll.u32 %s2487_s13, 2 }
  0x62   : > { %1894 = vmatpush3.bf16.msra.mxu1 %v2146_v13  ;;  %1883 = vmatprep.subr.bf16.mxu0 %v2030_v1  ;;  %s2467_s19 = scalar_lea.vmem %s2484_s2, %s1668_s4 }
  0x63   : > { %1895 = vmatprep.subr.bf16.mxu1 %v2030_v1 }
  0x65   : > { %1884 = vmatpush3.bf16.msra.mxu0 %v2104_v6  ;;  %v1356_v6 = vshll.u32 %v1663_v5, 16 }
  0x66   : > { %1896 = vmatpush3.bf16.msra.mxu1 %v2167_v17  ;;  %1885 = vmatprep.subr.bf16.mxu0 %v2030_v1 }
  0x67   : > { %1897 = vmatprep.subr.bf16.mxu1 %v2030_v1 }
  0x69   : > { %1886 = vmatpush3.bf16.msra.mxu0 %v2123_v8  ;;  %v1358_v8 = vrot.slane %v1356_v6, 1 }
  0x6a   : > { %1898 = vmatpush3.bf16.msra.mxu1 %v2181_v21  ;;  %1903 = vmatprep.subr.bf16.mxu0 %v2030_v1 }
  0x6b   : > { %1915 = vmatprep.subr.bf16.mxu1 %v2030_v1  ;;  %v1359_v10 = vor.u32 %v1358_v8, %v1354_v7 }
  0x6c   : > { %1888 = vmatmul.mubr.msk.bf16.vlgmr.msra.gmra.mxu0 %vm290_vm1, %v1644_v59 }
  0x6d   : > { %1900 = vmatmul.mubr.msk.bf16.vlgmr.msra.gmra.mxu1 %vm290_vm1, %v864_v57  ;;  %1904 = vmatpush3.bf16.msra.mxu0 %v2139_v12 }
  0x6e   : > { %1916 = vmatpush3.bf16.msra.mxu1 %v2196_v25  ;;  %1905 = vmatprep.subr.bf16.mxu0 %v2030_v1 }
  0x6f   : > { %1917 = vmatprep.subr.bf16.mxu1 %v2030_v1  ;;  %1911 = vmatprep.mubr.msk.bf16.mxu0 %vm2031_vm0, %v2030_v1 }
  0x70   : > { %1923 = vmatprep.mubr.msk.bf16.mxu1 %vm2031_vm0, %v2030_v1 }
  0x71   : > { %1906 = vmatpush3.bf16.msra.mxu0 %v2151_v14 }
  0x72   : > { %1918 = vmatpush3.bf16.msra.mxu1 %v2210_v27  ;;  %1907 = vmatprep.subr.bf16.mxu0 %v2030_v1 }
  0x73   : > { %1919 = vmatprep.subr.bf16.mxu1 %v2030_v1 }
  0x75   : > { %1908 = vmatpush3.bf16.msra.mxu0 %v2174_v18 }
  0x76   : > { %1920 = vmatpush3.bf16.msra.mxu1 %v2231_v30  ;;  %1909 = vmatprep.subr.bf16.mxu0 %v2030_v1 }
  0x77   : > { %1921 = vmatprep.subr.bf16.mxu1 %v2030_v1 }
  0x79   : > { %1910 = vmatpush3.bf16.msra.mxu0 %v2188_v22 }
  0x7a   : > { %1922 = vmatpush3.bf16.msra.mxu1 %v2245_v33  ;;  %1927 = vmatprep.subr.bf16.mxu0 %v2030_v1 }
  0x7b   : > { %1939 = vmatprep.subr.bf16.mxu1 %v2030_v1 }
  0x7c   : > { %1912 = vmatmul.mubr.msk.bf16.vlgmr.msra.gmra.mxu0 %vm290_vm1, %v1651_v60 }
  0x7d   : > { %1924 = vmatmul.mubr.msk.bf16.vlgmr.msra.gmra.mxu1 %vm290_vm1, %v1653_v61  ;;  %1928 = vmatpush3.bf16.msra.mxu0 %v2203_v26 }
  0x7e   : > { %1940 = vmatpush3.bf16.msra.mxu1 %v2260_v39  ;;  %1929 = vmatprep.subr.bf16.mxu0 %v2030_v1 }
  0x7f   : > { %1941 = vmatprep.subr.bf16.mxu1 %v2030_v1  ;;  %1935 = vmatprep.mubr.msk.bf16.mxu0 %vm2031_vm0, %v2030_v1 }
  0x80   : > { %1947 = vmatprep.mubr.msk.bf16.mxu1 %vm2031_vm0, %v2030_v1 }
  0x81   : > { %1930 = vmatpush3.bf16.msra.mxu0 %v2220_v29 }
  0x82   : > { %1942 = vmatpush3.bf16.msra.mxu1 %v2276_v41  ;;  %1931 = vmatprep.subr.bf16.mxu0 %v2030_v1 }
  0x83   : > { %1943 = vmatprep.subr.bf16.mxu1 %v2030_v1 }
  0x85   : > { %1932 = vmatpush3.bf16.msra.mxu0 %v2238_v32 }
  0x86   : > { %1944 = vmatpush3.bf16.msra.mxu1 %v2294_v43  ;;  %1933 = vmatprep.subr.bf16.mxu0 %v2030_v1 }
  0x87   : > { %1945 = vmatprep.subr.bf16.mxu1 %v2030_v1 }
  0x89   : > { %1934 = vmatpush3.bf16.msra.mxu0 %v2252_v36 }
  0x8a   : > { %1946 = vmatpush3.bf16.msra.mxu1 %v2308_v45  ;;  %1951 = vmatprep.subr.bf16.mxu0 %v2030_v1 }
  0x8b   : > { %1963 = vmatprep.subr.bf16.mxu1 %v2030_v1 }
  0x8c   : > { %1936 = vmatmul.mubr.msk.bf16.vlgmr.msra.gmra.mxu0 %vm290_vm1, %v1207_v3 }
  0x8d   : > { %1948 = vmatmul.mubr.msk.bf16.vlgmr.msra.gmra.mxu1 %vm290_vm1, %v1658_v4  ;;  %1952 = vmatpush3.bf16.msra.mxu0 %v2267_v40 }
  0x8e   : > { %1964 = vmatpush3.bf16.msra.mxu1 %v2323_v48  ;;  %1953 = vmatprep.subr.bf16.mxu0 %v2030_v1 }
  0x8f   : > { %1965 = vmatprep.subr.bf16.mxu1 %v2030_v1  ;;  %1959 = vmatprep.mubr.msk.bf16.mxu0 %vm2031_vm0, %v2030_v1 }
  0x90   : > { %1971 = vmatprep.mubr.msk.bf16.mxu1 %vm2031_vm0, %v2030_v1 }
  0x91   : > { %1954 = vmatpush3.bf16.msra.mxu0 %v2283_v42 }
  0x92   : > { %1966 = vmatpush3.bf16.msra.mxu1 %v2335_v50  ;;  %1955 = vmatprep.subr.bf16.mxu0 %v2030_v1 }
  0x93   : > { %1967 = vmatprep.subr.bf16.mxu1 %v2030_v1 }
  0x95   : > { %1956 = vmatpush3.bf16.msra.mxu0 %v2301_v44 }
  0x96   : > { %1968 = vmatpush3.bf16.msra.mxu1 %v2349_v53  ;;  %1957 = vmatprep.subr.bf16.mxu0 %v2030_v1 }
  0x97   : > { %1969 = vmatprep.subr.bf16.mxu1 %v2030_v1 }
  0x99   : > { %1958 = vmatpush3.bf16.msra.mxu0 %v2315_v46 }
  0x9a   : > { %1970 = vmatpush3.bf16.msra.mxu1 %v2358_v56 }
  0x9c   : > { %1960 = vmatmul.mubr.msk.bf16.vlgmr.msra.gmra.mxu0 %vm290_vm1, %v1660_v9 }
  0x9d   : > { %1972 = vmatmul.mubr.msk.bf16.vlgmr.msra.gmra.mxu1 %vm290_vm1, %v1359_v10 }
  0xdc   : > { %v328_v11 = vpop.f32.mrf.mxu0 }
  0xdd   : > { %v395_v12 = vpop.f32.mrf.mxu1 }
  0xde   : > { %v1769_v13 = vpop.f32.mrf.mxu0  ;;  %v396_v34 = vadd.f32 %v395_v12, %v328_v11 }
  0xdf   : > { %v1781_v14 = vpop.f32.mrf.mxu1 }
  0xe0   : > { %v331_v15 = vpop.f32.mrf.mxu0 }
  0xe1   : > { %v398_v16 = vpop.f32.mrf.mxu1 }
  0xe2   : > { %v1770_v17 = vpop.f32.mrf.mxu0 }
  0xe3   : > { %v1782_v18 = vpop.f32.mrf.mxu1 }
  0xec   : > { %v478_v19 = vpop.f32.mrf.mxu0 }
  0xed   : > { %v548_v1 = vpop.f32.mrf.mxu1  ;;  %v484_v35 = vadd.f32 %v478_v19, %v396_v34 }
  0xee   : > { %v1793_v20 = vpop.f32.mrf.mxu0 }
  0xef   : > { %v1805_v21 = vpop.f32.mrf.mxu1  ;;  %v554_v39 = vadd.f32 %v548_v1, %v484_v35 }
  0xf0   : > { %v481_v22 = vpop.f32.mrf.mxu0 }
  0xf1   : > { %v551_v23 = vpop.f32.mrf.mxu1 }
  0xf2   : > { %v1794_v24 = vpop.f32.mrf.mxu0 }
  0xf3   : > { %v1806_v25 = vpop.f32.mrf.mxu1 }
  0xfc   : > { %v618_v26 = vpop.f32.mrf.mxu0 }
  0xfd   : > { %v702_v27 = vpop.f32.mrf.mxu1  ;;  %v624_v42 = vadd.f32 %v618_v26, %v554_v39 }
  0xfe   : > { %v1817_v28 = vpop.f32.mrf.mxu0 }
  0xff   : > { %v1829_v29 = vpop.f32.mrf.mxu1  ;;  %v708_v46 = vadd.f32 %v702_v27, %v624_v42 }
 0x100   : > { %v621_v30 = vpop.f32.mrf.mxu0 }
 0x101   : > { %v705_v31 = vpop.f32.mrf.mxu1 }
 0x102   : > { %v1818_v32 = vpop.f32.mrf.mxu0 }
 0x103   : > { %v1830_v33 = vpop.f32.mrf.mxu1 }
 0x10c   : > { %v772_v36 = vpop.f32.mrf.mxu0 }
 0x10d   : > { %v842_v37 = vpop.f32.mrf.mxu1  ;;  %v778_v47 = vadd.f32 %v772_v36, %v708_v46 }
 0x10e   : > { %v1841_v38 = vpop.f32.mrf.mxu0 }
 0x10f   : > { %v1853_v40 = vpop.f32.mrf.mxu1  ;;  %v848_v48 = vadd.f32 %v842_v37, %v778_v47 }
 0x110   : > { %v775_v41 = vpop.f32.mrf.mxu0 }
 0x111   : > { %v845_v43 = vpop.f32.mrf.mxu1 }
 0x112   : > { %v1842_v44 = vpop.f32.mrf.mxu0 }
 0x113   : > { %v1854_v45 = vpop.f32.mrf.mxu1 }
 0x11c   : > { %v926_v49 = vpop.f32.mrf.mxu0 }
 0x11d   : > { %v932_v50 = vadd.f32 %v926_v49, %v848_v48  ;;  %v991_v51 = vpop.f32.mrf.mxu1 }
 0x11e   : > { %v1865_v52 = vpop.f32.mrf.mxu0 }
 0x11f   : > { %933 = vst [vmem:[%s2467_s19] sm:$0x3] %v932_v50  ;;  %v1877_v53 = vpop.f32.mrf.mxu1  ;;  %v943_v20 = vmul.f32 %v932_v50, %v932_v50  ;;  %v935_v22 = vsel %vm934_vm2, %v932_v50, 0.0  ;;  %v1423_v50 = vlaneseq }
 0x120   : > { %v929_v54 = vpop.f32.mrf.mxu0  ;;  %v936_v26 = vrot.slane %v935_v22, 4 }
 0x121   : > { %v994_v55 = vpop.f32.mrf.mxu1  ;;  %v944_v24 = vsel %vm934_vm2, %v943_v20, 0.0 }
 0x122   : > { %v1866_v56 = vpop.f32.mrf.mxu0  ;;  %v945_v27 = vrot.slane %v944_v24, 4  ;;  %v937_v29 = vadd.f32 %v936_v26, %v935_v22 }
 0x123   : > { %v1878_v57 = vpop.f32.mrf.mxu1 }
 0x124   : > { %v946_v33 = vadd.f32 %v945_v27, %v944_v24  ;;  %v938_v37 = vrot.slane %v937_v29, 2  ;;  %v1424_v57 = vshrl.u32 %v1423_v50, 7 }
 0x126   : > { %v947_v42 = vrot.slane %v946_v33, 2  ;;  %v939_v47 = vadd.f32 %v938_v37, %v937_v29  ;;  %vm1425_vm3 = vcmp.eq.s32.totalorder %v1424_v57, 0  ;;  %vm1427_vm4 = vcmp.eq.s32.totalorder %v1424_v57, 1 }
 0x128   : > { %v940_v54 = vrot.slane %v939_v47, 1 }
 0x12c   : > { %v1034_v58 = vpop.f32.mrf.mxu0 }
 0x12d   : > { %v1093_v59 = vpop.f32.mrf.mxu1  ;;  %v1035_v11 = vadd.f32 %v1034_v58, %v991_v51  ;;  %v948_v51 = vadd.f32 %v947_v42, %v946_v33 }
 0x12e   : > { %v1889_v60 = vpop.f32.mrf.mxu0 }
 0x12f   : > { %v1901_v61 = vpop.f32.mrf.mxu1  ;;  %v1099_v15 = vadd.f32 %v1093_v59, %v1035_v11  ;;  %v949_v58 = vrot.slane %v948_v51, 1 }
 0x130   : > { %v1037_v62 = vpop.f32.mrf.mxu0  ;;  %v941_v61 = vadd.f32 %v940_v54, %v939_v47 }
 0x131   : > { %v1096_v63 = vpop.f32.mrf.mxu1 }
 0x132   : > { %v1890_v0 = vpop.f32.mrf.mxu0 }
 0x133   : > { %v1902_v2 = vpop.f32.mrf.mxu1  ;;  %v950_v0 = vadd.f32 %v949_v58, %v948_v51 }
 0x13c   : > { %v1139_v3 = vpop.f32.mrf.mxu0 }
 0x13d   : > { %v1185_v4 = vpop.f32.mrf.mxu1  ;;  %v1145_v18 = vadd.f32 %v1139_v3, %v1099_v15 }
 0x13e   : > { %v1913_v5 = vpop.f32.mrf.mxu0 }
 0x13f   : > { %v1925_v6 = vpop.f32.mrf.mxu1  ;;  %v1191_v23 = vadd.f32 %v1185_v4, %v1145_v18 }
 0x140   : > { %v1142_v7 = vpop.f32.mrf.mxu0 }
 0x141   : > { %v1188_v8 = vpop.f32.mrf.mxu1 }
 0x142   : > { %v1914_v9 = vpop.f32.mrf.mxu0 }
 0x143   : > { %v1926_v10 = vpop.f32.mrf.mxu1 }
 0x14c   : > { %v1245_v12 = vpop.f32.mrf.mxu0 }
 0x14d   : > { %v1291_v13 = vpop.f32.mrf.mxu1  ;;  %v1251_v25 = vadd.f32 %v1245_v12, %v1191_v23 }
 0x14e   : > { %v1937_v14 = vpop.f32.mrf.mxu0 }
 0x14f   : > { %v1949_v16 = vpop.f32.mrf.mxu1  ;;  %v1297_v28 = vadd.f32 %v1291_v13, %v1251_v25 }
 0x150   : > { %v1248_v17 = vpop.f32.mrf.mxu0 }
 0x151   : > { %v1294_v19 = vpop.f32.mrf.mxu1 }
 0x152   : > { %v1938_v1 = vpop.f32.mrf.mxu0 }
 0x153   : > { %v1950_v21 = vpop.f32.mrf.mxu1 }
 0x15c   : > { %v1337_v30 = vpop.f32.mrf.mxu0 }
 0x15d   : > { %v1343_v31 = vadd.f32 %v1337_v30, %v1297_v28  ;;  %v1397_v32 = vpop.f32.mrf.mxu1 }
 0x15e   : > { %v1961_v34 = vpop.f32.mrf.mxu0 }
 0x15f   : > { %v1403_v35 = vadd.f32 %v1397_v32, %v1343_v31  ;;  %v1973_v36 = vpop.f32.mrf.mxu1 }
 0x160   : > { %v1340_v38 = vpop.f32.mrf.mxu0 }
 0x161   : > { %1665 = vst [vmem:[%s2467_s19 + $0x2] sm:$0x3] %v1403_v35  ;;  %v1406_v39 = vsel %vm934_vm2, %v1403_v35, 0.0  ;;  %v1414_v40 = vmul.f32 %v1403_v35, %v1403_v35  ;;  %v1400_v41 = vpop.f32.mrf.mxu1 }
 0x162   : > { %v1407_v43 = vrot.slane %v1406_v39, 4  ;;  %v1962_v44 = vpop.f32.mrf.mxu0 }
 0x163   : > { %v1415_v45 = vsel %vm934_vm2, %v1414_v40, 0.0  ;;  %v1974_v46 = vpop.f32.mrf.mxu1 }
 0x164   : > { %v1408_v48 = vadd.f32 %v1407_v43, %v1406_v39  ;;  %v1416_v49 = vrot.slane %v1415_v45, 4 }
 0x166   : > { %v1409_v52 = vrot.slane %v1408_v48, 2  ;;  %v1417_v53 = vadd.f32 %v1416_v49, %v1415_v45 }
 0x168   : > { %v1410_v55 = vadd.f32 %v1409_v52, %v1408_v48  ;;  %v1418_v56 = vrot.slane %v1417_v53, 2 }
 0x16a   : > { %v1411_v59 = vrot.slane %v1410_v55, 1  ;;  %v1419_v60 = vadd.f32 %v1418_v56, %v1417_v53 }
 0x16c   : > { %v1412_v62 = vadd.f32 %v1411_v59, %v1410_v55  ;;  %v1420_v63 = vrot.slane %v1419_v60, 1 }
 0x16e   : > { %v1413_v2 = vadd.f32 %v1412_v62, %v941_v61  ;;  %v1421_v3 = vadd.f32 %v1420_v63, %v1419_v60 }
 0x170   : > { %v1422_v4 = vadd.f32 %v1421_v3, %v950_v0  ;;  %v1426_v5 = vsel %vm1425_vm3, %v1413_v2, 0.0 }
 0x172   : > { %v1428_v6 = vsel %vm1427_vm4, %v1422_v4, %v1426_v5 }
 0x173   : > { %1429 = vst [vmem:[%s181_s23] sm:$0xff] %v1428_v6 }
 0x174 PF: > { %s14_s12 = sadd.s32 1, %s2028_s12  }
 0x175   : > { %p11_p4 = scmp.ge.s32.totalorder %s14_s12, 4  }
 0x177   :  { %13 = sbr.rel (!%p11_p4) target bundleno = 1 (0x1), region = 88 }

// kernel: _lambda_.36
= control target key start
LH: loop header
LB: loop body
LE: loop exit
PB: predicated region body
PF: predicated region fallthrough
CT: control target
= control target key end

     0   :  { %s2685_s12 = smov 0   ;;  %s3443_s0 = inlined_call_operand.vmem [shape: bf16[2,4,4,128], index: 0, kind: input, shape index: {}]   ;;  %s3444_s1 = inlined_call_operand.vmem [shape: bf16[3,3,128,128], index: 1, kind: input, shape index: {}]   ;;  %s3445_s2 = inlined_call_operand.vmem [shape: f32[2,2,2,128], index: 2, kind: output, shape index: {0}]   ;;  %s3446_s3 = inlined_call_operand.vmem [shape: f32[2,8,128], index: 3, kind: output, shape index: {1}]  }
   0x1 LB: > { %s1809_s13 = sadd.s32 4294967295, %s2661_s12   ;;  %p1813_p0 = scmp.ge.s32.totalorder %s2661_s12, 1  ;;  %s2661_s12 = sphi %s2685_s12, %s14_s12  }
   0x2   : > { %p140_p1 = scmp.lt.s32.totalorder %s2661_s12, 3 }
   0x4   : > { %p141_p2 = pnand %p1813_p0, %p140_p1 }
   0x6   : > { %144 = sbr.rel (%p141_p2) target bundleno = 516 (0x204), region = 28 }
   0xb   : > { %v2696_v0 = vld [vmem:[%s3444_s1 + $0x78] sm:$0xff]   ;;  %v2663_v1 = vmov 0.0   ;;  %v2709_v3 = vld [vmem:[%s3444_s1 + $0x70] sm:$0xff]   ;;  %vm2664_vm0 = vmmov 0   ;;  %p168_p3 = scmp.lt.s32.totalorder %s1809_s13, 1  ;;  %v2727_v5 = vld [vmem:[%s3444_s1 + $0x68] sm:$0xff]  }
   0xc   : > { %2213 = vmatprep.subr.bf16.mxu0 %v2663_v1  ;;  %2233 = vmatprep.subr.bf16.mxu1 %v2663_v1  ;;  %v2703_v2 = vld [vmem:[%s3444_s1 + $0x38] sm:$0xff]   ;;  %v2718_v4 = vld [vmem:[%s3444_s1 + $0x30] sm:$0xff]   ;;  %v2736_v6 = vld [vmem:[%s3444_s1 + $0x28] sm:$0xff]   ;;  %vm1224_vm1 = vcmask 1041408  }
   0xd   : > { %2214 = vmatpush3.bf16.msra.mxu0 %v2696_v0  ;;  %2229 = vmatprep.mubr.msk.bf16.mxu0 %vm2664_vm0, %v2663_v1  ;;  %s3477_s13 = smov (!%p168_p3, %s1809_s13), 1  ;;  %v2743_v7 = vld [vmem:[%s3444_s1 + $0x60] sm:$0xff]   ;;  %v2765_v9 = vld [vmem:[%s3444_s1 + $0x58] sm:$0xff]   ;;  %v2780_v12 = vld [vmem:[%s3444_s1 + $0x50] sm:$0xff]  }
   0xe   : > { %2234 = vmatpush3.bf16.msra.mxu1 %v2703_v2  ;;  %2215 = vmatprep.subr.bf16.mxu0 %v2663_v1  ;;  %s2049_s28 = sshll.u32 %s3477_s13, 3  ;;  %v2751_v8 = vld [vmem:[%s3444_s1 + $0x20] sm:$0xff]   ;;  %v2772_v10 = vld [vmem:[%s3444_s1 + $0x18] sm:$0xff]   ;;  %v2787_v13 = vld [vmem:[%s3444_s1 + $0x10] sm:$0xff]  }
   0xf   : > { %2235 = vmatprep.subr.bf16.mxu1 %v2663_v1  ;;  %2249 = vmatprep.mubr.msk.bf16.mxu1 %vm2664_vm0, %v2663_v1  ;;  %s2759_s6 = scalar_lea.vmem %s3443_s0, %s2049_s28  ;;  %v2794_v15 = vld [vmem:[%s3444_s1 + $0x48] sm:$0xff]   ;;  %v2808_v19 = vld [vmem:[%s3444_s1 + $0x40] sm:$0xff]   ;;  %v2823_v23 = vld [vmem:[%s3444_s1 + $0xb8] sm:$0xff]   ;;  %s181_s27 = scalar_lea.vmem %s3446_s3, %s2049_s28 }
  0x10   : > { %v1947_v11 = vld.sshfl [vmem:[%s2759_s6] sm:$0x3 pattern:$0x76325410]  ;;  %v2801_v16 = vld [vmem:[%s3444_s1 + $0x8] sm:$0xff]   ;;  %v2830_v24 = vld [vmem:[%s3444_s1 + $0xf8] sm:$0xff]  }
  0x11   : > { %2216 = vmatpush3.bf16.msra.mxu0 %v2709_v3  ;;  %v348_v14 = vshll.u32 %v1947_v11, 16  ;;  %v346_v17 = vshrl.u32 %v1947_v11, 16  ;;  %v2815_v20 = vld [vmem:[%s3444_s1] sm:$0xff]   ;;  %v2837_v25 = vld [vmem:[%s3444_s1 + $0xb0] sm:$0xff]   ;;  %v2855_v27 = vld [vmem:[%s3444_s1 + $0xa8] sm:$0xff]  }
  0x12   : > { %2236 = vmatpush3.bf16.msra.mxu1 %v2718_v4  ;;  %2217 = vmatprep.subr.bf16.mxu0 %v2663_v1  ;;  %v335_v22 = vld [vmem:[%s2759_s6] sm:$0x1]  ;;  %v2842_v26 = vld [vmem:[%s3444_s1 + $0xf0] sm:$0xff]   ;;  %v2862_v28 = vld [vmem:[%s3444_s1 + $0xe8] sm:$0xff]  }
  0x13   : > { %2237 = vmatprep.subr.bf16.mxu1 %v2663_v1  ;;  %v350_v18 = vrot.slane %v348_v14, 1  ;;  %v2869_v29 = vld [vmem:[%s3444_s1 + $0xa0] sm:$0xff]   ;;  %v2883_v31 = vld [vmem:[%s3444_s1 + $0x98] sm:$0xff]   ;;  %v2897_v33 = vld [vmem:[%s3444_s1 + $0x90] sm:$0xff]  }
  0x14   : > { %v2876_v30 = vld [vmem:[%s3444_s1 + $0xe0] sm:$0xff]   ;;  %v2890_v32 = vld [vmem:[%s3444_s1 + $0xd8] sm:$0xff]   ;;  %v2904_v34 = vld [vmem:[%s3444_s1 + $0xd0] sm:$0xff]  }
  0x15   : > { %2218 = vmatpush3.bf16.msra.mxu0 %v2727_v5  ;;  %v351_v21 = vor.u32 %v350_v18, %v346_v17  ;;  %v2911_v35 = vld [vmem:[%s3444_s1 + $0x88] sm:$0xff]   ;;  %v1964_v37 = vld.sshfl [vmem:[%s2759_s6] sm:$0x2 pattern:$0x76325410]  ;;  %v2939_v41 = vld [vmem:[%s3444_s1 + $0x138] sm:$0xff]  }
  0x16   : > { %2238 = vmatpush3.bf16.msra.mxu1 %v2736_v6  ;;  %2219 = vmatprep.subr.bf16.mxu0 %v2663_v1  ;;  %v2918_v36 = vld [vmem:[%s3444_s1 + $0xc8] sm:$0xff]   ;;  %v2926_v38 = vld [vmem:[%s3444_s1 + $0x80] sm:$0xff]   ;;  %v538_v40 = vrot.slane %v1964_v37, 1  ;;  %v2948_v43 = vld [vmem:[%s3444_s1 + $0x178] sm:$0xff]  }
  0x17   : > { %2239 = vmatprep.subr.bf16.mxu1 %v2663_v1  ;;  %v2933_v39 = vld [vmem:[%s3444_s1 + $0xc0] sm:$0xff]   ;;  %v2955_v44 = vld [vmem:[%s3444_s1 + $0x130] sm:$0xff]   ;;  %v2970_v46 = vld [vmem:[%s3444_s1 + $0x128] sm:$0xff]  }
  0x18   : > { %v1973_v42 = vld [vmem:[%s2759_s6 + $0x2] sm:$0x1]  ;;  %v2962_v45 = vld [vmem:[%s3444_s1 + $0x170] sm:$0xff]   ;;  %v2980_v47 = vld [vmem:[%s3444_s1 + $0x168] sm:$0xff]  }
  0x19   : > { %2220 = vmatpush3.bf16.msra.mxu0 %v2743_v7  ;;  %v2987_v48 = vld [vmem:[%s3444_s1 + $0x120] sm:$0xff]   ;;  %v3001_v50 = vld [vmem:[%s3444_s1 + $0x118] sm:$0xff]   ;;  %v3015_v52 = vld [vmem:[%s3444_s1 + $0x110] sm:$0xff]  }
  0x1a   : > { %2240 = vmatpush3.bf16.msra.mxu1 %v2751_v8  ;;  %2221 = vmatprep.subr.bf16.mxu0 %v2663_v1  ;;  %v2994_v49 = vld [vmem:[%s3444_s1 + $0x160] sm:$0xff]   ;;  %v3008_v51 = vld [vmem:[%s3444_s1 + $0x158] sm:$0xff]   ;;  %v3023_v54 = vld [vmem:[%s3444_s1 + $0x150] sm:$0xff]  }
  0x1b   : > { %2241 = vmatprep.subr.bf16.mxu1 %v2663_v1  ;;  %v1983_v53 = vld.sshfl [vmem:[%s2759_s6 + $0x2] sm:$0x3 pattern:$0x76325410]  ;;  %v3030_v56 = vld [vmem:[%s3444_s1 + $0x108] sm:$0xff]   ;;  %v3064_v14 = vld [vmem:[%s3444_s1 + $0x1b8] sm:$0xff]  }
  0x1c   : > { %v732_v55 = vshll.u32 %v1983_v53, 16  ;;  %v3037_v57 = vld [vmem:[%s3444_s1 + $0x148] sm:$0xff]   ;;  %v730_v58 = vshrl.u32 %v1983_v53, 16  ;;  %v3044_v60 = vld [vmem:[%s3444_s1 + $0x100] sm:$0xff]   ;;  %v3071_v17 = vld [vmem:[%s3444_s1 + $0x1f8] sm:$0xff]  }
  0x1d   : > { %2222 = vmatpush3.bf16.msra.mxu0 %v2765_v9  ;;  %3457 = vst [vmem:[#allocation2_spill] sm:$0xff] %v3037_v57  ;;  %v3051_v61 = vld [vmem:[%s3444_s1 + $0x140] sm:$0xff]   ;;  %3459 = vst [vmem:[#allocation4_spill] sm:$0xff] %v3071_v17  ;;  %v3081_v18 = vld [vmem:[%s3444_s1 + $0x1b0] sm:$0xff]  }
  0x1e   : > { %2242 = vmatpush3.bf16.msra.mxu1 %v2772_v10  ;;  %2223 = vmatprep.subr.bf16.mxu0 %v2663_v1  ;;  %v734_v59 = vrot.slane %v732_v55, 1  ;;  %3458 = vst [vmem:[#allocation3_spill] sm:$0xff] %v3051_v61  ;;  %v3054_v62 = vld.sshfl [vmem:[%s2759_s6 + $0x2] sm:$0x2 pattern:$0x76325410] }
  0x1f   : > { %2243 = vmatprep.subr.bf16.mxu1 %v2663_v1  ;;  %v3447_v11 = vrot.slane %v3054_v62, 1  ;;  %v3106_v37 = vld [vmem:[%s3444_s1 + $0x1e8] sm:$0xff]   ;;  %v3127_v53 = vld [vmem:[%s3444_s1 + $0x198] sm:$0xff]  }
  0x20   : > { %v3057_v63 = vor.u32 %v734_v59, %v730_v58  ;;  %3461 = vst [vmem:[#allocation6_spill] sm:$0xff] %v3106_v37  ;;  %v3134_v55 = vld [vmem:[%s3444_s1 + $0x1d8] sm:$0xff]   ;;  %v3141_v58 = vld [vmem:[%s3444_s1 + $0x190] sm:$0xff]  }
  0x21   : > { %2224 = vmatpush3.bf16.msra.mxu0 %v2780_v12  ;;  %3463 = vst [vmem:[#allocation8_spill] sm:$0xff] %v3134_v55  ;;  %v3148_v59 = vld [vmem:[%s3444_s1 + $0x1d0] sm:$0xff]  }
  0x22   : > { %2244 = vmatpush3.bf16.msra.mxu1 %v2787_v13  ;;  %2225 = vmatprep.subr.bf16.mxu0 %v2663_v1  ;;  %3464 = vst [vmem:[#allocation9_spill] sm:$0xff] %v3148_v59 }
  0x23   : > { %2245 = vmatprep.subr.bf16.mxu1 %v2663_v1 }
  0x25   : > { %2226 = vmatpush3.bf16.msra.mxu0 %v2794_v15 }
  0x26   : > { %2246 = vmatpush3.bf16.msra.mxu1 %v2801_v16  ;;  %2227 = vmatprep.subr.bf16.mxu0 %v2663_v1 }
  0x27   : > { %2247 = vmatprep.subr.bf16.mxu1 %v2663_v1 }
  0x29   : > { %2228 = vmatpush3.bf16.msra.mxu0 %v2808_v19 }
  0x2a   : > { %2248 = vmatpush3.bf16.msra.mxu1 %v2815_v20  ;;  %2253 = vmatprep.subr.bf16.mxu0 %v2663_v1 }
  0x2b   : > { %2273 = vmatprep.subr.bf16.mxu1 %v2663_v1 }
  0x2c   : > { %2230 = vmatmul.mubr.bf16.vlgmr.msra.gmra.mxu0 %v351_v21  ;;  %v3088_v21 = vld [vmem:[%s3444_s1 + $0x1f0] sm:$0xff]  }
  0x2d   : > { %2250 = vmatmul.mubr.bf16.vlgmr.msra.gmra.mxu1 %v335_v22  ;;  %2254 = vmatpush3.bf16.msra.mxu0 %v2823_v23  ;;  %3460 = vst [vmem:[#allocation5_spill] sm:$0xff] %v3088_v21  ;;  %v3099_v22 = vld [vmem:[%s3444_s1 + $0x1a8] sm:$0xff]  }
  0x2e   : > { %2274 = vmatpush3.bf16.msra.mxu1 %v2830_v24  ;;  %2255 = vmatprep.subr.bf16.mxu0 %v2663_v1 }
  0x2f   : > { %2275 = vmatprep.subr.bf16.mxu1 %v2663_v1  ;;  %2269 = vmatprep.mubr.msk.bf16.mxu0 %vm2664_vm0, %v2663_v1 }
  0x30   : > { %2289 = vmatprep.mubr.msk.bf16.mxu1 %vm2664_vm0, %v2663_v1 }
  0x31   : > { %2256 = vmatpush3.bf16.msra.mxu0 %v2837_v25 }
  0x32   : > { %2276 = vmatpush3.bf16.msra.mxu1 %v2842_v26  ;;  %2257 = vmatprep.subr.bf16.mxu0 %v2663_v1 }
  0x33   : > { %2277 = vmatprep.subr.bf16.mxu1 %v2663_v1 }
  0x35   : > { %2258 = vmatpush3.bf16.msra.mxu0 %v2855_v27 }
  0x36   : > { %2278 = vmatpush3.bf16.msra.mxu1 %v2862_v28  ;;  %2259 = vmatprep.subr.bf16.mxu0 %v2663_v1 }
  0x37   : > { %2279 = vmatprep.subr.bf16.mxu1 %v2663_v1 }
  0x39   : > { %2260 = vmatpush3.bf16.msra.mxu0 %v2869_v29 }
  0x3a   : > { %2280 = vmatpush3.bf16.msra.mxu1 %v2876_v30  ;;  %2261 = vmatprep.subr.bf16.mxu0 %v2663_v1 }
  0x3b   : > { %2281 = vmatprep.subr.bf16.mxu1 %v2663_v1 }
  0x3d   : > { %2262 = vmatpush3.bf16.msra.mxu0 %v2883_v31 }
  0x3e   : > { %2282 = vmatpush3.bf16.msra.mxu1 %v2890_v32  ;;  %2263 = vmatprep.subr.bf16.mxu0 %v2663_v1 }
  0x3f   : > { %2283 = vmatprep.subr.bf16.mxu1 %v2663_v1 }
  0x41   : > { %2264 = vmatpush3.bf16.msra.mxu0 %v2897_v33 }
  0x42   : > { %2284 = vmatpush3.bf16.msra.mxu1 %v2904_v34  ;;  %2265 = vmatprep.subr.bf16.mxu0 %v2663_v1 }
  0x43   : > { %2285 = vmatprep.subr.bf16.mxu1 %v2663_v1 }
  0x45   : > { %2266 = vmatpush3.bf16.msra.mxu0 %v2911_v35 }
  0x46   : > { %2286 = vmatpush3.bf16.msra.mxu1 %v2918_v36  ;;  %2267 = vmatprep.subr.bf16.mxu0 %v2663_v1 }
  0x47   : > { %2287 = vmatprep.subr.bf16.mxu1 %v2663_v1 }
  0x49   : > { %2268 = vmatpush3.bf16.msra.mxu0 %v2926_v38 }
  0x4a   : > { %2288 = vmatpush3.bf16.msra.mxu1 %v2933_v39  ;;  %2293 = vmatprep.subr.bf16.mxu0 %v2663_v1 }
  0x4b   : > { %2313 = vmatprep.subr.bf16.mxu1 %v2663_v1 }
  0x4c   : > { %2270 = vmatmul.mubr.bf16.vlgmr.msra.gmra.mxu0 %v538_v40  ;;  %v3113_v40 = vld [vmem:[%s3444_s1 + $0x1a0] sm:$0xff]  }
  0x4d   : > { %2290 = vmatmul.mubr.bf16.vlgmr.msra.gmra.mxu1 %v1973_v42  ;;  %2294 = vmatpush3.bf16.msra.mxu0 %v2939_v41  ;;  %v3120_v42 = vld [vmem:[%s3444_s1 + $0x1e0] sm:$0xff]  }
  0x4e   : > { %2314 = vmatpush3.bf16.msra.mxu1 %v2948_v43  ;;  %2295 = vmatprep.subr.bf16.mxu0 %v2663_v1  ;;  %3462 = vst [vmem:[#allocation7_spill] sm:$0xff] %v3120_v42 }
  0x4f   : > { %2315 = vmatprep.subr.bf16.mxu1 %v2663_v1  ;;  %2309 = vmatprep.mubr.msk.bf16.mxu0 %vm2664_vm0, %v2663_v1 }
  0x50   : > { %2329 = vmatprep.mubr.msk.bf16.mxu1 %vm2664_vm0, %v2663_v1 }
  0x51   : > { %2296 = vmatpush3.bf16.msra.mxu0 %v2955_v44 }
  0x52   : > { %2316 = vmatpush3.bf16.msra.mxu1 %v2962_v45  ;;  %2297 = vmatprep.subr.bf16.mxu0 %v2663_v1 }
  0x53   : > { %2317 = vmatprep.subr.bf16.mxu1 %v2663_v1 }
  0x55   : > { %2298 = vmatpush3.bf16.msra.mxu0 %v2970_v46 }
  0x56   : > { %2318 = vmatpush3.bf16.msra.mxu1 %v2980_v47  ;;  %2299 = vmatprep.subr.bf16.mxu0 %v2663_v1 }
  0x57   : > { %2319 = vmatprep.subr.bf16.mxu1 %v2663_v1 }
  0x59   : > { %2300 = vmatpush3.bf16.msra.mxu0 %v2987_v48 }
  0x5a   : > { %2320 = vmatpush3.bf16.msra.mxu1 %v2994_v49  ;;  %2301 = vmatprep.subr.bf16.mxu0 %v2663_v1 }
  0x5b   : > { %2321 = vmatprep.subr.bf16.mxu1 %v2663_v1 }
  0x5d   : > { %2302 = vmatpush3.bf16.msra.mxu0 %v3001_v50 }
  0x5e   : > { %2322 = vmatpush3.bf16.msra.mxu1 %v3008_v51  ;;  %2303 = vmatprep.subr.bf16.mxu0 %v2663_v1 }
  0x5f   : > { %2323 = vmatprep.subr.bf16.mxu1 %v2663_v1 }
  0x61   : > { %2304 = vmatpush3.bf16.msra.mxu0 %v3015_v52 }
  0x62   : > { %2324 = vmatpush3.bf16.msra.mxu1 %v3023_v54  ;;  %2305 = vmatprep.subr.bf16.mxu0 %v2663_v1 }
  0x63   : > { %2325 = vmatprep.subr.bf16.mxu1 %v2663_v1 }
  0x65   : > { %2306 = vmatpush3.bf16.msra.mxu0 %v3030_v56 }
  0x66   : > { %2326 = vmatpush3.bf16.msra.mxu1 %v3037_v57  ;;  %2307 = vmatprep.subr.bf16.mxu0 %v2663_v1 }
  0x67   : > { %2327 = vmatprep.subr.bf16.mxu1 %v2663_v1 }
  0x69   : > { %2308 = vmatpush3.bf16.msra.mxu0 %v3044_v60 }
  0x6a   : > { %2328 = vmatpush3.bf16.msra.mxu1 %v3051_v61  ;;  %2333 = vmatprep.subr.bf16.mxu0 %v2663_v1 }
  0x6b   : > { %2353 = vmatprep.subr.bf16.mxu1 %v2663_v1 }
  0x6c   : > { %2310 = vmatmul.mubr.bf16.vlgmr.msra.gmra.mxu0 %v3057_v63 }
  0x6d   : > { %2330 = vmatmul.mubr.bf16.vlgmr.msra.gmra.mxu1 %v3447_v11  ;;  %2334 = vmatpush3.bf16.msra.mxu0 %v3064_v14  ;;  %v2012_v11 = vld.sshfl [vmem:[%s2759_s6 + $0x4] sm:$0x3 pattern:$0x76325410] }
  0x6e   : > { %2354 = vmatpush3.bf16.msra.mxu1 %v3071_v17  ;;  %2335 = vmatprep.subr.bf16.mxu0 %v2663_v1  ;;  %v1027_v17 = vshrl.u32 %v2012_v11, 16 }
  0x6f   : > { %2355 = vmatprep.subr.bf16.mxu1 %v2663_v1  ;;  %2349 = vmatprep.mubr.msk.bf16.mxu0 %vm2664_vm0, %v2663_v1 }
  0x70   : > { %2369 = vmatprep.mubr.msk.bf16.mxu1 %vm2664_vm0, %v2663_v1 }
  0x71   : > { %2336 = vmatpush3.bf16.msra.mxu0 %v3081_v18 }
  0x72   : > { %2356 = vmatpush3.bf16.msra.mxu1 %v3088_v21  ;;  %2337 = vmatprep.subr.bf16.mxu0 %v2663_v1  ;;  %v3170_v21 = vld [vmem:[%s3444_s1 + $0x180] sm:$0xff]  }
  0x73   : > { %2357 = vmatprep.subr.bf16.mxu1 %v2663_v1 }
  0x75   : > { %2338 = vmatpush3.bf16.msra.mxu0 %v3099_v22 }
  0x76   : > { %2358 = vmatpush3.bf16.msra.mxu1 %v3106_v37  ;;  %2339 = vmatprep.subr.bf16.mxu0 %v2663_v1  ;;  %v1029_v37 = vshll.u32 %v2012_v11, 16  ;;  %v3187_v11 = vld [vmem:[%s3444_s1 + $0x238] sm:$0xff]  }
  0x77   : > { %2359 = vmatprep.subr.bf16.mxu1 %v2663_v1 }
  0x78   : > { %v1031_v61 = vrot.slane %v1029_v37, 1  ;;  %v3258_v37 = vld.sshfl [vmem:[%s2759_s6 + $0x4] sm:$0x2 pattern:$0x76325410] }
  0x79   : > { %2340 = vmatpush3.bf16.msra.mxu0 %v3113_v40 }
  0x7a   : > { %2360 = vmatpush3.bf16.msra.mxu1 %v3120_v42  ;;  %2341 = vmatprep.subr.bf16.mxu0 %v2663_v1  ;;  %v3156_v42 = vld [vmem:[%s3444_s1 + $0x188] sm:$0xff]   ;;  %v3182_v57 = vor.u32 %v1031_v61, %v1027_v17  ;;  %v3197_v61 = vld [vmem:[%s3444_s1 + $0x230] sm:$0xff]  }
  0x7b   : > { %2361 = vmatprep.subr.bf16.mxu1 %v2663_v1  ;;  %3465 = vst [vmem:[#allocation10_spill] sm:$0xff] %v3156_v42  ;;  %v3210_v17 = vld [vmem:[%s3444_s1 + $0x228] sm:$0xff]  }
  0x7d   : > { %2342 = vmatpush3.bf16.msra.mxu0 %v3127_v53 }
  0x7e   : > { %2362 = vmatpush3.bf16.msra.mxu1 %v3134_v55  ;;  %2343 = vmatprep.subr.bf16.mxu0 %v2663_v1  ;;  %v3163_v55 = vld [vmem:[%s3444_s1 + $0x1c8] sm:$0xff]  }
  0x7f   : > { %2363 = vmatprep.subr.bf16.mxu1 %v2663_v1 }
  0x81   : > { %2344 = vmatpush3.bf16.msra.mxu0 %v3141_v58 }
  0x82   : > { %2364 = vmatpush3.bf16.msra.mxu1 %v3148_v59  ;;  %2345 = vmatprep.subr.bf16.mxu0 %v2663_v1  ;;  %v3177_v59 = vld [vmem:[%s3444_s1 + $0x1c0] sm:$0xff]  }
  0x83   : > { %2365 = vmatprep.subr.bf16.mxu1 %v2663_v1 }
  0x85   : > { %2346 = vmatpush3.bf16.msra.mxu0 %v3156_v42  ;;  %v2002_v42 = vld [vmem:[%s2759_s6 + $0x4] sm:$0x1] }
  0x86   : > { %2366 = vmatpush3.bf16.msra.mxu1 %v3163_v55  ;;  %2347 = vmatprep.subr.bf16.mxu0 %v2663_v1 }
  0x87   : > { %2367 = vmatprep.subr.bf16.mxu1 %v2663_v1 }
  0x89   : > { %2348 = vmatpush3.bf16.msra.mxu0 %v3170_v21 }
  0x8a   : > { %2368 = vmatpush3.bf16.msra.mxu1 %v3177_v59  ;;  %2373 = vmatprep.subr.bf16.mxu0 %v2663_v1 }
  0x8b   : > { %2393 = vmatprep.subr.bf16.mxu1 %v2663_v1 }
  0x8c   : > { %2350 = vmatmul.mubr.bf16.vlgmr.msra.gmra.mxu0 %v2002_v42 }
  0x8d   : > { %2370 = vmatmul.mubr.bf16.vlgmr.msra.gmra.mxu1 %v3182_v57  ;;  %2374 = vmatpush3.bf16.msra.mxu0 %v3187_v11 }
  0x8e   : > { %2394 = vmatpush3.bf16.msra.mxu1 %v2696_v0  ;;  %2375 = vmatprep.subr.bf16.mxu0 %v2663_v1  ;;  %v3219_v0 = vld [vmem:[%s3444_s1 + $0x220] sm:$0xff]  }
  0x8f   : > { %2395 = vmatprep.subr.bf16.mxu1 %v2663_v1  ;;  %2389 = vmatprep.mubr.msk.bf16.mxu0 %vm2664_vm0, %v2663_v1 }
  0x90   : > { %2409 = vmatprep.mubr.msk.bf16.mxu1 %vm2664_vm0, %v2663_v1 }
  0x91   : > { %2376 = vmatpush3.bf16.msra.mxu0 %v3197_v61 }
  0x92   : > { %2396 = vmatpush3.bf16.msra.mxu1 %v2709_v3  ;;  %2377 = vmatprep.subr.bf16.mxu0 %v2663_v1  ;;  %v3228_v3 = vld [vmem:[%s3444_s1 + $0x218] sm:$0xff]  }
  0x93   : > { %2397 = vmatprep.subr.bf16.mxu1 %v2663_v1 }
  0x95   : > { %2378 = vmatpush3.bf16.msra.mxu0 %v3210_v17 }
  0x96   : > { %2398 = vmatpush3.bf16.msra.mxu1 %v2727_v5  ;;  %2379 = vmatprep.subr.bf16.mxu0 %v2663_v1  ;;  %v3237_v5 = vld [vmem:[%s3444_s1 + $0x210] sm:$0xff]  }
  0x97   : > { %2399 = vmatprep.subr.bf16.mxu1 %v2663_v1 }
  0x99   : > { %2380 = vmatpush3.bf16.msra.mxu0 %v3219_v0 }
  0x9a   : > { %2400 = vmatpush3.bf16.msra.mxu1 %v2743_v7  ;;  %2381 = vmatprep.subr.bf16.mxu0 %v2663_v1  ;;  %v3246_v7 = vld [vmem:[%s3444_s1 + $0x208] sm:$0xff]  }
  0x9b   : > { %2401 = vmatprep.subr.bf16.mxu1 %v2663_v1 }
  0x9d   : > { %2382 = vmatpush3.bf16.msra.mxu0 %v3228_v3 }
  0x9e   : > { %2402 = vmatpush3.bf16.msra.mxu1 %v2765_v9  ;;  %2383 = vmatprep.subr.bf16.mxu0 %v2663_v1  ;;  %v3255_v9 = vld [vmem:[%s3444_s1 + $0x200] sm:$0xff]  }
  0x9f   : > { %2403 = vmatprep.subr.bf16.mxu1 %v2663_v1 }
  0xa1   : > { %2384 = vmatpush3.bf16.msra.mxu0 %v3237_v5 }
  0xa2   : > { %2404 = vmatpush3.bf16.msra.mxu1 %v2780_v12  ;;  %2385 = vmatprep.subr.bf16.mxu0 %v2663_v1  ;;  %v1132_v12 = vrot.slane %v3258_v37, 1 }
  0xa3   : > { %2405 = vmatprep.subr.bf16.mxu1 %v2663_v1 }
  0xa5   : > { %2386 = vmatpush3.bf16.msra.mxu0 %v3246_v7 }
  0xa6   : > { %2406 = vmatpush3.bf16.msra.mxu1 %v2794_v15  ;;  %2387 = vmatprep.subr.bf16.mxu0 %v2663_v1 }
  0xa7   : > { %2407 = vmatprep.subr.bf16.mxu1 %v2663_v1 }
  0xa9   : > { %2388 = vmatpush3.bf16.msra.mxu0 %v3255_v9 }
  0xaa   : > { %2408 = vmatpush3.bf16.msra.mxu1 %v2808_v19  ;;  %2413 = vmatprep.subr.bf16.mxu0 %v2663_v1 }
  0xab   : > { %2433 = vmatprep.subr.bf16.mxu1 %v2663_v1 }
  0xac   : > { %2390 = vmatmul.mubr.bf16.vlgmr.msra.gmra.mxu0 %v1132_v12 }
  0xad   : > { %2410 = vmatmul.mubr.bf16.vlgmr.msra.gmra.mxu1 %v3057_v63  ;;  %2414 = vmatpush3.bf16.msra.mxu0 %v2703_v2  ;;  %v2031_v2 = vld [vmem:[%s2759_s6 + $0x2] sm:$0x1] }
  0xae   : > { %2434 = vmatpush3.bf16.msra.mxu1 %v2823_v23  ;;  %2415 = vmatprep.subr.bf16.mxu0 %v2663_v1 }
  0xaf   : > { %2435 = vmatprep.subr.bf16.mxu1 %v2663_v1  ;;  %2429 = vmatprep.mubr.msk.bf16.mxu0 %vm2664_vm0, %v2663_v1 }
  0xb0   : > { %2449 = vmatprep.mubr.msk.bf16.mxu1 %vm2664_vm0, %v2663_v1 }
  0xb1   : > { %2416 = vmatpush3.bf16.msra.mxu0 %v2718_v4  ;;  %v3466_v4 = vrot.slane %v3054_v62, 1 }
  0xb2   : > { %2436 = vmatpush3.bf16.msra.mxu1 %v2837_v25  ;;  %2417 = vmatprep.subr.bf16.mxu0 %v2663_v1  ;;  %v3467_v25 = vld [vmem:[#allocation2_spill] sm:$0xff] }
  0xb3   : > { %2437 = vmatprep.subr.bf16.mxu1 %v2663_v1 }
  0xb5   : > { %2418 = vmatpush3.bf16.msra.mxu0 %v2736_v6  ;;  %v2036_v6 = vld [vmem:[%s2759_s6 + $0x4] sm:$0x1] }
  0xb6   : > { %2438 = vmatpush3.bf16.msra.mxu1 %v2855_v27  ;;  %2419 = vmatprep.subr.bf16.mxu0 %v2663_v1  ;;  %v3469_v27 = vld [vmem:[#allocation3_spill] sm:$0xff] }
  0xb7   : > { %2439 = vmatprep.subr.bf16.mxu1 %v2663_v1 }
  0xb9   : > { %2420 = vmatpush3.bf16.msra.mxu0 %v2751_v8 }
  0xba   : > { %2440 = vmatpush3.bf16.msra.mxu1 %v2869_v29  ;;  %2421 = vmatprep.subr.bf16.mxu0 %v2663_v1 }
  0xbb   : > { %2441 = vmatprep.subr.bf16.mxu1 %v2663_v1 }
  0xbd   : > { %2422 = vmatpush3.bf16.msra.mxu0 %v2772_v10 }
  0xbe   : > { %2442 = vmatpush3.bf16.msra.mxu1 %v2883_v31  ;;  %2423 = vmatprep.subr.bf16.mxu0 %v2663_v1 }
  0xbf   : > { %2443 = vmatprep.subr.bf16.mxu1 %v2663_v1 }
  0xc1   : > { %2424 = vmatpush3.bf16.msra.mxu0 %v2787_v13 }
  0xc2   : > { %2444 = vmatpush3.bf16.msra.mxu1 %v2897_v33  ;;  %2425 = vmatprep.subr.bf16.mxu0 %v2663_v1 }
  0xc3   : > { %2445 = vmatprep.subr.bf16.mxu1 %v2663_v1 }
  0xc5   : > { %2426 = vmatpush3.bf16.msra.mxu0 %v2801_v16 }
  0xc6   : > { %2446 = vmatpush3.bf16.msra.mxu1 %v2911_v35  ;;  %2427 = vmatprep.subr.bf16.mxu0 %v2663_v1 }
  0xc7   : > { %2447 = vmatprep.subr.bf16.mxu1 %v2663_v1 }
  0xc9   : > { %2428 = vmatpush3.bf16.msra.mxu0 %v2815_v20 }
  0xca   : > { %2448 = vmatpush3.bf16.msra.mxu1 %v2926_v38  ;;  %2453 = vmatprep.subr.bf16.mxu0 %v2663_v1 }
  0xcb   : > { %2473 = vmatprep.subr.bf16.mxu1 %v2663_v1 }
  0xcc   : > { %2430 = vmatmul.mubr.bf16.vlgmr.msra.gmra.mxu0 %v2031_v2 }
  0xcd   : > { %2450 = vmatmul.mubr.bf16.vlgmr.msra.gmra.mxu1 %v3466_v4  ;;  %2454 = vmatpush3.bf16.msra.mxu0 %v2830_v24 }
  0xce   : > { %2474 = vmatpush3.bf16.msra.mxu1 %v2939_v41  ;;  %2455 = vmatprep.subr.bf16.mxu0 %v2663_v1 }
  0xcf   : > { %2475 = vmatprep.subr.bf16.mxu1 %v2663_v1  ;;  %2469 = vmatprep.mubr.msk.bf16.mxu0 %vm2664_vm0, %v2663_v1 }
  0xd0   : > { %2489 = vmatprep.mubr.msk.bf16.mxu1 %vm2664_vm0, %v2663_v1 }
  0xd1   : > { %2456 = vmatpush3.bf16.msra.mxu0 %v2842_v26  ;;  %v3468_v26 = vld [vmem:[#allocation10_spill] sm:$0xff] }
  0xd2   : > { %2476 = vmatpush3.bf16.msra.mxu1 %v2955_v44  ;;  %2457 = vmatprep.subr.bf16.mxu0 %v2663_v1  ;;  %v3472_v44 = vld [vmem:[#allocation6_spill] sm:$0xff] }
  0xd3   : > { %2477 = vmatprep.subr.bf16.mxu1 %v2663_v1 }
  0xd5   : > { %2458 = vmatpush3.bf16.msra.mxu0 %v2862_v28  ;;  %v2041_v28 = vld [vmem:[%s2759_s6 + $0x6] sm:$0x1] }
  0xd6   : > { %2478 = vmatpush3.bf16.msra.mxu1 %v2970_v46  ;;  %2459 = vmatprep.subr.bf16.mxu0 %v2663_v1  ;;  %v3474_v46 = vld [vmem:[#allocation8_spill] sm:$0xff] }
  0xd7   : > { %2479 = vmatprep.subr.bf16.mxu1 %v2663_v1 }
  0xd9   : > { %2460 = vmatpush3.bf16.msra.mxu0 %v2876_v30 }
  0xda   : > { %2480 = vmatpush3.bf16.msra.mxu1 %v2987_v48  ;;  %2461 = vmatprep.subr.bf16.mxu0 %v2663_v1 }
  0xdb   : > { %2481 = vmatprep.subr.bf16.mxu1 %v2663_v1 }
  0xdd   : > { %2462 = vmatpush3.bf16.msra.mxu0 %v2890_v32  ;;  %v3470_v32 = vld [vmem:[#allocation4_spill] sm:$0xff] }
  0xde   : > { %2482 = vmatpush3.bf16.msra.mxu1 %v3001_v50  ;;  %2463 = vmatprep.subr.bf16.mxu0 %v2663_v1 }
  0xdf   : > { %2483 = vmatprep.subr.bf16.mxu1 %v2663_v1 }
  0xe1   : > { %2464 = vmatpush3.bf16.msra.mxu0 %v2904_v34 }
  0xe2   : > { %2484 = vmatpush3.bf16.msra.mxu1 %v3015_v52  ;;  %2465 = vmatprep.subr.bf16.mxu0 %v2663_v1  ;;  %v2045_v52 = vld.sshfl [vmem:[%s2759_s6 + $0x6] sm:$0x2 pattern:$0x76325410] }
  0xe3   : > { %2485 = vmatprep.subr.bf16.mxu1 %v2663_v1 }
  0xe5   : > { %2466 = vmatpush3.bf16.msra.mxu0 %v2918_v36 }
  0xe6   : > { %2486 = vmatpush3.bf16.msra.mxu1 %v3030_v56  ;;  %2467 = vmatprep.subr.bf16.mxu0 %v2663_v1  ;;  %v1654_v56 = vrot.slane %v2045_v52, 1 }
  0xe7   : > { %2487 = vmatprep.subr.bf16.mxu1 %v2663_v1 }
  0xe9   : > { %2468 = vmatpush3.bf16.msra.mxu0 %v2933_v39  ;;  %v3471_v39 = vld [vmem:[#allocation5_spill] sm:$0xff] }
  0xea   : > { %2488 = vmatpush3.bf16.msra.mxu1 %v3044_v60  ;;  %2493 = vmatprep.subr.bf16.mxu0 %v2663_v1 }
  0xeb   : > { %2513 = vmatprep.subr.bf16.mxu1 %v2663_v1 }
  0xec   : > { %v435_v8 = vpop.f32.mrf.mxu0  ;;  %2470 = vmatmul.mubr.bf16.vlgmr.msra.gmra.mxu0 %v2036_v6 }
  0xed   : > { %v523_v10 = vpop.f32.mrf.mxu1  ;;  %2490 = vmatmul.mubr.bf16.vlgmr.msra.gmra.mxu1 %v3182_v57  ;;  %2494 = vmatpush3.bf16.msra.mxu0 %v2948_v43 }
  0xee   : > { %v524_v13 = vadd.f32 %v523_v10, %v435_v8  ;;  %2514 = vmatpush3.bf16.msra.mxu1 %v3064_v14  ;;  %v2231_v15 = vpop.f32.mrf.mxu0  ;;  %2495 = vmatprep.subr.bf16.mxu0 %v2663_v1 }
  0xef   : > { %v2251_v16 = vpop.f32.mrf.mxu1  ;;  %2515 = vmatprep.subr.bf16.mxu1 %v2663_v1  ;;  %2509 = vmatprep.mubr.msk.bf16.mxu0 %vm2664_vm0, %v2663_v1 }
  0xf0   : > { %v438_v19 = vpop.f32.mrf.mxu0  ;;  %2529 = vmatprep.mubr.msk.bf16.mxu1 %vm2664_vm0, %v2663_v1 }
  0xf1   : > { %v526_v20 = vpop.f32.mrf.mxu1  ;;  %2496 = vmatpush3.bf16.msra.mxu0 %v2962_v45  ;;  %v3473_v45 = vld [vmem:[#allocation7_spill] sm:$0xff] }
  0xf2   : > { %2516 = vmatpush3.bf16.msra.mxu1 %v3081_v18  ;;  %v2232_v23 = vpop.f32.mrf.mxu0  ;;  %2497 = vmatprep.subr.bf16.mxu0 %v2663_v1 }
  0xf3   : > { %v2252_v24 = vpop.f32.mrf.mxu1  ;;  %2517 = vmatprep.subr.bf16.mxu1 %v2663_v1 }
  0xf5   : > { %2498 = vmatpush3.bf16.msra.mxu0 %v2980_v47  ;;  %v2043_v47 = vld.sshfl [vmem:[%s2759_s6 + $0x6] sm:$0x3 pattern:$0x76325410]  ;;  %s2050_s6 = sshll.u32 %s3477_s13, 2 }
  0xf6   : > { %2518 = vmatpush3.bf16.msra.mxu1 %v3099_v22  ;;  %2499 = vmatprep.subr.bf16.mxu0 %v2663_v1  ;;  %v1599_v48 = vshll.u32 %v2043_v47, 16  ;;  %v1597_v50 = vshrl.u32 %v2043_v47, 16  ;;  %s3427_s24 = scalar_lea.vmem %s3445_s2, %s2050_s6 }
  0xf7   : > { %2519 = vmatprep.subr.bf16.mxu1 %v2663_v1 }
  0xf9   : > { %2500 = vmatpush3.bf16.msra.mxu0 %v2994_v49  ;;  %v3475_v49 = vld [vmem:[#allocation9_spill] sm:$0xff] }
  0xfa   : > { %2520 = vmatpush3.bf16.msra.mxu1 %v3113_v40  ;;  %2501 = vmatprep.subr.bf16.mxu0 %v2663_v1 }
  0xfb   : > { %2521 = vmatprep.subr.bf16.mxu1 %v2663_v1 }
  0xfd   : > { %2502 = vmatpush3.bf16.msra.mxu0 %v3008_v51  ;;  %v1601_v51 = vrot.slane %v1599_v48, 1 }
  0xfe   : > { %2522 = vmatpush3.bf16.msra.mxu1 %v3127_v53  ;;  %2503 = vmatprep.subr.bf16.mxu0 %v2663_v1 }
  0xff   : > { %2523 = vmatprep.subr.bf16.mxu1 %v2663_v1 }
 0x101   : > { %2504 = vmatpush3.bf16.msra.mxu0 %v3023_v54  ;;  %v1602_v54 = vor.u32 %v1601_v51, %v1597_v50 }
 0x102   : > { %2524 = vmatpush3.bf16.msra.mxu1 %v3141_v58  ;;  %2505 = vmatprep.subr.bf16.mxu0 %v2663_v1 }
 0x103   : > { %2525 = vmatprep.subr.bf16.mxu1 %v2663_v1 }
 0x105   : > { %2506 = vmatpush3.bf16.msra.mxu0 %v3467_v25 }
 0x106   : > { %2526 = vmatpush3.bf16.msra.mxu1 %v3468_v26  ;;  %2507 = vmatprep.subr.bf16.mxu0 %v2663_v1 }
 0x107   : > { %2527 = vmatprep.subr.bf16.mxu1 %v2663_v1 }
 0x109   : > { %2508 = vmatpush3.bf16.msra.mxu0 %v3469_v27 }
 0x10a   : > { %2528 = vmatpush3.bf16.msra.mxu1 %v3170_v21  ;;  %2533 = vmatprep.subr.bf16.mxu0 %v2663_v1 }
 0x10b   : > { %2553 = vmatprep.subr.bf16.mxu1 %v2663_v1 }
 0x10c   : > { %v622_v29 = vpop.f32.mrf.mxu0  ;;  %2510 = vmatmul.mubr.bf16.vlgmr.msra.gmra.mxu0 %v1132_v12 }
 0x10d   : > { %v628_v30 = vadd.f32 %v622_v29, %v524_v13  ;;  %v713_v31 = vpop.f32.mrf.mxu1  ;;  %2530 = vmatmul.mubr.bf16.vlgmr.msra.gmra.mxu1 %v2041_v28  ;;  %2534 = vmatpush3.bf16.msra.mxu0 %v3470_v32 }
 0x10e   : > { %2554 = vmatpush3.bf16.msra.mxu1 %v3187_v11  ;;  %v2271_v33 = vpop.f32.mrf.mxu0  ;;  %2535 = vmatprep.subr.bf16.mxu0 %v2663_v1 }
 0x10f   : > { %v719_v34 = vadd.f32 %v713_v31, %v628_v30  ;;  %v2291_v35 = vpop.f32.mrf.mxu1  ;;  %2555 = vmatprep.subr.bf16.mxu1 %v2663_v1  ;;  %2549 = vmatprep.mubr.msk.bf16.mxu0 %vm2664_vm0, %v2663_v1 }
 0x110   : > { %v625_v36 = vpop.f32.mrf.mxu0  ;;  %2569 = vmatprep.mubr.msk.bf16.mxu1 %vm2664_vm0, %v2663_v1 }
 0x111   : > { %v716_v38 = vpop.f32.mrf.mxu1  ;;  %2536 = vmatpush3.bf16.msra.mxu0 %v3471_v39 }
 0x112   : > { %2556 = vmatpush3.bf16.msra.mxu1 %v3197_v61  ;;  %v2272_v41 = vpop.f32.mrf.mxu0  ;;  %2537 = vmatprep.subr.bf16.mxu0 %v2663_v1 }
 0x113   : > { %v2292_v43 = vpop.f32.mrf.mxu1  ;;  %2557 = vmatprep.subr.bf16.mxu1 %v2663_v1 }
 0x115   : > { %2538 = vmatpush3.bf16.msra.mxu0 %v3472_v44 }
 0x116   : > { %2558 = vmatpush3.bf16.msra.mxu1 %v3210_v17  ;;  %2539 = vmatprep.subr.bf16.mxu0 %v2663_v1 }
 0x117   : > { %2559 = vmatprep.subr.bf16.mxu1 %v2663_v1 }
 0x119   : > { %2540 = vmatpush3.bf16.msra.mxu0 %v3473_v45 }
 0x11a   : > { %2560 = vmatpush3.bf16.msra.mxu1 %v3219_v0  ;;  %2541 = vmatprep.subr.bf16.mxu0 %v2663_v1 }
 0x11b   : > { %2561 = vmatprep.subr.bf16.mxu1 %v2663_v1 }
 0x11d   : > { %2542 = vmatpush3.bf16.msra.mxu0 %v3474_v46 }
 0x11e   : > { %2562 = vmatpush3.bf16.msra.mxu1 %v3228_v3  ;;  %2543 = vmatprep.subr.bf16.mxu0 %v2663_v1 }
 0x11f   : > { %2563 = vmatprep.subr.bf16.mxu1 %v2663_v1 }
 0x121   : > { %2544 = vmatpush3.bf16.msra.mxu0 %v3475_v49 }
 0x122   : > { %2564 = vmatpush3.bf16.msra.mxu1 %v3237_v5  ;;  %2545 = vmatprep.subr.bf16.mxu0 %v2663_v1 }
 0x123   : > { %2565 = vmatprep.subr.bf16.mxu1 %v2663_v1 }
 0x125   : > { %2546 = vmatpush3.bf16.msra.mxu0 %v3163_v55 }
 0x126   : > { %2566 = vmatpush3.bf16.msra.mxu1 %v3246_v7  ;;  %2547 = vmatprep.subr.bf16.mxu0 %v2663_v1 }
 0x127   : > { %2567 = vmatprep.subr.bf16.mxu1 %v2663_v1 }
 0x129   : > { %2548 = vmatpush3.bf16.msra.mxu0 %v3177_v59 }
 0x12a   : > { %2568 = vmatpush3.bf16.msra.mxu1 %v3255_v9 }
 0x12c   : > { %v819_v57 = vpop.f32.mrf.mxu0  ;;  %2550 = vmatmul.mubr.bf16.vlgmr.msra.gmra.mxu0 %v1602_v54 }
 0x12d   : > { %v919_v60 = vpop.f32.mrf.mxu1  ;;  %2570 = vmatmul.mubr.bf16.vlgmr.msra.gmra.mxu1 %v1654_v56  ;;  %v825_v61 = vadd.f32 %v819_v57, %v719_v34 }
 0x12e   : > { %v2311_v62 = vpop.f32.mrf.mxu0 }
 0x12f   : > { %v2331_v63 = vpop.f32.mrf.mxu1  ;;  %v925_v17 = vadd.f32 %v919_v60, %v825_v61 }
 0x130   : > { %v822_v14 = vpop.f32.mrf.mxu0 }
 0x131   : > { %v922_v18 = vpop.f32.mrf.mxu1 }
 0x132   : > { %v2312_v21 = vpop.f32.mrf.mxu0 }
 0x133   : > { %v2332_v22 = vpop.f32.mrf.mxu1 }
 0x14c   : > { %v1010_v40 = vpop.f32.mrf.mxu0 }
 0x14d   : > { %v1116_v42 = vpop.f32.mrf.mxu1  ;;  %v1016_v0 = vadd.f32 %v1010_v40, %v925_v17 }
 0x14e   : > { %v2351_v1 = vpop.f32.mrf.mxu0 }
 0x14f   : > { %v2371_v53 = vpop.f32.mrf.mxu1  ;;  %v1122_v3 = vadd.f32 %v1116_v42, %v1016_v0 }
 0x150   : > { %v1013_v55 = vpop.f32.mrf.mxu0 }
 0x151   : > { %v1119_v58 = vpop.f32.mrf.mxu1 }
 0x152   : > { %v2352_v59 = vpop.f32.mrf.mxu0 }
 0x153   : > { %v2372_v11 = vpop.f32.mrf.mxu1 }
 0x16c   : > { %v1216_v5 = vpop.f32.mrf.mxu0 }
 0x16d   : > { %v1222_v7 = vadd.f32 %v1216_v5, %v1122_v3  ;;  %v1294_v9 = vpop.f32.mrf.mxu1 }
 0x16e   : > { %v2391_v37 = vpop.f32.mrf.mxu0 }
 0x16f   : > { %1223 = vst [vmem:[%s3427_s24] sm:$0x3] %v1222_v7  ;;  %v2411_v12 = vpop.f32.mrf.mxu1  ;;  %v1233_v47 = vmul.f32 %v1222_v7, %v1222_v7  ;;  %v1225_v48 = vsel %vm1224_vm1, %v1222_v7, 0.0  ;;  %v1716_v7 = vlaneseq }
 0x170   : > { %v1219_v2 = vpop.f32.mrf.mxu0  ;;  %v1226_v52 = vrot.slane %v1225_v48, 4 }
 0x171   : > { %v1297_v4 = vpop.f32.mrf.mxu1  ;;  %v1234_v50 = vsel %vm1224_vm1, %v1233_v47, 0.0 }
 0x172   : > { %v2392_v6 = vpop.f32.mrf.mxu0  ;;  %v1235_v54 = vrot.slane %v1234_v50, 4  ;;  %v1227_v57 = vadd.f32 %v1226_v52, %v1225_v48 }
 0x173   : > { %v2412_v8 = vpop.f32.mrf.mxu1 }
 0x174   : > { %v1236_v14 = vadd.f32 %v1235_v54, %v1234_v50  ;;  %v1228_v40 = vrot.slane %v1227_v57, 2  ;;  %v1717_v8 = vshrl.u32 %v1716_v7, 7 }
 0x176   : > { %v1237_v58 = vrot.slane %v1236_v14, 2  ;;  %v1229_v0 = vadd.f32 %v1228_v40, %v1227_v57  ;;  %vm1718_vm2 = vcmp.eq.s32.totalorder %v1717_v8, 0  ;;  %vm1720_vm3 = vcmp.eq.s32.totalorder %v1717_v8, 1 }
 0x178   : > { %v1230_v2 = vrot.slane %v1229_v0, 1 }
 0x18c   : > { %v1334_v10 = vpop.f32.mrf.mxu0 }
 0x18d   : > { %v1335_v13 = vadd.f32 %v1334_v10, %v1294_v9  ;;  %v1385_v15 = vpop.f32.mrf.mxu1  ;;  %v1238_v9 = vadd.f32 %v1237_v58, %v1236_v14 }
 0x18e   : > { %v2431_v16 = vpop.f32.mrf.mxu0 }
 0x18f   : > { %v1391_v19 = vadd.f32 %v1385_v15, %v1335_v13  ;;  %v2451_v20 = vpop.f32.mrf.mxu1  ;;  %v1239_v10 = vrot.slane %v1238_v9, 1  ;;  %v1231_v16 = vadd.f32 %v1230_v2, %v1229_v0 }
 0x190   : > { %v1337_v23 = vpop.f32.mrf.mxu0 }
 0x191   : > { %v1388_v24 = vpop.f32.mrf.mxu1  ;;  %v1240_v23 = vadd.f32 %v1239_v10, %v1238_v9 }
 0x192   : > { %v2432_v25 = vpop.f32.mrf.mxu0 }
 0x193   : > { %v2452_v26 = vpop.f32.mrf.mxu1 }
 0x1ac   : > { %v1427_v27 = vpop.f32.mrf.mxu0 }
 0x1ad   : > { %v1485_v28 = vpop.f32.mrf.mxu1  ;;  %v1433_v46 = vadd.f32 %v1427_v27, %v1391_v19 }
 0x1ae   : > { %v2471_v29 = vpop.f32.mrf.mxu0 }
 0x1af   : > { %v2491_v30 = vpop.f32.mrf.mxu1  ;;  %v1491_v49 = vadd.f32 %v1485_v28, %v1433_v46 }
 0x1b0   : > { %v1430_v31 = vpop.f32.mrf.mxu0 }
 0x1b1   : > { %v1488_v32 = vpop.f32.mrf.mxu1 }
 0x1b2   : > { %v2472_v33 = vpop.f32.mrf.mxu0 }
 0x1b3   : > { %v2492_v34 = vpop.f32.mrf.mxu1 }
 0x1cc   : > { %v1537_v35 = vpop.f32.mrf.mxu0 }
 0x1cd   : > { %v1580_v36 = vpop.f32.mrf.mxu1  ;;  %v1543_v51 = vadd.f32 %v1537_v35, %v1491_v49 }
 0x1ce   : > { %v2511_v38 = vpop.f32.mrf.mxu0 }
 0x1cf   : > { %v2531_v39 = vpop.f32.mrf.mxu1  ;;  %v1586_v56 = vadd.f32 %v1580_v36, %v1543_v51 }
 0x1d0   : > { %v1540_v41 = vpop.f32.mrf.mxu0 }
 0x1d1   : > { %v1583_v43 = vpop.f32.mrf.mxu1 }
 0x1d2   : > { %v2512_v44 = vpop.f32.mrf.mxu0 }
 0x1d3   : > { %v2532_v45 = vpop.f32.mrf.mxu1 }
 0x1ec   : > { %v1638_v60 = vpop.f32.mrf.mxu0 }
 0x1ed   : > { %v1644_v62 = vadd.f32 %v1638_v60, %v1586_v56  ;;  %v1690_v63 = vpop.f32.mrf.mxu1 }
 0x1ee   : > { %v2551_v18 = vpop.f32.mrf.mxu0 }
 0x1ef   : > { %v1696_v21 = vadd.f32 %v1690_v63, %v1644_v62  ;;  %v2571_v22 = vpop.f32.mrf.mxu1 }
 0x1f0   : > { %v1641_v42 = vpop.f32.mrf.mxu0 }
 0x1f1   : > { %2046 = vst [vmem:[%s3427_s24 + $0x2] sm:$0x3] %v1696_v21  ;;  %v1699_v1 = vsel %vm1224_vm1, %v1696_v21, 0.0  ;;  %v1707_v53 = vmul.f32 %v1696_v21, %v1696_v21  ;;  %v1693_v55 = vpop.f32.mrf.mxu1 }
 0x1f2   : > { %v1700_v59 = vrot.slane %v1699_v1, 4  ;;  %v2552_v11 = vpop.f32.mrf.mxu0 }
 0x1f3   : > { %v1708_v61 = vsel %vm1224_vm1, %v1707_v53, 0.0  ;;  %v2572_v17 = vpop.f32.mrf.mxu1 }
 0x1f4   : > { %v1701_v3 = vadd.f32 %v1700_v59, %v1699_v1  ;;  %v1709_v5 = vrot.slane %v1708_v61, 4 }
 0x1f6   : > { %v1702_v37 = vrot.slane %v1701_v3, 2  ;;  %v1710_v12 = vadd.f32 %v1709_v5, %v1708_v61 }
 0x1f8   : > { %v1703_v4 = vadd.f32 %v1702_v37, %v1701_v3  ;;  %v1711_v6 = vrot.slane %v1710_v12, 2 }
 0x1fa   : > { %v1704_v13 = vrot.slane %v1703_v4, 1  ;;  %v1712_v15 = vadd.f32 %v1711_v6, %v1710_v12 }
 0x1fc   : > { %v1705_v19 = vadd.f32 %v1704_v13, %v1703_v4  ;;  %v1713_v20 = vrot.slane %v1712_v15, 1 }
 0x1fe   : > { %v1706_v24 = vadd.f32 %v1705_v19, %v1231_v16  ;;  %v1714_v25 = vadd.f32 %v1713_v20, %v1712_v15 }
 0x200   : > { %v1715_v26 = vadd.f32 %v1714_v25, %v1240_v23  ;;  %v1719_v27 = vsel %vm1718_vm2, %v1706_v24, 0.0 }
 0x202   : > { %v1721_v28 = vsel %vm1720_vm3, %v1715_v26, %v1719_v27 }
 0x203   : > { %1722 = vst [vmem:[%s181_s27] sm:$0xff] %v1721_v28 }
 0x204 PF: > { %s14_s12 = sadd.s32 1, %s2661_s12  }
 0x205   : > { %p11_p4 = scmp.ge.s32.totalorder %s14_s12, 4  }
 0x207   :  { %13 = sbr.rel (!%p11_p4) target bundleno = 1 (0x1), region = 82 }

</bundles_post_ra>
